<compile_context>
chip_gen: v6e
topology: v6e:2x2x1
jax: 0.10.0
libtpu: 0.0.40
codegen_flags: <defaults>
</compile_context>

<pallas_src>
import jax
import jax.numpy as jnp
from jax.experimental import pallas as pl
from jax.experimental.pallas import tpu as pltpu


_VMEM_LIMIT = 32 * 1024 * 1024   # safe on v5e/v6e (128 MiB phys) and v7x (64 MiB)
_TN = 1024                       # point-tile size; ~5 MiB live per grid step


def _mm_dtype(k_dim):
    # bf16 MXU operands, except the tiny K=3 input matmul (kept f32).
    return jnp.bfloat16 if k_dim >= 8 else jnp.float32


# -----------------------------------------------------------------------------
# Kernel 1: fused per-point conv chain + max-pool over points
# -----------------------------------------------------------------------------

def _make_chain_maxpool_kernel(n_layers, per_batch, relus, mm_dtypes,
                               n_points, tn):
    needs_mask = (n_points % tn) != 0

    def kernel(*refs):
        x_ref = refs[0]
        o_ref = refs[-1]
        h = x_ref[0]                                  # (tn, Cin)
        idx = 1
        for li in range(n_layers):
            w_ref, s_ref, t_ref = refs[idx], refs[idx + 1], refs[idx + 2]
            idx += 3
            w = w_ref[0] if per_batch[li] else w_ref[...]
            y = jnp.dot(h.astype(mm_dtypes[li]), w,
                        preferred_element_type=jnp.float32)
            y = y * s_ref[...] + t_ref[...]           # folded bias + eval BN
            if relus[li]:
                y = jnp.maximum(y, 0.0)
            h = y                                     # f32
        if needs_mask:                                # mask padded rows of last tile
            rows = (pl.program_id(1) * tn
                    + jax.lax.broadcasted_iota(jnp.int32, (tn, 1), 0))
            h = jnp.where(rows < n_points, h, -jnp.inf)
        tile_max = jnp.max(h, axis=0, keepdims=True)  # (1, C_out) f32

        @pl.when(pl.program_id(1) == 0)
        def _init():
            o_ref[0] = tile_max

        @pl.when(pl.program_id(1) != 0)
        def _acc():
            o_ref[0] = jnp.maximum(o_ref[0], tile_max)

    return kernel


def conv_chain_maxpool(x, layers, relu_last):
    """Fused [(pointwise conv + BN(+ReLU)) x len(layers)] + max over points.

    x:       (B, N, Cin) activations (f32).
    layers:  list of (w, scale, shift); w is (Cin, Cout) shared or
             (B, Cin, Cout) per-batch (folded feature transform).
    Returns: (B, C_last) float32 pooled features.
    """
    B, N, Cin = x.shape
    tn = N if N <= _TN else _TN
    n_tiles = pl.cdiv(N, tn)
    c_out = layers[-1][0].shape[-1]

    per_batch, relus, mm_dtypes = [], [], []
    in_specs = [pl.BlockSpec((1, tn, Cin), lambda b, n: (b, n, 0))]
    args = [x]
    for li, (w, s, t) in enumerate(layers):
        pb = (w.ndim == 3)
        dt = _mm_dtype(w.shape[-2])
        per_batch.append(pb)
        relus.append(True if li + 1 < len(layers) else relu_last)
        mm_dtypes.append(dt)
        if pb:   # per-batch folded weight, re-fetched only when b changes
            in_specs.append(pl.BlockSpec((1,) + w.shape[1:],
                                         lambda b, n: (b, 0, 0)))
        else:    # shared weight, VMEM-resident (constant block index)
            in_specs.append(pl.BlockSpec(w.shape, lambda b, n: (0, 0)))
        in_specs.append(pl.BlockSpec(s.shape, lambda b, n: (0, 0)))
        in_specs.append(pl.BlockSpec(t.shape, lambda b, n: (0, 0)))
        args += [w.astype(dt), s, t]

    kernel = _make_chain_maxpool_kernel(
        n_layers=len(layers), per_batch=tuple(per_batch), relus=tuple(relus),
        mm_dtypes=tuple(mm_dtypes), n_points=N, tn=tn)

    pooled = pl.pallas_call(
        kernel,
        grid=(B, n_tiles),
        in_specs=in_specs,
        out_specs=pl.BlockSpec((1, 1, c_out), lambda b, n: (b, 0, 0)),
        out_shape=jax.ShapeDtypeStruct((B, 1, c_out), jnp.float32),
        compiler_params=pltpu.CompilerParams(
            dimension_semantics=("parallel", "arbitrary"),
            vmem_limit_bytes=_VMEM_LIMIT),
    )(*args)
    return pooled.reshape(B, c_out)


# -----------------------------------------------------------------------------
# Kernel 2: fused tiny FC head (fc1+BN+ReLU -> fc2+BN+ReLU -> fc3)
# -----------------------------------------------------------------------------

def _fc_head_kernel(x_ref, w1_ref, s1_ref, t1_ref, w2_ref, s2_ref, t2_ref,
                    w3_ref, s3_ref, t3_ref, o_ref):
    h = x_ref[...].astype(jnp.bfloat16)
    y = jnp.dot(h, w1_ref[...], preferred_element_type=jnp.float32)
    y = jnp.maximum(y * s1_ref[...] + t1_ref[...], 0.0)
    y = jnp.dot(y.astype(jnp.bfloat16), w2_ref[...],
                preferred_element_type=jnp.float32)
    y = jnp.maximum(y * s2_ref[...] + t2_ref[...], 0.0)
    y = jnp.dot(y.astype(jnp.bfloat16), w3_ref[...],
                preferred_element_type=jnp.float32)
    o_ref[...] = (y * s3_ref[...] + t3_ref[...]).astype(o_ref.dtype)


def fc_head(x, l1, l2, l3):
    """Fused 1024->512->256->out head on pooled features (whole arrays are a
    few MiB, so a single un-gridded VMEM kernel avoids per-layer launches)."""
    B = x.shape[0]
    out = l3["w"].shape[-1]
    args = [x]
    for p in (l1, l2, l3):
        args += [p["w"].astype(jnp.bfloat16), p["scale"], p["shift"]]
    vmem = pl.BlockSpec(memory_space=pltpu.MemorySpace.VMEM)
    return pl.pallas_call(
        _fc_head_kernel,
        in_specs=[vmem] * 10,
        out_specs=vmem,
        out_shape=jax.ShapeDtypeStruct((B, out), jnp.float32),
        compiler_params=pltpu.CompilerParams(vmem_limit_bytes=_VMEM_LIMIT),
    )(*args)


# -----------------------------------------------------------------------------
# Deterministic parameter construction (synthetic; eval-mode BN folded)
# -----------------------------------------------------------------------------

def _init_layer(key, cin, cout, with_bn=True):
    kw, kb, kg, kbe, km = jax.random.split(key, 5)
    w = jax.random.normal(kw, (cin, cout), jnp.float32) / jnp.sqrt(float(cin))
    b = 0.01 * jax.random.normal(kb, (cout,), jnp.float32)
    if with_bn:
        gamma = 1.0 + 0.01 * jax.random.normal(kg, (cout,), jnp.float32)
        beta = 0.01 * jax.random.normal(kbe, (cout,), jnp.float32)
        mean = 0.01 * jax.random.normal(km, (cout,), jnp.float32)
        var = jnp.ones((cout,), jnp.float32)
        scale = gamma / jnp.sqrt(var + 1e-5)
        shift = (b - mean) * scale + beta      # conv/linear bias folded into shift
    else:
        scale = jnp.ones((cout,), jnp.float32)
        shift = b
    return dict(w=w, scale=scale.reshape(1, cout), shift=shift.reshape(1, cout))


def _init_tnet(key, k):
    ks = jax.random.split(key, 6)
    return dict(
        conv1=_init_layer(ks[0], k, 64),
        conv2=_init_layer(ks[1], 64, 128),
        conv3=_init_layer(ks[2], 128, 1024),
        fc1=_init_layer(ks[3], 1024, 512),
        fc2=_init_layer(ks[4], 512, 256),
        fc3=_init_layer(ks[5], 256, k * k, with_bn=False),
    )


def init_pointnet_params(key, num_in_features, out_size):
    ks = jax.random.split(key, 8)
    transform = dict(
        tnet_in=_init_tnet(ks[0], num_in_features),
        conv1=_init_layer(ks[1], num_in_features, 64),
        tnet_feat=_init_tnet(ks[2], 64),
        conv2=_init_layer(ks[3], 64, 128),
        conv3=_init_layer(ks[4], 128, 1024),
    )
    return dict(
        transform=transform,
        fc1=_init_layer(ks[5], 1024, 512),
        fc2=_init_layer(ks[6], 512, 256),
        fc3=_init_layer(ks[7], 256, out_size, with_bn=False),
    )


# -----------------------------------------------------------------------------
# Model (glue in plain JAX, hot path in the fused Pallas kernels)
# -----------------------------------------------------------------------------

def _layer_args(p):
    return (p["w"], p["scale"], p["shift"])


def tnet_apply(p, x_bnc, k, prefix_layers=()):
    """Canonical PointNet T-net.  x_bnc: (B, N, Cin) channels-last -> (B, k, k).

    `prefix_layers` are extra (per-batch) conv layers prepended to the T-net's
    own chain so the chain can start directly from the raw input instead of an
    HBM-materialised intermediate activation.
    """
    B = x_bnc.shape[0]
    layers = list(prefix_layers) + [
        _layer_args(p["conv1"]), _layer_args(p["conv2"]), _layer_args(p["conv3"])]
    pooled = conv_chain_maxpool(x_bnc, layers, relu_last=True)   # (B, 1024)
    m = fc_head(pooled, p["fc1"], p["fc2"], p["fc3"])            # (B, k*k)
    eye = jnp.eye(k, dtype=jnp.float32)[None]
    return m.reshape(B, k, k) + eye                              # identity init


def transform_apply(p, x_bnc):
    """Canonical PointNet Transform. x_bnc: (B, N, k) channels-last."""
    k = x_bnc.shape[-1]
    m3 = tnet_apply(p["tnet_in"], x_bnc, k)                      # (B, k, k)
    # torch.bmm(x^T, m3) folded into conv1: (x @ m3) @ W1 == x @ (m3 @ W1).
    w1p = jnp.einsum("bij,jk->bik", m3, p["conv1"]["w"])         # (B, k, 64), tiny
    conv1_folded = (w1p, p["conv1"]["scale"], p["conv1"]["shift"])
    # Feature T-net: recompute xb = relu(bn1(x @ w1p)) inside the fused chain
    # (prefix layer) instead of materialising the (B, N, 64) activation in HBM.
    m64 = tnet_apply(p["tnet_feat"], x_bnc, 64,
                     prefix_layers=(conv1_folded,))              # (B, 64, 64)
    # torch.bmm(xb^T, m64) folded into conv2: xb @ (m64 @ W2).
    w2p = jnp.einsum("bij,jk->bik", m64, p["conv2"]["w"])        # (B, 64, 128), tiny
    # conv1(folded, relu) -> conv2(folded, relu) -> conv3+bn3 (no ReLU) ->
    # max over points, fused so neither the 64- nor 1024-channel activation
    # ever reaches HBM.
    mod = conv_chain_maxpool(
        x_bnc,
        [conv1_folded,
         (w2p, p["conv2"]["scale"], p["conv2"]["shift"]),
         _layer_args(p["conv3"])],
        relu_last=False)
    return mod, m3, m64


def pointnet_base_apply(params, x_bkn):
    """PointNetBase.forward.  x_bkn: (B, num_in_features, N) -- PyTorch layout."""
    x = jnp.transpose(x_bkn, (0, 2, 1))                          # -> (B, N, k)
    mod, m3, m64 = transform_apply(params["transform"], x)
    # fc1+bn1+relu -> dropout(identity, eval) -> fc2+bn2+relu -> fc3
    out = fc_head(mod, params["fc1"], params["fc2"], params["fc3"])
    return out, m3, m64


# -----------------------------------------------------------------------------
# Demo
# -----------------------------------------------------------------------------

if __name__ == "__main__":
    key = jax.random.PRNGKey(0)
    kp, kx = jax.random.split(key)

    num_in_features = 3
    out_size = 10
    B, N = 2, 16                                                 # small demo shapes

    params = init_pointnet_params(kp, num_in_features, out_size)
    x = jax.random.normal(kx, (B, num_in_features, N), jnp.float32)

    fwd = jax.jit(pointnet_base_apply)
    out, m3, m64 = fwd(params, x)
    jax.block_until_ready((out, m3, m64))

    assert out.shape == (B, out_size)
    assert m3.shape == (B, num_in_features, num_in_features)
    assert m64.shape == (B, 64, 64)
    assert jnp.all(jnp.isfinite(out))
    assert jnp.all(jnp.isfinite(m3))
    assert jnp.all(jnp.isfinite(m64))

    print("KERNEL_OK")
</pallas_src>

<mosaic_0001>
module attributes {stable_mosaic.version = 11 : i64} {
  func.func @kernel(%arg0: i32, %arg1: i32, %arg2: memref<1x16x3xf32, #tpu.memory_space<vmem>>, %arg3: memref<3x64xf32, #tpu.memory_space<vmem>>, %arg4: memref<1x64xf32, #tpu.memory_space<vmem>>, %arg5: memref<1x64xf32, #tpu.memory_space<vmem>>, %arg6: memref<64x128xbf16, #tpu.memory_space<vmem>>, %arg7: memref<1x128xf32, #tpu.memory_space<vmem>>, %arg8: memref<1x128xf32, #tpu.memory_space<vmem>>, %arg9: memref<128x1024xbf16, #tpu.memory_space<vmem>>, %arg10: memref<1x1024xf32, #tpu.memory_space<vmem>>, %arg11: memref<1x1024xf32, #tpu.memory_space<vmem>>, %arg12: memref<1x1x1024xf32, #tpu.memory_space<vmem>>) attributes {dimension_semantics = [#tpu.dimension_semantics<parallel>, #tpu.dimension_semantics<arbitrary>], iteration_bounds = array<i64: 2, 1>, scalar_prefetch = 0 : i64, scratch_operands = 0 : i64, tpu.core_type = #tpu.core_type<tc>, window_params = [{transform_indices = @transform_0, window_bounds = array<i64: 1, 16, 3>}, {pipeline_mode = #tpu.pipeline_mode<synchronous>, transform_indices = @transform_1, window_bounds = array<i64: 3, 64>}, {pipeline_mode = #tpu.pipeline_mode<synchronous>, transform_indices = @transform_2, window_bounds = array<i64: 1, 64>}, {pipeline_mode = #tpu.pipeline_mode<synchronous>, transform_indices = @transform_3, window_bounds = array<i64: 1, 64>}, {pipeline_mode = #tpu.pipeline_mode<synchronous>, transform_indices = @transform_4, window_bounds = array<i64: 64, 128>}, {pipeline_mode = #tpu.pipeline_mode<synchronous>, transform_indices = @transform_5, window_bounds = array<i64: 1, 128>}, {pipeline_mode = #tpu.pipeline_mode<synchronous>, transform_indices = @transform_6, window_bounds = array<i64: 1, 128>}, {pipeline_mode = #tpu.pipeline_mode<synchronous>, transform_indices = @transform_7, window_bounds = array<i64: 128, 1024>}, {pipeline_mode = #tpu.pipeline_mode<synchronous>, transform_indices = @transform_8, window_bounds = array<i64: 1, 1024>}, {pipeline_mode = #tpu.pipeline_mode<synchronous>, transform_indices = @transform_9, window_bounds = array<i64: 1, 1024>}, {transform_indices = @transform_10, window_bounds = array<i64: 1, 1, 1024>}]} {
    %c0 = arith.constant 0 : index
    %c0_0 = arith.constant 0 : index
    %c0_1 = arith.constant 0 : index
    %0 = vector.load %arg2[%c0, %c0_0, %c0_1] : memref<1x16x3xf32, #tpu.memory_space<vmem>>, vector<1x16x3xf32>
    %1 = vector.shape_cast %0 : vector<1x16x3xf32> to vector<16x3xf32>
    %c0_2 = arith.constant 0 : index
    %c0_3 = arith.constant 0 : index
    %2 = vector.load %arg3[%c0_2, %c0_3] : memref<3x64xf32, #tpu.memory_space<vmem>>, vector<3x64xf32>
    %cst = arith.constant dense<0.000000e+00> : vector<16x64xf32>
    %3 = tpu.matmul %1, %2, %cst {dimension_numbers = #tpu.dot_dimension_numbers<[1], [0], [0], [1], [0, 0, 1, 1], [], []>} : vector<16x3xf32>, vector<3x64xf32>, vector<16x64xf32> -> vector<16x64xf32>
    %c0_4 = arith.constant 0 : index
    %c0_5 = arith.constant 0 : index
    %4 = vector.load %arg4[%c0_4, %c0_5] : memref<1x64xf32, #tpu.memory_space<vmem>>, vector<1x64xf32>
    %5 = vector.broadcast %4 : vector<1x64xf32> to vector<16x64xf32>
    %6 = arith.mulf %3, %5 : vector<16x64xf32>
    %c0_6 = arith.constant 0 : index
    %c0_7 = arith.constant 0 : index
    %7 = vector.load %arg5[%c0_6, %c0_7] : memref<1x64xf32, #tpu.memory_space<vmem>>, vector<1x64xf32>
    %8 = vector.broadcast %7 : vector<1x64xf32> to vector<16x64xf32>
    %9 = arith.addf %6, %8 : vector<16x64xf32>
    %cst_8 = arith.constant 0.000000e+00 : f32
    %10 = vector.broadcast %cst_8 : f32 to vector<16x64xf32>
    %11 = arith.maximumf %9, %10 : vector<16x64xf32>
    %c0_9 = arith.constant 0 : index
    %c0_10 = arith.constant 0 : index
    %12 = vector.load %arg6[%c0_9, %c0_10] : memref<64x128xbf16, #tpu.memory_space<vmem>>, vector<64x128xbf16>
    %13 = arith.truncf %11 : vector<16x64xf32> to vector<16x64xbf16>
    %cst_11 = arith.constant dense<0.000000e+00> : vector<16x128xf32>
    %14 = tpu.matmul %13, %12, %cst_11 {dimension_numbers = #tpu.dot_dimension_numbers<[1], [0], [0], [1], [0, 0, 1, 1], [], []>} : vector<16x64xbf16>, vector<64x128xbf16>, vector<16x128xf32> -> vector<16x128xf32>
    %c0_12 = arith.constant 0 : index
    %c0_13 = arith.constant 0 : index
    %15 = vector.load %arg7[%c0_12, %c0_13] : memref<1x128xf32, #tpu.memory_space<vmem>>, vector<1x128xf32>
    %16 = vector.broadcast %15 : vector<1x128xf32> to vector<16x128xf32>
    %17 = arith.mulf %14, %16 : vector<16x128xf32>
    %c0_14 = arith.constant 0 : index
    %c0_15 = arith.constant 0 : index
    %18 = vector.load %arg8[%c0_14, %c0_15] : memref<1x128xf32, #tpu.memory_space<vmem>>, vector<1x128xf32>
    %19 = vector.broadcast %18 : vector<1x128xf32> to vector<16x128xf32>
    %20 = arith.addf %17, %19 : vector<16x128xf32>
    %cst_16 = arith.constant 0.000000e+00 : f32
    %21 = vector.broadcast %cst_16 : f32 to vector<16x128xf32>
    %22 = arith.maximumf %20, %21 : vector<16x128xf32>
    %c0_17 = arith.constant 0 : index
    %c0_18 = arith.constant 0 : index
    %23 = vector.load %arg9[%c0_17, %c0_18] : memref<128x1024xbf16, #tpu.memory_space<vmem>>, vector<128x1024xbf16>
    %24 = arith.truncf %22 : vector<16x128xf32> to vector<16x128xbf16>
    %cst_19 = arith.constant dense<0.000000e+00> : vector<16x1024xf32>
    %25 = tpu.matmul %24, %23, %cst_19 {dimension_numbers = #tpu.dot_dimension_numbers<[1], [0], [0], [1], [0, 0, 1, 1], [], []>} : vector<16x128xbf16>, vector<128x1024xbf16>, vector<16x1024xf32> -> vector<16x1024xf32>
    %c0_20 = arith.constant 0 : index
    %c0_21 = arith.constant 0 : index
    %26 = vector.load %arg10[%c0_20, %c0_21] : memref<1x1024xf32, #tpu.memory_space<vmem>>, vector<1x1024xf32>
    %27 = vector.broadcast %26 : vector<1x1024xf32> to vector<16x1024xf32>
    %28 = arith.mulf %25, %27 : vector<16x1024xf32>
    %c0_22 = arith.constant 0 : index
    %c0_23 = arith.constant 0 : index
    %29 = vector.load %arg11[%c0_22, %c0_23] : memref<1x1024xf32, #tpu.memory_space<vmem>>, vector<1x1024xf32>
    %30 = vector.broadcast %29 : vector<1x1024xf32> to vector<16x1024xf32>
    %31 = arith.addf %28, %30 : vector<16x1024xf32>
    %cst_24 = arith.constant 0.000000e+00 : f32
    %32 = vector.broadcast %cst_24 : f32 to vector<16x1024xf32>
    %33 = arith.maximumf %31, %32 : vector<16x1024xf32>
    %cst_25 = arith.constant dense<0xFF800000> : vector<1024xf32>
    %34 = vector.multi_reduction <maximumf>, %33, %cst_25 [0] : vector<16x1024xf32> to vector<1024xf32>
    %35 = vector.shape_cast %34 : vector<1024xf32> to vector<1x1024xf32>
    %c0_i32 = arith.constant 0 : i32
    %36 = arith.cmpi eq, %arg1, %c0_i32 : i32
    %37 = arith.extui %36 : i1 to i32
    %c0_i32_26 = arith.constant 0 : i32
    %38 = arith.cmpi ne, %37, %c0_i32_26 : i32
    scf.if %38 {
      %c0_29 = arith.constant 0 : index
      %c0_30 = arith.constant 0 : index
      %c0_31 = arith.constant 0 : index
      %42 = vector.load %arg12[%c0_29, %c0_30, %c0_31] : memref<1x1x1024xf32, #tpu.memory_space<vmem>>, vector<1x1x1024xf32>
      %43 = vector.shape_cast %42 : vector<1x1x1024xf32> to vector<1x1024xf32>
      %44 = vector.shape_cast %35 : vector<1x1024xf32> to vector<1x1x1024xf32>
      tpu.vector_store %arg12[%c0_29, %c0_30, %c0_31], %44 {strides = array<i32>} : memref<1x1x1024xf32, #tpu.memory_space<vmem>>, vector<1x1x1024xf32>,
    } else {
    }
    %c0_i32_27 = arith.constant 0 : i32
    %39 = arith.cmpi ne, %arg1, %c0_i32_27 : i32
    %40 = arith.extui %39 : i1 to i32
    %c0_i32_28 = arith.constant 0 : i32
    %41 = arith.cmpi ne, %40, %c0_i32_28 : i32
    scf.if %41 {
      %c0_29 = arith.constant 0 : index
      %c0_30 = arith.constant 0 : index
      %c0_31 = arith.constant 0 : index
      %42 = vector.load %arg12[%c0_29, %c0_30, %c0_31] : memref<1x1x1024xf32, #tpu.memory_space<vmem>>, vector<1x1x1024xf32>
      %43 = vector.shape_cast %42 : vector<1x1x1024xf32> to vector<1x1024xf32>
      %44 = arith.maximumf %43, %35 : vector<1x1024xf32>
      %c0_32 = arith.constant 0 : index
      %c0_33 = arith.constant 0 : index
      %c0_34 = arith.constant 0 : index
      %45 = vector.load %arg12[%c0_32, %c0_33, %c0_34] : memref<1x1x1024xf32, #tpu.memory_space<vmem>>, vector<1x1x1024xf32>
      %46 = vector.shape_cast %45 : vector<1x1x1024xf32> to vector<1x1024xf32>
      %47 = vector.shape_cast %44 : vector<1x1024xf32> to vector<1x1x1024xf32>
      tpu.vector_store %arg12[%c0_32, %c0_33, %c0_34], %47 {strides = array<i32>} : memref<1x1x1024xf32, #tpu.memory_space<vmem>>, vector<1x1x1024xf32>,
    } else {
    }
    return
  }
  func.func @transform_0(%arg0: i32, %arg1: i32) -> (i32, i32, i32) {
    %c0_i32 = arith.constant 0 : i32
    %c0_i32_0 = arith.constant 0 : i32
    return %arg0, %arg1, %c0_i32 : i32, i32, i32
  }
  func.func @transform_1(%arg0: i32, %arg1: i32) -> (i32, i32) {
    %c0_i32 = arith.constant 0 : i32
    %c0_i32_0 = arith.constant 0 : i32
    %c0_i32_1 = arith.constant 0 : i32
    return %c0_i32, %c0_i32_0 : i32, i32
  }
  func.func @transform_2(%arg0: i32, %arg1: i32) -> (i32, i32) {
    %c0_i32 = arith.constant 0 : i32
    %c0_i32_0 = arith.constant 0 : i32
    %c0_i32_1 = arith.constant 0 : i32
    return %c0_i32, %c0_i32_0 : i32, i32
  }
  func.func @transform_3(%arg0: i32, %arg1: i32) -> (i32, i32) {
    %c0_i32 = arith.constant 0 : i32
    %c0_i32_0 = arith.constant 0 : i32
    %c0_i32_1 = arith.constant 0 : i32
    return %c0_i32, %c0_i32_0 : i32, i32
  }
  func.func @transform_4(%arg0: i32, %arg1: i32) -> (i32, i32) {
    %c0_i32 = arith.constant 0 : i32
    %c0_i32_0 = arith.constant 0 : i32
    %c0_i32_1 = arith.constant 0 : i32
    return %c0_i32, %c0_i32_0 : i32, i32
  }
  func.func @transform_5(%arg0: i32, %arg1: i32) -> (i32, i32) {
    %c0_i32 = arith.constant 0 : i32
    %c0_i32_0 = arith.constant 0 : i32
    %c0_i32_1 = arith.constant 0 : i32
    return %c0_i32, %c0_i32_0 : i32, i32
  }
  func.func @transform_6(%arg0: i32, %arg1: i32) -> (i32, i32) {
    %c0_i32 = arith.constant 0 : i32
    %c0_i32_0 = arith.constant 0 : i32
    %c0_i32_1 = arith.constant 0 : i32
    return %c0_i32, %c0_i32_0 : i32, i32
  }
  func.func @transform_7(%arg0: i32, %arg1: i32) -> (i32, i32) {
    %c0_i32 = arith.constant 0 : i32
    %c0_i32_0 = arith.constant 0 : i32
    %c0_i32_1 = arith.constant 0 : i32
    return %c0_i32, %c0_i32_0 : i32, i32
  }
  func.func @transform_8(%arg0: i32, %arg1: i32) -> (i32, i32) {
    %c0_i32 = arith.constant 0 : i32
    %c0_i32_0 = arith.constant 0 : i32
    %c0_i32_1 = arith.constant 0 : i32
    return %c0_i32, %c0_i32_0 : i32, i32
  }
  func.func @transform_9(%arg0: i32, %arg1: i32) -> (i32, i32) {
    %c0_i32 = arith.constant 0 : i32
    %c0_i32_0 = arith.constant 0 : i32
    %c0_i32_1 = arith.constant 0 : i32
    return %c0_i32, %c0_i32_0 : i32, i32
  }
  func.func @transform_10(%arg0: i32, %arg1: i32) -> (i32, i32, i32) {
    %c0_i32 = arith.constant 0 : i32
    %c0_i32_0 = arith.constant 0 : i32
    %c0_i32_1 = arith.constant 0 : i32
    return %arg0, %c0_i32, %c0_i32_0 : i32, i32, i32
  }
}

module attributes {stable_mosaic.version = 11 : i64} {
  func.func @_fc_head_kernel(%arg0: memref<2x1024xf32, #tpu.memory_space<vmem>>, %arg1: memref<1024x512xbf16, #tpu.memory_space<vmem>>, %arg2: memref<1x512xf32, #tpu.memory_space<vmem>>, %arg3: memref<1x512xf32, #tpu.memory_space<vmem>>, %arg4: memref<512x256xbf16, #tpu.memory_space<vmem>>, %arg5: memref<1x256xf32, #tpu.memory_space<vmem>>, %arg6: memref<1x256xf32, #tpu.memory_space<vmem>>, %arg7: memref<256x9xbf16, #tpu.memory_space<vmem>>, %arg8: memref<1x9xf32, #tpu.memory_space<vmem>>, %arg9: memref<1x9xf32, #tpu.memory_space<vmem>>, %arg10: memref<2x9xf32, #tpu.memory_space<vmem>>) attributes {dimension_semantics = [], scalar_prefetch = 0 : i64, scratch_operands = 0 : i64, tpu.core_type = #tpu.core_type<tc>} {
    %c0 = arith.constant 0 : index
    %c0_0 = arith.constant 0 : index
    %0 = vector.load %arg0[%c0, %c0_0] : memref<2x1024xf32, #tpu.memory_space<vmem>>, vector<2x1024xf32>
    %1 = arith.truncf %0 : vector<2x1024xf32> to vector<2x1024xbf16>
    %c0_1 = arith.constant 0 : index
    %c0_2 = arith.constant 0 : index
    %2 = vector.load %arg1[%c0_1, %c0_2] : memref<1024x512xbf16, #tpu.memory_space<vmem>>, vector<1024x512xbf16>
    %cst = arith.constant dense<0.000000e+00> : vector<2x512xf32>
    %3 = tpu.matmul %1, %2, %cst {dimension_numbers = #tpu.dot_dimension_numbers<[1], [0], [0], [1], [0, 0, 1, 1], [], []>} : vector<2x1024xbf16>, vector<1024x512xbf16>, vector<2x512xf32> -> vector<2x512xf32>
    %c0_3 = arith.constant 0 : index
    %c0_4 = arith.constant 0 : index
    %4 = vector.load %arg2[%c0_3, %c0_4] : memref<1x512xf32, #tpu.memory_space<vmem>>, vector<1x512xf32>
    %5 = vector.broadcast %4 : vector<1x512xf32> to vector<2x512xf32>
    %6 = arith.mulf %3, %5 : vector<2x512xf32>
    %c0_5 = arith.constant 0 : index
    %c0_6 = arith.constant 0 : index
    %7 = vector.load %arg3[%c0_5, %c0_6] : memref<1x512xf32, #tpu.memory_space<vmem>>, vector<1x512xf32>
    %8 = vector.broadcast %7 : vector<1x512xf32> to vector<2x512xf32>
    %9 = arith.addf %6, %8 : vector<2x512xf32>
    %cst_7 = arith.constant 0.000000e+00 : f32
    %10 = vector.broadcast %cst_7 : f32 to vector<2x512xf32>
    %11 = arith.maximumf %9, %10 : vector<2x512xf32>
    %12 = arith.truncf %11 : vector<2x512xf32> to vector<2x512xbf16>
    %c0_8 = arith.constant 0 : index
    %c0_9 = arith.constant 0 : index
    %13 = vector.load %arg4[%c0_8, %c0_9] : memref<512x256xbf16, #tpu.memory_space<vmem>>, vector<512x256xbf16>
    %cst_10 = arith.constant dense<0.000000e+00> : vector<2x256xf32>
    %14 = tpu.matmul %12, %13, %cst_10 {dimension_numbers = #tpu.dot_dimension_numbers<[1], [0], [0], [1], [0, 0, 1, 1], [], []>} : vector<2x512xbf16>, vector<512x256xbf16>, vector<2x256xf32> -> vector<2x256xf32>
    %c0_11 = arith.constant 0 : index
    %c0_12 = arith.constant 0 : index
    %15 = vector.load %arg5[%c0_11, %c0_12] : memref<1x256xf32, #tpu.memory_space<vmem>>, vector<1x256xf32>
    %16 = vector.broadcast %15 : vector<1x256xf32> to vector<2x256xf32>
    %17 = arith.mulf %14, %16 : vector<2x256xf32>
    %c0_13 = arith.constant 0 : index
    %c0_14 = arith.constant 0 : index
    %18 = vector.load %arg6[%c0_13, %c0_14] : memref<1x256xf32, #tpu.memory_space<vmem>>, vector<1x256xf32>
    %19 = vector.broadcast %18 : vector<1x256xf32> to vector<2x256xf32>
    %20 = arith.addf %17, %19 : vector<2x256xf32>
    %cst_15 = arith.constant 0.000000e+00 : f32
    %21 = vector.broadcast %cst_15 : f32 to vector<2x256xf32>
    %22 = arith.maximumf %20, %21 : vector<2x256xf32>
    %23 = arith.truncf %22 : vector<2x256xf32> to vector<2x256xbf16>
    %c0_16 = arith.constant 0 : index
    %c0_17 = arith.constant 0 : index
    %24 = vector.load %arg7[%c0_16, %c0_17] : memref<256x9xbf16, #tpu.memory_space<vmem>>, vector<256x9xbf16>
    %cst_18 = arith.constant dense<0.000000e+00> : vector<2x9xf32>
    %25 = tpu.matmul %23, %24, %cst_18 {dimension_numbers = #tpu.dot_dimension_numbers<[1], [0], [0], [1], [0, 0, 1, 1], [], []>} : vector<2x256xbf16>, vector<256x9xbf16>, vector<2x9xf32> -> vector<2x9xf32>
    %c0_19 = arith.constant 0 : index
    %c0_20 = arith.constant 0 : index
    %26 = vector.load %arg8[%c0_19, %c0_20] : memref<1x9xf32, #tpu.memory_space<vmem>>, vector<1x9xf32>
    %27 = vector.broadcast %26 : vector<1x9xf32> to vector<2x9xf32>
    %28 = arith.mulf %25, %27 : vector<2x9xf32>
    %c0_21 = arith.constant 0 : index
    %c0_22 = arith.constant 0 : index
    %29 = vector.load %arg9[%c0_21, %c0_22] : memref<1x9xf32, #tpu.memory_space<vmem>>, vector<1x9xf32>
    %30 = vector.broadcast %29 : vector<1x9xf32> to vector<2x9xf32>
    %31 = arith.addf %28, %30 : vector<2x9xf32>
    %c0_23 = arith.constant 0 : index
    %c0_24 = arith.constant 0 : index
    %32 = vector.load %arg10[%c0_23, %c0_24] : memref<2x9xf32, #tpu.memory_space<vmem>>, vector<2x9xf32>
    tpu.vector_store %arg10[%c0_23, %c0_24], %31 {strides = array<i32>} : memref<2x9xf32, #tpu.memory_space<vmem>>, vector<2x9xf32>,
    return
  }
}

module attributes {stable_mosaic.version = 11 : i64} {
  func.func @kernel(%arg0: i32, %arg1: i32, %arg2: memref<1x16x3xf32, #tpu.memory_space<vmem>>, %arg3: memref<1x3x64xf32, #tpu.memory_space<vmem>>, %arg4: memref<1x64xf32, #tpu.memory_space<vmem>>, %arg5: memref<1x64xf32, #tpu.memory_space<vmem>>, %arg6: memref<64x64xbf16, #tpu.memory_space<vmem>>, %arg7: memref<1x64xf32, #tpu.memory_space<vmem>>, %arg8: memref<1x64xf32, #tpu.memory_space<vmem>>, %arg9: memref<64x128xbf16, #tpu.memory_space<vmem>>, %arg10: memref<1x128xf32, #tpu.memory_space<vmem>>, %arg11: memref<1x128xf32, #tpu.memory_space<vmem>>, %arg12: memref<128x1024xbf16, #tpu.memory_space<vmem>>, %arg13: memref<1x1024xf32, #tpu.memory_space<vmem>>, %arg14: memref<1x1024xf32, #tpu.memory_space<vmem>>, %arg15: memref<1x1x1024xf32, #tpu.memory_space<vmem>>) attributes {dimension_semantics = [#tpu.dimension_semantics<parallel>, #tpu.dimension_semantics<arbitrary>], iteration_bounds = array<i64: 2, 1>, scalar_prefetch = 0 : i64, scratch_operands = 0 : i64, tpu.core_type = #tpu.core_type<tc>, window_params = [{transform_indices = @transform_0, window_bounds = array<i64: 1, 16, 3>}, {transform_indices = @transform_1, window_bounds = array<i64: 1, 3, 64>}, {pipeline_mode = #tpu.pipeline_mode<synchronous>, transform_indices = @transform_2, window_bounds = array<i64: 1, 64>}, {pipeline_mode = #tpu.pipeline_mode<synchronous>, transform_indices = @transform_3, window_bounds = array<i64: 1, 64>}, {pipeline_mode = #tpu.pipeline_mode<synchronous>, transform_indices = @transform_4, window_bounds = array<i64: 64, 64>}, {pipeline_mode = #tpu.pipeline_mode<synchronous>, transform_indices = @transform_5, window_bounds = array<i64: 1, 64>}, {pipeline_mode = #tpu.pipeline_mode<synchronous>, transform_indices = @transform_6, window_bounds = array<i64: 1, 64>}, {pipeline_mode = #tpu.pipeline_mode<synchronous>, transform_indices = @transform_7, window_bounds = array<i64: 64, 128>}, {pipeline_mode = #tpu.pipeline_mode<synchronous>, transform_indices = @transform_8, window_bounds = array<i64: 1, 128>}, {pipeline_mode = #tpu.pipeline_mode<synchronous>, transform_indices = @transform_9, window_bounds = array<i64: 1, 128>}, {pipeline_mode = #tpu.pipeline_mode<synchronous>, transform_indices = @transform_10, window_bounds = array<i64: 128, 1024>}, {pipeline_mode = #tpu.pipeline_mode<synchronous>, transform_indices = @transform_11, window_bounds = array<i64: 1, 1024>}, {pipeline_mode = #tpu.pipeline_mode<synchronous>, transform_indices = @transform_12, window_bounds = array<i64: 1, 1024>}, {transform_indices = @transform_13, window_bounds = array<i64: 1, 1, 1024>}]} {
    %c0 = arith.constant 0 : index
    %c0_0 = arith.constant 0 : index
    %c0_1 = arith.constant 0 : index
    %0 = vector.load %arg2[%c0, %c0_0, %c0_1] : memref<1x16x3xf32, #tpu.memory_space<vmem>>, vector<1x16x3xf32>
    %1 = vector.shape_cast %0 : vector<1x16x3xf32> to vector<16x3xf32>
    %c0_2 = arith.constant 0 : index
    %c0_3 = arith.constant 0 : index
    %c0_4 = arith.constant 0 : index
    %2 = vector.load %arg3[%c0_2, %c0_3, %c0_4] : memref<1x3x64xf32, #tpu.memory_space<vmem>>, vector<1x3x64xf32>
    %3 = vector.shape_cast %2 : vector<1x3x64xf32> to vector<3x64xf32>
    %cst = arith.constant dense<0.000000e+00> : vector<16x64xf32>
    %4 = tpu.matmul %1, %3, %cst {dimension_numbers = #tpu.dot_dimension_numbers<[1], [0], [0], [1], [0, 0, 1, 1], [], []>} : vector<16x3xf32>, vector<3x64xf32>, vector<16x64xf32> -> vector<16x64xf32>
    %c0_5 = arith.constant 0 : index
    %c0_6 = arith.constant 0 : index
    %5 = vector.load %arg4[%c0_5, %c0_6] : memref<1x64xf32, #tpu.memory_space<vmem>>, vector<1x64xf32>
    %6 = vector.broadcast %5 : vector<1x64xf32> to vector<16x64xf32>
    %7 = arith.mulf %4, %6 : vector<16x64xf32>
    %c0_7 = arith.constant 0 : index
    %c0_8 = arith.constant 0 : index
    %8 = vector.load %arg5[%c0_7, %c0_8] : memref<1x64xf32, #tpu.memory_space<vmem>>, vector<1x64xf32>
    %9 = vector.broadcast %8 : vector<1x64xf32> to vector<16x64xf32>
    %10 = arith.addf %7, %9 : vector<16x64xf32>
    %cst_9 = arith.constant 0.000000e+00 : f32
    %11 = vector.broadcast %cst_9 : f32 to vector<16x64xf32>
    %12 = arith.maximumf %10, %11 : vector<16x64xf32>
    %c0_10 = arith.constant 0 : index
    %c0_11 = arith.constant 0 : index
    %13 = vector.load %arg6[%c0_10, %c0_11] : memref<64x64xbf16, #tpu.memory_space<vmem>>, vector<64x64xbf16>
    %14 = arith.truncf %12 : vector<16x64xf32> to vector<16x64xbf16>
    %cst_12 = arith.constant dense<0.000000e+00> : vector<16x64xf32>
    %15 = tpu.matmul %14, %13, %cst_12 {dimension_numbers = #tpu.dot_dimension_numbers<[1], [0], [0], [1], [0, 0, 1, 1], [], []>} : vector<16x64xbf16>, vector<64x64xbf16>, vector<16x64xf32> -> vector<16x64xf32>
    %c0_13 = arith.constant 0 : index
    %c0_14 = arith.constant 0 : index
    %16 = vector.load %arg7[%c0_13, %c0_14] : memref<1x64xf32, #tpu.memory_space<vmem>>, vector<1x64xf32>
    %17 = vector.broadcast %16 : vector<1x64xf32> to vector<16x64xf32>
    %18 = arith.mulf %15, %17 : vector<16x64xf32>
    %c0_15 = arith.constant 0 : index
    %c0_16 = arith.constant 0 : index
    %19 = vector.load %arg8[%c0_15, %c0_16] : memref<1x64xf32, #tpu.memory_space<vmem>>, vector<1x64xf32>
    %20 = vector.broadcast %19 : vector<1x64xf32> to vector<16x64xf32>
    %21 = arith.addf %18, %20 : vector<16x64xf32>
    %cst_17 = arith.constant 0.000000e+00 : f32
    %22 = vector.broadcast %cst_17 : f32 to vector<16x64xf32>
    %23 = arith.maximumf %21, %22 : vector<16x64xf32>
    %c0_18 = arith.constant 0 : index
    %c0_19 = arith.constant 0 : index
    %24 = vector.load %arg9[%c0_18, %c0_19] : memref<64x128xbf16, #tpu.memory_space<vmem>>, vector<64x128xbf16>
    %25 = arith.truncf %23 : vector<16x64xf32> to vector<16x64xbf16>
    %cst_20 = arith.constant dense<0.000000e+00> : vector<16x128xf32>
    %26 = tpu.matmul %25, %24, %cst_20 {dimension_numbers = #tpu.dot_dimension_numbers<[1], [0], [0], [1], [0, 0, 1, 1], [], []>} : vector<16x64xbf16>, vector<64x128xbf16>, vector<16x128xf32> -> vector<16x128xf32>
    %c0_21 = arith.constant 0 : index
    %c0_22 = arith.constant 0 : index
    %27 = vector.load %arg10[%c0_21, %c0_22] : memref<1x128xf32, #tpu.memory_space<vmem>>, vector<1x128xf32>
    %28 = vector.broadcast %27 : vector<1x128xf32> to vector<16x128xf32>
    %29 = arith.mulf %26, %28 : vector<16x128xf32>
    %c0_23 = arith.constant 0 : index
    %c0_24 = arith.constant 0 : index
    %30 = vector.load %arg11[%c0_23, %c0_24] : memref<1x128xf32, #tpu.memory_space<vmem>>, vector<1x128xf32>
    %31 = vector.broadcast %30 : vector<1x128xf32> to vector<16x128xf32>
    %32 = arith.addf %29, %31 : vector<16x128xf32>
    %cst_25 = arith.constant 0.000000e+00 : f32
    %33 = vector.broadcast %cst_25 : f32 to vector<16x128xf32>
    %34 = arith.maximumf %32, %33 : vector<16x128xf32>
    %c0_26 = arith.constant 0 : index
    %c0_27 = arith.constant 0 : index
    %35 = vector.load %arg12[%c0_26, %c0_27] : memref<128x1024xbf16, #tpu.memory_space<vmem>>, vector<128x1024xbf16>
    %36 = arith.truncf %34 : vector<16x128xf32> to vector<16x128xbf16>
    %cst_28 = arith.constant dense<0.000000e+00> : vector<16x1024xf32>
    %37 = tpu.matmul %36, %35, %cst_28 {dimension_numbers = #tpu.dot_dimension_numbers<[1], [0], [0], [1], [0, 0, 1, 1], [], []>} : vector<16x128xbf16>, vector<128x1024xbf16>, vector<16x1024xf32> -> vector<16x1024xf32>
    %c0_29 = arith.constant 0 : index
    %c0_30 = arith.constant 0 : index
    %38 = vector.load %arg13[%c0_29, %c0_30] : memref<1x1024xf32, #tpu.memory_space<vmem>>, vector<1x1024xf32>
    %39 = vector.broadcast %38 : vector<1x1024xf32> to vector<16x1024xf32>
    %40 = arith.mulf %37, %39 : vector<16x1024xf32>
    %c0_31 = arith.constant 0 : index
    %c0_32 = arith.constant 0 : index
    %41 = vector.load %arg14[%c0_31, %c0_32] : memref<1x1024xf32, #tpu.memory_space<vmem>>, vector<1x1024xf32>
    %42 = vector.broadcast %41 : vector<1x1024xf32> to vector<16x1024xf32>
    %43 = arith.addf %40, %42 : vector<16x1024xf32>
    %cst_33 = arith.constant 0.000000e+00 : f32
    %44 = vector.broadcast %cst_33 : f32 to vector<16x1024xf32>
    %45 = arith.maximumf %43, %44 : vector<16x1024xf32>
    %cst_34 = arith.constant dense<0xFF800000> : vector<1024xf32>
    %46 = vector.multi_reduction <maximumf>, %45, %cst_34 [0] : vector<16x1024xf32> to vector<1024xf32>
    %47 = vector.shape_cast %46 : vector<1024xf32> to vector<1x1024xf32>
    %c0_i32 = arith.constant 0 : i32
    %48 = arith.cmpi eq, %arg1, %c0_i32 : i32
    %49 = arith.extui %48 : i1 to i32
    %c0_i32_35 = arith.constant 0 : i32
    %50 = arith.cmpi ne, %49, %c0_i32_35 : i32
    scf.if %50 {
      %c0_38 = arith.constant 0 : index
      %c0_39 = arith.constant 0 : index
      %c0_40 = arith.constant 0 : index
      %54 = vector.load %arg15[%c0_38, %c0_39, %c0_40] : memref<1x1x1024xf32, #tpu.memory_space<vmem>>, vector<1x1x1024xf32>
      %55 = vector.shape_cast %54 : vector<1x1x1024xf32> to vector<1x1024xf32>
      %56 = vector.shape_cast %47 : vector<1x1024xf32> to vector<1x1x1024xf32>
      tpu.vector_store %arg15[%c0_38, %c0_39, %c0_40], %56 {strides = array<i32>} : memref<1x1x1024xf32, #tpu.memory_space<vmem>>, vector<1x1x1024xf32>,
    } else {
    }
    %c0_i32_36 = arith.constant 0 : i32
    %51 = arith.cmpi ne, %arg1, %c0_i32_36 : i32
    %52 = arith.extui %51 : i1 to i32
    %c0_i32_37 = arith.constant 0 : i32
    %53 = arith.cmpi ne, %52, %c0_i32_37 : i32
    scf.if %53 {
      %c0_38 = arith.constant 0 : index
      %c0_39 = arith.constant 0 : index
      %c0_40 = arith.constant 0 : index
      %54 = vector.load %arg15[%c0_38, %c0_39, %c0_40] : memref<1x1x1024xf32, #tpu.memory_space<vmem>>, vector<1x1x1024xf32>
      %55 = vector.shape_cast %54 : vector<1x1x1024xf32> to vector<1x1024xf32>
      %56 = arith.maximumf %55, %47 : vector<1x1024xf32>
      %c0_41 = arith.constant 0 : index
      %c0_42 = arith.constant 0 : index
      %c0_43 = arith.constant 0 : index
      %57 = vector.load %arg15[%c0_41, %c0_42, %c0_43] : memref<1x1x1024xf32, #tpu.memory_space<vmem>>, vector<1x1x1024xf32>
      %58 = vector.shape_cast %57 : vector<1x1x1024xf32> to vector<1x1024xf32>
      %59 = vector.shape_cast %56 : vector<1x1024xf32> to vector<1x1x1024xf32>
      tpu.vector_store %arg15[%c0_41, %c0_42, %c0_43], %59 {strides = array<i32>} : memref<1x1x1024xf32, #tpu.memory_space<vmem>>, vector<1x1x1024xf32>,
    } else {
    }
    return
  }
  func.func @transform_0(%arg0: i32, %arg1: i32) -> (i32, i32, i32) {
    %c0_i32 = arith.constant 0 : i32
    %c0_i32_0 = arith.constant 0 : i32
    return %arg0, %arg1, %c0_i32 : i32, i32, i32
  }
  func.func @transform_1(%arg0: i32, %arg1: i32) -> (i32, i32, i32) {
    %c0_i32 = arith.constant 0 : i32
    %c0_i32_0 = arith.constant 0 : i32
    %c0_i32_1 = arith.constant 0 : i32
    return %arg0, %c0_i32, %c0_i32_0 : i32, i32, i32
  }
  func.func @transform_2(%arg0: i32, %arg1: i32) -> (i32, i32) {
    %c0_i32 = arith.constant 0 : i32
    %c0_i32_0 = arith.constant 0 : i32
    %c0_i32_1 = arith.constant 0 : i32
    return %c0_i32, %c0_i32_0 : i32, i32
  }
  func.func @transform_3(%arg0: i32, %arg1: i32) -> (i32, i32) {
    %c0_i32 = arith.constant 0 : i32
    %c0_i32_0 = arith.constant 0 : i32
    %c0_i32_1 = arith.constant 0 : i32
    return %c0_i32, %c0_i32_0 : i32, i32
  }
  func.func @transform_4(%arg0: i32, %arg1: i32) -> (i32, i32) {
    %c0_i32 = arith.constant 0 : i32
    %c0_i32_0 = arith.constant 0 : i32
    %c0_i32_1 = arith.constant 0 : i32
    return %c0_i32, %c0_i32_0 : i32, i32
  }
  func.func @transform_5(%arg0: i32, %arg1: i32) -> (i32, i32) {
    %c0_i32 = arith.constant 0 : i32
    %c0_i32_0 = arith.constant 0 : i32
    %c0_i32_1 = arith.constant 0 : i32
    return %c0_i32, %c0_i32_0 : i32, i32
  }
  func.func @transform_6(%arg0: i32, %arg1: i32) -> (i32, i32) {
    %c0_i32 = arith.constant 0 : i32
    %c0_i32_0 = arith.constant 0 : i32
    %c0_i32_1 = arith.constant 0 : i32
    return %c0_i32, %c0_i32_0 : i32, i32
  }
  func.func @transform_7(%arg0: i32, %arg1: i32) -> (i32, i32) {
    %c0_i32 = arith.constant 0 : i32
    %c0_i32_0 = arith.constant 0 : i32
    %c0_i32_1 = arith.constant 0 : i32
    return %c0_i32, %c0_i32_0 : i32, i32
  }
  func.func @transform_8(%arg0: i32, %arg1: i32) -> (i32, i32) {
    %c0_i32 = arith.constant 0 : i32
    %c0_i32_0 = arith.constant 0 : i32
    %c0_i32_1 = arith.constant 0 : i32
    return %c0_i32, %c0_i32_0 : i32, i32
  }
  func.func @transform_9(%arg0: i32, %arg1: i32) -> (i32, i32) {
    %c0_i32 = arith.constant 0 : i32
    %c0_i32_0 = arith.constant 0 : i32
    %c0_i32_1 = arith.constant 0 : i32
    return %c0_i32, %c0_i32_0 : i32, i32
  }
  func.func @transform_10(%arg0: i32, %arg1: i32) -> (i32, i32) {
    %c0_i32 = arith.constant 0 : i32
    %c0_i32_0 = arith.constant 0 : i32
    %c0_i32_1 = arith.constant 0 : i32
    return %c0_i32, %c0_i32_0 : i32, i32
  }
  func.func @transform_11(%arg0: i32, %arg1: i32) -> (i32, i32) {
    %c0_i32 = arith.constant 0 : i32
    %c0_i32_0 = arith.constant 0 : i32
    %c0_i32_1 = arith.constant 0 : i32
    return %c0_i32, %c0_i32_0 : i32, i32
  }
  func.func @transform_12(%arg0: i32, %arg1: i32) -> (i32, i32) {
    %c0_i32 = arith.constant 0 : i32
    %c0_i32_0 = arith.constant 0 : i32
    %c0_i32_1 = arith.constant 0 : i32
    return %c0_i32, %c0_i32_0 : i32, i32
  }
  func.func @transform_13(%arg0: i32, %arg1: i32) -> (i32, i32, i32) {
    %c0_i32 = arith.constant 0 : i32
    %c0_i32_0 = arith.constant 0 : i32
    %c0_i32_1 = arith.constant 0 : i32
    return %arg0, %c0_i32, %c0_i32_0 : i32, i32, i32
  }
}

module attributes {stable_mosaic.version = 11 : i64} {
  func.func @_fc_head_kernel(%arg0: memref<2x1024xf32, #tpu.memory_space<vmem>>, %arg1: memref<1024x512xbf16, #tpu.memory_space<vmem>>, %arg2: memref<1x512xf32, #tpu.memory_space<vmem>>, %arg3: memref<1x512xf32, #tpu.memory_space<vmem>>, %arg4: memref<512x256xbf16, #tpu.memory_space<vmem>>, %arg5: memref<1x256xf32, #tpu.memory_space<vmem>>, %arg6: memref<1x256xf32, #tpu.memory_space<vmem>>, %arg7: memref<256x4096xbf16, #tpu.memory_space<vmem>>, %arg8: memref<1x4096xf32, #tpu.memory_space<vmem>>, %arg9: memref<1x4096xf32, #tpu.memory_space<vmem>>, %arg10: memref<2x4096xf32, #tpu.memory_space<vmem>>) attributes {dimension_semantics = [], scalar_prefetch = 0 : i64, scratch_operands = 0 : i64, tpu.core_type = #tpu.core_type<tc>} {
    %c0 = arith.constant 0 : index
    %c0_0 = arith.constant 0 : index
    %0 = vector.load %arg0[%c0, %c0_0] : memref<2x1024xf32, #tpu.memory_space<vmem>>, vector<2x1024xf32>
    %1 = arith.truncf %0 : vector<2x1024xf32> to vector<2x1024xbf16>
    %c0_1 = arith.constant 0 : index
    %c0_2 = arith.constant 0 : index
    %2 = vector.load %arg1[%c0_1, %c0_2] : memref<1024x512xbf16, #tpu.memory_space<vmem>>, vector<1024x512xbf16>
    %cst = arith.constant dense<0.000000e+00> : vector<2x512xf32>
    %3 = tpu.matmul %1, %2, %cst {dimension_numbers = #tpu.dot_dimension_numbers<[1], [0], [0], [1], [0, 0, 1, 1], [], []>} : vector<2x1024xbf16>, vector<1024x512xbf16>, vector<2x512xf32> -> vector<2x512xf32>
    %c0_3 = arith.constant 0 : index
    %c0_4 = arith.constant 0 : index
    %4 = vector.load %arg2[%c0_3, %c0_4] : memref<1x512xf32, #tpu.memory_space<vmem>>, vector<1x512xf32>
    %5 = vector.broadcast %4 : vector<1x512xf32> to vector<2x512xf32>
    %6 = arith.mulf %3, %5 : vector<2x512xf32>
    %c0_5 = arith.constant 0 : index
    %c0_6 = arith.constant 0 : index
    %7 = vector.load %arg3[%c0_5, %c0_6] : memref<1x512xf32, #tpu.memory_space<vmem>>, vector<1x512xf32>
    %8 = vector.broadcast %7 : vector<1x512xf32> to vector<2x512xf32>
    %9 = arith.addf %6, %8 : vector<2x512xf32>
    %cst_7 = arith.constant 0.000000e+00 : f32
    %10 = vector.broadcast %cst_7 : f32 to vector<2x512xf32>
    %11 = arith.maximumf %9, %10 : vector<2x512xf32>
    %12 = arith.truncf %11 : vector<2x512xf32> to vector<2x512xbf16>
    %c0_8 = arith.constant 0 : index
    %c0_9 = arith.constant 0 : index
    %13 = vector.load %arg4[%c0_8, %c0_9] : memref<512x256xbf16, #tpu.memory_space<vmem>>, vector<512x256xbf16>
    %cst_10 = arith.constant dense<0.000000e+00> : vector<2x256xf32>
    %14 = tpu.matmul %12, %13, %cst_10 {dimension_numbers = #tpu.dot_dimension_numbers<[1], [0], [0], [1], [0, 0, 1, 1], [], []>} : vector<2x512xbf16>, vector<512x256xbf16>, vector<2x256xf32> -> vector<2x256xf32>
    %c0_11 = arith.constant 0 : index
    %c0_12 = arith.constant 0 : index
    %15 = vector.load %arg5[%c0_11, %c0_12] : memref<1x256xf32, #tpu.memory_space<vmem>>, vector<1x256xf32>
    %16 = vector.broadcast %15 : vector<1x256xf32> to vector<2x256xf32>
    %17 = arith.mulf %14, %16 : vector<2x256xf32>
    %c0_13 = arith.constant 0 : index
    %c0_14 = arith.constant 0 : index
    %18 = vector.load %arg6[%c0_13, %c0_14] : memref<1x256xf32, #tpu.memory_space<vmem>>, vector<1x256xf32>
    %19 = vector.broadcast %18 : vector<1x256xf32> to vector<2x256xf32>
    %20 = arith.addf %17, %19 : vector<2x256xf32>
    %cst_15 = arith.constant 0.000000e+00 : f32
    %21 = vector.broadcast %cst_15 : f32 to vector<2x256xf32>
    %22 = arith.maximumf %20, %21 : vector<2x256xf32>
    %23 = arith.truncf %22 : vector<2x256xf32> to vector<2x256xbf16>
    %c0_16 = arith.constant 0 : index
    %c0_17 = arith.constant 0 : index
    %24 = vector.load %arg7[%c0_16, %c0_17] : memref<256x4096xbf16, #tpu.memory_space<vmem>>, vector<256x4096xbf16>
    %cst_18 = arith.constant dense<0.000000e+00> : vector<2x4096xf32>
    %25 = tpu.matmul %23, %24, %cst_18 {dimension_numbers = #tpu.dot_dimension_numbers<[1], [0], [0], [1], [0, 0, 1, 1], [], []>} : vector<2x256xbf16>, vector<256x4096xbf16>, vector<2x4096xf32> -> vector<2x4096xf32>
    %c0_19 = arith.constant 0 : index
    %c0_20 = arith.constant 0 : index
    %26 = vector.load %arg8[%c0_19, %c0_20] : memref<1x4096xf32, #tpu.memory_space<vmem>>, vector<1x4096xf32>
    %27 = vector.broadcast %26 : vector<1x4096xf32> to vector<2x4096xf32>
    %28 = arith.mulf %25, %27 : vector<2x4096xf32>
    %c0_21 = arith.constant 0 : index
    %c0_22 = arith.constant 0 : index
    %29 = vector.load %arg9[%c0_21, %c0_22] : memref<1x4096xf32, #tpu.memory_space<vmem>>, vector<1x4096xf32>
    %30 = vector.broadcast %29 : vector<1x4096xf32> to vector<2x4096xf32>
    %31 = arith.addf %28, %30 : vector<2x4096xf32>
    %c0_23 = arith.constant 0 : index
    %c0_24 = arith.constant 0 : index
    %32 = vector.load %arg10[%c0_23, %c0_24] : memref<2x4096xf32, #tpu.memory_space<vmem>>, vector<2x4096xf32>
    tpu.vector_store %arg10[%c0_23, %c0_24], %31 {strides = array<i32>} : memref<2x4096xf32, #tpu.memory_space<vmem>>, vector<2x4096xf32>,
    return
  }
}

module attributes {stable_mosaic.version = 11 : i64} {
  func.func @kernel(%arg0: i32, %arg1: i32, %arg2: memref<1x16x3xf32, #tpu.memory_space<vmem>>, %arg3: memref<1x3x64xf32, #tpu.memory_space<vmem>>, %arg4: memref<1x64xf32, #tpu.memory_space<vmem>>, %arg5: memref<1x64xf32, #tpu.memory_space<vmem>>, %arg6: memref<1x64x128xbf16, #tpu.memory_space<vmem>>, %arg7: memref<1x128xf32, #tpu.memory_space<vmem>>, %arg8: memref<1x128xf32, #tpu.memory_space<vmem>>, %arg9: memref<128x1024xbf16, #tpu.memory_space<vmem>>, %arg10: memref<1x1024xf32, #tpu.memory_space<vmem>>, %arg11: memref<1x1024xf32, #tpu.memory_space<vmem>>, %arg12: memref<1x1x1024xf32, #tpu.memory_space<vmem>>) attributes {dimension_semantics = [#tpu.dimension_semantics<parallel>, #tpu.dimension_semantics<arbitrary>], iteration_bounds = array<i64: 2, 1>, scalar_prefetch = 0 : i64, scratch_operands = 0 : i64, tpu.core_type = #tpu.core_type<tc>, window_params = [{transform_indices = @transform_0, window_bounds = array<i64: 1, 16, 3>}, {transform_indices = @transform_1, window_bounds = array<i64: 1, 3, 64>}, {pipeline_mode = #tpu.pipeline_mode<synchronous>, transform_indices = @transform_2, window_bounds = array<i64: 1, 64>}, {pipeline_mode = #tpu.pipeline_mode<synchronous>, transform_indices = @transform_3, window_bounds = array<i64: 1, 64>}, {transform_indices = @transform_4, window_bounds = array<i64: 1, 64, 128>}, {pipeline_mode = #tpu.pipeline_mode<synchronous>, transform_indices = @transform_5, window_bounds = array<i64: 1, 128>}, {pipeline_mode = #tpu.pipeline_mode<synchronous>, transform_indices = @transform_6, window_bounds = array<i64: 1, 128>}, {pipeline_mode = #tpu.pipeline_mode<synchronous>, transform_indices = @transform_7, window_bounds = array<i64: 128, 1024>}, {pipeline_mode = #tpu.pipeline_mode<synchronous>, transform_indices = @transform_8, window_bounds = array<i64: 1, 1024>}, {pipeline_mode = #tpu.pipeline_mode<synchronous>, transform_indices = @transform_9, window_bounds = array<i64: 1, 1024>}, {transform_indices = @transform_10, window_bounds = array<i64: 1, 1, 1024>}]} {
    %c0 = arith.constant 0 : index
    %c0_0 = arith.constant 0 : index
    %c0_1 = arith.constant 0 : index
    %0 = vector.load %arg2[%c0, %c0_0, %c0_1] : memref<1x16x3xf32, #tpu.memory_space<vmem>>, vector<1x16x3xf32>
    %1 = vector.shape_cast %0 : vector<1x16x3xf32> to vector<16x3xf32>
    %c0_2 = arith.constant 0 : index
    %c0_3 = arith.constant 0 : index
    %c0_4 = arith.constant 0 : index
    %2 = vector.load %arg3[%c0_2, %c0_3, %c0_4] : memref<1x3x64xf32, #tpu.memory_space<vmem>>, vector<1x3x64xf32>
    %3 = vector.shape_cast %2 : vector<1x3x64xf32> to vector<3x64xf32>
    %cst = arith.constant dense<0.000000e+00> : vector<16x64xf32>
    %4 = tpu.matmul %1, %3, %cst {dimension_numbers = #tpu.dot_dimension_numbers<[1], [0], [0], [1], [0, 0, 1, 1], [], []>} : vector<16x3xf32>, vector<3x64xf32>, vector<16x64xf32> -> vector<16x64xf32>
    %c0_5 = arith.constant 0 : index
    %c0_6 = arith.constant 0 : index
    %5 = vector.load %arg4[%c0_5, %c0_6] : memref<1x64xf32, #tpu.memory_space<vmem>>, vector<1x64xf32>
    %6 = vector.broadcast %5 : vector<1x64xf32> to vector<16x64xf32>
    %7 = arith.mulf %4, %6 : vector<16x64xf32>
    %c0_7 = arith.constant 0 : index
    %c0_8 = arith.constant 0 : index
    %8 = vector.load %arg5[%c0_7, %c0_8] : memref<1x64xf32, #tpu.memory_space<vmem>>, vector<1x64xf32>
    %9 = vector.broadcast %8 : vector<1x64xf32> to vector<16x64xf32>
    %10 = arith.addf %7, %9 : vector<16x64xf32>
    %cst_9 = arith.constant 0.000000e+00 : f32
    %11 = vector.broadcast %cst_9 : f32 to vector<16x64xf32>
    %12 = arith.maximumf %10, %11 : vector<16x64xf32>
    %c0_10 = arith.constant 0 : index
    %c0_11 = arith.constant 0 : index
    %c0_12 = arith.constant 0 : index
    %13 = vector.load %arg6[%c0_10, %c0_11, %c0_12] : memref<1x64x128xbf16, #tpu.memory_space<vmem>>, vector<1x64x128xbf16>
    %14 = vector.shape_cast %13 : vector<1x64x128xbf16> to vector<64x128xbf16>
    %15 = arith.truncf %12 : vector<16x64xf32> to vector<16x64xbf16>
    %cst_13 = arith.constant dense<0.000000e+00> : vector<16x128xf32>
    %16 = tpu.matmul %15, %14, %cst_13 {dimension_numbers = #tpu.dot_dimension_numbers<[1], [0], [0], [1], [0, 0, 1, 1], [], []>} : vector<16x64xbf16>, vector<64x128xbf16>, vector<16x128xf32> -> vector<16x128xf32>
    %c0_14 = arith.constant 0 : index
    %c0_15 = arith.constant 0 : index
    %17 = vector.load %arg7[%c0_14, %c0_15] : memref<1x128xf32, #tpu.memory_space<vmem>>, vector<1x128xf32>
    %18 = vector.broadcast %17 : vector<1x128xf32> to vector<16x128xf32>
    %19 = arith.mulf %16, %18 : vector<16x128xf32>
    %c0_16 = arith.constant 0 : index
    %c0_17 = arith.constant 0 : index
    %20 = vector.load %arg8[%c0_16, %c0_17] : memref<1x128xf32, #tpu.memory_space<vmem>>, vector<1x128xf32>
    %21 = vector.broadcast %20 : vector<1x128xf32> to vector<16x128xf32>
    %22 = arith.addf %19, %21 : vector<16x128xf32>
    %cst_18 = arith.constant 0.000000e+00 : f32
    %23 = vector.broadcast %cst_18 : f32 to vector<16x128xf32>
    %24 = arith.maximumf %22, %23 : vector<16x128xf32>
    %c0_19 = arith.constant 0 : index
    %c0_20 = arith.constant 0 : index
    %25 = vector.load %arg9[%c0_19, %c0_20] : memref<128x1024xbf16, #tpu.memory_space<vmem>>, vector<128x1024xbf16>
    %26 = arith.truncf %24 : vector<16x128xf32> to vector<16x128xbf16>
    %cst_21 = arith.constant dense<0.000000e+00> : vector<16x1024xf32>
    %27 = tpu.matmul %26, %25, %cst_21 {dimension_numbers = #tpu.dot_dimension_numbers<[1], [0], [0], [1], [0, 0, 1, 1], [], []>} : vector<16x128xbf16>, vector<128x1024xbf16>, vector<16x1024xf32> -> vector<16x1024xf32>
    %c0_22 = arith.constant 0 : index
    %c0_23 = arith.constant 0 : index
    %28 = vector.load %arg10[%c0_22, %c0_23] : memref<1x1024xf32, #tpu.memory_space<vmem>>, vector<1x1024xf32>
    %29 = vector.broadcast %28 : vector<1x1024xf32> to vector<16x1024xf32>
    %30 = arith.mulf %27, %29 : vector<16x1024xf32>
    %c0_24 = arith.constant 0 : index
    %c0_25 = arith.constant 0 : index
    %31 = vector.load %arg11[%c0_24, %c0_25] : memref<1x1024xf32, #tpu.memory_space<vmem>>, vector<1x1024xf32>
    %32 = vector.broadcast %31 : vector<1x1024xf32> to vector<16x1024xf32>
    %33 = arith.addf %30, %32 : vector<16x1024xf32>
    %cst_26 = arith.constant dense<0xFF800000> : vector<1024xf32>
    %34 = vector.multi_reduction <maximumf>, %33, %cst_26 [0] : vector<16x1024xf32> to vector<1024xf32>
    %35 = vector.shape_cast %34 : vector<1024xf32> to vector<1x1024xf32>
    %c0_i32 = arith.constant 0 : i32
    %36 = arith.cmpi eq, %arg1, %c0_i32 : i32
    %37 = arith.extui %36 : i1 to i32
    %c0_i32_27 = arith.constant 0 : i32
    %38 = arith.cmpi ne, %37, %c0_i32_27 : i32
    scf.if %38 {
      %c0_30 = arith.constant 0 : index
      %c0_31 = arith.constant 0 : index
      %c0_32 = arith.constant 0 : index
      %42 = vector.load %arg12[%c0_30, %c0_31, %c0_32] : memref<1x1x1024xf32, #tpu.memory_space<vmem>>, vector<1x1x1024xf32>
      %43 = vector.shape_cast %42 : vector<1x1x1024xf32> to vector<1x1024xf32>
      %44 = vector.shape_cast %35 : vector<1x1024xf32> to vector<1x1x1024xf32>
      tpu.vector_store %arg12[%c0_30, %c0_31, %c0_32], %44 {strides = array<i32>} : memref<1x1x1024xf32, #tpu.memory_space<vmem>>, vector<1x1x1024xf32>,
    } else {
    }
    %c0_i32_28 = arith.constant 0 : i32
    %39 = arith.cmpi ne, %arg1, %c0_i32_28 : i32
    %40 = arith.extui %39 : i1 to i32
    %c0_i32_29 = arith.constant 0 : i32
    %41 = arith.cmpi ne, %40, %c0_i32_29 : i32
    scf.if %41 {
      %c0_30 = arith.constant 0 : index
      %c0_31 = arith.constant 0 : index
      %c0_32 = arith.constant 0 : index
      %42 = vector.load %arg12[%c0_30, %c0_31, %c0_32] : memref<1x1x1024xf32, #tpu.memory_space<vmem>>, vector<1x1x1024xf32>
      %43 = vector.shape_cast %42 : vector<1x1x1024xf32> to vector<1x1024xf32>
      %44 = arith.maximumf %43, %35 : vector<1x1024xf32>
      %c0_33 = arith.constant 0 : index
      %c0_34 = arith.constant 0 : index
      %c0_35 = arith.constant 0 : index
      %45 = vector.load %arg12[%c0_33, %c0_34, %c0_35] : memref<1x1x1024xf32, #tpu.memory_space<vmem>>, vector<1x1x1024xf32>
      %46 = vector.shape_cast %45 : vector<1x1x1024xf32> to vector<1x1024xf32>
      %47 = vector.shape_cast %44 : vector<1x1024xf32> to vector<1x1x1024xf32>
      tpu.vector_store %arg12[%c0_33, %c0_34, %c0_35], %47 {strides = array<i32>} : memref<1x1x1024xf32, #tpu.memory_space<vmem>>, vector<1x1x1024xf32>,
    } else {
    }
    return
  }
  func.func @transform_0(%arg0: i32, %arg1: i32) -> (i32, i32, i32) {
    %c0_i32 = arith.constant 0 : i32
    %c0_i32_0 = arith.constant 0 : i32
    return %arg0, %arg1, %c0_i32 : i32, i32, i32
  }
  func.func @transform_1(%arg0: i32, %arg1: i32) -> (i32, i32, i32) {
    %c0_i32 = arith.constant 0 : i32
    %c0_i32_0 = arith.constant 0 : i32
    %c0_i32_1 = arith.constant 0 : i32
    return %arg0, %c0_i32, %c0_i32_0 : i32, i32, i32
  }
  func.func @transform_2(%arg0: i32, %arg1: i32) -> (i32, i32) {
    %c0_i32 = arith.constant 0 : i32
    %c0_i32_0 = arith.constant 0 : i32
    %c0_i32_1 = arith.constant 0 : i32
    return %c0_i32, %c0_i32_0 : i32, i32
  }
  func.func @transform_3(%arg0: i32, %arg1: i32) -> (i32, i32) {
    %c0_i32 = arith.constant 0 : i32
    %c0_i32_0 = arith.constant 0 : i32
    %c0_i32_1 = arith.constant 0 : i32
    return %c0_i32, %c0_i32_0 : i32, i32
  }
  func.func @transform_4(%arg0: i32, %arg1: i32) -> (i32, i32, i32) {
    %c0_i32 = arith.constant 0 : i32
    %c0_i32_0 = arith.constant 0 : i32
    %c0_i32_1 = arith.constant 0 : i32
    return %arg0, %c0_i32, %c0_i32_0 : i32, i32, i32
  }
  func.func @transform_5(%arg0: i32, %arg1: i32) -> (i32, i32) {
    %c0_i32 = arith.constant 0 : i32
    %c0_i32_0 = arith.constant 0 : i32
    %c0_i32_1 = arith.constant 0 : i32
    return %c0_i32, %c0_i32_0 : i32, i32
  }
  func.func @transform_6(%arg0: i32, %arg1: i32) -> (i32, i32) {
    %c0_i32 = arith.constant 0 : i32
    %c0_i32_0 = arith.constant 0 : i32
    %c0_i32_1 = arith.constant 0 : i32
    return %c0_i32, %c0_i32_0 : i32, i32
  }
  func.func @transform_7(%arg0: i32, %arg1: i32) -> (i32, i32) {
    %c0_i32 = arith.constant 0 : i32
    %c0_i32_0 = arith.constant 0 : i32
    %c0_i32_1 = arith.constant 0 : i32
    return %c0_i32, %c0_i32_0 : i32, i32
  }
  func.func @transform_8(%arg0: i32, %arg1: i32) -> (i32, i32) {
    %c0_i32 = arith.constant 0 : i32
    %c0_i32_0 = arith.constant 0 : i32
    %c0_i32_1 = arith.constant 0 : i32
    return %c0_i32, %c0_i32_0 : i32, i32
  }
  func.func @transform_9(%arg0: i32, %arg1: i32) -> (i32, i32) {
    %c0_i32 = arith.constant 0 : i32
    %c0_i32_0 = arith.constant 0 : i32
    %c0_i32_1 = arith.constant 0 : i32
    return %c0_i32, %c0_i32_0 : i32, i32
  }
  func.func @transform_10(%arg0: i32, %arg1: i32) -> (i32, i32, i32) {
    %c0_i32 = arith.constant 0 : i32
    %c0_i32_0 = arith.constant 0 : i32
    %c0_i32_1 = arith.constant 0 : i32
    return %arg0, %c0_i32, %c0_i32_0 : i32, i32, i32
  }
}

module attributes {stable_mosaic.version = 11 : i64} {
  func.func @_fc_head_kernel(%arg0: memref<2x1024xf32, #tpu.memory_space<vmem>>, %arg1: memref<1024x512xbf16, #tpu.memory_space<vmem>>, %arg2: memref<1x512xf32, #tpu.memory_space<vmem>>, %arg3: memref<1x512xf32, #tpu.memory_space<vmem>>, %arg4: memref<512x256xbf16, #tpu.memory_space<vmem>>, %arg5: memref<1x256xf32, #tpu.memory_space<vmem>>, %arg6: memref<1x256xf32, #tpu.memory_space<vmem>>, %arg7: memref<256x10xbf16, #tpu.memory_space<vmem>>, %arg8: memref<1x10xf32, #tpu.memory_space<vmem>>, %arg9: memref<1x10xf32, #tpu.memory_space<vmem>>, %arg10: memref<2x10xf32, #tpu.memory_space<vmem>>) attributes {dimension_semantics = [], scalar_prefetch = 0 : i64, scratch_operands = 0 : i64, tpu.core_type = #tpu.core_type<tc>} {
    %c0 = arith.constant 0 : index
    %c0_0 = arith.constant 0 : index
    %0 = vector.load %arg0[%c0, %c0_0] : memref<2x1024xf32, #tpu.memory_space<vmem>>, vector<2x1024xf32>
    %1 = arith.truncf %0 : vector<2x1024xf32> to vector<2x1024xbf16>
    %c0_1 = arith.constant 0 : index
    %c0_2 = arith.constant 0 : index
    %2 = vector.load %arg1[%c0_1, %c0_2] : memref<1024x512xbf16, #tpu.memory_space<vmem>>, vector<1024x512xbf16>
    %cst = arith.constant dense<0.000000e+00> : vector<2x512xf32>
    %3 = tpu.matmul %1, %2, %cst {dimension_numbers = #tpu.dot_dimension_numbers<[1], [0], [0], [1], [0, 0, 1, 1], [], []>} : vector<2x1024xbf16>, vector<1024x512xbf16>, vector<2x512xf32> -> vector<2x512xf32>
    %c0_3 = arith.constant 0 : index
    %c0_4 = arith.constant 0 : index
    %4 = vector.load %arg2[%c0_3, %c0_4] : memref<1x512xf32, #tpu.memory_space<vmem>>, vector<1x512xf32>
    %5 = vector.broadcast %4 : vector<1x512xf32> to vector<2x512xf32>
    %6 = arith.mulf %3, %5 : vector<2x512xf32>
    %c0_5 = arith.constant 0 : index
    %c0_6 = arith.constant 0 : index
    %7 = vector.load %arg3[%c0_5, %c0_6] : memref<1x512xf32, #tpu.memory_space<vmem>>, vector<1x512xf32>
    %8 = vector.broadcast %7 : vector<1x512xf32> to vector<2x512xf32>
    %9 = arith.addf %6, %8 : vector<2x512xf32>
    %cst_7 = arith.constant 0.000000e+00 : f32
    %10 = vector.broadcast %cst_7 : f32 to vector<2x512xf32>
    %11 = arith.maximumf %9, %10 : vector<2x512xf32>
    %12 = arith.truncf %11 : vector<2x512xf32> to vector<2x512xbf16>
    %c0_8 = arith.constant 0 : index
    %c0_9 = arith.constant 0 : index
    %13 = vector.load %arg4[%c0_8, %c0_9] : memref<512x256xbf16, #tpu.memory_space<vmem>>, vector<512x256xbf16>
    %cst_10 = arith.constant dense<0.000000e+00> : vector<2x256xf32>
    %14 = tpu.matmul %12, %13, %cst_10 {dimension_numbers = #tpu.dot_dimension_numbers<[1], [0], [0], [1], [0, 0, 1, 1], [], []>} : vector<2x512xbf16>, vector<512x256xbf16>, vector<2x256xf32> -> vector<2x256xf32>
    %c0_11 = arith.constant 0 : index
    %c0_12 = arith.constant 0 : index
    %15 = vector.load %arg5[%c0_11, %c0_12] : memref<1x256xf32, #tpu.memory_space<vmem>>, vector<1x256xf32>
    %16 = vector.broadcast %15 : vector<1x256xf32> to vector<2x256xf32>
    %17 = arith.mulf %14, %16 : vector<2x256xf32>
    %c0_13 = arith.constant 0 : index
    %c0_14 = arith.constant 0 : index
    %18 = vector.load %arg6[%c0_13, %c0_14] : memref<1x256xf32, #tpu.memory_space<vmem>>, vector<1x256xf32>
    %19 = vector.broadcast %18 : vector<1x256xf32> to vector<2x256xf32>
    %20 = arith.addf %17, %19 : vector<2x256xf32>
    %cst_15 = arith.constant 0.000000e+00 : f32
    %21 = vector.broadcast %cst_15 : f32 to vector<2x256xf32>
    %22 = arith.maximumf %20, %21 : vector<2x256xf32>
    %23 = arith.truncf %22 : vector<2x256xf32> to vector<2x256xbf16>
    %c0_16 = arith.constant 0 : index
    %c0_17 = arith.constant 0 : index
    %24 = vector.load %arg7[%c0_16, %c0_17] : memref<256x10xbf16, #tpu.memory_space<vmem>>, vector<256x10xbf16>
    %cst_18 = arith.constant dense<0.000000e+00> : vector<2x10xf32>
    %25 = tpu.matmul %23, %24, %cst_18 {dimension_numbers = #tpu.dot_dimension_numbers<[1], [0], [0], [1], [0, 0, 1, 1], [], []>} : vector<2x256xbf16>, vector<256x10xbf16>, vector<2x10xf32> -> vector<2x10xf32>
    %c0_19 = arith.constant 0 : index
    %c0_20 = arith.constant 0 : index
    %26 = vector.load %arg8[%c0_19, %c0_20] : memref<1x10xf32, #tpu.memory_space<vmem>>, vector<1x10xf32>
    %27 = vector.broadcast %26 : vector<1x10xf32> to vector<2x10xf32>
    %28 = arith.mulf %25, %27 : vector<2x10xf32>
    %c0_21 = arith.constant 0 : index
    %c0_22 = arith.constant 0 : index
    %29 = vector.load %arg9[%c0_21, %c0_22] : memref<1x10xf32, #tpu.memory_space<vmem>>, vector<1x10xf32>
    %30 = vector.broadcast %29 : vector<1x10xf32> to vector<2x10xf32>
    %31 = arith.addf %28, %30 : vector<2x10xf32>
    %c0_23 = arith.constant 0 : index
    %c0_24 = arith.constant 0 : index
    %32 = vector.load %arg10[%c0_23, %c0_24] : memref<2x10xf32, #tpu.memory_space<vmem>>, vector<2x10xf32>
    tpu.vector_store %arg10[%c0_23, %c0_24], %31 {strides = array<i32>} : memref<2x10xf32, #tpu.memory_space<vmem>>, vector<2x10xf32>,
    return
  }
}

</mosaic_0001>

<bundles_post_ra>
// kernel: pointnet_base_apply.6
= control target key start
LH: loop header
LB: loop body
LE: loop exit
PB: predicated region body
PF: predicated region fallthrough
CT: control target
= control target key end

     0   :  { %15 = vsyncpa [#allocation3], 0  ;;  %s2568_s0 = inlined_call_operand.vmem [shape: f32[2,16,3], index: 0, kind: input, shape index: {}]   ;;  %s2569_s1 = inlined_call_operand.hbm [shape: f32[3,64], index: 1, kind: input, shape index: {}]   ;;  %s2570_s2 = inlined_call_operand.hbm [shape: f32[1,64], index: 2, kind: input, shape index: {}]   ;;  %s2571_s3 = inlined_call_operand.hbm [shape: f32[1,64], index: 3, kind: input, shape index: {}]   ;;  %s2572_s4 = inlined_call_operand.vmem [shape: bf16[64,128], index: 4, kind: input, shape index: {}]   ;;  %s2573_s5 = inlined_call_operand.hbm [shape: f32[1,128], index: 5, kind: input, shape index: {}]   ;;  %s2574_s6 = inlined_call_operand.hbm [shape: f32[1,128], index: 6, kind: input, shape index: {}]   ;;  %s2575_s7 = inlined_call_operand.vmem [shape: bf16[128,1024], index: 7, kind: input, shape index: {}]   ;;  %s2576_s8 = inlined_call_operand.hbm [shape: f32[1,1024], index: 8, kind: input, shape index: {}]   ;;  %s2577_s9 = inlined_call_operand.hbm [shape: f32[1,1024], index: 9, kind: input, shape index: {}]   ;;  %s2578_s10 = inlined_call_operand.vmem [shape: f32[2,1,1024], index: 10, kind: output, shape index: {}]  }
   0x1   :  { %16 = vsyncpa [#allocation5], 0 }
   0x2   :  { %17 = vsyncpa [#allocation8], 0 }
   0x3   :  { %18 = vsyncpa [#allocation11], 0  ;;  %s2209_s13 = smov 0   ;;  %s2211_s14 = smov 0  }
   0x4   :  { %s2213_s15 = smov 0  }
   0x5 LB: > { %s2143_s16 = smov [#allocation4]   ;;  %s1692_s18 = sadd.s32 4294967295, %s2141_s15   ;;  %s2141_s15 = sphi %s2213_s15, %s24_s15   ;;  %s2137_s14 = sphi %s2211_s14, %s2589_s14   ;;  %s2133_s13 = sphi %s2209_s13, %s2588_s13  }
   0x6   : > { %s308_s17 = sshll.u32 %s2143_s16, 4  ;;  %p1694_p0 = scmp.ge.s32.totalorder %s2141_s15, 1  ;;  %s309_s17 = int_to_ptr.vmem [resolvable:$true] %s308_s17 }
   0x7   : > { %p284_p1 = scmp.lt.s32.totalorder %s2141_s15, 3  ;;  %p2227_p2 = scmp.eq.s32.totalorder %s1692_s18, 0 }
   0x8   : > { %s2144_s21 = smov [#allocation7]   ;;  %s2145_s23 = smov [#allocation10]  }
   0x9   : > { %s2582_s19 = scalar_select %p2227_p2, 1, 0 }
   0xa   : > { %p2231_p3 = pnand %p1694_p0, %p284_p1  ;;  %s333_s22 = sshll.u32 %s2144_s21, 4  ;;  %s334_s22 = int_to_ptr.vmem [resolvable:$true] %s333_s22 }
   0xb   : > { %s358_s24 = sshll.u32 %s2145_s23, 4  ;;  %s1932_s27 = scalar_lea.vmem %s309_s17, 16  ;;  %s2243_s24 = int_to_ptr.vmem [resolvable:$true] %s358_s24 }
   0xc   : > { %s2583_s20 = scalar_select %p2231_p3, 1, 0 }
   0xd   : > { %p1846_p4 = pneg %p2231_p3  ;;  %p1933_p7 = scmp.ne.s32.totalorder %s309_s17, %s1932_s27 }
   0xe   : > { %s1939_s28 = scalar_lea.vmem %s309_s17, 32  ;;  %p1940_p10 = scmp.lt.s32.totalorder %s309_s17, %s309_s17 }
   0xf   : > { %p2239_p5 = pnand %p2227_p2, %p1846_p4  ;;  %p1941_p11 = scmp.lt.s32.totalorder %s1939_s28, %s1932_s27 }
  0x11   : > { %p2247_p6 = pneg %p2239_p5  ;;  %p1942_p12 = por %p1941_p11, %p1940_p10 }
  0x13   : > { %p1935_p8 = pnand %p1933_p7, %p2247_p6 }
  0x15   : > { %p1936_p9 = pneg %p1935_p8 }
  0x17   : > { %p1943_p13 = pnand %p1942_p12, %p1936_p9 }
  0x19   : > { %1946 = shalt.err (!%p1943_p13)
}
  0x1a   : > { %1852 = dma.hbm_to_vmem [thread:$0]  (!%p2239_p5), %s2570_s2, 16, %s309_s17, [#allocation5]  }
  0x1b   : > { %s1958_s11 = scalar_lea.vmem %s334_s22, 16  ;;  %s1965_s12 = scalar_lea.vmem %s334_s22, 32 }
  0x1c   : > { %p1959_p0 = scmp.ne.s32.totalorder %s334_s22, %s1958_s11  ;;  %p1966_p7 = scmp.lt.s32.totalorder %s334_s22, %s334_s22 }
  0x1d   : > { %p1967_p8 = scmp.lt.s32.totalorder %s1965_s12, %s1958_s11 }
  0x1e   : > { %p1961_p1 = pnand %p1959_p0, %p2247_p6 }
  0x1f   : > { %p1968_p2 = por %p1967_p8, %p1966_p7 }
  0x20   : > { %p1962_p4 = pneg %p1961_p1 }
  0x22   : > { %p1969_p3 = pnand %p1968_p2, %p1962_p4 }
  0x24   : > { %1972 = shalt.err (!%p1969_p3)
}
  0x25   : > { %1858 = dma.hbm_to_vmem [thread:$0]  (!%p2239_p5), %s2573_s5, 16, %s334_s22, [#allocation8]  }
  0x26   : > { %s1984_s17 = scalar_lea.vmem %s2243_s24, 128  ;;  %p1992_p12 = scmp.lt.s32.totalorder %s2243_s24, %s2243_s24 }
  0x27   : > { %p1985_p9 = scmp.ne.s32.totalorder %s2243_s24, %s1984_s17  ;;  %p1993_p13 = scmp.lt.s32.totalorder %s1984_s17, %s1984_s17 }
  0x29   : > { %p1987_p10 = pnand %p1985_p9, %p2247_p6  ;;  %p1994_p2 = por %p1993_p13, %p1992_p12 }
  0x2b   : > { %p1988_p11 = pneg %p1987_p10 }
  0x2d   : > { %p1995_p3 = pnand %p1994_p2, %p1988_p11 }
  0x2f   : > { %1998 = shalt.err (!%p1995_p3)
}
  0x30   : > { %1864 = dma.hbm_to_vmem [thread:$0]  (!%p2239_p5), %s2576_s8, 128, %s2243_s24, [#allocation11]  }
  0x31   : > { %s36_s22 = sadd.s32 1, %s2137_s14  ;;  %s2146_s27 = smov [#allocation2]  }
  0x32   : > { %p38_p0 = scmp.ge.s32.totalorder %s36_s22, 2  ;;  %s297_s28 = sshll.u32 %s2146_s27, 4  ;;  %s298_s28 = int_to_ptr.vmem [resolvable:$true] %s297_s28 }
  0x33   : > { %s2010_s29 = scalar_lea.vmem %s298_s28, 64  ;;  %p2018_p8 = scmp.lt.s32.totalorder %s298_s28, %s298_s28 }
  0x34   : > { %s2591_s22 = smov (%p38_p0, %s36_s22), 0  ;;  %p2011_p1 = scmp.ne.s32.totalorder %s298_s28, %s2010_s29 }
  0x35   : > { %p2019_p9 = scmp.lt.s32.totalorder %s2010_s29, %s2010_s29 }
  0x36   : > { %p2013_p4 = pnand %p2011_p1, %p2247_p6 }
  0x37   : > { %p2020_p10 = por %p2019_p9, %p2018_p8 }
  0x38   : > { %p2014_p7 = pneg %p2013_p4 }
  0x3a   : > { %p2021_p11 = pnand %p2020_p10, %p2014_p7 }
  0x3c   : > { %2024 = shalt.err (!%p2021_p11)
}
  0x3d   : > { %1849 = dma.hbm_to_vmem [thread:$0]  (!%p2239_p5), %s2569_s1, 64, %s298_s28, [#allocation3]  }
  0x3e   : > { %s2147_s11 = smov [#allocation6]   ;;  %s2148_s16 = smov [#allocation9]  }
  0x3f   : > { %s319_s12 = sshll.u32 %s2147_s11, 4  ;;  %s344_s18 = sshll.u32 %s2148_s16, 4  ;;  %s320_s12 = int_to_ptr.vmem [resolvable:$true] %s319_s12  ;;  %s345_s18 = int_to_ptr.vmem [resolvable:$true] %s344_s18 }
  0x40   : > { %s2036_s17 = scalar_lea.vmem %s320_s12, 16  ;;  %s2043_s21 = scalar_lea.vmem %s320_s12, 32 }
  0x41   : > { %p2037_p12 = scmp.ne.s32.totalorder %s320_s12, %s2036_s17  ;;  %p2044_p3 = scmp.lt.s32.totalorder %s320_s12, %s320_s12 }
  0x42   : > { %p2045_p0 = scmp.lt.s32.totalorder %s2043_s21, %s2036_s17 }
  0x43   : > { %p2039_p13 = pnand %p2037_p12, %p2247_p6 }
  0x44   : > { %p2046_p1 = por %p2045_p0, %p2044_p3 }
  0x45   : > { %p2040_p2 = pneg %p2039_p13 }
  0x47   : > { %p2047_p4 = pnand %p2046_p1, %p2040_p2 }
  0x49   : > { %2050 = shalt.err (!%p2047_p4)
}
  0x4a   : > { %1855 = dma.hbm_to_vmem [thread:$0]  (!%p2239_p5), %s2571_s3, 16, %s320_s12, [#allocation5]  }
  0x4b   : > { %s2062_s28 = scalar_lea.vmem %s345_s18, 16  ;;  %s2069_s29 = scalar_lea.vmem %s345_s18, 32 }
  0x4c   : > { %p2063_p7 = scmp.ne.s32.totalorder %s345_s18, %s2062_s28  ;;  %p2070_p10 = scmp.lt.s32.totalorder %s345_s18, %s345_s18 }
  0x4d   : > { %p2071_p11 = scmp.lt.s32.totalorder %s2069_s29, %s2062_s28 }
  0x4e   : > { %p2065_p8 = pnand %p2063_p7, %p2247_p6 }
  0x4f   : > { %p2072_p12 = por %p2071_p11, %p2070_p10 }
  0x50   : > { %p2066_p9 = pneg %p2065_p8 }
  0x52   : > { %p2073_p13 = pnand %p2072_p12, %p2066_p9 }
  0x54   : > { %2076 = shalt.err (!%p2073_p13)
}
  0x55   : > { %1861 = dma.hbm_to_vmem [thread:$0]  (!%p2239_p5), %s2574_s6, 16, %s345_s18, [#allocation8]  }
  0x56   : > { %s2149_s11 = smov [#allocation12]  }
  0x57   : > { %s369_s12 = sshll.u32 %s2149_s11, 4  ;;  %s370_s12 = int_to_ptr.vmem [resolvable:$true] %s369_s12 }
  0x58   : > { %s2088_s16 = scalar_lea.vmem %s370_s12, 128  ;;  %p2096_p1 = scmp.lt.s32.totalorder %s370_s12, %s370_s12 }
  0x59   : > { %p2089_p2 = scmp.ne.s32.totalorder %s370_s12, %s2088_s16  ;;  %p2097_p4 = scmp.lt.s32.totalorder %s2088_s16, %s2088_s16 }
  0x5b   : > { %p2091_p3 = pnand %p2089_p2, %p2247_p6  ;;  %p2098_p7 = por %p2097_p4, %p2096_p1 }
  0x5d   : > { %p2092_p0 = pneg %p2091_p3 }
  0x5f   : > { %p2099_p8 = pnand %p2098_p7, %p2092_p0 }
  0x61   : > { %2102 = shalt.err (!%p2099_p8)
}
  0x62   : > { %1867 = dma.hbm_to_vmem [thread:$0]  (!%p2239_p5), %s2577_s9, 128, %s370_s12, [#allocation11]  }
  0x63   : > { %p2586_p9 = scmp.ne.s32.totalorder %s2583_s20, 0 }
  0x64   : > { %p2587_p10 = scmp.ne.s32.totalorder (!%p2586_p9), %s2582_s19, 0 }
  0x65   : > { %395 = sbr.rel (%p2586_p9) target bundleno = 790 (0x316), region = 60 }
  0x6a   : > { %2116 = dma.done.wait (%p2587_p10), [#allocation3], 64  }
  0x6b   : > { %2118 = vsyncadd (%p2587_p10), [#allocation3], 4294967232 }
  0x6c   : > { %2120 = dma.done.wait (%p2587_p10), [#allocation5], 32  }
  0x6d   : > { %2122 = vsyncadd (%p2587_p10), [#allocation5], 4294967264 }
  0x6e   : > { %2124 = dma.done.wait (%p2587_p10), [#allocation8], 32  }
  0x6f   : > { %2126 = vsyncadd (%p2587_p10), [#allocation8], 4294967264 }
  0x70   : > { %2128 = dma.done.wait (%p2587_p10), [#allocation11], 256  }
  0x71   : > { %2130 = vsyncadd (%p2587_p10), [#allocation11], 4294967040  ;;  %p461_p5 = scmp.lt.s32.totalorder %s2133_s13, 1  ;;  %v2150_v0 = vmov 0.0   ;;  %vm485_vm0 = vcmask 1042432   ;;  %vm478_vm1 = vcmask 23552  }
  0x72   : > { %1806 = vmatprep.subr.bf16.mxu1 %v2150_v0  ;;  %v477_v1 = vld [vmem:[#allocation2] sm:$0x7]  ;;  %v1917_v4 = vld [vmem:[%s2572_s4 + $0x18] sm:$0xff]   ;;  %v1918_v5 = vld [vmem:[%s2572_s4 + $0x10] sm:$0xff]   ;;  %vm2151_vm2 = vmmov 0   ;;  %vm617_vm3 = vcmask 523264  }
  0x73   : > { %s2593_s13 = smov (!%p461_p5, %s2133_s13), 1  ;;  %1801 = vmatprep.subr.msk.mxu0 %vm485_vm0, %v477_v1  ;;  %1807 = vmatpush3.bf16.msra.mxu1 %v1917_v4  ;;  %v1919_v6 = vld [vmem:[%s2572_s4 + $0x8] sm:$0xff]   ;;  %v1920_v7 = vld [vmem:[%s2572_s4] sm:$0xff]  }
  0x74   : > { %s1792_s20 = sshll.u32 %s2593_s13, 4  ;;  %1802 = vmatpush3.msk.msra.mxu0 %vm485_vm0, %v477_v1  ;;  %1808 = vmatprep.subr.bf16.mxu1 %v2150_v0  ;;  %v738_v8 = vld [vmem:[%s2575_s7 + $0x1c0] sm:$0xff]  ;;  %v739_v10 = vld [vmem:[%s2575_s7 + $0x1c8] sm:$0xff]  ;;  %s1713_s12 = sshll.u32 %s2593_s13, 3 }
  0x75   : > { %s468_s18 = scalar_lea.vmem %s2568_s0, %s1792_s20  ;;  %1814 = vmatprep.mubr.msk.bf16.mxu1 %vm2151_vm2, %v2150_v0  ;;  %v742_v9 = vld [vmem:[%s2575_s7 + $0x1e0] sm:$0xff]  ;;  %v743_v13 = vld [vmem:[%s2575_s7 + $0x1e8] sm:$0xff]  ;;  %s473_s21 = scalar_lea.vmem %s2578_s10, %s1713_s12 }
  0x76   : > { %v475_v2 = vld [vmem:[%s468_s18] sm:$0xff]  ;;  %v476_v3 = vld [vmem:[%s468_s18 + $0x8] sm:$0xff]  ;;  %v1782_v11 = vcombine.low %v738_v8, %v742_v9  ;;  %v1783_v12 = vcombine.high %v738_v8, %v742_v9  ;;  %v1784_v16 = vcombine.low %v739_v10, %v743_v13  ;;  %v1785_v17 = vcombine.high %v739_v10, %v743_v13 }
  0x77   : > { %1803 = vmatprep.mubr.msk.f32.mxu0 %vm478_vm1, %v475_v2  ;;  %1809 = vmatpush3.bf16.msra.mxu1 %v1918_v5  ;;  %v730_v14 = vld [vmem:[%s2575_s7 + $0x180] sm:$0xff]  ;;  %v731_v40 = vld [vmem:[%s2575_s7 + $0x188] sm:$0xff] }
  0x78   : > { %1804 = vmatmul.mubr.msk.f32.vlgmr.msra.gmra.mxu0 %vm478_vm1, %v476_v3  ;;  %1810 = vmatprep.subr.bf16.mxu1 %v2150_v0  ;;  %v734_v15 = vld [vmem:[%s2575_s7 + $0x1a0] sm:$0xff]  ;;  %v735_v41 = vld [vmem:[%s2575_s7 + $0x1a8] sm:$0xff] }
  0x79   : > { %v1775_v18 = vcombine.high %v730_v14, %v734_v15  ;;  %1067 = vmatprep.subr.bf16.mxu0 %v1783_v12  ;;  %v1774_v19 = vcombine.low %v730_v14, %v734_v15  ;;  %v722_v20 = vld [vmem:[%s2575_s7 + $0x140] sm:$0xff]  ;;  %v1777_v45 = vcombine.high %v731_v40, %v735_v41  ;;  %v723_v46 = vld [vmem:[%s2575_s7 + $0x148] sm:$0xff]  ;;  %v1776_v48 = vcombine.low %v731_v40, %v735_v41  ;;  %v733_v40 = vld [vmem:[%s2575_s7 + $0x198] sm:$0xff] }
  0x7a   : > { %1068 = vmatpush1.bf16.msra.mxu0 %v1782_v11  ;;  %v726_v21 = vld [vmem:[%s2575_s7 + $0x160] sm:$0xff]  ;;  %v727_v47 = vld [vmem:[%s2575_s7 + $0x168] sm:$0xff]  ;;  %v737_v41 = vld [vmem:[%s2575_s7 + $0x1b8] sm:$0xff] }
  0x7b   : > { %1811 = vmatpush3.bf16.msra.mxu1 %v1919_v6  ;;  %1069 = vmatprep.subr.bf16.mxu0 %v1775_v18  ;;  %v1767_v22 = vcombine.high %v722_v20, %v726_v21  ;;  %v1766_v23 = vcombine.low %v722_v20, %v726_v21  ;;  %v714_v24 = vld [vmem:[%s2575_s7 + $0x100] sm:$0xff]  ;;  %v1769_v49 = vcombine.high %v723_v46, %v727_v47  ;;  %v715_v50 = vld [vmem:[%s2575_s7 + $0x108] sm:$0xff]  ;;  %v744_v20 = vld [vmem:[%s2575_s7 + $0x1f0] sm:$0xff] }
  0x7c   : > { %1812 = vmatprep.subr.bf16.mxu1 %v2150_v0  ;;  %v718_v25 = vld [vmem:[%s2575_s7 + $0x120] sm:$0xff]  ;;  %v719_v51 = vld [vmem:[%s2575_s7 + $0x128] sm:$0xff]  ;;  %v1768_v52 = vcombine.low %v723_v46, %v727_v47  ;;  %v741_v21 = vld [vmem:[%s2575_s7 + $0x1d8] sm:$0xff]  ;;  %v1781_v46 = vcombine.high %v733_v40, %v737_v41 }
  0x7d   : > { %v1759_v26 = vcombine.high %v714_v24, %v718_v25  ;;  %v1758_v27 = vcombine.low %v714_v24, %v718_v25  ;;  %v706_v28 = vld [vmem:[%s2575_s7 + $0xc0] sm:$0xff]  ;;  %v1761_v53 = vcombine.high %v715_v50, %v719_v51  ;;  %v707_v54 = vld [vmem:[%s2575_s7 + $0xc8] sm:$0xff]  ;;  %v1760_v56 = vcombine.low %v715_v50, %v719_v51  ;;  %v724_v47 = vld [vmem:[%s2575_s7 + $0x150] sm:$0xff] }
  0x7e   : > { %1070 = vmatpush1.bf16.msra.mxu0 %v1774_v19  ;;  %v710_v29 = vld [vmem:[%s2575_s7 + $0xe0] sm:$0xff]  ;;  %v711_v55 = vld [vmem:[%s2575_s7 + $0xe8] sm:$0xff]  ;;  %v740_v19 = vld [vmem:[%s2575_s7 + $0x1d0] sm:$0xff] }
  0x7f   : > { %1813 = vmatpush3.bf16.msra.mxu1 %v1920_v7  ;;  %1071 = vmatprep.subr.bf16.mxu0 %v1767_v22  ;;  %v1751_v30 = vcombine.high %v706_v28, %v710_v29  ;;  %v1750_v31 = vcombine.low %v706_v28, %v710_v29  ;;  %v1717_v32 = vld [vmem:[#allocation4] ss:$0 sm:$0xff]  ;;  %v1718_v34 = vld [vmem:[#allocation6] ss:$0 sm:$0xff]  ;;  %v1753_v57 = vcombine.high %v707_v54, %v711_v55  ;;  %v699_v61 = vld [vmem:[%s2575_s7 + $0x88] sm:$0xff] }
  0x80   : > { %1110 = vmatprep.subr.bf16.mxu1 %v1785_v17  ;;  %v1752_v58 = vcombine.low %v707_v54, %v711_v55  ;;  %v698_v59 = vld [vmem:[%s2575_s7 + $0x80] sm:$0xff]  ;;  %v703_v63 = vld [vmem:[%s2575_s7 + $0xa8] sm:$0xff]  ;;  %v1787_v22 = vcombine.high %v740_v19, %v744_v20  ;;  %v1786_v24 = vcombine.low %v740_v19, %v744_v20  ;;  %v729_v50 = vld [vmem:[%s2575_s7 + $0x178] sm:$0xff] }
  0x81   : > { %v702_v60 = vld [vmem:[%s2575_s7 + $0xa0] sm:$0xff]  ;;  %v1744_v1 = vcombine.low %v699_v61, %v703_v63  ;;  %v1745_v2 = vcombine.high %v699_v61, %v703_v63  ;;  %v691_v6 = vld [vmem:[%s2575_s7 + $0x48] sm:$0xff]  ;;  %v716_v55 = vld [vmem:[%s2575_s7 + $0x110] sm:$0xff] }
  0x82   : > { %1072 = vmatpush1.bf16.msra.mxu0 %v1766_v23  ;;  %v1743_v62 = vcombine.high %v698_v59, %v702_v60  ;;  %v1742_v0 = vcombine.low %v698_v59, %v702_v60  ;;  %v690_v3 = vld [vmem:[%s2575_s7 + $0x40] sm:$0xff]  ;;  %v695_v7 = vld [vmem:[%s2575_s7 + $0x68] sm:$0xff]  ;;  %v745_v23 = vld [vmem:[%s2575_s7 + $0x1f8] sm:$0xff] }
  0x83   : > { %1073 = vmatprep.subr.bf16.mxu0 %v1759_v26  ;;  %v694_v4 = vld [vmem:[%s2575_s7 + $0x60] sm:$0xff]  ;;  %v1736_v9 = vcombine.low %v691_v6, %v695_v7  ;;  %v1737_v10 = vcombine.high %v691_v6, %v695_v7  ;;  %v683_v13 = vld [vmem:[%s2575_s7 + $0x8] sm:$0xff]  ;;  %v1788_v25 = vcombine.low %v741_v21, %v745_v23  ;;  %v1789_v26 = vcombine.high %v741_v21, %v745_v23  ;;  %v708_v63 = vld [vmem:[%s2575_s7 + $0xd0] sm:$0xff] }
  0x84   : > { %v1735_v5 = vcombine.high %v690_v3, %v694_v4  ;;  %v1734_v8 = vcombine.low %v690_v3, %v694_v4  ;;  %v682_v11 = vld [vmem:[%s2575_s7] sm:$0xff]  ;;  %v687_v15 = vld [vmem:[%s2575_s7 + $0x28] sm:$0xff]  ;;  %v700_v7 = vld [vmem:[%s2575_s7 + $0x90] sm:$0xff] }
  0x85   : > { %v686_v12 = vld [vmem:[%s2575_s7 + $0x20] sm:$0xff]  ;;  %v1728_v17 = vcombine.low %v683_v13, %v687_v15  ;;  %v1729_v18 = vcombine.high %v683_v13, %v687_v15  ;;  %v1724_v28 = vld [vmem:[#allocation7] ss:$0 sm:$0xff]  ;;  %v692_v15 = vld [vmem:[%s2575_s7 + $0x50] sm:$0xff] }
  0x86   : > { %1074 = vmatpush1.bf16.msra.mxu0 %v1758_v27  ;;  %v1727_v14 = vcombine.high %v682_v11, %v686_v12  ;;  %v2152_v27 = vmov 0   ;;  %v684_v23 = vld [vmem:[%s2575_s7 + $0x10] sm:$0xff] }
  0x87   : > { %1075 = vmatprep.subr.bf16.mxu0 %v1751_v30  ;;  %1099 = vmatprep.mubr.bf16.mxu0 %v2152_v27 }
  0x8a   : > { %1076 = vmatpush1.bf16.msra.mxu0 %v1750_v31  ;;  %v1725_v31 = vld [vmem:[#allocation9] ss:$0 sm:$0xff] }
  0x8b   : > { %1077 = vmatprep.subr.bf16.mxu0 %v1743_v62 }
  0x8e   : > { %1078 = vmatpush1.bf16.msra.mxu0 %v1742_v0  ;;  %v712_v0 = vld [vmem:[%s2575_s7 + $0xf0] sm:$0xff] }
  0x8f   : > { %1079 = vmatprep.subr.bf16.mxu0 %v1735_v5  ;;  %v1755_v5 = vcombine.high %v708_v63, %v712_v0 }
  0x92   : > { %1080 = vmatpush1.bf16.msra.mxu0 %v1734_v8  ;;  %v704_v8 = vld [vmem:[%s2575_s7 + $0xb0] sm:$0xff] }
  0x93   : > { %1081 = vmatprep.subr.bf16.mxu0 %v1727_v14  ;;  %v1747_v13 = vcombine.high %v700_v7, %v704_v8  ;;  %v1746_v19 = vcombine.low %v700_v7, %v704_v8 }
 0x138   : > { %v1805_v33 = vpop.f32.mrf.mxu0 }
 0x139   : > { %v572_v35 = vmul.f32 %v1805_v33, %v1717_v32 }
 0x13a   : > { %v555_v36 = vpop.f32.mrf.mxu0 }
 0x13b   : > { %v581_v37 = vadd.f32 %v1718_v34, %v572_v35  ;;  %v571_v38 = vmul.f32 %v1717_v32, %v555_v36 }
 0x13d   : > { %v580_v39 = vadd.f32 %v1718_v34, %v571_v38  ;;  %v583_v42 = vmax.f32 %v581_v37, 0.0  ;;  %v732_v38 = vld [vmem:[%s2575_s7 + $0x190] sm:$0xff] }
 0x13f   : > { %v582_v43 = vmax.f32 %v580_v39, 0.0  ;;  %v736_v39 = vld [vmem:[%s2575_s7 + $0x1b0] sm:$0xff] }
 0x140   : > { %v1778_v51 = vcombine.low %v732_v38, %v736_v39 }
 0x141   : > { %v592_v44 = vpack.c.bf16 %v583_v42, %v582_v43 }
 0x143   : > { %1815 = vmatmul.mubr.msk.bf16.vlgmr.msra.gmra.mxu1 %vm617_vm3, %v592_v44 }
 0x144   : > { %1111 = vmatpush1.bf16.msra.mxu1 %v1784_v16  ;;  %v1726_v16 = vcombine.low %v682_v11, %v686_v12  ;;  %1142 = vmatprep.mubr.bf16.mxu1 %v2152_v27  ;;  %v1754_v11 = vcombine.low %v708_v63, %v712_v0 }
 0x145   : > { %1112 = vmatprep.subr.bf16.mxu1 %v1777_v45  ;;  %v1779_v45 = vcombine.high %v732_v38, %v736_v39 }
 0x146   : > { %1082 = vmatpush1.bf16.msra.mxu0 %v1726_v16  ;;  %v696_v16 = vld [vmem:[%s2575_s7 + $0x70] sm:$0xff] }
 0x147   : > { %1153 = vmatprep.subr.bf16.mxu0 %v1787_v22  ;;  %v1739_v21 = vcombine.high %v692_v15, %v696_v16 }
 0x148   : > { %1113 = vmatpush1.bf16.msra.mxu1 %v1776_v48  ;;  %v728_v48 = vld [vmem:[%s2575_s7 + $0x170] sm:$0xff] }
 0x149   : > { %1114 = vmatprep.subr.bf16.mxu1 %v1769_v49  ;;  %v725_v49 = vld [vmem:[%s2575_s7 + $0x158] sm:$0xff]  ;;  %v1770_v59 = vcombine.low %v724_v47, %v728_v48 }
 0x14a   : > { %v1773_v54 = vcombine.high %v725_v49, %v729_v50  ;;  %v1772_v60 = vcombine.low %v725_v49, %v729_v50 }
 0x14c   : > { %1115 = vmatpush1.bf16.msra.mxu1 %v1768_v52  ;;  %v1780_v52 = vcombine.low %v733_v40, %v737_v41 }
 0x14d   : > { %1116 = vmatprep.subr.bf16.mxu1 %v1761_v53  ;;  %v1771_v53 = vcombine.high %v724_v47, %v728_v48 }
 0x150   : > { %1117 = vmatpush1.bf16.msra.mxu1 %v1760_v56  ;;  %v720_v56 = vld [vmem:[%s2575_s7 + $0x130] sm:$0xff] }
 0x151   : > { %1118 = vmatprep.subr.bf16.mxu1 %v1753_v57  ;;  %v717_v57 = vld [vmem:[%s2575_s7 + $0x118] sm:$0xff]  ;;  %v1763_v61 = vcombine.high %v716_v55, %v720_v56  ;;  %v1762_v3 = vcombine.low %v716_v55, %v720_v56 }
 0x154   : > { %1119 = vmatpush1.bf16.msra.mxu1 %v1752_v58  ;;  %v721_v58 = vld [vmem:[%s2575_s7 + $0x138] sm:$0xff] }
 0x155   : > { %1120 = vmatprep.subr.bf16.mxu1 %v1745_v2  ;;  %v1765_v62 = vcombine.high %v717_v57, %v721_v58  ;;  %v713_v2 = vld [vmem:[%s2575_s7 + $0xf8] sm:$0xff]  ;;  %v1764_v4 = vcombine.low %v717_v57, %v721_v58 }
 0x158   : > { %1121 = vmatpush1.bf16.msra.mxu1 %v1744_v1  ;;  %v709_v1 = vld [vmem:[%s2575_s7 + $0xd8] sm:$0xff] }
 0x159   : > { %1122 = vmatprep.subr.bf16.mxu1 %v1737_v10  ;;  %v1757_v6 = vcombine.high %v709_v1, %v713_v2  ;;  %v705_v10 = vld [vmem:[%s2575_s7 + $0xb8] sm:$0xff]  ;;  %v1756_v12 = vcombine.low %v709_v1, %v713_v2 }
 0x15c   : > { %1123 = vmatpush1.bf16.msra.mxu1 %v1736_v9  ;;  %v701_v9 = vld [vmem:[%s2575_s7 + $0x98] sm:$0xff] }
 0x15d   : > { %1124 = vmatprep.subr.bf16.mxu1 %v1729_v18  ;;  %v1749_v14 = vcombine.high %v701_v9, %v705_v10  ;;  %v697_v18 = vld [vmem:[%s2575_s7 + $0x78] sm:$0xff]  ;;  %v1748_v20 = vcombine.low %v701_v9, %v705_v10 }
 0x160   : > { %1125 = vmatpush1.bf16.msra.mxu1 %v1728_v17  ;;  %v693_v17 = vld [vmem:[%s2575_s7 + $0x58] sm:$0xff] }
 0x161   : > { %1196 = vmatprep.subr.bf16.mxu1 %v1789_v26  ;;  %v1741_v22 = vcombine.high %v693_v17, %v697_v18  ;;  %v689_v26 = vld [vmem:[%s2575_s7 + $0x38] sm:$0xff] }
 0x203   : > { %v655_v29 = vpop.f32.mrf.mxu1 }
 0x204   : > { %v669_v30 = vmul.f32 %v1724_v28, %v655_v29 }
 0x205   : > { %v1816_v32 = vpop.f32.mrf.mxu1 }
 0x206   : > { %v678_v34 = vadd.f32 %v1725_v31, %v669_v30 }
 0x207   : > { %v658_v33 = vpop.f32.mrf.mxu1 }
 0x208   : > { %v670_v35 = vmul.f32 %v1724_v28, %v658_v33  ;;  %v680_v42 = vmax.f32 %v678_v34, 0.0  ;;  %v1740_v28 = vcombine.low %v693_v17, %v697_v18  ;;  %v1241_v33 = vlaneseq }
 0x209   : > { %v1817_v36 = vpop.f32.mrf.mxu1 }
 0x20a   : > { %v679_v37 = vadd.f32 %v1725_v31, %v670_v35  ;;  %v2544_v38 = vshrl.u32 %v1241_v33, 7 }
 0x20c   : > { %v681_v43 = vmax.f32 %v679_v37, 0.0  ;;  %v1247_v41 = vsub.s32 1, %v2544_v38 }
 0x20e   : > { %v2466_v44 = vpack.c.bf16 %v681_v43, %v680_v42  ;;  %v1255_v42 = vsub.s32 3, %v2544_v38  ;;  %v1243_v43 = vsub.s32 0, %v2544_v38 }
 0x210   : > { %1100 = vmatmul.mubr.bf16.vlgmr.msra.gmra.mxu0 %v2466_v44  ;;  %1143 = vmatmul.mubr.bf16.vlgmr.msra.gmra.mxu1 %v2466_v44 }
 0x211   : > { %1154 = vmatpush1.bf16.msra.mxu0 %v1786_v24  ;;  %1197 = vmatpush1.bf16.msra.mxu1 %v1788_v25  ;;  %v688_v24 = vld [vmem:[%s2575_s7 + $0x30] sm:$0xff]  ;;  %v685_v25 = vld [vmem:[%s2575_s7 + $0x18] sm:$0xff] }
 0x212   : > { %1155 = vmatprep.subr.bf16.mxu0 %v1779_v45  ;;  %1198 = vmatprep.subr.bf16.mxu1 %v1781_v46  ;;  %v1731_v29 = vcombine.high %v684_v23, %v688_v24  ;;  %v1733_v30 = vcombine.high %v685_v25, %v689_v26  ;;  %v1730_v31 = vcombine.low %v684_v23, %v688_v24  ;;  %v1251_v45 = vsub.s32 2, %v2544_v38  ;;  %v1239_v46 = vld [vmem:[#allocation10] sm:$0xff] }
 0x213   : > { %1185 = vmatprep.mubr.bf16.mxu0 %v2152_v27  ;;  %1228 = vmatprep.mubr.bf16.mxu1 %v2152_v27  ;;  %v1738_v27 = vcombine.low %v692_v15, %v696_v16  ;;  %v1732_v32 = vcombine.low %v685_v25, %v689_v26  ;;  %v1248_v48 = vrot.slane %v1239_v46, %v1247_v41  ;;  %v1263_v23 = vsub.s32 5, %v2544_v38 }
 0x214   : > { %v1256_v49 = vrot.slane %v1239_v46, %v1255_v42  ;;  %v1244_v50 = vrot.slane %v1239_v46, %v1243_v43  ;;  %v1271_v24 = vsub.s32 7, %v2544_v38 }
 0x215   : > { %1156 = vmatpush1.bf16.msra.mxu0 %v1778_v51  ;;  %1199 = vmatpush1.bf16.msra.mxu1 %v1780_v52  ;;  %v1252_v51 = vrot.slane %v1239_v46, %v1251_v45  ;;  %v1297_v52 = vld [vmem:[#allocation12] sm:$0xff] }
 0x216   : > { %1157 = vmatprep.subr.bf16.mxu0 %v1771_v53  ;;  %1200 = vmatprep.subr.bf16.mxu1 %v1773_v54  ;;  %v1306_v58 = vrot.slane %v1297_v52, %v1247_v41  ;;  %v1310_v0 = vrot.slane %v1297_v52, %v1251_v45 }
 0x219   : > { %1158 = vmatpush1.bf16.msra.mxu0 %v1770_v59  ;;  %1201 = vmatpush1.bf16.msra.mxu1 %v1772_v60  ;;  %v1314_v60 = vrot.slane %v1297_v52, %v1255_v42 }
 0x21a   : > { %1159 = vmatprep.subr.bf16.mxu0 %v1763_v61  ;;  %1202 = vmatprep.subr.bf16.mxu1 %v1765_v62  ;;  %v1302_v62 = vrot.slane %v1297_v52, %v1243_v43 }
 0x21d   : > { %1160 = vmatpush1.bf16.msra.mxu0 %v1762_v3  ;;  %1203 = vmatpush1.bf16.msra.mxu1 %v1764_v4 }
 0x21e   : > { %1161 = vmatprep.subr.bf16.mxu0 %v1755_v5  ;;  %1204 = vmatprep.subr.bf16.mxu1 %v1757_v6 }
 0x221   : > { %1162 = vmatpush1.bf16.msra.mxu0 %v1754_v11  ;;  %1205 = vmatpush1.bf16.msra.mxu1 %v1756_v12 }
 0x222   : > { %1163 = vmatprep.subr.bf16.mxu0 %v1747_v13  ;;  %1206 = vmatprep.subr.bf16.mxu1 %v1749_v14 }
 0x225   : > { %1164 = vmatpush1.bf16.msra.mxu0 %v1746_v19  ;;  %1207 = vmatpush1.bf16.msra.mxu1 %v1748_v20 }
 0x226   : > { %1165 = vmatprep.subr.bf16.mxu0 %v1739_v21  ;;  %1208 = vmatprep.subr.bf16.mxu1 %v1741_v22  ;;  %v1259_v21 = vsub.s32 4, %v2544_v38  ;;  %v1267_v22 = vsub.s32 6, %v2544_v38 }
 0x228   : > { %v1318_v41 = vrot.slane %v1297_v52, %v1259_v21  ;;  %v1326_v43 = vrot.slane %v1297_v52, %v1267_v22 }
 0x229   : > { %1166 = vmatpush1.bf16.msra.mxu0 %v1738_v27  ;;  %1209 = vmatpush1.bf16.msra.mxu1 %v1740_v28 }
 0x22a   : > { %1167 = vmatprep.subr.bf16.mxu0 %v1731_v29  ;;  %1210 = vmatprep.subr.bf16.mxu1 %v1733_v30  ;;  %v1260_v29 = vrot.slane %v1239_v46, %v1259_v21  ;;  %v1268_v30 = vrot.slane %v1239_v46, %v1267_v22 }
 0x22d   : > { %1168 = vmatpush1.bf16.msra.mxu0 %v1730_v31  ;;  %1211 = vmatpush1.bf16.msra.mxu1 %v1732_v32  ;;  %v1264_v31 = vrot.slane %v1239_v46, %v1263_v23  ;;  %v1272_v32 = vrot.slane %v1239_v46, %v1271_v24 }
 0x230   : > { %1186 = vmatmul.mubr.bf16.vlgmr.msra.gmra.mxu0 %v2466_v44  ;;  %1229 = vmatmul.mubr.bf16.vlgmr.msra.gmra.mxu1 %v2466_v44 }
 0x2d0   : > { %v1101_v34 = vpop.f32.mrf.mxu0  ;;  %v1144_v35 = vpop.f32.mrf.mxu1 }
 0x2d1   : > { %v1281_v61 = vmul.f32 %v1244_v50, %v1101_v34  ;;  %v1283_v63 = vmul.f32 %v1252_v51, %v1144_v35 }
 0x2d2   : > { %v1103_v36 = vpop.f32.mrf.mxu0  ;;  %v1146_v37 = vpop.f32.mrf.mxu1 }
 0x2d3   : > { %v1282_v57 = vmul.f32 %v1248_v48, %v1103_v36  ;;  %v1284_v59 = vmul.f32 %v1256_v49, %v1146_v37  ;;  %v1339_v7 = vadd.f32 %v1302_v62, %v1281_v61  ;;  %v1341_v8 = vadd.f32 %v1310_v0, %v1283_v63 }
 0x2d4   : > { %v1105_v39 = vpop.f32.mrf.mxu0  ;;  %v1148_v40 = vpop.f32.mrf.mxu1 }
 0x2d5   : > { %v1289_v55 = vmul.f32 %v1244_v50, %v1105_v39  ;;  %v1291_v56 = vmul.f32 %v1252_v51, %v1148_v40  ;;  %v1340_v5 = vadd.f32 %v1306_v58, %v1282_v57  ;;  %v1342_v6 = vadd.f32 %v1314_v60, %v1284_v59 }
 0x2d6   : > { %v1107_v47 = vpop.f32.mrf.mxu0  ;;  %v1150_v44 = vpop.f32.mrf.mxu1  ;;  %v1355_v15 = vmax.f32 %v1339_v7, 0.0  ;;  %v1357_v16 = vmax.f32 %v1341_v8, 0.0  ;;  %v1330_v50 = vrot.slane %v1297_v52, %v1271_v24  ;;  %v2153_v57 = vmov 1966171168  }
 0x2d7   : > { %v1290_v53 = vmul.f32 %v1248_v48, %v1107_v47  ;;  %v1292_v54 = vmul.f32 %v1256_v49, %v1150_v44  ;;  %v1347_v3 = vadd.f32 %v1302_v62, %v1289_v55  ;;  %v1349_v4 = vadd.f32 %v1310_v0, %v1291_v56 }
 0x2d8   : > { %v1356_v13 = vmax.f32 %v1340_v5, 0.0  ;;  %v1358_v14 = vmax.f32 %v1342_v6, 0.0  ;;  %v1322_v48 = vrot.slane %v1297_v52, %v1263_v23 }
 0x2d9   : > { %v1348_v1 = vadd.f32 %v1306_v58, %v1290_v53  ;;  %v1350_v2 = vadd.f32 %v1314_v60, %v1292_v54  ;;  %v1363_v11 = vmax.f32 %v1347_v3, 0.0  ;;  %v1365_v12 = vmax.f32 %v1349_v4, 0.0 }
 0x2da   : > { %v1444_v58 = vunpack.c.l.s4 %v2153_v57 }
 0x2db   : > { %v1364_v9 = vmax.f32 %v1348_v1, 0.0  ;;  %v1366_v10 = vmax.f32 %v1350_v2, 0.0  ;;  %v1371_v19 = vmax.f32 %v1355_v15, %v1363_v11  ;;  %v1385_v20 = vmax.f32 %v1357_v16, %v1365_v12 }
 0x2dd   : > { %v1378_v17 = vmax.f32 %v1356_v13, %v1364_v9  ;;  %v1392_v18 = vmax.f32 %v1358_v14, %v1366_v10  ;;  %v1372_v27 = vrot.slane %v1371_v19, 4  ;;  %v1386_v28 = vrot.slane %v1385_v20, 4 }
 0x2df   : > { %v1379_v25 = vrot.slane %v1378_v17, 4  ;;  %v1393_v26 = vrot.slane %v1392_v18, 4  ;;  %v1373_v37 = vmax.f32 %v1371_v19, %v1372_v27  ;;  %v1387_v39 = vmax.f32 %v1385_v20, %v1386_v28 }
 0x2e1   : > { %v1380_v33 = vmax.f32 %v1378_v17, %v1379_v25  ;;  %v1394_v34 = vmax.f32 %v1392_v18, %v1393_v26  ;;  %v1374_v55 = vrot.slane %v1373_v37, 2  ;;  %v1388_v56 = vrot.slane %v1387_v39, 2 }
 0x2e3   : > { %v1381_v51 = vrot.slane %v1380_v33, 2  ;;  %v1395_v53 = vrot.slane %v1394_v34, 2  ;;  %v1375_v8 = vmax.f32 %v1373_v37, %v1374_v55  ;;  %v1389_v9 = vmax.f32 %v1387_v39, %v1388_v56 }
 0x2e5   : > { %v1382_v5 = vmax.f32 %v1380_v33, %v1381_v51  ;;  %v1396_v52 = vmax.f32 %v1394_v34, %v1395_v53  ;;  %v1376_v26 = vrot.slane %v1375_v8, 1  ;;  %v1390_v27 = vrot.slane %v1389_v9, 1 }
 0x2e7   : > { %v1383_v20 = vrot.slane %v1382_v5, 1  ;;  %v1397_v21 = vrot.slane %v1396_v52, 1 }
 0x2e9   : > { %v1384_v33 = vmax.f32 %v1382_v5, %v1383_v20  ;;  %v1398_v34 = vmax.f32 %v1396_v52, %v1397_v21 }
 0x2f0   : > { %v1187_v35 = vpop.f32.mrf.mxu0  ;;  %v1230_v36 = vpop.f32.mrf.mxu1 }
 0x2f1   : > { %v1285_v40 = vmul.f32 %v1260_v29, %v1187_v35  ;;  %v1287_v42 = vmul.f32 %v1268_v30, %v1230_v36 }
 0x2f2   : > { %v1189_v45 = vpop.f32.mrf.mxu0  ;;  %v1232_v47 = vpop.f32.mrf.mxu1 }
 0x2f3   : > { %v1286_v44 = vmul.f32 %v1264_v31, %v1189_v45  ;;  %v1288_v49 = vmul.f32 %v1272_v32, %v1232_v47  ;;  %v1343_v59 = vadd.f32 %v1318_v41, %v1285_v40  ;;  %v1345_v60 = vadd.f32 %v1326_v43, %v1287_v42 }
 0x2f4   : > { %v1191_v54 = vpop.f32.mrf.mxu0  ;;  %v1234_v46 = vpop.f32.mrf.mxu1  ;;  %v1377_v40 = vmax.f32 %v1375_v8, %v1376_v26 }
 0x2f5   : > { %v1293_v61 = vmul.f32 %v1260_v29, %v1191_v54  ;;  %v1295_v62 = vmul.f32 %v1268_v30, %v1234_v46  ;;  %v1344_v1 = vadd.f32 %v1322_v48, %v1286_v44  ;;  %v1346_v2 = vadd.f32 %v1330_v50, %v1288_v49 }
 0x2f6   : > { %v1193_v63 = vpop.f32.mrf.mxu0  ;;  %v1236_v0 = vpop.f32.mrf.mxu1  ;;  %v1359_v12 = vmax.f32 %v1343_v59, 0.0  ;;  %v1361_v13 = vmax.f32 %v1345_v60, 0.0  ;;  %v1445_v30 = vunpack.c.0.s8 %v1444_v58 }
 0x2f7   : > { %v1294_v3 = vmul.f32 %v1264_v31, %v1193_v63  ;;  %v1296_v4 = vmul.f32 %v1272_v32, %v1236_v0  ;;  %v1351_v6 = vadd.f32 %v1318_v41, %v1293_v61  ;;  %v1353_v7 = vadd.f32 %v1326_v43, %v1295_v62 }
 0x2f8   : > { %v1360_v16 = vmax.f32 %v1344_v1, 0.0  ;;  %v1362_v17 = vmax.f32 %v1346_v2, 0.0  ;;  %v1391_v41 = vmax.f32 %v1389_v9, %v1390_v27  ;;  %v1448_v45 = vsub.s32 %v1445_v30, %v2544_v38 }
 0x2f9   : > { %v1352_v10 = vadd.f32 %v1322_v48, %v1294_v3  ;;  %v1354_v11 = vadd.f32 %v1330_v50, %v1296_v4  ;;  %v1367_v14 = vmax.f32 %v1351_v6, 0.0  ;;  %v1369_v15 = vmax.f32 %v1353_v7, 0.0 }
 0x2fa   : > { %v1439_v48 = vcombine.low %v1377_v40, %v1384_v33  ;;  %v1440_v49 = vcombine.low %v1391_v41, %v1398_v34 }
 0x2fb   : > { %v1368_v18 = vmax.f32 %v1352_v10, 0.0  ;;  %v1370_v19 = vmax.f32 %v1354_v11, 0.0  ;;  %v1399_v22 = vmax.f32 %v1359_v12, %v1367_v14  ;;  %v1413_v23 = vmax.f32 %v1361_v13, %v1369_v15 }
 0x2fc   : > { %v1449_v58 = vrot.slane %v1439_v48, %v1448_v45  ;;  %v1456_v59 = vrot.slane %v1440_v49, %v1448_v45 }
 0x2fd   : > { %v1406_v24 = vmax.f32 %v1360_v16, %v1368_v18  ;;  %v1420_v25 = vmax.f32 %v1362_v17, %v1370_v19  ;;  %v1400_v28 = vrot.slane %v1399_v22, 4  ;;  %v1414_v29 = vrot.slane %v1413_v23, 4 }
 0x2fe   : > { %v1471_v1 = vcombine.low %v1449_v58, %v1456_v59 }
 0x2ff   : > { %v1407_v31 = vrot.slane %v1406_v24, 4  ;;  %v1421_v32 = vrot.slane %v1420_v25, 4  ;;  %v1401_v35 = vmax.f32 %v1399_v22, %v1400_v28  ;;  %v1415_v36 = vmax.f32 %v1413_v23, %v1414_v29 }
 0x300   : > { %v1479_v5 = vrot.slane %v1471_v1, %v1448_v45 }
 0x301   : > { %v1408_v37 = vmax.f32 %v1406_v24, %v1407_v31  ;;  %v1422_v39 = vmax.f32 %v1420_v25, %v1421_v32  ;;  %v1402_v42 = vrot.slane %v1401_v35, 2  ;;  %v1416_v43 = vrot.slane %v1415_v36, 2 }
 0x303   : > { %v1409_v47 = vrot.slane %v1408_v37, 2  ;;  %v1423_v44 = vrot.slane %v1422_v39, 2  ;;  %v1403_v50 = vmax.f32 %v1401_v35, %v1402_v42  ;;  %v1417_v51 = vmax.f32 %v1415_v36, %v1416_v43 }
 0x305   : > { %v1410_v53 = vmax.f32 %v1408_v37, %v1409_v47  ;;  %v1424_v54 = vmax.f32 %v1422_v39, %v1423_v44  ;;  %v1404_v46 = vrot.slane %v1403_v50, 1  ;;  %v1418_v55 = vrot.slane %v1417_v51, 1 }
 0x307   : > { %v1411_v56 = vrot.slane %v1410_v53, 1  ;;  %v1425_v57 = vrot.slane %v1424_v54, 1  ;;  %v1405_v60 = vmax.f32 %v1403_v50, %v1404_v46  ;;  %v1419_v61 = vmax.f32 %v1417_v51, %v1418_v55 }
 0x309   : > { %v1412_v62 = vmax.f32 %v1410_v53, %v1411_v56  ;;  %v1426_v63 = vmax.f32 %v1424_v54, %v1425_v57 }
 0x30b   : > { %v1441_v38 = vcombine.low %v1405_v60, %v1412_v62  ;;  %v1442_v0 = vcombine.low %v1419_v61, %v1426_v63 }
 0x30d   : > { %v1463_v2 = vrot.slane %v1441_v38, %v1448_v45  ;;  %v1470_v3 = vrot.slane %v1442_v0, %v1448_v45 }
 0x30f   : > { %v1472_v4 = vcombine.low %v1463_v2, %v1470_v3 }
 0x311   : > { %v1486_v52 = vrot.slane %v1472_v4, %v1448_v45 }
 0x313   : > { %v1487_v6 = vcombine.low %v1479_v5, %v1486_v52 }
 0x315   : > { %1489 = vst [vmem:[%s473_s21] sm:$0xff] %v1487_v6 }
 0x316 PF: > { %s24_s15 = sadd.s32 1, %s2141_s15   ;;  %s2588_s13 = smov %s2137_s14 }
 0x317   : > { %p21_p6 = scmp.ge.s32.totalorder %s24_s15, 4   ;;  %s2589_s14 = smov %s2591_s22 }
 0x319   :  { %23 = sbr.rel (!%p21_p6) target bundleno = 5 (0x5), region = 127 }
 0x31e   :  { %1574 = vsyncpa [#allocation3], 1 }
 0x31f   :  { %1576 = vsyncpa [#allocation3 + $0x1], 1 }
 0x320   :  { %1577 = vsyncpa [#allocation5], 1 }
 0x321   :  { %1578 = vsyncpa [#allocation8], 1 }
 0x322   :  { %1579 = vsyncpa [#allocation11], 1 }

// kernel: pointnet_base_apply.8
= control target key start
LH: loop header
LB: loop body
LE: loop exit
PB: predicated region body
PF: predicated region fallthrough
CT: control target
= control target key end

     0   :  { %s2012_s25 = smov 0   ;;  %s2014_s26 = smov 0   ;;  %s2312_s0 = inlined_call_operand.vmem [shape: f32[2,16,3], index: 0, kind: input, shape index: {}]   ;;  %s2313_s1 = inlined_call_operand.vmem [shape: f32[2,3,64], index: 1, kind: input, shape index: {}]   ;;  %s2314_s2 = inlined_call_operand.vmem [shape: f32[1,64], index: 2, kind: input, shape index: {}]   ;;  %s2315_s3 = inlined_call_operand.vmem [shape: f32[1,64], index: 3, kind: input, shape index: {}]   ;;  %s2316_s4 = inlined_call_operand.vmem [shape: bf16[64,64], index: 4, kind: input, shape index: {}]   ;;  %s2317_s5 = inlined_call_operand.vmem [shape: f32[1,64], index: 5, kind: input, shape index: {}]   ;;  %s2318_s6 = inlined_call_operand.vmem [shape: f32[1,64], index: 6, kind: input, shape index: {}]   ;;  %s2319_s7 = inlined_call_operand.vmem [shape: bf16[64,128], index: 7, kind: input, shape index: {}]   ;;  %s2320_s8 = inlined_call_operand.vmem [shape: f32[1,128], index: 8, kind: input, shape index: {}]   ;;  %s2321_s9 = inlined_call_operand.vmem [shape: f32[1,128], index: 9, kind: input, shape index: {}]   ;;  %s2322_s10 = inlined_call_operand.vmem [shape: bf16[128,1024], index: 10, kind: input, shape index: {}]   ;;  %s2323_s11 = inlined_call_operand.vmem [shape: f32[1,1024], index: 11, kind: input, shape index: {}]   ;;  %s2324_s12 = inlined_call_operand.vmem [shape: f32[1,1024], index: 12, kind: input, shape index: {}]   ;;  %s2325_s13 = inlined_call_operand.vmem [shape: f32[2,1,1024], index: 13, kind: output, shape index: {}]  }
   0x1   :  { %s2016_s27 = smov 0  }
   0x2 LB: > { %s35_s28 = sadd.s32 1, %s1932_s26  ;;  %p1745_p0 = scmp.ge.s32.totalorder %s1936_s27, 1  ;;  %s1936_s27 = sphi %s2016_s27, %s23_s27   ;;  %s1932_s26 = sphi %s2014_s26, %s2327_s26   ;;  %s1928_s25 = sphi %s2012_s25, %s2326_s25  }
   0x3   : > { %p37_p1 = scmp.ge.s32.totalorder %s35_s28, 2  ;;  %p415_p2 = scmp.lt.s32.totalorder %s1936_s27, 3 }
   0x5   : > { %s2329_s28 = smov (%p37_p1, %s35_s28), 0  ;;  %p416_p3 = pnand %p1745_p0, %p415_p2 }
   0x6   : > { %p467_p4 = scmp.lt.s32.totalorder (!%p416_p3), %s1928_s25, 1 }
   0x7   : > { %419 = sbr.rel (%p416_p3) target bundleno = 893 (0x37d), region = 72 }
   0xc   : > { %v1938_v0 = vmov 0.0   ;;  %v1906_v1 = vld [vmem:[%s2316_s4 + $0x18] sm:$0xff]   ;;  %s2331_s25 = smov (!%p467_p4, %s1928_s25), 1  ;;  %vm495_vm0 = vcmask 1042432   ;;  %vm488_vm1 = vcmask 23552   ;;  %v1907_v5 = vld [vmem:[%s2316_s4 + $0x10] sm:$0xff]  }
   0xd   : > { %1854 = vmatprep.subr.bf16.mxu1 %v1938_v0  ;;  %s1748_s14 = sshll.u32 %s2331_s25, 2  ;;  %s1835_s18 = sshll.u32 %s2331_s25, 4  ;;  %v1908_v6 = vld [vmem:[%s2316_s4 + $0x8] sm:$0xff]   ;;  %v1909_v7 = vld [vmem:[%s2316_s4] sm:$0xff]   ;;  %vm1939_vm2 = vmmov 0   ;;  %v1910_v8 = vld [vmem:[%s2319_s7 + $0x18] sm:$0xff]  }
   0xe   : > { %1855 = vmatpush3.bf16.msra.mxu1 %v1906_v1  ;;  %s479_s17 = scalar_lea.vmem %s2313_s1, %s1748_s14  ;;  %s474_s21 = scalar_lea.vmem %s2312_s0, %s1835_s18  ;;  %1862 = vmatprep.mubr.msk.bf16.mxu1 %vm1939_vm2, %v1938_v0  ;;  %v1753_v9 = vld [vmem:[%s2314_s2] ss:$0 sm:$0xff]  ;;  %vm627_vm3 = vcmask 523264   ;;  %v1911_v20 = vld [vmem:[%s2319_s7 + $0x10] sm:$0xff]   ;;  %v1912_v21 = vld [vmem:[%s2319_s7 + $0x8] sm:$0xff]  }
   0xf   : > { %1856 = vmatprep.subr.bf16.mxu1 %v1938_v0  ;;  %v487_v2 = vld [vmem:[%s479_s17] sm:$0x7]  ;;  %v486_v4 = vld [vmem:[%s474_s21 + $0x8] sm:$0xff]  ;;  %s1749_s24 = sshll.u32 %s2331_s25, 3 }
  0x10   : > { %1849 = vmatprep.subr.msk.mxu0 %vm495_vm0, %v487_v2  ;;  %v485_v3 = vld [vmem:[%s474_s21] sm:$0xff]  ;;  %v846_v25 = vld [vmem:[%s2322_s10 + $0x1c8] sm:$0xff]  ;;  %s483_s14 = scalar_lea.vmem %s2325_s13, %s1749_s24 }
  0x11   : > { %1850 = vmatpush3.msk.msra.mxu0 %vm495_vm0, %v487_v2  ;;  %1851 = vmatprep.mubr.msk.f32.mxu0 %vm488_vm1, %v485_v3  ;;  %v1754_v11 = vld [vmem:[%s2315_s3] ss:$0 sm:$0xff]  ;;  %v850_v28 = vld [vmem:[%s2322_s10 + $0x1e8] sm:$0xff] }
  0x12   : > { %1866 = vmatprep.subr.bf16.mxu0 %v1938_v0  ;;  %1852 = vmatmul.mubr.msk.f32.vlgmr.msra.gmra.mxu0 %vm488_vm1, %v486_v4  ;;  %v1913_v22 = vld [vmem:[%s2319_s7] sm:$0xff]   ;;  %v1827_v31 = vcombine.low %v846_v25, %v850_v28  ;;  %v1828_v32 = vcombine.high %v846_v25, %v850_v28  ;;  %v838_v57 = vld [vmem:[%s2322_s10 + $0x188] sm:$0xff] }
  0x13   : > { %1857 = vmatpush3.bf16.msra.mxu1 %v1907_v5  ;;  %1874 = vmatprep.mubr.msk.bf16.mxu0 %vm1939_vm2, %v1938_v0  ;;  %v845_v23 = vld [vmem:[%s2322_s10 + $0x1c0] sm:$0xff]  ;;  %v842_v58 = vld [vmem:[%s2322_s10 + $0x1a8] sm:$0xff] }
  0x14   : > { %1858 = vmatprep.subr.bf16.mxu1 %v1938_v0  ;;  %1867 = vmatpush3.bf16.msra.mxu0 %v1910_v8  ;;  %v849_v24 = vld [vmem:[%s2322_s10 + $0x1e0] sm:$0xff]  ;;  %v1820_v62 = vcombine.high %v838_v57, %v842_v58  ;;  %v830_v63 = vld [vmem:[%s2322_s10 + $0x148] sm:$0xff]  ;;  %v1819_v1 = vcombine.low %v838_v57, %v842_v58  ;;  %v840_v57 = vld [vmem:[%s2322_s10 + $0x198] sm:$0xff] }
  0x15   : > { %1868 = vmatprep.subr.bf16.mxu0 %v1938_v0  ;;  %v1825_v26 = vcombine.low %v845_v23, %v849_v24  ;;  %v1826_v27 = vcombine.high %v845_v23, %v849_v24  ;;  %v837_v29 = vld [vmem:[%s2322_s10 + $0x180] sm:$0xff]  ;;  %v822_v3 = vld [vmem:[%s2322_s10 + $0x108] sm:$0xff]  ;;  %v844_v58 = vld [vmem:[%s2322_s10 + $0x1b8] sm:$0xff] }
  0x16   : > { %v841_v30 = vld [vmem:[%s2322_s10 + $0x1a0] sm:$0xff]  ;;  %v826_v4 = vld [vmem:[%s2322_s10 + $0x128] sm:$0xff] }
  0x17   : > { %1859 = vmatpush3.bf16.msra.mxu1 %v1908_v6  ;;  %v1818_v33 = vcombine.high %v837_v29, %v841_v30  ;;  %v1817_v34 = vcombine.low %v837_v29, %v841_v30  ;;  %v829_v35 = vld [vmem:[%s2322_s10 + $0x140] sm:$0xff]  ;;  %v1804_v6 = vcombine.high %v822_v3, %v826_v4  ;;  %v818_v8 = vld [vmem:[%s2322_s10 + $0xe8] sm:$0xff] }
  0x18   : > { %1860 = vmatprep.subr.bf16.mxu1 %v1938_v0  ;;  %1869 = vmatpush3.bf16.msra.mxu0 %v1911_v20  ;;  %v833_v36 = vld [vmem:[%s2322_s10 + $0x160] sm:$0xff]  ;;  %v798_v23 = vld [vmem:[%s2322_s10 + $0x48] sm:$0xff] }
  0x19   : > { %1870 = vmatprep.subr.bf16.mxu0 %v1938_v0  ;;  %v1810_v37 = vcombine.high %v829_v35, %v833_v36  ;;  %v1809_v38 = vcombine.low %v829_v35, %v833_v36  ;;  %v821_v39 = vld [vmem:[%s2322_s10 + $0x100] sm:$0xff]  ;;  %v802_v24 = vld [vmem:[%s2322_s10 + $0x68] sm:$0xff]  ;;  %v847_v36 = vld [vmem:[%s2322_s10 + $0x1d0] sm:$0xff] }
  0x1a   : > { %v825_v40 = vld [vmem:[%s2322_s10 + $0x120] sm:$0xff]  ;;  %v790_v30 = vld [vmem:[%s2322_s10 + $0x8] sm:$0xff] }
  0x1b   : > { %1861 = vmatpush3.bf16.msra.mxu1 %v1909_v7  ;;  %v1802_v41 = vcombine.high %v821_v39, %v825_v40  ;;  %v1801_v42 = vcombine.low %v821_v39, %v825_v40  ;;  %v813_v43 = vld [vmem:[%s2322_s10 + $0xc0] sm:$0xff]  ;;  %v814_v7 = vld [vmem:[%s2322_s10 + $0xc8] sm:$0xff]  ;;  %v852_v40 = vld [vmem:[%s2322_s10 + $0x1f8] sm:$0xff] }
  0x1c   : > { %1871 = vmatpush3.bf16.msra.mxu0 %v1912_v21  ;;  %1174 = vmatprep.subr.bf16.mxu1 %v1826_v27  ;;  %v817_v44 = vld [vmem:[%s2322_s10 + $0xe0] sm:$0xff]  ;;  %v1780_v27 = vcombine.high %v798_v23, %v802_v24 }
  0x1d   : > { %1872 = vmatprep.subr.bf16.mxu0 %v1938_v0  ;;  %v1794_v45 = vcombine.high %v813_v43, %v817_v44  ;;  %v1793_v46 = vcombine.low %v813_v43, %v817_v44  ;;  %v1760_v47 = vld [vmem:[%s2317_s5] ss:$0 sm:$0xff]  ;;  %v834_v0 = vld [vmem:[%s2322_s10 + $0x168] sm:$0xff]  ;;  %v1940_v44 = vmov 0  }
  0x1e   : > { %v1761_v50 = vld [vmem:[%s2318_s6] ss:$0 sm:$0xff]  ;;  %v1812_v2 = vcombine.high %v830_v63, %v834_v0  ;;  %v1811_v5 = vcombine.low %v830_v63, %v834_v0  ;;  %v1824_v63 = vcombine.high %v840_v57, %v844_v58  ;;  %v831_v0 = vld [vmem:[%s2322_s10 + $0x150] sm:$0xff] }
  0x1f   : > { %v797_v20 = vld [vmem:[%s2322_s10 + $0x40] sm:$0xff] }
  0x20   : > { %1873 = vmatpush3.bf16.msra.mxu0 %v1913_v22  ;;  %v801_v21 = vld [vmem:[%s2322_s10 + $0x60] sm:$0xff] }
  0x21   : > { %1217 = vmatprep.subr.bf16.mxu0 %v1828_v32  ;;  %v1778_v22 = vcombine.high %v797_v20, %v801_v21  ;;  %v1777_v25 = vcombine.low %v797_v20, %v801_v21  ;;  %v789_v28 = vld [vmem:[%s2322_s10] sm:$0xff]  ;;  %v794_v32 = vld [vmem:[%s2322_s10 + $0x28] sm:$0xff] }
  0x22   : > { %v793_v29 = vld [vmem:[%s2322_s10 + $0x20] sm:$0xff]  ;;  %v1772_v35 = vcombine.high %v790_v30, %v794_v32 }
  0xd2   : > { %v1853_v10 = vpop.f32.mrf.mxu0 }
  0xd3   : > { %v582_v12 = vmul.f32 %v1853_v10, %v1753_v9  ;;  %v1796_v10 = vcombine.high %v814_v7, %v818_v8 }
  0xd4   : > { %v565_v13 = vpop.f32.mrf.mxu0 }
  0xd5   : > { %v591_v14 = vadd.f32 %v1754_v11, %v582_v12  ;;  %v581_v15 = vmul.f32 %v1753_v9, %v565_v13  ;;  %v1803_v9 = vcombine.low %v822_v3, %v826_v4  ;;  %v805_v12 = vld [vmem:[%s2322_s10 + $0x80] sm:$0xff]  ;;  %v836_v3 = vld [vmem:[%s2322_s10 + $0x178] sm:$0xff] }
  0xd6   : > { %v809_v13 = vld [vmem:[%s2322_s10 + $0xa0] sm:$0xff] }
  0xd7   : > { %v590_v16 = vadd.f32 %v1754_v11, %v581_v15  ;;  %v593_v17 = vmax.f32 %v591_v14, 0.0  ;;  %v1795_v11 = vcombine.low %v814_v7, %v818_v8  ;;  %v806_v14 = vld [vmem:[%s2322_s10 + $0x88] sm:$0xff]  ;;  %v1786_v15 = vcombine.high %v805_v12, %v809_v13  ;;  %v823_v8 = vld [vmem:[%s2322_s10 + $0x110] sm:$0xff] }
  0xd9   : > { %v592_v18 = vmax.f32 %v590_v16, 0.0  ;;  %v810_v16 = vld [vmem:[%s2322_s10 + $0xa8] sm:$0xff] }
  0xdb   : > { %v602_v19 = vpack.c.bf16 %v593_v17, %v592_v18  ;;  %v1785_v17 = vcombine.low %v805_v12, %v809_v13  ;;  %v1787_v18 = vcombine.low %v806_v14, %v810_v16 }
  0xdd   : > { %1863 = vmatmul.mubr.msk.bf16.vlgmr.msra.gmra.mxu1 %vm627_vm3, %v602_v19  ;;  %v1788_v19 = vcombine.high %v806_v14, %v810_v16  ;;  %v815_v16 = vld [vmem:[%s2322_s10 + $0xd0] sm:$0xff] }
  0xde   : > { %1175 = vmatpush1.bf16.msra.mxu1 %v1825_v26  ;;  %v1779_v26 = vcombine.low %v798_v23, %v802_v24  ;;  %1206 = vmatprep.mubr.bf16.mxu1 %v1940_v44  ;;  %v807_v24 = vld [vmem:[%s2322_s10 + $0x90] sm:$0xff] }
  0xdf   : > { %1176 = vmatprep.subr.bf16.mxu1 %v1818_v33  ;;  %v1769_v33 = vcombine.low %v789_v28, %v793_v29 }
  0xe2   : > { %1177 = vmatpush1.bf16.msra.mxu1 %v1817_v34  ;;  %v1771_v34 = vcombine.low %v790_v30, %v794_v32  ;;  %v799_v32 = vld [vmem:[%s2322_s10 + $0x50] sm:$0xff] }
  0xe3   : > { %1178 = vmatprep.subr.bf16.mxu1 %v1810_v37  ;;  %v851_v37 = vld [vmem:[%s2322_s10 + $0x1f0] sm:$0xff] }
  0xe4   : > { %v1830_v39 = vcombine.high %v847_v36, %v851_v37 }
  0xe6   : > { %1179 = vmatpush1.bf16.msra.mxu1 %v1809_v38  ;;  %v848_v38 = vld [vmem:[%s2322_s10 + $0x1d8] sm:$0xff] }
  0xe7   : > { %1180 = vmatprep.subr.bf16.mxu1 %v1802_v41  ;;  %v1829_v41 = vcombine.low %v847_v36, %v851_v37  ;;  %v1832_v43 = vcombine.high %v848_v38, %v852_v40 }
  0xea   : > { %1181 = vmatpush1.bf16.msra.mxu1 %v1801_v42  ;;  %v1831_v42 = vcombine.low %v848_v38, %v852_v40  ;;  %v791_v40 = vld [vmem:[%s2322_s10 + $0x10] sm:$0xff] }
  0xeb   : > { %1182 = vmatprep.subr.bf16.mxu1 %v1794_v45  ;;  %v1767_v45 = vld [vmem:[%s2320_s8] ss:$0 sm:$0xff] }
  0xee   : > { %1183 = vmatpush1.bf16.msra.mxu1 %v1793_v46 }
  0xef   : > { %1184 = vmatprep.subr.bf16.mxu1 %v1786_v15 }
  0xf2   : > { %1185 = vmatpush1.bf16.msra.mxu1 %v1785_v17  ;;  %v819_v17 = vld [vmem:[%s2322_s10 + $0xf0] sm:$0xff] }
  0xf3   : > { %1186 = vmatprep.subr.bf16.mxu1 %v1778_v22  ;;  %v1798_v22 = vcombine.high %v815_v16, %v819_v17 }
  0xf6   : > { %1187 = vmatpush1.bf16.msra.mxu1 %v1777_v25  ;;  %v811_v25 = vld [vmem:[%s2322_s10 + $0xb0] sm:$0xff] }
  0xf7   : > { %v1790_v30 = vcombine.high %v807_v24, %v811_v25  ;;  %v1789_v36 = vcombine.low %v807_v24, %v811_v25 }
 0x19d   : > { %v665_v48 = vpop.f32.mrf.mxu1 }
 0x19e   : > { %v679_v49 = vmul.f32 %v1760_v47, %v665_v48  ;;  %v1768_v48 = vld [vmem:[%s2321_s9] ss:$0 sm:$0xff] }
 0x19f   : > { %v1864_v51 = vpop.f32.mrf.mxu1 }
 0x1a0   : > { %v688_v53 = vadd.f32 %v1761_v50, %v679_v49 }
 0x1a1   : > { %v668_v52 = vpop.f32.mrf.mxu1 }
 0x1a2   : > { %v680_v54 = vmul.f32 %v1760_v47, %v668_v52  ;;  %v690_v59 = vmax.f32 %v688_v53, 0.0 }
 0x1a3   : > { %v1865_v55 = vpop.f32.mrf.mxu1 }
 0x1a4   : > { %v689_v56 = vadd.f32 %v1761_v50, %v680_v54  ;;  %v839_v55 = vld [vmem:[%s2322_s10 + $0x190] sm:$0xff] }
 0x1a6   : > { %v691_v60 = vmax.f32 %v689_v56, 0.0  ;;  %v843_v56 = vld [vmem:[%s2322_s10 + $0x1b0] sm:$0xff] }
 0x1a7   : > { %v1821_v4 = vcombine.low %v839_v55, %v843_v56 }
 0x1a8   : > { %v700_v61 = vpack.c.bf16 %v691_v60, %v690_v59 }
 0x1aa   : > { %1875 = vmatmul.mubr.msk.bf16.vlgmr.msra.gmra.mxu0 %vm627_vm3, %v700_v61 }
 0x1ab   : > { %1218 = vmatpush1.bf16.msra.mxu0 %v1827_v31  ;;  %v1770_v31 = vcombine.high %v789_v28, %v793_v29  ;;  %1249 = vmatprep.mubr.bf16.mxu0 %v1940_v44  ;;  %v1797_v28 = vcombine.low %v815_v16, %v819_v17 }
 0x1ac   : > { %1219 = vmatprep.subr.bf16.mxu0 %v1820_v62  ;;  %v1822_v62 = vcombine.high %v839_v55, %v843_v56 }
 0x1ad   : > { %1188 = vmatprep.subr.bf16.mxu1 %v1770_v31 }
 0x1ae   : > { %1189 = vmatpush1.bf16.msra.mxu1 %v1769_v33  ;;  %v803_v33 = vld [vmem:[%s2322_s10 + $0x70] sm:$0xff] }
 0x1af   : > { %1220 = vmatpush1.bf16.msra.mxu0 %v1819_v1  ;;  %1260 = vmatprep.subr.bf16.mxu1 %v1830_v39  ;;  %v835_v1 = vld [vmem:[%s2322_s10 + $0x170] sm:$0xff]  ;;  %v1782_v38 = vcombine.high %v799_v32, %v803_v33 }
 0x1b0   : > { %1221 = vmatprep.subr.bf16.mxu0 %v1812_v2  ;;  %v832_v2 = vld [vmem:[%s2322_s10 + $0x158] sm:$0xff]  ;;  %v1813_v12 = vcombine.low %v831_v0, %v835_v1 }
 0x1b1   : > { %v1816_v7 = vcombine.high %v832_v2, %v836_v3  ;;  %v1815_v13 = vcombine.low %v832_v2, %v836_v3 }
 0x1b3   : > { %1222 = vmatpush1.bf16.msra.mxu0 %v1811_v5  ;;  %v1823_v5 = vcombine.low %v840_v57, %v844_v58 }
 0x1b4   : > { %1223 = vmatprep.subr.bf16.mxu0 %v1804_v6  ;;  %v1814_v6 = vcombine.high %v831_v0, %v835_v1 }
 0x1b7   : > { %1224 = vmatpush1.bf16.msra.mxu0 %v1803_v9  ;;  %v827_v9 = vld [vmem:[%s2322_s10 + $0x130] sm:$0xff] }
 0x1b8   : > { %1225 = vmatprep.subr.bf16.mxu0 %v1796_v10  ;;  %v824_v10 = vld [vmem:[%s2322_s10 + $0x118] sm:$0xff]  ;;  %v1806_v14 = vcombine.high %v823_v8, %v827_v9  ;;  %v1805_v20 = vcombine.low %v823_v8, %v827_v9 }
 0x1bb   : > { %1226 = vmatpush1.bf16.msra.mxu0 %v1795_v11  ;;  %v828_v11 = vld [vmem:[%s2322_s10 + $0x138] sm:$0xff] }
 0x1bc   : > { %1227 = vmatprep.subr.bf16.mxu0 %v1788_v19  ;;  %v1808_v15 = vcombine.high %v824_v10, %v828_v11  ;;  %v820_v19 = vld [vmem:[%s2322_s10 + $0xf8] sm:$0xff]  ;;  %v1807_v21 = vcombine.low %v824_v10, %v828_v11 }
 0x1bf   : > { %1228 = vmatpush1.bf16.msra.mxu0 %v1787_v18  ;;  %v816_v18 = vld [vmem:[%s2322_s10 + $0xd8] sm:$0xff] }
 0x1c0   : > { %1229 = vmatprep.subr.bf16.mxu0 %v1780_v27  ;;  %v1800_v23 = vcombine.high %v816_v18, %v820_v19  ;;  %v812_v27 = vld [vmem:[%s2322_s10 + $0xb8] sm:$0xff]  ;;  %v1799_v29 = vcombine.low %v816_v18, %v820_v19 }
 0x1c3   : > { %1230 = vmatpush1.bf16.msra.mxu0 %v1779_v26  ;;  %v808_v26 = vld [vmem:[%s2322_s10 + $0x98] sm:$0xff] }
 0x1c4   : > { %1231 = vmatprep.subr.bf16.mxu0 %v1772_v35  ;;  %v1792_v31 = vcombine.high %v808_v26, %v812_v27  ;;  %v804_v35 = vld [vmem:[%s2322_s10 + $0x78] sm:$0xff]  ;;  %v1791_v37 = vcombine.low %v808_v26, %v812_v27 }
 0x1c7   : > { %1232 = vmatpush1.bf16.msra.mxu0 %v1771_v34  ;;  %v800_v34 = vld [vmem:[%s2322_s10 + $0x58] sm:$0xff] }
 0x1c8   : > { %1303 = vmatprep.subr.bf16.mxu0 %v1832_v43  ;;  %v1784_v39 = vcombine.high %v800_v34, %v804_v35  ;;  %v796_v43 = vld [vmem:[%s2322_s10 + $0x38] sm:$0xff] }
 0x26a   : > { %v762_v46 = vpop.f32.mrf.mxu0 }
 0x26b   : > { %v776_v47 = vmul.f32 %v1767_v45, %v762_v46 }
 0x26c   : > { %v1876_v49 = vpop.f32.mrf.mxu0 }
 0x26d   : > { %v785_v51 = vadd.f32 %v1768_v48, %v776_v47 }
 0x26e   : > { %v765_v50 = vpop.f32.mrf.mxu0 }
 0x26f   : > { %v777_v52 = vmul.f32 %v1767_v45, %v765_v50  ;;  %v787_v59 = vmax.f32 %v785_v51, 0.0  ;;  %v1783_v45 = vcombine.low %v800_v34, %v804_v35  ;;  %v1348_v50 = vlaneseq }
 0x270   : > { %v1877_v53 = vpop.f32.mrf.mxu0 }
 0x271   : > { %v786_v54 = vadd.f32 %v1768_v48, %v777_v52  ;;  %v2282_v55 = vshrl.u32 %v1348_v50, 7 }
 0x273   : > { %v788_v60 = vmax.f32 %v786_v54, 0.0  ;;  %v1354_v58 = vsub.s32 1, %v2282_v55 }
 0x275   : > { %v2204_v61 = vpack.c.bf16 %v788_v60, %v787_v59  ;;  %v1362_v59 = vsub.s32 3, %v2282_v55  ;;  %v1350_v60 = vsub.s32 0, %v2282_v55 }
 0x277   : > { %1207 = vmatmul.mubr.bf16.vlgmr.msra.gmra.mxu1 %v2204_v61  ;;  %1250 = vmatmul.mubr.bf16.vlgmr.msra.gmra.mxu0 %v2204_v61 }
 0x278   : > { %1261 = vmatpush1.bf16.msra.mxu1 %v1829_v41  ;;  %1304 = vmatpush1.bf16.msra.mxu0 %v1831_v42  ;;  %v795_v41 = vld [vmem:[%s2322_s10 + $0x30] sm:$0xff]  ;;  %v792_v42 = vld [vmem:[%s2322_s10 + $0x18] sm:$0xff] }
 0x279   : > { %1262 = vmatprep.subr.bf16.mxu1 %v1822_v62  ;;  %1305 = vmatprep.subr.bf16.mxu0 %v1824_v63  ;;  %v1774_v46 = vcombine.high %v791_v40, %v795_v41  ;;  %v1776_v47 = vcombine.high %v792_v42, %v796_v43  ;;  %v1773_v48 = vcombine.low %v791_v40, %v795_v41  ;;  %v1358_v62 = vsub.s32 2, %v2282_v55 }
 0x27a   : > { %1292 = vmatprep.mubr.bf16.mxu1 %v1940_v44  ;;  %1335 = vmatprep.mubr.bf16.mxu0 %v1940_v44  ;;  %v1781_v44 = vcombine.low %v799_v32, %v803_v33  ;;  %v1775_v49 = vcombine.low %v792_v42, %v796_v43  ;;  %v1370_v40 = vsub.s32 5, %v2282_v55  ;;  %v1378_v41 = vsub.s32 7, %v2282_v55 }
 0x27c   : > { %1263 = vmatpush1.bf16.msra.mxu1 %v1821_v4  ;;  %1306 = vmatpush1.bf16.msra.mxu0 %v1823_v5  ;;  %v1404_v5 = vld [vmem:[%s2324_s12] sm:$0xff] }
 0x27d   : > { %1264 = vmatprep.subr.bf16.mxu1 %v1814_v6  ;;  %1307 = vmatprep.subr.bf16.mxu0 %v1816_v7  ;;  %v1413_v11 = vrot.slane %v1404_v5, %v1354_v58  ;;  %v1417_v17 = vrot.slane %v1404_v5, %v1358_v62 }
 0x280   : > { %1265 = vmatpush1.bf16.msra.mxu1 %v1813_v12  ;;  %1308 = vmatpush1.bf16.msra.mxu0 %v1815_v13  ;;  %v1421_v13 = vrot.slane %v1404_v5, %v1362_v59 }
 0x281   : > { %1266 = vmatprep.subr.bf16.mxu1 %v1806_v14  ;;  %1309 = vmatprep.subr.bf16.mxu0 %v1808_v15  ;;  %v1409_v15 = vrot.slane %v1404_v5, %v1350_v60 }
 0x284   : > { %1267 = vmatpush1.bf16.msra.mxu1 %v1805_v20  ;;  %1310 = vmatpush1.bf16.msra.mxu0 %v1807_v21 }
 0x285   : > { %1268 = vmatprep.subr.bf16.mxu1 %v1798_v22  ;;  %1311 = vmatprep.subr.bf16.mxu0 %v1800_v23 }
 0x288   : > { %1269 = vmatpush1.bf16.msra.mxu1 %v1797_v28  ;;  %1312 = vmatpush1.bf16.msra.mxu0 %v1799_v29 }
 0x289   : > { %1270 = vmatprep.subr.bf16.mxu1 %v1790_v30  ;;  %1313 = vmatprep.subr.bf16.mxu0 %v1792_v31 }
 0x28c   : > { %1271 = vmatpush1.bf16.msra.mxu1 %v1789_v36  ;;  %1314 = vmatpush1.bf16.msra.mxu0 %v1791_v37 }
 0x28d   : > { %1272 = vmatprep.subr.bf16.mxu1 %v1782_v38  ;;  %1315 = vmatprep.subr.bf16.mxu0 %v1784_v39  ;;  %v1366_v38 = vsub.s32 4, %v2282_v55  ;;  %v1374_v39 = vsub.s32 6, %v2282_v55 }
 0x290   : > { %1273 = vmatpush1.bf16.msra.mxu1 %v1781_v44  ;;  %1316 = vmatpush1.bf16.msra.mxu0 %v1783_v45 }
 0x291   : > { %1274 = vmatprep.subr.bf16.mxu1 %v1774_v46  ;;  %1317 = vmatprep.subr.bf16.mxu0 %v1776_v47 }
 0x294   : > { %1275 = vmatpush1.bf16.msra.mxu1 %v1773_v48  ;;  %1318 = vmatpush1.bf16.msra.mxu0 %v1775_v49 }
 0x297   : > { %1293 = vmatmul.mubr.bf16.vlgmr.msra.gmra.mxu1 %v2204_v61  ;;  %1336 = vmatmul.mubr.bf16.vlgmr.msra.gmra.mxu0 %v2204_v61  ;;  %v1346_v61 = vld [vmem:[%s2323_s11] sm:$0xff] }
 0x298   : > { %v1355_v1 = vrot.slane %v1346_v61, %v1354_v58  ;;  %v1363_v2 = vrot.slane %v1346_v61, %v1362_v59  ;;  %v1351_v3 = vrot.slane %v1346_v61, %v1350_v60  ;;  %v1359_v4 = vrot.slane %v1346_v61, %v1358_v62 }
 0x299   : > { %v1367_v46 = vrot.slane %v1346_v61, %v1366_v38  ;;  %v1375_v47 = vrot.slane %v1346_v61, %v1374_v39  ;;  %v1371_v48 = vrot.slane %v1346_v61, %v1370_v40  ;;  %v1379_v49 = vrot.slane %v1346_v61, %v1378_v41 }
 0x29a   : > { %v1425_v58 = vrot.slane %v1404_v5, %v1366_v38  ;;  %v1433_v60 = vrot.slane %v1404_v5, %v1374_v39 }
 0x337   : > { %v1208_v51 = vpop.f32.mrf.mxu1  ;;  %v1251_v52 = vpop.f32.mrf.mxu0 }
 0x338   : > { %v1388_v14 = vmul.f32 %v1351_v3, %v1208_v51  ;;  %v1390_v16 = vmul.f32 %v1359_v4, %v1251_v52 }
 0x339   : > { %v1210_v53 = vpop.f32.mrf.mxu1  ;;  %v1253_v54 = vpop.f32.mrf.mxu0 }
 0x33a   : > { %v1389_v10 = vmul.f32 %v1355_v1, %v1210_v53  ;;  %v1391_v12 = vmul.f32 %v1363_v2, %v1253_v54  ;;  %v1446_v24 = vadd.f32 %v1409_v15, %v1388_v14  ;;  %v1448_v25 = vadd.f32 %v1417_v17, %v1390_v16 }
 0x33b   : > { %v1212_v56 = vpop.f32.mrf.mxu1  ;;  %v1255_v57 = vpop.f32.mrf.mxu0 }
 0x33c   : > { %v1396_v8 = vmul.f32 %v1351_v3, %v1212_v56  ;;  %v1398_v9 = vmul.f32 %v1359_v4, %v1255_v57  ;;  %v1447_v22 = vadd.f32 %v1413_v11, %v1389_v10  ;;  %v1449_v23 = vadd.f32 %v1421_v13, %v1391_v12 }
 0x33d   : > { %v1214_v63 = vpop.f32.mrf.mxu1  ;;  %v1257_v0 = vpop.f32.mrf.mxu0  ;;  %v1462_v32 = vmax.f32 %v1446_v24, 0.0  ;;  %v1464_v33 = vmax.f32 %v1448_v25, 0.0  ;;  %v1437_v3 = vrot.slane %v1404_v5, %v1378_v41  ;;  %v1941_v10 = vmov 1966171168  }
 0x33e   : > { %v1397_v6 = vmul.f32 %v1355_v1, %v1214_v63  ;;  %v1399_v7 = vmul.f32 %v1363_v2, %v1257_v0  ;;  %v1454_v20 = vadd.f32 %v1409_v15, %v1396_v8  ;;  %v1456_v21 = vadd.f32 %v1417_v17, %v1398_v9 }
 0x33f   : > { %v1463_v30 = vmax.f32 %v1447_v22, 0.0  ;;  %v1465_v31 = vmax.f32 %v1449_v23, 0.0  ;;  %v1429_v1 = vrot.slane %v1404_v5, %v1370_v40 }
 0x340   : > { %v1455_v18 = vadd.f32 %v1413_v11, %v1397_v6  ;;  %v1457_v19 = vadd.f32 %v1421_v13, %v1399_v7  ;;  %v1470_v28 = vmax.f32 %v1454_v20, 0.0  ;;  %v1472_v29 = vmax.f32 %v1456_v21, 0.0 }
 0x341   : > { %v1551_v11 = vunpack.c.l.s4 %v1941_v10 }
 0x342   : > { %v1471_v26 = vmax.f32 %v1455_v18, 0.0  ;;  %v1473_v27 = vmax.f32 %v1457_v19, 0.0  ;;  %v1478_v36 = vmax.f32 %v1462_v32, %v1470_v28  ;;  %v1492_v37 = vmax.f32 %v1464_v33, %v1472_v29 }
 0x344   : > { %v1485_v34 = vmax.f32 %v1463_v30, %v1471_v26  ;;  %v1499_v35 = vmax.f32 %v1465_v31, %v1473_v27  ;;  %v1479_v44 = vrot.slane %v1478_v36, 4  ;;  %v1493_v45 = vrot.slane %v1492_v37, 4 }
 0x346   : > { %v1486_v42 = vrot.slane %v1485_v34, 4  ;;  %v1500_v43 = vrot.slane %v1499_v35, 4  ;;  %v1480_v54 = vmax.f32 %v1478_v36, %v1479_v44  ;;  %v1494_v56 = vmax.f32 %v1492_v37, %v1493_v45 }
 0x348   : > { %v1487_v50 = vmax.f32 %v1485_v34, %v1486_v42  ;;  %v1501_v51 = vmax.f32 %v1499_v35, %v1500_v43  ;;  %v1481_v8 = vrot.slane %v1480_v54, 2  ;;  %v1495_v9 = vrot.slane %v1494_v56, 2 }
 0x34a   : > { %v1488_v4 = vrot.slane %v1487_v50, 2  ;;  %v1502_v6 = vrot.slane %v1501_v51, 2  ;;  %v1482_v25 = vmax.f32 %v1480_v54, %v1481_v8  ;;  %v1496_v26 = vmax.f32 %v1494_v56, %v1495_v9 }
 0x34c   : > { %v1489_v22 = vmax.f32 %v1487_v50, %v1488_v4  ;;  %v1503_v5 = vmax.f32 %v1501_v51, %v1502_v6  ;;  %v1483_v43 = vrot.slane %v1482_v25, 1  ;;  %v1497_v44 = vrot.slane %v1496_v26, 1 }
 0x34e   : > { %v1490_v37 = vrot.slane %v1489_v22, 1  ;;  %v1504_v38 = vrot.slane %v1503_v5, 1 }
 0x350   : > { %v1491_v50 = vmax.f32 %v1489_v22, %v1490_v37  ;;  %v1505_v51 = vmax.f32 %v1503_v5, %v1504_v38 }
 0x357   : > { %v1294_v52 = vpop.f32.mrf.mxu1  ;;  %v1337_v53 = vpop.f32.mrf.mxu0 }
 0x358   : > { %v1392_v57 = vmul.f32 %v1367_v46, %v1294_v52  ;;  %v1394_v59 = vmul.f32 %v1375_v47, %v1337_v53 }
 0x359   : > { %v1296_v62 = vpop.f32.mrf.mxu1  ;;  %v1339_v63 = vpop.f32.mrf.mxu0 }
 0x35a   : > { %v1393_v0 = vmul.f32 %v1371_v48, %v1296_v62  ;;  %v1395_v2 = vmul.f32 %v1379_v49, %v1339_v63  ;;  %v1450_v12 = vadd.f32 %v1425_v58, %v1392_v57  ;;  %v1452_v13 = vadd.f32 %v1433_v60, %v1394_v59 }
 0x35b   : > { %v1298_v7 = vpop.f32.mrf.mxu1  ;;  %v1341_v61 = vpop.f32.mrf.mxu0  ;;  %v1484_v57 = vmax.f32 %v1482_v25, %v1483_v43 }
 0x35c   : > { %v1400_v14 = vmul.f32 %v1367_v46, %v1298_v7  ;;  %v1402_v15 = vmul.f32 %v1375_v47, %v1341_v61  ;;  %v1451_v18 = vadd.f32 %v1429_v1, %v1393_v0  ;;  %v1453_v19 = vadd.f32 %v1437_v3, %v1395_v2 }
 0x35d   : > { %v1300_v16 = vpop.f32.mrf.mxu1  ;;  %v1343_v17 = vpop.f32.mrf.mxu0  ;;  %v1466_v29 = vmax.f32 %v1450_v12, 0.0  ;;  %v1468_v30 = vmax.f32 %v1452_v13, 0.0  ;;  %v1552_v47 = vunpack.c.0.s8 %v1551_v11 }
 0x35e   : > { %v1401_v20 = vmul.f32 %v1371_v48, %v1300_v16  ;;  %v1403_v21 = vmul.f32 %v1379_v49, %v1343_v17  ;;  %v1458_v23 = vadd.f32 %v1425_v58, %v1400_v14  ;;  %v1460_v24 = vadd.f32 %v1433_v60, %v1402_v15 }
 0x35f   : > { %v1467_v33 = vmax.f32 %v1451_v18, 0.0  ;;  %v1469_v34 = vmax.f32 %v1453_v19, 0.0  ;;  %v1498_v58 = vmax.f32 %v1496_v26, %v1497_v44  ;;  %v1555_v62 = vsub.s32 %v1552_v47, %v2282_v55 }
 0x360   : > { %v1459_v27 = vadd.f32 %v1429_v1, %v1401_v20  ;;  %v1461_v28 = vadd.f32 %v1437_v3, %v1403_v21  ;;  %v1474_v31 = vmax.f32 %v1458_v23, 0.0  ;;  %v1476_v32 = vmax.f32 %v1460_v24, 0.0 }
 0x361   : > { %v1546_v1 = vcombine.low %v1484_v57, %v1491_v50  ;;  %v1547_v2 = vcombine.low %v1498_v58, %v1505_v51 }
 0x362   : > { %v1475_v35 = vmax.f32 %v1459_v27, 0.0  ;;  %v1477_v36 = vmax.f32 %v1461_v28, 0.0  ;;  %v1506_v39 = vmax.f32 %v1466_v29, %v1474_v31  ;;  %v1520_v40 = vmax.f32 %v1468_v30, %v1476_v32 }
 0x363   : > { %v1556_v11 = vrot.slane %v1546_v1, %v1555_v62  ;;  %v1563_v12 = vrot.slane %v1547_v2, %v1555_v62 }
 0x364   : > { %v1513_v41 = vmax.f32 %v1467_v33, %v1475_v35  ;;  %v1527_v42 = vmax.f32 %v1469_v34, %v1477_v36  ;;  %v1507_v45 = vrot.slane %v1506_v39, 4  ;;  %v1521_v46 = vrot.slane %v1520_v40, 4 }
 0x365   : > { %v1578_v18 = vcombine.low %v1556_v11, %v1563_v12 }
 0x366   : > { %v1514_v48 = vrot.slane %v1513_v41, 4  ;;  %v1528_v49 = vrot.slane %v1527_v42, 4  ;;  %v1508_v52 = vmax.f32 %v1506_v39, %v1507_v45  ;;  %v1522_v53 = vmax.f32 %v1520_v40, %v1521_v46 }
 0x367   : > { %v1586_v22 = vrot.slane %v1578_v18, %v1555_v62 }
 0x368   : > { %v1515_v54 = vmax.f32 %v1513_v41, %v1514_v48  ;;  %v1529_v56 = vmax.f32 %v1527_v42, %v1528_v49  ;;  %v1509_v59 = vrot.slane %v1508_v52, 2  ;;  %v1523_v60 = vrot.slane %v1522_v53, 2 }
 0x36a   : > { %v1516_v63 = vrot.slane %v1515_v54, 2  ;;  %v1530_v0 = vrot.slane %v1529_v56, 2  ;;  %v1510_v3 = vmax.f32 %v1508_v52, %v1509_v59  ;;  %v1524_v4 = vmax.f32 %v1522_v53, %v1523_v60 }
 0x36c   : > { %v1517_v6 = vmax.f32 %v1515_v54, %v1516_v63  ;;  %v1531_v7 = vmax.f32 %v1529_v56, %v1530_v0  ;;  %v1511_v61 = vrot.slane %v1510_v3, 1  ;;  %v1525_v8 = vrot.slane %v1524_v4, 1 }
 0x36e   : > { %v1518_v9 = vrot.slane %v1517_v6, 1  ;;  %v1532_v10 = vrot.slane %v1531_v7, 1  ;;  %v1512_v13 = vmax.f32 %v1510_v3, %v1511_v61  ;;  %v1526_v14 = vmax.f32 %v1524_v4, %v1525_v8 }
 0x370   : > { %v1519_v15 = vmax.f32 %v1517_v6, %v1518_v9  ;;  %v1533_v16 = vmax.f32 %v1531_v7, %v1532_v10 }
 0x372   : > { %v1548_v55 = vcombine.low %v1512_v13, %v1519_v15  ;;  %v1549_v17 = vcombine.low %v1526_v14, %v1533_v16 }
 0x374   : > { %v1570_v19 = vrot.slane %v1548_v55, %v1555_v62  ;;  %v1577_v20 = vrot.slane %v1549_v17, %v1555_v62 }
 0x376   : > { %v1579_v21 = vcombine.low %v1570_v19, %v1577_v20 }
 0x378   : > { %v1593_v5 = vrot.slane %v1579_v21, %v1555_v62 }
 0x37a   : > { %v1594_v23 = vcombine.low %v1586_v22, %v1593_v5 }
 0x37c   : > { %1596 = vst [vmem:[%s483_s14] sm:$0xff] %v1594_v23 }
 0x37d PF: > { %s23_s27 = sadd.s32 1, %s1936_s27   ;;  %s2326_s25 = smov %s1932_s26 }
 0x37e   : > { %p20_p5 = scmp.ge.s32.totalorder %s23_s27, 4   ;;  %s2327_s26 = smov %s2329_s28 }
 0x380   :  { %22 = sbr.rel (!%p20_p5) target bundleno = 2 (0x2), region = 113 }

// kernel: pointnet_base_apply.7
= control target key start
LH: loop header
LB: loop body
LE: loop exit
PB: predicated region body
PF: predicated region fallthrough
CT: control target
= control target key end

     0   :  { %v3561_v36 = vmov 1983009808   ;;  %v44_v38 = vlaneseq  ;;  %vm2696_vm0 = vcmask 66560   ;;  %s4736_s1 = inlined_call_operand.vmem [shape: bf16[1024,512], index: 1, kind: input, shape index: {}]   ;;  %s4737_s0 = inlined_call_operand.vmem [shape: f32[2,1024], index: 0, kind: input, shape index: {}]   ;;  %s4738_s4 = inlined_call_operand.vmem [shape: bf16[512,256], index: 4, kind: input, shape index: {}]   ;;  %s4739_s2 = inlined_call_operand.vmem [shape: f32[1,512], index: 2, kind: input, shape index: {}]   ;;  %s4740_s3 = inlined_call_operand.vmem [shape: f32[1,512], index: 3, kind: input, shape index: {}]   ;;  %s4741_s7 = inlined_call_operand.vmem [shape: bf16[256,9], index: 7, kind: input, shape index: {}]   ;;  %s4742_s5 = inlined_call_operand.vmem [shape: f32[1,256], index: 5, kind: input, shape index: {}]   ;;  %s4743_s6 = inlined_call_operand.vmem [shape: f32[1,256], index: 6, kind: input, shape index: {}]   ;;  %s4744_s8 = inlined_call_operand.vmem [shape: f32[1,9], index: 8, kind: input, shape index: {}]   ;;  %s4745_s9 = inlined_call_operand.vmem [shape: f32[1,9], index: 9, kind: input, shape index: {}]   ;;  %s4746_s10 = inlined_call_operand.vmem [shape: f32[2,9], index: 10, kind: output, shape index: {}]  }
   0x1   :  { %v3063_v0 = vld [vmem:[%s4736_s1 + $0xe4] ss:$16 sps:$4 sm:$0xff]   ;;  %v3067_v2 = vld [vmem:[%s4736_s1 + $0xe0] ss:$16 sps:$4 sm:$0xff]   ;;  %v42_v37 = vunpack.c.l.s4 %v3561_v36 }
   0x2   :  { %v3065_v1 = vld [vmem:[%s4736_s1 + $0x2e4] ss:$16 sps:$4 sm:$0xff]   ;;  %1626 = vmatprep.subr.bf16.mxu0 %v3063_v0  ;;  %v3068_v3 = vld [vmem:[%s4736_s1 + $0x2e0] ss:$16 sps:$4 sm:$0xff]   ;;  %v3734_v43 = vshrl.u32 %v44_v38, 7 }
   0x3   :  { %1667 = vmatprep.subr.bf16.mxu1 %v3065_v1  ;;  %v3069_v4 = vld [vmem:[%s4736_s1 + $0xc4] ss:$16 sps:$4 sm:$0xff]   ;;  %1627 = vmatpush1.bf16.msra.mxu0 %v3067_v2  ;;  %v3073_v6 = vld [vmem:[%s4736_s1 + $0xc0] ss:$16 sps:$4 sm:$0xff]   ;;  %v43_v42 = vunpack.c.0.s8 %v42_v37 }
   0x4   :  { %1668 = vmatpush1.bf16.msra.mxu1 %v3068_v3  ;;  %v3071_v5 = vld [vmem:[%s4736_s1 + $0x2c4] ss:$16 sps:$4 sm:$0xff]   ;;  %1628 = vmatprep.subr.bf16.mxu0 %v3069_v4  ;;  %v3074_v7 = vld [vmem:[%s4736_s1 + $0x2c0] ss:$16 sps:$4 sm:$0xff]   ;;  %v37_v4 = vld [vmem:[%s4737_s0 + $0x8] sm:$0xff] }
   0x5   :  { %1669 = vmatprep.subr.bf16.mxu1 %v3071_v5  ;;  %v3075_v8 = vld [vmem:[%s4736_s1 + $0xa4] ss:$16 sps:$4 sm:$0xff]   ;;  %v3079_v10 = vld [vmem:[%s4736_s1 + $0xa0] ss:$16 sps:$4 sm:$0xff]   ;;  %v46_v49 = vsub.s32 %v43_v42, %v3734_v43 }
   0x6   :  { %v3077_v9 = vld [vmem:[%s4736_s1 + $0x2a4] ss:$16 sps:$4 sm:$0xff]   ;;  %v3080_v11 = vld [vmem:[%s4736_s1 + $0x2a0] ss:$16 sps:$4 sm:$0xff]  }
   0x7   :  { %1629 = vmatpush1.bf16.msra.mxu0 %v3073_v6  ;;  %v3081_v12 = vld [vmem:[%s4736_s1 + $0x84] ss:$16 sps:$4 sm:$0xff]   ;;  %v3085_v14 = vld [vmem:[%s4736_s1 + $0x80] ss:$16 sps:$4 sm:$0xff]  }
   0x8   :  { %1670 = vmatpush1.bf16.msra.mxu1 %v3074_v7  ;;  %1630 = vmatprep.subr.bf16.mxu0 %v3075_v8  ;;  %v3083_v13 = vld [vmem:[%s4736_s1 + $0x284] ss:$16 sps:$4 sm:$0xff]   ;;  %v3086_v15 = vld [vmem:[%s4736_s1 + $0x280] ss:$16 sps:$4 sm:$0xff]  }
   0x9   :  { %1671 = vmatprep.subr.bf16.mxu1 %v3077_v9  ;;  %v3087_v16 = vld [vmem:[%s4736_s1 + $0x64] ss:$16 sps:$4 sm:$0xff]   ;;  %v3091_v18 = vld [vmem:[%s4736_s1 + $0x60] ss:$16 sps:$4 sm:$0xff]   ;;  %v57_v9 = vcombine.high %v37_v4, %v37_v4 }
   0xa   :  { %v3089_v17 = vld [vmem:[%s4736_s1 + $0x264] ss:$16 sps:$4 sm:$0xff]   ;;  %v3092_v19 = vld [vmem:[%s4736_s1 + $0x260] ss:$16 sps:$4 sm:$0xff]  }
   0xb   :  { %1631 = vmatpush1.bf16.msra.mxu0 %v3079_v10  ;;  %v3093_v20 = vld [vmem:[%s4736_s1 + $0x44] ss:$16 sps:$4 sm:$0xff]   ;;  %v3097_v22 = vld [vmem:[%s4736_s1 + $0x40] ss:$16 sps:$4 sm:$0xff]  }
   0xc   :  { %1672 = vmatpush1.bf16.msra.mxu1 %v3080_v11  ;;  %1632 = vmatprep.subr.bf16.mxu0 %v3081_v12  ;;  %v3095_v21 = vld [vmem:[%s4736_s1 + $0x244] ss:$16 sps:$4 sm:$0xff]   ;;  %v3098_v23 = vld [vmem:[%s4736_s1 + $0x240] ss:$16 sps:$4 sm:$0xff]  }
   0xd   :  { %1673 = vmatprep.subr.bf16.mxu1 %v3083_v13  ;;  %v3099_v24 = vld [vmem:[%s4736_s1 + $0x24] ss:$16 sps:$4 sm:$0xff]   ;;  %v3103_v26 = vld [vmem:[%s4736_s1 + $0x20] ss:$16 sps:$4 sm:$0xff]  }
   0xe   :  { %v3101_v25 = vld [vmem:[%s4736_s1 + $0x224] ss:$16 sps:$4 sm:$0xff]   ;;  %v3104_v27 = vld [vmem:[%s4736_s1 + $0x220] ss:$16 sps:$4 sm:$0xff]  }
   0xf   :  { %1633 = vmatpush1.bf16.msra.mxu0 %v3085_v14  ;;  %v3105_v28 = vld [vmem:[%s4736_s1 + $0x4] ss:$16 sps:$4 sm:$0xff]   ;;  %v3109_v30 = vld [vmem:[%s4736_s1] ss:$16 sps:$4 sm:$0xff]   ;;  %v3818_v14 = vrot.slane %v37_v4, %v46_v49 }
  0x10   :  { %1674 = vmatpush1.bf16.msra.mxu1 %v3086_v15  ;;  %1634 = vmatprep.subr.bf16.mxu0 %v3087_v16  ;;  %v3107_v29 = vld [vmem:[%s4736_s1 + $0x204] ss:$16 sps:$4 sm:$0xff]   ;;  %v3110_v31 = vld [vmem:[%s4736_s1 + $0x200] ss:$16 sps:$4 sm:$0xff]   ;;  %v3820_v15 = vrot.slane %v57_v9, %v46_v49 }
  0x11   :  { %1675 = vmatprep.subr.bf16.mxu1 %v3089_v17  ;;  %v3111_v32 = vld [vmem:[%s4736_s1 + $0x1e4] ss:$16 sps:$4 sm:$0xff]   ;;  %v3115_v34 = vld [vmem:[%s4736_s1 + $0x1e0] ss:$16 sps:$4 sm:$0xff]  }
  0x12   :  { %v3113_v33 = vld [vmem:[%s4736_s1 + $0x3e4] ss:$16 sps:$4 sm:$0xff]   ;;  %v3116_v35 = vld [vmem:[%s4736_s1 + $0x3e0] ss:$16 sps:$4 sm:$0xff]  }
  0x13   :  { %1635 = vmatpush1.bf16.msra.mxu0 %v3091_v18  ;;  %v3117_v39 = vld [vmem:[%s4736_s1 + $0x1c4] ss:$16 sps:$4 sm:$0xff]   ;;  %v3121_v41 = vld [vmem:[%s4736_s1 + $0x1c0] ss:$16 sps:$4 sm:$0xff]  }
  0x14   :  { %1676 = vmatpush1.bf16.msra.mxu1 %v3092_v19  ;;  %1636 = vmatprep.subr.bf16.mxu0 %v3093_v20  ;;  %v3119_v40 = vld [vmem:[%s4736_s1 + $0x3c4] ss:$16 sps:$4 sm:$0xff]   ;;  %v3122_v44 = vld [vmem:[%s4736_s1 + $0x3c0] ss:$16 sps:$4 sm:$0xff]   ;;  %v72_v20 = vcombine.high %v3818_v14, %v3818_v14 }
  0x15   :  { %1677 = vmatprep.subr.bf16.mxu1 %v3095_v21  ;;  %v3123_v45 = vld [vmem:[%s4736_s1 + $0x1a4] ss:$16 sps:$4 sm:$0xff]   ;;  %v3127_v47 = vld [vmem:[%s4736_s1 + $0x1a0] ss:$16 sps:$4 sm:$0xff]   ;;  %v73_v21 = vcombine.high %v3820_v15, %v3820_v15 }
  0x16   :  { %v3125_v46 = vld [vmem:[%s4736_s1 + $0x3a4] ss:$16 sps:$4 sm:$0xff]   ;;  %v3128_v48 = vld [vmem:[%s4736_s1 + $0x3a0] ss:$16 sps:$4 sm:$0xff]  }
  0x17   :  { %1637 = vmatpush1.bf16.msra.mxu0 %v3097_v22  ;;  %v3129_v50 = vld [vmem:[%s4736_s1 + $0x184] ss:$16 sps:$4 sm:$0xff]   ;;  %v3133_v55 = vld [vmem:[%s4736_s1 + $0x180] ss:$16 sps:$4 sm:$0xff]  }
  0x18   :  { %1678 = vmatpush1.bf16.msra.mxu1 %v3098_v23  ;;  %1638 = vmatprep.subr.bf16.mxu0 %v3099_v24  ;;  %v3131_v51 = vld [vmem:[%s4736_s1 + $0x384] ss:$16 sps:$4 sm:$0xff]   ;;  %v3134_v56 = vld [vmem:[%s4736_s1 + $0x380] ss:$16 sps:$4 sm:$0xff]  }
  0x19   :  { %1679 = vmatprep.subr.bf16.mxu1 %v3101_v25  ;;  %v36_v52 = vld [vmem:[%s4737_s0] sm:$0xff] }
  0x1a   :  { %v47_v53 = vrot.slane %v36_v52, %v46_v49  ;;  %v40_v54 = vcombine.high %v36_v52, %v36_v52  ;;  %v3135_v57 = vld [vmem:[%s4736_s1 + $0x164] ss:$16 sps:$4 sm:$0xff]   ;;  %v3139_v63 = vld [vmem:[%s4736_s1 + $0x160] ss:$16 sps:$4 sm:$0xff]  }
  0x1b   :  { %1639 = vmatpush1.bf16.msra.mxu0 %v3103_v26  ;;  %v3137_v58 = vld [vmem:[%s4736_s1 + $0x364] ss:$16 sps:$4 sm:$0xff]   ;;  %v3140_v0 = vld [vmem:[%s4736_s1 + $0x360] ss:$16 sps:$4 sm:$0xff]  }
  0x1c   :  { %1680 = vmatpush1.bf16.msra.mxu1 %v3104_v27  ;;  %1640 = vmatprep.subr.bf16.mxu0 %v3105_v28  ;;  %v55_v59 = vcombine.high %v47_v53, %v47_v53  ;;  %v54_v60 = vrot.slane %v40_v54, %v46_v49  ;;  %v3141_v1 = vld [vmem:[%s4736_s1 + $0x144] ss:$16 sps:$4 sm:$0xff]   ;;  %v3145_v5 = vld [vmem:[%s4736_s1 + $0x140] ss:$16 sps:$4 sm:$0xff]   ;;  %v3838_v22 = vpack.c.bf16 %v47_v53, %v47_v53 }
  0x1d   :  { %1681 = vmatprep.subr.bf16.mxu1 %v3107_v29  ;;  %v3143_v2 = vld [vmem:[%s4736_s1 + $0x344] ss:$16 sps:$4 sm:$0xff]   ;;  %v3146_v6 = vld [vmem:[%s4736_s1 + $0x340] ss:$16 sps:$4 sm:$0xff]   ;;  %v3854_v28 = vpack.c.bf16 %v72_v20, %v72_v20  ;;  %v3856_v29 = vpack.c.bf16 %v73_v21, %v73_v21 }
  0x1e   :  { %v3773_v61 = vpack.c.bf16 %v55_v59, %v55_v59  ;;  %v56_v62 = vcombine.high %v54_v60, %v54_v60  ;;  %v3147_v7 = vld [vmem:[%s4736_s1 + $0x124] ss:$16 sps:$4 sm:$0xff]   ;;  %v3151_v10 = vld [vmem:[%s4736_s1 + $0x120] ss:$16 sps:$4 sm:$0xff]   ;;  %v3840_v23 = vpack.c.bf16 %v54_v60, %v54_v60 }
  0x1f   :  { %1641 = vmatpush1.bf16.msra.mxu0 %v3109_v30  ;;  %v3149_v8 = vld [vmem:[%s4736_s1 + $0x324] ss:$16 sps:$4 sm:$0xff]   ;;  %v3152_v11 = vld [vmem:[%s4736_s1 + $0x320] ss:$16 sps:$4 sm:$0xff]  }
  0x20   :  { %1682 = vmatpush1.bf16.msra.mxu1 %v3110_v31  ;;  %1642 = vmatprep.subr.bf16.mxu0 %v3111_v32  ;;  %v3787_v3 = vpack.c.bf16 %v56_v62, %v56_v62  ;;  %v3153_v12 = vld [vmem:[%s4736_s1 + $0x104] ss:$16 sps:$4 sm:$0xff]   ;;  %v3157_v16 = vld [vmem:[%s4736_s1 + $0x100] ss:$16 sps:$4 sm:$0xff]  }
  0x21   :  { %1683 = vmatprep.subr.bf16.mxu1 %v3113_v33  ;;  %1658 = vmatprep.mubr.bf16.mxu0 %v3773_v61  ;;  %v3155_v13 = vld [vmem:[%s4736_s1 + $0x304] ss:$16 sps:$4 sm:$0xff]   ;;  %v3158_v17 = vld [vmem:[%s4736_s1 + $0x300] ss:$16 sps:$4 sm:$0xff]  }
  0x22   :  { %1699 = vmatprep.mubr.bf16.mxu1 %v3787_v3  ;;  %v3163_v18 = vld [vmem:[%s4736_s1 + $0x4e4] ss:$16 sps:$4 sm:$0xff]   ;;  %v3161_v24 = vld [vmem:[%s4736_s1 + $0x4e0] ss:$16 sps:$4 sm:$0xff]  }
  0x23   :  { %1643 = vmatpush2.bf16.msra.mxu0 %v3115_v34  ;;  %v3166_v19 = vld [vmem:[%s4736_s1 + $0x6e4] ss:$16 sps:$4 sm:$0xff]   ;;  %v3164_v25 = vld [vmem:[%s4736_s1 + $0x6e0] ss:$16 sps:$4 sm:$0xff]  }
  0x24   :  { %1684 = vmatpush2.bf16.msra.mxu1 %v3116_v35  ;;  %1644 = vmatprep.subr.bf16.mxu0 %v3117_v39  ;;  %v3169_v26 = vld [vmem:[%s4736_s1 + $0x4c4] ss:$16 sps:$4 sm:$0xff]   ;;  %v3167_v30 = vld [vmem:[%s4736_s1 + $0x4c0] ss:$16 sps:$4 sm:$0xff]  }
  0x25   :  { %1685 = vmatprep.subr.bf16.mxu1 %v3119_v40  ;;  %v3172_v27 = vld [vmem:[%s4736_s1 + $0x6c4] ss:$16 sps:$4 sm:$0xff]   ;;  %v3170_v31 = vld [vmem:[%s4736_s1 + $0x6c0] ss:$16 sps:$4 sm:$0xff]  }
  0x26   :  { %v3175_v32 = vld [vmem:[%s4736_s1 + $0x4a4] ss:$16 sps:$4 sm:$0xff]   ;;  %v3173_v34 = vld [vmem:[%s4736_s1 + $0x4a0] ss:$16 sps:$4 sm:$0xff]  }
  0x27   :  { %1645 = vmatpush2.bf16.msra.mxu0 %v3121_v41  ;;  %v3178_v33 = vld [vmem:[%s4736_s1 + $0x6a4] ss:$16 sps:$4 sm:$0xff]   ;;  %v3176_v35 = vld [vmem:[%s4736_s1 + $0x6a0] ss:$16 sps:$4 sm:$0xff]  }
  0x28   :  { %1686 = vmatpush2.bf16.msra.mxu1 %v3122_v44  ;;  %1646 = vmatprep.subr.bf16.mxu0 %v3123_v45  ;;  %v3181_v36 = vld [vmem:[%s4736_s1 + $0x484] ss:$16 sps:$4 sm:$0xff]   ;;  %v3179_v38 = vld [vmem:[%s4736_s1 + $0x480] ss:$16 sps:$4 sm:$0xff]  }
  0x29   :  { %1687 = vmatprep.subr.bf16.mxu1 %v3125_v46  ;;  %v3184_v37 = vld [vmem:[%s4736_s1 + $0x684] ss:$16 sps:$4 sm:$0xff]   ;;  %v3182_v39 = vld [vmem:[%s4736_s1 + $0x680] ss:$16 sps:$4 sm:$0xff]  }
  0x2a   :  { %v3187_v40 = vld [vmem:[%s4736_s1 + $0x464] ss:$16 sps:$4 sm:$0xff]   ;;  %v3185_v42 = vld [vmem:[%s4736_s1 + $0x460] ss:$16 sps:$4 sm:$0xff]  }
  0x2b   :  { %1647 = vmatpush2.bf16.msra.mxu0 %v3127_v47  ;;  %v3190_v41 = vld [vmem:[%s4736_s1 + $0x664] ss:$16 sps:$4 sm:$0xff]   ;;  %v3188_v44 = vld [vmem:[%s4736_s1 + $0x660] ss:$16 sps:$4 sm:$0xff]  }
  0x2c   :  { %1688 = vmatpush2.bf16.msra.mxu1 %v3128_v48  ;;  %1648 = vmatprep.subr.bf16.mxu0 %v3129_v50  ;;  %v3193_v45 = vld [vmem:[%s4736_s1 + $0x444] ss:$16 sps:$4 sm:$0xff]   ;;  %v3191_v47 = vld [vmem:[%s4736_s1 + $0x440] ss:$16 sps:$4 sm:$0xff]  }
  0x2d   :  { %1689 = vmatprep.subr.bf16.mxu1 %v3131_v51  ;;  %v3196_v46 = vld [vmem:[%s4736_s1 + $0x644] ss:$16 sps:$4 sm:$0xff]   ;;  %v3194_v48 = vld [vmem:[%s4736_s1 + $0x640] ss:$16 sps:$4 sm:$0xff]  }
  0x2e   :  { %v3199_v49 = vld [vmem:[%s4736_s1 + $0x424] ss:$16 sps:$4 sm:$0xff]   ;;  %v3197_v51 = vld [vmem:[%s4736_s1 + $0x420] ss:$16 sps:$4 sm:$0xff]  }
  0x2f   :  { %1649 = vmatpush2.bf16.msra.mxu0 %v3133_v55  ;;  %v3202_v50 = vld [vmem:[%s4736_s1 + $0x624] ss:$16 sps:$4 sm:$0xff]   ;;  %v3200_v52 = vld [vmem:[%s4736_s1 + $0x620] ss:$16 sps:$4 sm:$0xff]  }
  0x30   :  { %1690 = vmatpush2.bf16.msra.mxu1 %v3134_v56  ;;  %1650 = vmatprep.subr.bf16.mxu0 %v3135_v57  ;;  %v3205_v53 = vld [vmem:[%s4736_s1 + $0x404] ss:$16 sps:$4 sm:$0xff]   ;;  %v3203_v55 = vld [vmem:[%s4736_s1 + $0x400] ss:$16 sps:$4 sm:$0xff]  }
  0x31   :  { %1691 = vmatprep.subr.bf16.mxu1 %v3137_v58  ;;  %v3208_v54 = vld [vmem:[%s4736_s1 + $0x604] ss:$16 sps:$4 sm:$0xff]   ;;  %v3206_v56 = vld [vmem:[%s4736_s1 + $0x600] ss:$16 sps:$4 sm:$0xff]  }
  0x32   :  { %v3211_v57 = vld [vmem:[%s4736_s1 + $0x5e4] ss:$16 sps:$4 sm:$0xff]   ;;  %v3209_v59 = vld [vmem:[%s4736_s1 + $0x5e0] ss:$16 sps:$4 sm:$0xff]  }
  0x33   :  { %1651 = vmatpush2.bf16.msra.mxu0 %v3139_v63  ;;  %v3214_v58 = vld [vmem:[%s4736_s1 + $0x7e4] ss:$16 sps:$4 sm:$0xff]   ;;  %v3212_v60 = vld [vmem:[%s4736_s1 + $0x7e0] ss:$16 sps:$4 sm:$0xff]  }
  0x34   :  { %1692 = vmatpush2.bf16.msra.mxu1 %v3140_v0  ;;  %1652 = vmatprep.subr.bf16.mxu0 %v3141_v1  ;;  %v3217_v62 = vld [vmem:[%s4736_s1 + $0x5c4] ss:$16 sps:$4 sm:$0xff]   ;;  %v3215_v0 = vld [vmem:[%s4736_s1 + $0x5c0] ss:$16 sps:$4 sm:$0xff]  }
  0x35   :  { %1693 = vmatprep.subr.bf16.mxu1 %v3143_v2  ;;  %v3220_v63 = vld [vmem:[%s4736_s1 + $0x7c4] ss:$16 sps:$4 sm:$0xff]   ;;  %v3218_v1 = vld [vmem:[%s4736_s1 + $0x7c0] ss:$16 sps:$4 sm:$0xff]  }
  0x36   :  { %v3223_v2 = vld [vmem:[%s4736_s1 + $0x5a4] ss:$16 sps:$4 sm:$0xff]   ;;  %v3227_v9 = vld [vmem:[%s4736_s1 + $0x580] ss:$16 sps:$4 sm:$0xff]  }
  0x37   :  { %1653 = vmatpush2.bf16.msra.mxu0 %v3145_v5  ;;  %v3226_v4 = vld [vmem:[%s4736_s1 + $0x7a4] ss:$16 sps:$4 sm:$0xff]   ;;  %v3221_v5 = vld [vmem:[%s4736_s1 + $0x5a0] ss:$16 sps:$4 sm:$0xff]  }
  0x38   :  { %1694 = vmatpush2.bf16.msra.mxu1 %v3146_v6  ;;  %1654 = vmatprep.subr.bf16.mxu0 %v3147_v7  ;;  %v3224_v6 = vld [vmem:[%s4736_s1 + $0x7a0] ss:$16 sps:$4 sm:$0xff]   ;;  %v3229_v7 = vld [vmem:[%s4736_s1 + $0x584] ss:$16 sps:$4 sm:$0xff]  }
  0x39   :  { %1695 = vmatprep.subr.bf16.mxu1 %v3149_v8  ;;  %v3232_v8 = vld [vmem:[%s4736_s1 + $0x784] ss:$16 sps:$4 sm:$0xff]   ;;  %v3242_v20 = vld [vmem:[%s4736_s1 + $0x740] ss:$16 sps:$4 sm:$0xff]  }
  0x3a   :  { %v3247_v21 = vld [vmem:[%s4736_s1 + $0x524] ss:$16 sps:$4 sm:$0xff]  }
  0x3b   :  { %1655 = vmatpush2.bf16.msra.mxu0 %v3151_v10  ;;  %v3230_v10 = vld [vmem:[%s4736_s1 + $0x780] ss:$16 sps:$4 sm:$0xff]  }
  0x3c   :  { %1696 = vmatpush2.bf16.msra.mxu1 %v3152_v11  ;;  %1656 = vmatprep.subr.bf16.mxu0 %v3153_v12  ;;  %v3235_v11 = vld [vmem:[%s4736_s1 + $0x564] ss:$16 sps:$4 sm:$0xff]  }
  0x3d   :  { %1697 = vmatprep.subr.bf16.mxu1 %v3155_v13  ;;  %v3238_v12 = vld [vmem:[%s4736_s1 + $0x764] ss:$16 sps:$4 sm:$0xff]   ;;  %v3233_v13 = vld [vmem:[%s4736_s1 + $0x560] ss:$16 sps:$4 sm:$0xff]  }
  0x3f   :  { %1657 = vmatpush2.bf16.msra.mxu0 %v3157_v16  ;;  %v3236_v16 = vld [vmem:[%s4736_s1 + $0x760] ss:$16 sps:$4 sm:$0xff]  }
  0x40   :  { %1698 = vmatpush2.bf16.msra.mxu1 %v3158_v17  ;;  %1708 = vmatprep.subr.bf16.mxu0 %v3163_v18  ;;  %v3241_v17 = vld [vmem:[%s4736_s1 + $0x544] ss:$16 sps:$4 sm:$0xff]  }
  0x41   :  { %1749 = vmatprep.subr.bf16.mxu1 %v3166_v19  ;;  %v3244_v18 = vld [vmem:[%s4736_s1 + $0x744] ss:$16 sps:$4 sm:$0xff]   ;;  %v3239_v19 = vld [vmem:[%s4736_s1 + $0x540] ss:$16 sps:$4 sm:$0xff]  }
  0x42   :  { %1659 = vmatmul.mubr.bf16.vlgmr.msra.gmra.mxu0 %v3838_v22 }
  0x43   :  { %1700 = vmatmul.mubr.bf16.vlgmr.msra.gmra.mxu1 %v3840_v23  ;;  %1709 = vmatpush1.bf16.msra.mxu0 %v3161_v24  ;;  %v3250_v24 = vld [vmem:[%s4736_s1 + $0x724] ss:$16 sps:$4 sm:$0xff]  }
  0x44   :  { %1750 = vmatpush1.bf16.msra.mxu1 %v3164_v25  ;;  %1710 = vmatprep.subr.bf16.mxu0 %v3169_v26  ;;  %v3245_v25 = vld [vmem:[%s4736_s1 + $0x520] ss:$16 sps:$4 sm:$0xff]  }
  0x45   :  { %1751 = vmatprep.subr.bf16.mxu1 %v3172_v27  ;;  %1740 = vmatprep.mubr.bf16.mxu0 %v3854_v28  ;;  %v3248_v26 = vld [vmem:[%s4736_s1 + $0x720] ss:$16 sps:$4 sm:$0xff]   ;;  %v3253_v27 = vld [vmem:[%s4736_s1 + $0x504] ss:$16 sps:$4 sm:$0xff]  }
  0x46   :  { %1781 = vmatprep.mubr.bf16.mxu1 %v3856_v29 }
  0x47   :  { %1711 = vmatpush1.bf16.msra.mxu0 %v3167_v30  ;;  %v3256_v30 = vld [vmem:[%s4736_s1 + $0x704] ss:$16 sps:$4 sm:$0xff]  }
  0x48   :  { %1752 = vmatpush1.bf16.msra.mxu1 %v3170_v31  ;;  %1712 = vmatprep.subr.bf16.mxu0 %v3175_v32  ;;  %v3251_v31 = vld [vmem:[%s4736_s1 + $0x500] ss:$16 sps:$4 sm:$0xff]  }
  0x49   :  { %1753 = vmatprep.subr.bf16.mxu1 %v3178_v33  ;;  %v3254_v32 = vld [vmem:[%s4736_s1 + $0x700] ss:$16 sps:$4 sm:$0xff]   ;;  %v3259_v33 = vld [vmem:[%s4736_s1 + $0xec] ss:$16 sps:$4 sm:$0xff]  }
  0x4b   :  { %1713 = vmatpush1.bf16.msra.mxu0 %v3173_v34  ;;  %v3262_v34 = vld [vmem:[%s4736_s1 + $0x2ec] ss:$16 sps:$4 sm:$0xff]  }
  0x4c   :  { %1754 = vmatpush1.bf16.msra.mxu1 %v3176_v35  ;;  %1714 = vmatprep.subr.bf16.mxu0 %v3181_v36  ;;  %v4044_v35 = vpack.c.bf16 %v3818_v14, %v3818_v14  ;;  %v4048_v36 = vpack.c.bf16 %v3820_v15, %v3820_v15  ;;  %v3265_v14 = vld [vmem:[%s4736_s1 + $0xcc] ss:$16 sps:$4 sm:$0xff]  }
  0x4d   :  { %1755 = vmatprep.subr.bf16.mxu1 %v3184_v37  ;;  %v3257_v37 = vld [vmem:[%s4736_s1 + $0xe8] ss:$16 sps:$4 sm:$0xff]   ;;  %v3268_v15 = vld [vmem:[%s4736_s1 + $0x2cc] ss:$16 sps:$4 sm:$0xff]  }
  0x4f   :  { %1715 = vmatpush1.bf16.msra.mxu0 %v3179_v38  ;;  %v3260_v38 = vld [vmem:[%s4736_s1 + $0x2e8] ss:$16 sps:$4 sm:$0xff]  }
  0x50   :  { %1756 = vmatpush1.bf16.msra.mxu1 %v3182_v39  ;;  %1716 = vmatprep.subr.bf16.mxu0 %v3187_v40  ;;  %v3263_v39 = vld [vmem:[%s4736_s1 + $0xc8] ss:$16 sps:$4 sm:$0xff]  }
  0x51   :  { %1757 = vmatprep.subr.bf16.mxu1 %v3190_v41  ;;  %v3266_v40 = vld [vmem:[%s4736_s1 + $0x2c8] ss:$16 sps:$4 sm:$0xff]   ;;  %v3271_v41 = vld [vmem:[%s4736_s1 + $0xac] ss:$16 sps:$4 sm:$0xff]  }
  0x53   :  { %1717 = vmatpush1.bf16.msra.mxu0 %v3185_v42  ;;  %v3274_v42 = vld [vmem:[%s4736_s1 + $0x2ac] ss:$16 sps:$4 sm:$0xff]  }
  0x54   :  { %1758 = vmatpush1.bf16.msra.mxu1 %v3188_v44  ;;  %1718 = vmatprep.subr.bf16.mxu0 %v3193_v45  ;;  %v3269_v44 = vld [vmem:[%s4736_s1 + $0xa8] ss:$16 sps:$4 sm:$0xff]  }
  0x55   :  { %1759 = vmatprep.subr.bf16.mxu1 %v3196_v46  ;;  %v3272_v45 = vld [vmem:[%s4736_s1 + $0x2a8] ss:$16 sps:$4 sm:$0xff]   ;;  %v3277_v46 = vld [vmem:[%s4736_s1 + $0x8c] ss:$16 sps:$4 sm:$0xff]  }
  0x57   :  { %1719 = vmatpush1.bf16.msra.mxu0 %v3191_v47  ;;  %v3278_v47 = vld [vmem:[%s4736_s1 + $0x288] ss:$16 sps:$4 sm:$0xff]  }
  0x58   :  { %1760 = vmatpush1.bf16.msra.mxu1 %v3194_v48  ;;  %1720 = vmatprep.subr.bf16.mxu0 %v3199_v49  ;;  %v3283_v48 = vld [vmem:[%s4736_s1 + $0x6c] ss:$16 sps:$4 sm:$0xff]  }
  0x59   :  { %1761 = vmatprep.subr.bf16.mxu1 %v3202_v50  ;;  %v3286_v49 = vld [vmem:[%s4736_s1 + $0x26c] ss:$16 sps:$4 sm:$0xff]   ;;  %v3281_v50 = vld [vmem:[%s4736_s1 + $0x68] ss:$16 sps:$4 sm:$0xff]  }
  0x5b   :  { %1721 = vmatpush1.bf16.msra.mxu0 %v3197_v51  ;;  %v3284_v51 = vld [vmem:[%s4736_s1 + $0x268] ss:$16 sps:$4 sm:$0xff]  }
  0x5c   :  { %1762 = vmatpush1.bf16.msra.mxu1 %v3200_v52  ;;  %1722 = vmatprep.subr.bf16.mxu0 %v3205_v53  ;;  %v3289_v52 = vld [vmem:[%s4736_s1 + $0x4c] ss:$16 sps:$4 sm:$0xff]  }
  0x5d   :  { %1763 = vmatprep.subr.bf16.mxu1 %v3208_v54  ;;  %v3292_v53 = vld [vmem:[%s4736_s1 + $0x24c] ss:$16 sps:$4 sm:$0xff]   ;;  %v3287_v54 = vld [vmem:[%s4736_s1 + $0x48] ss:$16 sps:$4 sm:$0xff]  }
  0x5f   :  { %1723 = vmatpush1.bf16.msra.mxu0 %v3203_v55  ;;  %v3290_v55 = vld [vmem:[%s4736_s1 + $0x248] ss:$16 sps:$4 sm:$0xff]  }
  0x60   :  { %1764 = vmatpush1.bf16.msra.mxu1 %v3206_v56  ;;  %1724 = vmatprep.subr.bf16.mxu0 %v3211_v57  ;;  %v3295_v56 = vld [vmem:[%s4736_s1 + $0x2c] ss:$16 sps:$4 sm:$0xff]  }
  0x61   :  { %1765 = vmatprep.subr.bf16.mxu1 %v3214_v58  ;;  %v3298_v57 = vld [vmem:[%s4736_s1 + $0x22c] ss:$16 sps:$4 sm:$0xff]   ;;  %v3293_v58 = vld [vmem:[%s4736_s1 + $0x28] ss:$16 sps:$4 sm:$0xff]  }
  0x63   :  { %1725 = vmatpush2.bf16.msra.mxu0 %v3209_v59  ;;  %v3296_v59 = vld [vmem:[%s4736_s1 + $0x228] ss:$16 sps:$4 sm:$0xff]  }
  0x64   :  { %1766 = vmatpush2.bf16.msra.mxu1 %v3212_v60  ;;  %1726 = vmatprep.subr.bf16.mxu0 %v3217_v62  ;;  %v3301_v60 = vld [vmem:[%s4736_s1 + $0xc] ss:$16 sps:$4 sm:$0xff]  }
  0x65   :  { %1767 = vmatprep.subr.bf16.mxu1 %v3220_v63  ;;  %v3304_v62 = vld [vmem:[%s4736_s1 + $0x20c] ss:$16 sps:$4 sm:$0xff]   ;;  %v3299_v63 = vld [vmem:[%s4736_s1 + $0x8] ss:$16 sps:$4 sm:$0xff]  }
  0x67   :  { %1727 = vmatpush2.bf16.msra.mxu0 %v3215_v0  ;;  %v3302_v0 = vld [vmem:[%s4736_s1 + $0x208] ss:$16 sps:$4 sm:$0xff]  }
  0x68   :  { %1768 = vmatpush2.bf16.msra.mxu1 %v3218_v1  ;;  %1728 = vmatprep.subr.bf16.mxu0 %v3223_v2  ;;  %v3307_v1 = vld [vmem:[%s4736_s1 + $0x1ec] ss:$16 sps:$4 sm:$0xff]  }
  0x69   :  { %1769 = vmatprep.subr.bf16.mxu1 %v3226_v4  ;;  %v3310_v2 = vld [vmem:[%s4736_s1 + $0x3ec] ss:$16 sps:$4 sm:$0xff]   ;;  %v3305_v4 = vld [vmem:[%s4736_s1 + $0x1e8] ss:$16 sps:$4 sm:$0xff]  }
  0x6b   :  { %1729 = vmatpush2.bf16.msra.mxu0 %v3221_v5  ;;  %v3308_v5 = vld [vmem:[%s4736_s1 + $0x3e8] ss:$16 sps:$4 sm:$0xff]  }
  0x6c   :  { %1770 = vmatpush2.bf16.msra.mxu1 %v3224_v6  ;;  %1730 = vmatprep.subr.bf16.mxu0 %v3229_v7  ;;  %v3313_v6 = vld [vmem:[%s4736_s1 + $0x1cc] ss:$16 sps:$4 sm:$0xff]  }
  0x6d   :  { %1771 = vmatprep.subr.bf16.mxu1 %v3232_v8  ;;  %v3316_v7 = vld [vmem:[%s4736_s1 + $0x3cc] ss:$16 sps:$4 sm:$0xff]   ;;  %v3311_v8 = vld [vmem:[%s4736_s1 + $0x1c8] ss:$16 sps:$4 sm:$0xff]  }
  0x6f   :  { %1731 = vmatpush2.bf16.msra.mxu0 %v3227_v9  ;;  %v3314_v9 = vld [vmem:[%s4736_s1 + $0x3c8] ss:$16 sps:$4 sm:$0xff]  }
  0x70   :  { %1772 = vmatpush2.bf16.msra.mxu1 %v3230_v10  ;;  %1732 = vmatprep.subr.bf16.mxu0 %v3235_v11  ;;  %v3319_v10 = vld [vmem:[%s4736_s1 + $0x1ac] ss:$16 sps:$4 sm:$0xff]  }
  0x71   :  { %1773 = vmatprep.subr.bf16.mxu1 %v3238_v12  ;;  %v3322_v11 = vld [vmem:[%s4736_s1 + $0x3ac] ss:$16 sps:$4 sm:$0xff]   ;;  %v3317_v12 = vld [vmem:[%s4736_s1 + $0x1a8] ss:$16 sps:$4 sm:$0xff]  }
  0x73   :  { %1733 = vmatpush2.bf16.msra.mxu0 %v3233_v13  ;;  %v3320_v13 = vld [vmem:[%s4736_s1 + $0x3a8] ss:$16 sps:$4 sm:$0xff]  }
  0x74   :  { %1774 = vmatpush2.bf16.msra.mxu1 %v3236_v16  ;;  %1734 = vmatprep.subr.bf16.mxu0 %v3241_v17  ;;  %v3325_v16 = vld [vmem:[%s4736_s1 + $0x18c] ss:$16 sps:$4 sm:$0xff]  }
  0x75   :  { %1775 = vmatprep.subr.bf16.mxu1 %v3244_v18  ;;  %v3328_v17 = vld [vmem:[%s4736_s1 + $0x38c] ss:$16 sps:$4 sm:$0xff]   ;;  %v3323_v18 = vld [vmem:[%s4736_s1 + $0x188] ss:$16 sps:$4 sm:$0xff]  }
  0x77   :  { %1735 = vmatpush2.bf16.msra.mxu0 %v3239_v19  ;;  %v3326_v19 = vld [vmem:[%s4736_s1 + $0x388] ss:$16 sps:$4 sm:$0xff]  }
  0x78   :  { %1776 = vmatpush2.bf16.msra.mxu1 %v3242_v20  ;;  %1736 = vmatprep.subr.bf16.mxu0 %v3247_v21  ;;  %v3331_v20 = vld [vmem:[%s4736_s1 + $0x16c] ss:$16 sps:$4 sm:$0xff]  }
  0x79   :  { %1777 = vmatprep.subr.bf16.mxu1 %v3250_v24  ;;  %v3334_v21 = vld [vmem:[%s4736_s1 + $0x36c] ss:$16 sps:$4 sm:$0xff]   ;;  %v3329_v24 = vld [vmem:[%s4736_s1 + $0x168] ss:$16 sps:$4 sm:$0xff]  }
  0x7b   :  { %1737 = vmatpush2.bf16.msra.mxu0 %v3245_v25  ;;  %v3332_v25 = vld [vmem:[%s4736_s1 + $0x368] ss:$16 sps:$4 sm:$0xff]  }
  0x7c   :  { %1778 = vmatpush2.bf16.msra.mxu1 %v3248_v26  ;;  %1738 = vmatprep.subr.bf16.mxu0 %v3253_v27  ;;  %v3337_v26 = vld [vmem:[%s4736_s1 + $0x14c] ss:$16 sps:$4 sm:$0xff]  }
  0x7d   :  { %1779 = vmatprep.subr.bf16.mxu1 %v3256_v30  ;;  %v3340_v27 = vld [vmem:[%s4736_s1 + $0x34c] ss:$16 sps:$4 sm:$0xff]   ;;  %v3335_v30 = vld [vmem:[%s4736_s1 + $0x148] ss:$16 sps:$4 sm:$0xff]  }
  0x7f   :  { %1739 = vmatpush2.bf16.msra.mxu0 %v3251_v31  ;;  %v3338_v31 = vld [vmem:[%s4736_s1 + $0x348] ss:$16 sps:$4 sm:$0xff]  }
  0x80   :  { %1780 = vmatpush2.bf16.msra.mxu1 %v3254_v32  ;;  %1790 = vmatprep.subr.bf16.mxu0 %v3259_v33  ;;  %v3343_v32 = vld [vmem:[%s4736_s1 + $0x12c] ss:$16 sps:$4 sm:$0xff]  }
  0x81   :  { %1831 = vmatprep.subr.bf16.mxu1 %v3262_v34  ;;  %v3346_v33 = vld [vmem:[%s4736_s1 + $0x32c] ss:$16 sps:$4 sm:$0xff]   ;;  %v3341_v34 = vld [vmem:[%s4736_s1 + $0x128] ss:$16 sps:$4 sm:$0xff]  }
  0x82   :  { %1741 = vmatmul.mubr.bf16.vlgmr.msra.gmra.mxu0 %v4044_v35 }
  0x83   :  { %1782 = vmatmul.mubr.bf16.vlgmr.msra.gmra.mxu1 %v4048_v36  ;;  %1791 = vmatpush1.bf16.msra.mxu0 %v3257_v37  ;;  %v3344_v37 = vld [vmem:[%s4736_s1 + $0x328] ss:$16 sps:$4 sm:$0xff]  }
  0x84   :  { %1832 = vmatpush1.bf16.msra.mxu1 %v3260_v38  ;;  %1792 = vmatprep.subr.bf16.mxu0 %v3265_v14  ;;  %v3349_v38 = vld [vmem:[%s4736_s1 + $0x10c] ss:$16 sps:$4 sm:$0xff]  }
  0x85   :  { %1833 = vmatprep.subr.bf16.mxu1 %v3268_v15  ;;  %1822 = vmatprep.mubr.bf16.mxu0 %v3773_v61  ;;  %v3280_v61 = vld [vmem:[%s4736_s1 + $0x28c] ss:$16 sps:$4 sm:$0xff]   ;;  %v3347_v15 = vld [vmem:[%s4736_s1 + $0x108] ss:$16 sps:$4 sm:$0xff]  }
  0x86   :  { %1863 = vmatprep.mubr.bf16.mxu1 %v3787_v3  ;;  %v3275_v3 = vld [vmem:[%s4736_s1 + $0x88] ss:$16 sps:$4 sm:$0xff]   ;;  %v3352_v14 = vld [vmem:[%s4736_s1 + $0x30c] ss:$16 sps:$4 sm:$0xff]  }
  0x87   :  { %1793 = vmatpush1.bf16.msra.mxu0 %v3263_v39  ;;  %v3350_v39 = vld [vmem:[%s4736_s1 + $0x308] ss:$16 sps:$4 sm:$0xff]  }
  0x88   :  { %1834 = vmatpush1.bf16.msra.mxu1 %v3266_v40  ;;  %1794 = vmatprep.subr.bf16.mxu0 %v3271_v41  ;;  %v3355_v40 = vld [vmem:[%s4736_s1 + $0x4ec] ss:$16 sps:$4 sm:$0xff]  }
  0x89   :  { %1835 = vmatprep.subr.bf16.mxu1 %v3274_v42  ;;  %v3358_v41 = vld [vmem:[%s4736_s1 + $0x6ec] ss:$16 sps:$4 sm:$0xff]   ;;  %v3353_v42 = vld [vmem:[%s4736_s1 + $0x4e8] ss:$16 sps:$4 sm:$0xff]  }
  0x8b   :  { %1795 = vmatpush1.bf16.msra.mxu0 %v3269_v44  ;;  %v3356_v44 = vld [vmem:[%s4736_s1 + $0x6e8] ss:$16 sps:$4 sm:$0xff]  }
  0x8c   :  { %1836 = vmatpush1.bf16.msra.mxu1 %v3272_v45  ;;  %1796 = vmatprep.subr.bf16.mxu0 %v3277_v46  ;;  %v3361_v45 = vld [vmem:[%s4736_s1 + $0x4cc] ss:$16 sps:$4 sm:$0xff]  }
  0x8d   :  { %1837 = vmatprep.subr.bf16.mxu1 %v3280_v61  ;;  %v3364_v46 = vld [vmem:[%s4736_s1 + $0x6cc] ss:$16 sps:$4 sm:$0xff]   ;;  %v3359_v61 = vld [vmem:[%s4736_s1 + $0x4c8] ss:$16 sps:$4 sm:$0xff]  }
  0x8f   :  { %1797 = vmatpush1.bf16.msra.mxu0 %v3275_v3  ;;  %v3362_v3 = vld [vmem:[%s4736_s1 + $0x6c8] ss:$16 sps:$4 sm:$0xff]  }
  0x90   :  { %1838 = vmatpush1.bf16.msra.mxu1 %v3278_v47  ;;  %1798 = vmatprep.subr.bf16.mxu0 %v3283_v48  ;;  %v3367_v47 = vld [vmem:[%s4736_s1 + $0x4ac] ss:$16 sps:$4 sm:$0xff]  }
  0x91   :  { %1839 = vmatprep.subr.bf16.mxu1 %v3286_v49  ;;  %v3370_v48 = vld [vmem:[%s4736_s1 + $0x6ac] ss:$16 sps:$4 sm:$0xff]   ;;  %v3365_v49 = vld [vmem:[%s4736_s1 + $0x4a8] ss:$16 sps:$4 sm:$0xff]  }
  0x93   :  { %1799 = vmatpush1.bf16.msra.mxu0 %v3281_v50  ;;  %v3376_v50 = vld [vmem:[%s4736_s1 + $0x68c] ss:$16 sps:$4 sm:$0xff]  }
  0x94   :  { %1840 = vmatpush1.bf16.msra.mxu1 %v3284_v51  ;;  %1800 = vmatprep.subr.bf16.mxu0 %v3289_v52  ;;  %v3379_v51 = vld [vmem:[%s4736_s1 + $0x46c] ss:$16 sps:$4 sm:$0xff]  }
  0x95   :  { %1841 = vmatprep.subr.bf16.mxu1 %v3292_v53  ;;  %v3382_v52 = vld [vmem:[%s4736_s1 + $0x66c] ss:$16 sps:$4 sm:$0xff]   ;;  %v3377_v53 = vld [vmem:[%s4736_s1 + $0x468] ss:$16 sps:$4 sm:$0xff]  }
  0x97   :  { %1801 = vmatpush1.bf16.msra.mxu0 %v3287_v54  ;;  %v3380_v54 = vld [vmem:[%s4736_s1 + $0x668] ss:$16 sps:$4 sm:$0xff]  }
  0x98   :  { %1842 = vmatpush1.bf16.msra.mxu1 %v3290_v55  ;;  %1802 = vmatprep.subr.bf16.mxu0 %v3295_v56  ;;  %v3385_v55 = vld [vmem:[%s4736_s1 + $0x44c] ss:$16 sps:$4 sm:$0xff]  }
  0x99   :  { %1843 = vmatprep.subr.bf16.mxu1 %v3298_v57  ;;  %v3388_v56 = vld [vmem:[%s4736_s1 + $0x64c] ss:$16 sps:$4 sm:$0xff]   ;;  %v3383_v57 = vld [vmem:[%s4736_s1 + $0x448] ss:$16 sps:$4 sm:$0xff]  }
  0x9b   :  { %1803 = vmatpush1.bf16.msra.mxu0 %v3293_v58  ;;  %v3386_v58 = vld [vmem:[%s4736_s1 + $0x648] ss:$16 sps:$4 sm:$0xff]  }
  0x9c   :  { %1844 = vmatpush1.bf16.msra.mxu1 %v3296_v59  ;;  %1804 = vmatprep.subr.bf16.mxu0 %v3301_v60  ;;  %v3391_v59 = vld [vmem:[%s4736_s1 + $0x42c] ss:$16 sps:$4 sm:$0xff]  }
  0x9d   :  { %1845 = vmatprep.subr.bf16.mxu1 %v3304_v62  ;;  %v3394_v60 = vld [vmem:[%s4736_s1 + $0x62c] ss:$16 sps:$4 sm:$0xff]   ;;  %v3389_v62 = vld [vmem:[%s4736_s1 + $0x428] ss:$16 sps:$4 sm:$0xff]  }
  0x9f   :  { %1805 = vmatpush1.bf16.msra.mxu0 %v3299_v63  ;;  %v3392_v63 = vld [vmem:[%s4736_s1 + $0x628] ss:$16 sps:$4 sm:$0xff]  }
  0xa0   :  { %1846 = vmatpush1.bf16.msra.mxu1 %v3302_v0  ;;  %1806 = vmatprep.subr.bf16.mxu0 %v3307_v1  ;;  %v3397_v0 = vld [vmem:[%s4736_s1 + $0x40c] ss:$16 sps:$4 sm:$0xff]  }
  0xa1   :  { %1847 = vmatprep.subr.bf16.mxu1 %v3310_v2  ;;  %v3400_v1 = vld [vmem:[%s4736_s1 + $0x60c] ss:$16 sps:$4 sm:$0xff]   ;;  %v3395_v2 = vld [vmem:[%s4736_s1 + $0x408] ss:$16 sps:$4 sm:$0xff]  }
  0xa3   :  { %1807 = vmatpush2.bf16.msra.mxu0 %v3305_v4  ;;  %v3398_v4 = vld [vmem:[%s4736_s1 + $0x608] ss:$16 sps:$4 sm:$0xff]  }
  0xa4   :  { %1848 = vmatpush2.bf16.msra.mxu1 %v3308_v5  ;;  %1808 = vmatprep.subr.bf16.mxu0 %v3313_v6  ;;  %v3403_v5 = vld [vmem:[%s4736_s1 + $0x5ec] ss:$16 sps:$4 sm:$0xff]  }
  0xa5   :  { %1849 = vmatprep.subr.bf16.mxu1 %v3316_v7  ;;  %v3406_v6 = vld [vmem:[%s4736_s1 + $0x7ec] ss:$16 sps:$4 sm:$0xff]   ;;  %v3401_v7 = vld [vmem:[%s4736_s1 + $0x5e8] ss:$16 sps:$4 sm:$0xff]  }
  0xa7   :  { %1809 = vmatpush2.bf16.msra.mxu0 %v3311_v8  ;;  %v3404_v8 = vld [vmem:[%s4736_s1 + $0x7e8] ss:$16 sps:$4 sm:$0xff]  }
  0xa8   :  { %1850 = vmatpush2.bf16.msra.mxu1 %v3314_v9  ;;  %1810 = vmatprep.subr.bf16.mxu0 %v3319_v10  ;;  %v3409_v9 = vld [vmem:[%s4736_s1 + $0x5cc] ss:$16 sps:$4 sm:$0xff]  }
  0xa9   :  { %1851 = vmatprep.subr.bf16.mxu1 %v3322_v11  ;;  %v3412_v10 = vld [vmem:[%s4736_s1 + $0x7cc] ss:$16 sps:$4 sm:$0xff]   ;;  %v3407_v11 = vld [vmem:[%s4736_s1 + $0x5c8] ss:$16 sps:$4 sm:$0xff]  }
  0xab   :  { %1811 = vmatpush2.bf16.msra.mxu0 %v3317_v12  ;;  %v3410_v12 = vld [vmem:[%s4736_s1 + $0x7c8] ss:$16 sps:$4 sm:$0xff]  }
  0xac   :  { %1852 = vmatpush2.bf16.msra.mxu1 %v3320_v13  ;;  %1812 = vmatprep.subr.bf16.mxu0 %v3325_v16  ;;  %v3415_v13 = vld [vmem:[%s4736_s1 + $0x5ac] ss:$16 sps:$4 sm:$0xff]  }
  0xad   :  { %1853 = vmatprep.subr.bf16.mxu1 %v3328_v17  ;;  %v3418_v16 = vld [vmem:[%s4736_s1 + $0x7ac] ss:$16 sps:$4 sm:$0xff]   ;;  %v3413_v17 = vld [vmem:[%s4736_s1 + $0x5a8] ss:$16 sps:$4 sm:$0xff]  }
  0xaf   :  { %1813 = vmatpush2.bf16.msra.mxu0 %v3323_v18  ;;  %v3416_v18 = vld [vmem:[%s4736_s1 + $0x7a8] ss:$16 sps:$4 sm:$0xff]  }
  0xb0   :  { %1854 = vmatpush2.bf16.msra.mxu1 %v3326_v19  ;;  %1814 = vmatprep.subr.bf16.mxu0 %v3331_v20  ;;  %v3421_v19 = vld [vmem:[%s4736_s1 + $0x58c] ss:$16 sps:$4 sm:$0xff]  }
  0xb1   :  { %1855 = vmatprep.subr.bf16.mxu1 %v3334_v21  ;;  %v3424_v20 = vld [vmem:[%s4736_s1 + $0x78c] ss:$16 sps:$4 sm:$0xff]   ;;  %v3419_v21 = vld [vmem:[%s4736_s1 + $0x588] ss:$16 sps:$4 sm:$0xff]  }
  0xb3   :  { %1815 = vmatpush2.bf16.msra.mxu0 %v3329_v24  ;;  %v3422_v24 = vld [vmem:[%s4736_s1 + $0x788] ss:$16 sps:$4 sm:$0xff]  }
  0xb4   :  { %1856 = vmatpush2.bf16.msra.mxu1 %v3332_v25  ;;  %1816 = vmatprep.subr.bf16.mxu0 %v3337_v26  ;;  %v3427_v25 = vld [vmem:[%s4736_s1 + $0x56c] ss:$16 sps:$4 sm:$0xff]  }
  0xb5   :  { %1857 = vmatprep.subr.bf16.mxu1 %v3340_v27  ;;  %v3430_v26 = vld [vmem:[%s4736_s1 + $0x76c] ss:$16 sps:$4 sm:$0xff]   ;;  %v3425_v27 = vld [vmem:[%s4736_s1 + $0x568] ss:$16 sps:$4 sm:$0xff]  }
  0xb7   :  { %1817 = vmatpush2.bf16.msra.mxu0 %v3335_v30  ;;  %v3428_v30 = vld [vmem:[%s4736_s1 + $0x768] ss:$16 sps:$4 sm:$0xff]  }
  0xb8   :  { %1858 = vmatpush2.bf16.msra.mxu1 %v3338_v31  ;;  %1818 = vmatprep.subr.bf16.mxu0 %v3343_v32  ;;  %v3433_v31 = vld [vmem:[%s4736_s1 + $0x54c] ss:$16 sps:$4 sm:$0xff]  }
  0xb9   :  { %1859 = vmatprep.subr.bf16.mxu1 %v3346_v33  ;;  %v3436_v32 = vld [vmem:[%s4736_s1 + $0x74c] ss:$16 sps:$4 sm:$0xff]   ;;  %v3431_v33 = vld [vmem:[%s4736_s1 + $0x548] ss:$16 sps:$4 sm:$0xff]  }
  0xbb   :  { %1819 = vmatpush2.bf16.msra.mxu0 %v3341_v34  ;;  %v3434_v34 = vld [vmem:[%s4736_s1 + $0x748] ss:$16 sps:$4 sm:$0xff]  }
  0xbc   :  { %1860 = vmatpush2.bf16.msra.mxu1 %v3344_v37  ;;  %1820 = vmatprep.subr.bf16.mxu0 %v3349_v38  ;;  %v3439_v37 = vld [vmem:[%s4736_s1 + $0x52c] ss:$16 sps:$4 sm:$0xff]  }
  0xbd   :  { %1861 = vmatprep.subr.bf16.mxu1 %v3352_v14  ;;  %v3442_v38 = vld [vmem:[%s4736_s1 + $0x72c] ss:$16 sps:$4 sm:$0xff]   ;;  %v3437_v14 = vld [vmem:[%s4736_s1 + $0x528] ss:$16 sps:$4 sm:$0xff]  }
  0xbf   :  { %1821 = vmatpush2.bf16.msra.mxu0 %v3347_v15  ;;  %v3440_v15 = vld [vmem:[%s4736_s1 + $0x728] ss:$16 sps:$4 sm:$0xff]  }
  0xc0   :  { %1862 = vmatpush2.bf16.msra.mxu1 %v3350_v39  ;;  %1872 = vmatprep.subr.bf16.mxu0 %v3355_v40  ;;  %v3445_v39 = vld [vmem:[%s4736_s1 + $0x50c] ss:$16 sps:$4 sm:$0xff]  }
  0xc1   :  { %1913 = vmatprep.subr.bf16.mxu1 %v3358_v41  ;;  %v3448_v40 = vld [vmem:[%s4736_s1 + $0x70c] ss:$16 sps:$4 sm:$0xff]   ;;  %v3443_v41 = vld [vmem:[%s4736_s1 + $0x508] ss:$16 sps:$4 sm:$0xff]  }
  0xc2   :  { %1823 = vmatmul.mubr.bf16.vlgmr.msra.gmra.mxu0 %v3838_v22  ;;  %v3368_v22 = vld [vmem:[%s4736_s1 + $0x6a8] ss:$16 sps:$4 sm:$0xff]  }
  0xc3   :  { %1864 = vmatmul.mubr.bf16.vlgmr.msra.gmra.mxu1 %v3840_v23  ;;  %1873 = vmatpush1.bf16.msra.mxu0 %v3353_v42  ;;  %v3373_v23 = vld [vmem:[%s4736_s1 + $0x48c] ss:$16 sps:$4 sm:$0xff]   ;;  %v3446_v42 = vld [vmem:[%s4736_s1 + $0x708] ss:$16 sps:$4 sm:$0xff]  }
  0xc4   :  { %1914 = vmatpush1.bf16.msra.mxu1 %v3356_v44  ;;  %1874 = vmatprep.subr.bf16.mxu0 %v3361_v45  ;;  %v3451_v44 = vld [vmem:[%s4738_s4 + $0x74] ss:$8 sps:$4 sm:$0xff]   ;;  %v3449_v45 = vld [vmem:[%s4738_s4 + $0x70] ss:$8 sps:$4 sm:$0xff]  }
  0xc5   :  { %1915 = vmatprep.subr.bf16.mxu1 %v3364_v46  ;;  %1904 = vmatprep.mubr.bf16.mxu0 %v3854_v28  ;;  %v3371_v28 = vld [vmem:[%s4736_s1 + $0x488] ss:$16 sps:$4 sm:$0xff]   ;;  %v3454_v46 = vld [vmem:[%s4738_s4 + $0x64] ss:$8 sps:$4 sm:$0xff]  }
  0xc6   :  { %1945 = vmatprep.mubr.bf16.mxu1 %v3856_v29  ;;  %v3374_v29 = vld [vmem:[%s4736_s1 + $0x688] ss:$16 sps:$4 sm:$0xff]  }
  0xc7   :  { %1875 = vmatpush1.bf16.msra.mxu0 %v3359_v61 }
  0xc8   :  { %1916 = vmatpush1.bf16.msra.mxu1 %v3362_v3  ;;  %1876 = vmatprep.subr.bf16.mxu0 %v3367_v47 }
  0xc9   :  { %1917 = vmatprep.subr.bf16.mxu1 %v3370_v48  ;;  %v3452_v48 = vld [vmem:[%s4738_s4 + $0x60] ss:$8 sps:$4 sm:$0xff]  }
  0xcb   :  { %1877 = vmatpush1.bf16.msra.mxu0 %v3365_v49 }
  0xcc   :  { %1918 = vmatpush1.bf16.msra.mxu1 %v3368_v22  ;;  %1878 = vmatprep.subr.bf16.mxu0 %v3373_v23  ;;  %v3457_v23 = vld [vmem:[%s4738_s4 + $0x54] ss:$8 sps:$4 sm:$0xff]  }
  0xcd   :  { %1919 = vmatprep.subr.bf16.mxu1 %v3376_v50 }
  0xcf   :  { %1879 = vmatpush1.bf16.msra.mxu0 %v3371_v28 }
  0xd0   :  { %1920 = vmatpush1.bf16.msra.mxu1 %v3374_v29  ;;  %1880 = vmatprep.subr.bf16.mxu0 %v3379_v51  ;;  %v3460_v51 = vld [vmem:[%s4738_s4 + $0x44] ss:$8 sps:$4 sm:$0xff]  }
  0xd1   :  { %1921 = vmatprep.subr.bf16.mxu1 %v3382_v52  ;;  %v3497_v52 = vld [vmem:[%s4738_s4 + $0x170] ss:$8 sps:$4 sm:$0xff]  }
  0xd3   :  { %1881 = vmatpush1.bf16.msra.mxu0 %v3377_v53  ;;  %v3499_v53 = vld [vmem:[%s4738_s4 + $0x174] ss:$8 sps:$4 sm:$0xff]  }
  0xd4   :  { %1922 = vmatpush1.bf16.msra.mxu1 %v3380_v54  ;;  %1882 = vmatprep.subr.bf16.mxu0 %v3385_v55  ;;  %v3502_v54 = vld [vmem:[%s4738_s4 + $0x164] ss:$8 sps:$4 sm:$0xff]   ;;  %v3458_v55 = vld [vmem:[%s4738_s4 + $0x40] ss:$8 sps:$4 sm:$0xff]  }
  0xd5   :  { %1923 = vmatprep.subr.bf16.mxu1 %v3388_v56  ;;  %v3500_v56 = vld [vmem:[%s4738_s4 + $0x160] ss:$8 sps:$4 sm:$0xff]  }
  0xd7   :  { %1883 = vmatpush1.bf16.msra.mxu0 %v3383_v57  ;;  %v3463_v57 = vld [vmem:[%s4738_s4 + $0x34] ss:$8 sps:$4 sm:$0xff]  }
  0xd8   :  { %1924 = vmatpush1.bf16.msra.mxu1 %v3386_v58  ;;  %1884 = vmatprep.subr.bf16.mxu0 %v3391_v59  ;;  %v3505_v58 = vld [vmem:[%s4738_s4 + $0x154] ss:$8 sps:$4 sm:$0xff]   ;;  %v3461_v59 = vld [vmem:[%s4738_s4 + $0x30] ss:$8 sps:$4 sm:$0xff]  }
  0xd9   :  { %1925 = vmatprep.subr.bf16.mxu1 %v3394_v60  ;;  %v3503_v60 = vld [vmem:[%s4738_s4 + $0x150] ss:$8 sps:$4 sm:$0xff]  }
  0xdb   :  { %1885 = vmatpush1.bf16.msra.mxu0 %v3389_v62  ;;  %v3466_v62 = vld [vmem:[%s4738_s4 + $0x24] ss:$8 sps:$4 sm:$0xff]  }
  0xdc   :  { %1926 = vmatpush1.bf16.msra.mxu1 %v3392_v63  ;;  %1886 = vmatprep.subr.bf16.mxu0 %v3397_v0  ;;  %v3508_v63 = vld [vmem:[%s4738_s4 + $0x144] ss:$8 sps:$4 sm:$0xff]   ;;  %v3464_v0 = vld [vmem:[%s4738_s4 + $0x20] ss:$8 sps:$4 sm:$0xff]  }
  0xdd   :  { %1927 = vmatprep.subr.bf16.mxu1 %v3400_v1  ;;  %v3506_v1 = vld [vmem:[%s4738_s4 + $0x140] ss:$8 sps:$4 sm:$0xff]  }
  0xdf   :  { %1887 = vmatpush1.bf16.msra.mxu0 %v3395_v2  ;;  %v3469_v2 = vld [vmem:[%s4738_s4 + $0x14] ss:$8 sps:$4 sm:$0xff]  }
  0xe0   :  { %1928 = vmatpush1.bf16.msra.mxu1 %v3398_v4  ;;  %1888 = vmatprep.subr.bf16.mxu0 %v3403_v5  ;;  %v3511_v4 = vld [vmem:[%s4738_s4 + $0x134] ss:$8 sps:$4 sm:$0xff]   ;;  %v3467_v5 = vld [vmem:[%s4738_s4 + $0x10] ss:$8 sps:$4 sm:$0xff]  }
  0xe1   :  { %1929 = vmatprep.subr.bf16.mxu1 %v3406_v6  ;;  %v3509_v6 = vld [vmem:[%s4738_s4 + $0x130] ss:$8 sps:$4 sm:$0xff]  }
  0xe3   :  { %1889 = vmatpush2.bf16.msra.mxu0 %v3401_v7  ;;  %v3472_v7 = vld [vmem:[%s4738_s4 + $0x4] ss:$8 sps:$4 sm:$0xff]  }
  0xe4   :  { %1930 = vmatpush2.bf16.msra.mxu1 %v3404_v8  ;;  %1890 = vmatprep.subr.bf16.mxu0 %v3409_v9  ;;  %v3514_v8 = vld [vmem:[%s4738_s4 + $0x124] ss:$8 sps:$4 sm:$0xff]   ;;  %v3470_v9 = vld [vmem:[%s4738_s4] ss:$8 sps:$4 sm:$0xff]  }
  0xe5   :  { %1931 = vmatprep.subr.bf16.mxu1 %v3412_v10  ;;  %v3512_v10 = vld [vmem:[%s4738_s4 + $0x120] ss:$8 sps:$4 sm:$0xff]  }
  0xe7   :  { %1891 = vmatpush2.bf16.msra.mxu0 %v3407_v11  ;;  %v3475_v11 = vld [vmem:[%s4738_s4 + $0xf4] ss:$8 sps:$4 sm:$0xff]  }
  0xe8   :  { %1932 = vmatpush2.bf16.msra.mxu1 %v3410_v12  ;;  %1892 = vmatprep.subr.bf16.mxu0 %v3415_v13  ;;  %v3517_v12 = vld [vmem:[%s4738_s4 + $0x114] ss:$8 sps:$4 sm:$0xff]   ;;  %v3473_v13 = vld [vmem:[%s4738_s4 + $0xf0] ss:$8 sps:$4 sm:$0xff]  }
  0xe9   :  { %1933 = vmatprep.subr.bf16.mxu1 %v3418_v16  ;;  %v3515_v16 = vld [vmem:[%s4738_s4 + $0x110] ss:$8 sps:$4 sm:$0xff]  }
  0xeb   :  { %1893 = vmatpush2.bf16.msra.mxu0 %v3413_v17  ;;  %v3478_v17 = vld [vmem:[%s4738_s4 + $0xe4] ss:$8 sps:$4 sm:$0xff]  }
  0xec   :  { %1934 = vmatpush2.bf16.msra.mxu1 %v3416_v18  ;;  %1894 = vmatprep.subr.bf16.mxu0 %v3421_v19  ;;  %v3520_v18 = vld [vmem:[%s4738_s4 + $0x104] ss:$8 sps:$4 sm:$0xff]   ;;  %v3476_v19 = vld [vmem:[%s4738_s4 + $0xe0] ss:$8 sps:$4 sm:$0xff]  }
  0xed   :  { %1935 = vmatprep.subr.bf16.mxu1 %v3424_v20  ;;  %v3518_v20 = vld [vmem:[%s4738_s4 + $0x100] ss:$8 sps:$4 sm:$0xff]  }
  0xef   :  { %1895 = vmatpush2.bf16.msra.mxu0 %v3419_v21  ;;  %v3481_v21 = vld [vmem:[%s4738_s4 + $0xd4] ss:$8 sps:$4 sm:$0xff]  }
  0xf0   :  { %1936 = vmatpush2.bf16.msra.mxu1 %v3422_v24  ;;  %1896 = vmatprep.subr.bf16.mxu0 %v3427_v25  ;;  %v3523_v24 = vld [vmem:[%s4738_s4 + $0x1f4] ss:$8 sps:$4 sm:$0xff]   ;;  %v3479_v25 = vld [vmem:[%s4738_s4 + $0xd0] ss:$8 sps:$4 sm:$0xff]  }
  0xf1   :  { %1937 = vmatprep.subr.bf16.mxu1 %v3430_v26  ;;  %v3521_v26 = vld [vmem:[%s4738_s4 + $0x1f0] ss:$8 sps:$4 sm:$0xff]  }
  0xf3   :  { %1897 = vmatpush2.bf16.msra.mxu0 %v3425_v27  ;;  %v3484_v27 = vld [vmem:[%s4738_s4 + $0xc4] ss:$8 sps:$4 sm:$0xff]  }
  0xf4   :  { %1938 = vmatpush2.bf16.msra.mxu1 %v3428_v30  ;;  %1898 = vmatprep.subr.bf16.mxu0 %v3433_v31  ;;  %v3526_v30 = vld [vmem:[%s4738_s4 + $0x1e4] ss:$8 sps:$4 sm:$0xff]   ;;  %v3482_v31 = vld [vmem:[%s4738_s4 + $0xc0] ss:$8 sps:$4 sm:$0xff]  }
  0xf5   :  { %1939 = vmatprep.subr.bf16.mxu1 %v3436_v32  ;;  %v3524_v32 = vld [vmem:[%s4738_s4 + $0x1e0] ss:$8 sps:$4 sm:$0xff]  }
  0xf7   :  { %1899 = vmatpush2.bf16.msra.mxu0 %v3431_v33  ;;  %v3487_v33 = vld [vmem:[%s4738_s4 + $0xb4] ss:$8 sps:$4 sm:$0xff]  }
  0xf8   :  { %1940 = vmatpush2.bf16.msra.mxu1 %v3434_v34  ;;  %1900 = vmatprep.subr.bf16.mxu0 %v3439_v37  ;;  %v3529_v34 = vld [vmem:[%s4738_s4 + $0x1d4] ss:$8 sps:$4 sm:$0xff]   ;;  %v3485_v37 = vld [vmem:[%s4738_s4 + $0xb0] ss:$8 sps:$4 sm:$0xff]  }
  0xf9   :  { %1941 = vmatprep.subr.bf16.mxu1 %v3442_v38  ;;  %v3527_v38 = vld [vmem:[%s4738_s4 + $0x1d0] ss:$8 sps:$4 sm:$0xff]  }
  0xfb   :  { %1901 = vmatpush2.bf16.msra.mxu0 %v3437_v14  ;;  %v3490_v14 = vld [vmem:[%s4738_s4 + $0xa4] ss:$8 sps:$4 sm:$0xff]  }
  0xfc   :  { %1942 = vmatpush2.bf16.msra.mxu1 %v3440_v15  ;;  %1902 = vmatprep.subr.bf16.mxu0 %v3445_v39  ;;  %v3532_v15 = vld [vmem:[%s4738_s4 + $0x1c4] ss:$8 sps:$4 sm:$0xff]   ;;  %v3488_v39 = vld [vmem:[%s4738_s4 + $0xa0] ss:$8 sps:$4 sm:$0xff]  }
  0xfd   :  { %1943 = vmatprep.subr.bf16.mxu1 %v3448_v40  ;;  %v3530_v40 = vld [vmem:[%s4738_s4 + $0x1c0] ss:$8 sps:$4 sm:$0xff]  }
  0xff   :  { %1903 = vmatpush2.bf16.msra.mxu0 %v3443_v41  ;;  %v3493_v41 = vld [vmem:[%s4738_s4 + $0x94] ss:$8 sps:$4 sm:$0xff]  }
 0x100   :  { %1944 = vmatpush2.bf16.msra.mxu1 %v3446_v42  ;;  %2398 = vmatprep.subr.bf16.mxu0 %v3451_v44  ;;  %v3491_v42 = vld [vmem:[%s4738_s4 + $0x90] ss:$8 sps:$4 sm:$0xff]   ;;  %v3496_v44 = vld [vmem:[%s4738_s4 + $0x84] ss:$8 sps:$4 sm:$0xff]  }
 0x101   :  { %2439 = vmatprep.subr.bf16.mxu1 %v3499_v53 }
 0x102   :  { %v1660_v61 = vpop.f32.mrf.mxu0  ;;  %1905 = vmatmul.mubr.bf16.vlgmr.msra.gmra.mxu0 %v4044_v35 }
 0x103   :  { %v1701_v3 = vpop.f32.mrf.mxu1  ;;  %1946 = vmatmul.mubr.bf16.vlgmr.msra.gmra.mxu1 %v4048_v36  ;;  %2399 = vmatpush1.bf16.msra.mxu0 %v3449_v45  ;;  %v3455_v36 = vld [vmem:[%s4738_s4 + $0x50] ss:$8 sps:$4 sm:$0xff]   ;;  %v3494_v45 = vld [vmem:[%s4738_s4 + $0x80] ss:$8 sps:$4 sm:$0xff]  }
 0x104   :  { %v4447_v47 = vadd.f32 %v1701_v3, %v1660_v61  ;;  %v4452_v49 = vpop.f32.mrf.mxu0  ;;  %2400 = vmatprep.subr.bf16.mxu0 %v3454_v46  ;;  %2440 = vmatpush1.bf16.msra.mxu1 %v3497_v52  ;;  %v4613_v46 = vsub.s32 0, %v3734_v43  ;;  %v4618_v61 = vld [vmem:[%s4739_s2] sm:$0xf]  ;;  %v3535_v3 = vld [vmem:[%s4738_s4 + $0x1b4] ss:$8 sps:$4 sm:$0xff]  }
 0x105   :  { %v4454_v22 = vpop.f32.mrf.mxu1  ;;  %2441 = vmatprep.subr.bf16.mxu1 %v3502_v54  ;;  %v3538_v54 = vld [vmem:[%s4738_s4 + $0x1a4] ss:$8 sps:$4 sm:$0xff]  }
 0x106   :  { %v1664_v50 = vpop.f32.mrf.mxu0 }
 0x107   :  { %v1705_v35 = vpop.f32.mrf.mxu1  ;;  %2401 = vmatpush1.bf16.msra.mxu0 %v3452_v48  ;;  %v4624_v48 = vsub.s32 1, %v3734_v43 }
 0x108   :  { %v1665_v28 = vpop.f32.mrf.mxu0  ;;  %2402 = vmatprep.subr.bf16.mxu0 %v3457_v23  ;;  %2442 = vmatpush1.bf16.msra.mxu1 %v3500_v56  ;;  %v3533_v23 = vld [vmem:[%s4738_s4 + $0x1b0] ss:$8 sps:$4 sm:$0xff]  }
 0x109   :  { %v1706_v29 = vpop.f32.mrf.mxu1  ;;  %2443 = vmatprep.subr.bf16.mxu1 %v3505_v58  ;;  %v1704_v28 = vadd.f32 %v4454_v22, %v4452_v49  ;;  %v1963_v49 = vrot.slane %v4618_v61, %v4624_v48 }
 0x10b   :  { %2403 = vmatpush1.bf16.msra.mxu0 %v3455_v36  ;;  %v4632_v36 = vld [vmem:[%s4740_s3] sm:$0xf] }
 0x10c   :  { %2404 = vmatprep.subr.bf16.mxu0 %v3460_v51  ;;  %2444 = vmatpush1.bf16.msra.mxu1 %v3503_v60  ;;  %v1959_v51 = vrot.slane %v4618_v61, %v4613_v46  ;;  %v1985_v56 = vrot.slane %v4632_v36, %v4613_v46 }
 0x10d   :  { %2445 = vmatprep.subr.bf16.mxu1 %v3508_v63 }
 0x10f   :  { %2405 = vmatpush1.bf16.msra.mxu0 %v3458_v55 }
 0x110   :  { %2406 = vmatprep.subr.bf16.mxu0 %v3463_v57  ;;  %2446 = vmatpush1.bf16.msra.mxu1 %v3506_v1  ;;  %v3541_v1 = vld [vmem:[%s4738_s4 + $0x194] ss:$8 sps:$4 sm:$0xff]  }
 0x111   :  { %2447 = vmatprep.subr.bf16.mxu1 %v3511_v4 }
 0x113   :  { %2407 = vmatpush1.bf16.msra.mxu0 %v3461_v59 }
 0x114   :  { %2408 = vmatprep.subr.bf16.mxu0 %v3466_v62  ;;  %2448 = vmatpush1.bf16.msra.mxu1 %v3509_v6  ;;  %v1989_v62 = vrot.slane %v4632_v36, %v4624_v48 }
 0x115   :  { %2449 = vmatprep.subr.bf16.mxu1 %v3514_v8  ;;  %v3544_v8 = vld [vmem:[%s4738_s4 + $0x184] ss:$8 sps:$4 sm:$0xff]  }
 0x117   :  { %2409 = vmatpush1.bf16.msra.mxu0 %v3464_v0 }
 0x118   :  { %2410 = vmatprep.subr.bf16.mxu0 %v3469_v2  ;;  %2450 = vmatpush1.bf16.msra.mxu1 %v3512_v10  ;;  %v3542_v10 = vld [vmem:[%s4738_s4 + $0x180] ss:$8 sps:$4 sm:$0xff]  }
 0x119   :  { %2451 = vmatprep.subr.bf16.mxu1 %v3517_v12 }
 0x11b   :  { %2411 = vmatpush1.bf16.msra.mxu0 %v3467_v5  ;;  %v3539_v5 = vld [vmem:[%s4738_s4 + $0x190] ss:$8 sps:$4 sm:$0xff]  }
 0x11c   :  { %2412 = vmatprep.subr.bf16.mxu0 %v3472_v7  ;;  %2452 = vmatpush1.bf16.msra.mxu1 %v3515_v16 }
 0x11d   :  { %2453 = vmatprep.subr.bf16.mxu1 %v3520_v18 }
 0x11f   :  { %2413 = vmatpush1.bf16.msra.mxu0 %v3470_v9 }
 0x120   :  { %2414 = vmatprep.subr.bf16.mxu0 %v3475_v11  ;;  %2454 = vmatpush1.bf16.msra.mxu1 %v3518_v20 }
 0x121   :  { %2455 = vmatprep.subr.bf16.mxu1 %v3523_v24 }
 0x123   :  { %2415 = vmatpush2.bf16.msra.mxu0 %v3473_v13 }
 0x124   :  { %2416 = vmatprep.subr.bf16.mxu0 %v3478_v17  ;;  %2456 = vmatpush2.bf16.msra.mxu1 %v3521_v26  ;;  %v3545_v26 = vld [vmem:[%s4741_s7 + $0x78] sm:$0xff]  }
 0x125   :  { %2457 = vmatprep.subr.bf16.mxu1 %v3526_v30  ;;  %v3547_v30 = vld [vmem:[%s4741_s7 + $0x70] sm:$0xff]  }
 0x127   :  { %2417 = vmatpush2.bf16.msra.mxu0 %v3476_v19 }
 0x128   :  { %2418 = vmatprep.subr.bf16.mxu0 %v3481_v21  ;;  %2458 = vmatpush2.bf16.msra.mxu1 %v3524_v32  ;;  %v3549_v32 = vld [vmem:[%s4741_s7 + $0x68] sm:$0xff]  }
 0x129   :  { %2459 = vmatprep.subr.bf16.mxu1 %v3529_v34  ;;  %v3551_v34 = vld [vmem:[%s4741_s7 + $0x60] sm:$0xff]  }
 0x12b   :  { %2419 = vmatpush2.bf16.msra.mxu0 %v3479_v25 }
 0x12c   :  { %2420 = vmatprep.subr.bf16.mxu0 %v3484_v27  ;;  %2460 = vmatpush2.bf16.msra.mxu1 %v3527_v38  ;;  %v3546_v27 = vld [vmem:[%s4741_s7 + $0x38] sm:$0xff]  }
 0x12d   :  { %2461 = vmatprep.subr.bf16.mxu1 %v3532_v15  ;;  %v3553_v38 = vld [vmem:[%s4741_s7 + $0x58] sm:$0xff]   ;;  %v1966_v15 = vsub.s32 2, %v3734_v43 }
 0x12f   :  { %2421 = vmatpush2.bf16.msra.mxu0 %v3482_v31  ;;  %v3548_v31 = vld [vmem:[%s4741_s7 + $0x30] sm:$0xff]  }
 0x130   :  { %2422 = vmatprep.subr.bf16.mxu0 %v3487_v33  ;;  %2462 = vmatpush2.bf16.msra.mxu1 %v3530_v40  ;;  %v3550_v33 = vld [vmem:[%s4741_s7 + $0x28] sm:$0xff]  }
 0x131   :  { %2463 = vmatprep.subr.bf16.mxu1 %v3535_v3 }
 0x133   :  { %2423 = vmatpush2.bf16.msra.mxu0 %v3485_v37  ;;  %v3552_v37 = vld [vmem:[%s4741_s7 + $0x20] sm:$0xff]  }
 0x134   :  { %2424 = vmatprep.subr.bf16.mxu0 %v3490_v14  ;;  %2464 = vmatpush2.bf16.msra.mxu1 %v3533_v23  ;;  %v3554_v14 = vld [vmem:[%s4741_s7 + $0x18] sm:$0xff]  }
 0x135   :  { %2465 = vmatprep.subr.bf16.mxu1 %v3538_v54 }
 0x137   :  { %2425 = vmatpush2.bf16.msra.mxu0 %v3488_v39  ;;  %v1970_v39 = vsub.s32 3, %v3734_v43 }
 0x138   :  { %2426 = vmatprep.subr.bf16.mxu0 %v3493_v41 }
 0x139   :  { %v1997_v43 = vrot.slane %v4632_v36, %v1970_v39 }
 0x13b   :  { %2427 = vmatpush2.bf16.msra.mxu0 %v3491_v42 }
 0x13c   :  { %2428 = vmatprep.subr.bf16.mxu0 %v3496_v44 }
 0x13f   :  { %2429 = vmatpush2.bf16.msra.mxu0 %v3494_v45  ;;  %v1967_v45 = vrot.slane %v4618_v61, %v1966_v15 }
 0x140   :  { %3040 = vmatprep.subr.bf16.mxu0 %v3545_v26 }
 0x142   :  { %v1742_v50 = vpop.f32.mrf.mxu0 }
 0x143   :  { %v1783_v35 = vpop.f32.mrf.mxu1  ;;  %v1743_v29 = vadd.f32 %v1742_v50, %v4447_v47  ;;  %v3536_v47 = vld [vmem:[%s4738_s4 + $0x1a0] ss:$8 sps:$4 sm:$0xff]  }
 0x144   :  { %v1744_v52 = vpop.f32.mrf.mxu0  ;;  %2466 = vmatpush2.bf16.msra.mxu1 %v3536_v47 }
 0x145   :  { %v1785_v53 = vpop.f32.mrf.mxu1  ;;  %v1784_v55 = vadd.f32 %v1783_v35, %v1743_v29  ;;  %v1745_v57 = vadd.f32 %v1744_v52, %v1704_v28  ;;  %2467 = vmatprep.subr.bf16.mxu1 %v3541_v1  ;;  %v1993_v35 = vrot.slane %v4632_v36, %v1966_v15  ;;  %v1971_v29 = vrot.slane %v4618_v61, %v1970_v39  ;;  %v3555_v61 = vld [vmem:[%s4741_s7 + $0x50] sm:$0xff]   ;;  %v3557_v1 = vld [vmem:[%s4741_s7 + $0x48] sm:$0xff]  }
 0x146   :  { %v1746_v22 = vpop.f32.mrf.mxu0  ;;  %v3556_v36 = vld [vmem:[%s4741_s7 + $0x10] sm:$0xff]  }
 0x147   :  { %v1787_v58 = vpop.f32.mrf.mxu1  ;;  %v1976_v59 = vmul.f32 %v1959_v51, %v1784_v55  ;;  %v1786_v60 = vadd.f32 %v1785_v53, %v1745_v57 }
 0x148   :  { %v1747_v63 = vpop.f32.mrf.mxu0  ;;  %2468 = vmatpush2.bf16.msra.mxu1 %v3539_v5  ;;  %v3559_v5 = vld [vmem:[%s4741_s7 + $0x40] sm:$0xff]  }
 0x149   :  { %v1788_v0 = vpop.f32.mrf.mxu1  ;;  %v2002_v2 = vadd.f32 %v1985_v56, %v1976_v59  ;;  %v1977_v4 = vmul.f32 %v1963_v49, %v1786_v60  ;;  %2469 = vmatprep.subr.bf16.mxu1 %v3544_v8  ;;  %v2494_v8 = vld [vmem:[%s4743_s6] sm:$0x3] }
 0x14b   :  { %v2003_v6 = vadd.f32 %v1989_v62, %v1977_v4  ;;  %v2006_v7 = vmax.f32 %v2002_v2, 0.0  ;;  %v3558_v2 = vld [vmem:[%s4741_s7 + $0x8] sm:$0xff]  }
 0x14c   :  { %2470 = vmatpush2.bf16.msra.mxu1 %v3542_v10 }
 0x14d   :  { %v2007_v9 = vmax.f32 %v2003_v6, 0.0  ;;  %v2010_v12 = vpack.c.bf16 %v2006_v7, %v2006_v7  ;;  %v3560_v6 = vld [vmem:[%s4741_s7] sm:$0xff]  }
 0x14e   :  { %v2480_v7 = vld [vmem:[%s4742_s5] sm:$0x3] }
 0x14f   :  { %v2011_v11 = vpack.c.bf16 %v2007_v9, %v2007_v9  ;;  %v2485_v9 = vrot.slane %v2480_v7, %v4613_v46 }
 0x151   :  { %2430 = vmatprep.mubr.bf16.mxu0 %v2011_v11 }
 0x152   :  { %2431 = vmatmul.mubr.bf16.vlgmr.msra.gmra.mxu0 %v2010_v12  ;;  %v2499_v12 = vrot.slane %v2494_v8, %v4613_v46 }
 0x153   :  { %3041 = vmatpush3.bf16.msra.mxu0 %v3546_v27 }
 0x154   :  { %3042 = vmatprep.subr.bf16.mxu0 %v3547_v30 }
 0x157   :  { %3043 = vmatpush3.bf16.msra.mxu0 %v3548_v31 }
 0x158   :  { %3044 = vmatprep.subr.bf16.mxu0 %v3549_v32 }
 0x15b   :  { %3045 = vmatpush3.bf16.msra.mxu0 %v3550_v33 }
 0x15c   :  { %3046 = vmatprep.subr.bf16.mxu0 %v3551_v34  ;;  %v3038_v34 = vld [vmem:[%s4744_s8] ss:$0 sm:$0xff] }
 0x15f   :  { %3047 = vmatpush3.bf16.msra.mxu0 %v3552_v37 }
 0x160   :  { %3048 = vmatprep.subr.bf16.mxu0 %v3553_v38 }
 0x163   :  { %3049 = vmatpush3.bf16.msra.mxu0 %v3554_v14 }
 0x164   :  { %3050 = vmatprep.subr.bf16.mxu0 %v3555_v61 }
 0x167   :  { %3051 = vmatpush3.bf16.msra.mxu0 %v3556_v36 }
 0x168   :  { %3052 = vmatprep.subr.bf16.mxu0 %v3557_v1 }
 0x16b   :  { %3053 = vmatpush3.bf16.msra.mxu0 %v3558_v2 }
 0x16c   :  { %3054 = vmatprep.subr.bf16.mxu0 %v3559_v5 }
 0x16f   :  { %3055 = vmatpush3.bf16.msra.mxu0 %v3560_v6 }
 0x182   :  { %v1824_v13 = vpop.f32.mrf.mxu0 }
 0x183   :  { %v1865_v16 = vpop.f32.mrf.mxu1 }
 0x184   :  { %v1866_v17 = vadd.f32 %v1865_v16, %v1824_v13  ;;  %v1826_v18 = vpop.f32.mrf.mxu0  ;;  %v2489_v13 = vrot.slane %v2480_v7, %v4624_v48 }
 0x185   :  { %v1867_v19 = vpop.f32.mrf.mxu1 }
 0x186   :  { %v1828_v20 = vpop.f32.mrf.mxu0  ;;  %v1868_v42 = vadd.f32 %v1867_v19, %v1826_v18  ;;  %v2503_v19 = vrot.slane %v2494_v8, %v4624_v48  ;;  %v3039_v48 = vld [vmem:[%s4745_s9] ss:$0 sm:$0xff] }
 0x187   :  { %v1869_v21 = vpop.f32.mrf.mxu1 }
 0x188   :  { %v1829_v24 = vpop.f32.mrf.mxu0 }
 0x189   :  { %v1870_v25 = vpop.f32.mrf.mxu1 }
 0x1c2   :  { %v1906_v40 = vpop.f32.mrf.mxu0 }
 0x1c3   :  { %v1947_v41 = vpop.f32.mrf.mxu1  ;;  %v1907_v44 = vadd.f32 %v1906_v40, %v1866_v17 }
 0x1c4   :  { %v1908_v3 = vpop.f32.mrf.mxu0 }
 0x1c5   :  { %v1949_v23 = vpop.f32.mrf.mxu1  ;;  %v1948_v50 = vadd.f32 %v1947_v41, %v1907_v44  ;;  %v1909_v28 = vadd.f32 %v1908_v3, %v1868_v42 }
 0x1c6   :  { %v1910_v51 = vpop.f32.mrf.mxu0 }
 0x1c7   :  { %v1951_v52 = vpop.f32.mrf.mxu1  ;;  %v1978_v53 = vmul.f32 %v1967_v45, %v1948_v50  ;;  %v1950_v54 = vadd.f32 %v1949_v23, %v1909_v28 }
 0x1c8   :  { %v1911_v55 = vpop.f32.mrf.mxu0 }
 0x1c9   :  { %v1952_v56 = vpop.f32.mrf.mxu1  ;;  %v2004_v57 = vadd.f32 %v1993_v35, %v1978_v53  ;;  %v1979_v49 = vmul.f32 %v1971_v29, %v1950_v54 }
 0x1cb   :  { %v2005_v47 = vadd.f32 %v1997_v43, %v1979_v49  ;;  %v2008_v22 = vmax.f32 %v2004_v57, 0.0 }
 0x1cd   :  { %v2009_v58 = vmax.f32 %v2005_v47, 0.0  ;;  %v2012_v60 = vpack.c.bf16 %v2008_v22, %v2008_v22 }
 0x1cf   :  { %v2013_v59 = vpack.c.bf16 %v2009_v58, %v2009_v58 }
 0x1d1   :  { %2471 = vmatprep.mubr.bf16.mxu1 %v2013_v59 }
 0x1d2   :  { %2472 = vmatmul.mubr.bf16.vlgmr.msra.gmra.mxu1 %v2012_v60 }
 0x212   :  { %v2432_v62 = vpop.f32.mrf.mxu0 }
 0x214   :  { %v2434_v63 = vpop.f32.mrf.mxu0 }
 0x216   :  { %v2436_v0 = vpop.f32.mrf.mxu0 }
 0x218   :  { %v2437_v4 = vpop.f32.mrf.mxu0 }
 0x292   :  { %v2473_v10 = vpop.f32.mrf.mxu1 }
 0x293   :  { %v2474_v11 = vadd.f32 %v2473_v10, %v2432_v62 }
 0x294   :  { %v2475_v16 = vpop.f32.mrf.mxu1 }
 0x295   :  { %v2492_v17 = vmul.f32 %v2485_v9, %v2474_v11  ;;  %v2476_v18 = vadd.f32 %v2475_v16, %v2434_v63 }
 0x296   :  { %v2477_v20 = vpop.f32.mrf.mxu1 }
 0x297   :  { %v2506_v21 = vadd.f32 %v2499_v12, %v2492_v17  ;;  %v2493_v24 = vmul.f32 %v2489_v13, %v2476_v18 }
 0x298   :  { %v2478_v25 = vpop.f32.mrf.mxu1 }
 0x299   :  { %v2507_v26 = vadd.f32 %v2503_v19, %v2493_v24  ;;  %v2508_v27 = vmax.f32 %v2506_v21, 0.0 }
 0x29b   :  { %v2509_v30 = vmax.f32 %v2507_v26, 0.0  ;;  %v2510_v32 = vpack.c.bf16 %v2508_v27, %v2508_v27 }
 0x29d   :  { %v2511_v31 = vpack.c.bf16 %v2509_v30, %v2509_v30 }
 0x29f   :  { %2672 = vmatprep.mubr.bf16.mxu0 %v2511_v31 }
 0x2a0   :  { %2673 = vmatmul.mubr.bf16.vlgmr.msra.gmra.mxu0 %v2510_v32 }
 0x360   :  { %v3056_v33 = vpop.f32.mrf.mxu0 }
 0x362   :  { %v3057_v46 = vpop.f32.mrf.mxu0 }
 0x363   :  { %v3058_v37 = vadd.f32 %v3057_v46, %v3056_v33 }
 0x364   :  { %v3059_v38 = vpop.f32.mrf.mxu0 }
 0x365   :  { %v2687_v14 = vmul.f32 %v3058_v37, %v3038_v34 }
 0x366   :  { %v3060_v15 = vpop.f32.mrf.mxu0 }
 0x367   :  { %v2695_v39 = vadd.f32 %v3039_v48, %v2687_v14 }
 0x369   :  { %2697 = vst.msk [vmem:[%s4746_s10] sm:$0x3] %vm2696_vm0, %v2695_v39 }

// kernel: pointnet_base_apply.10
= control target key start
LH: loop header
LB: loop body
LE: loop exit
PB: predicated region body
PF: predicated region fallthrough
CT: control target
= control target key end

     0   :  { %s1810_s13 = smov 0   ;;  %s1812_s14 = smov 0   ;;  %s2082_s0 = inlined_call_operand.vmem [shape: f32[2,16,3], index: 0, kind: input, shape index: {}]   ;;  %s2083_s1 = inlined_call_operand.vmem [shape: f32[2,3,64], index: 1, kind: input, shape index: {}]   ;;  %s2084_s2 = inlined_call_operand.vmem [shape: f32[1,64], index: 2, kind: input, shape index: {}]   ;;  %s2085_s3 = inlined_call_operand.vmem [shape: f32[1,64], index: 3, kind: input, shape index: {}]   ;;  %s2086_s4 = inlined_call_operand.vmem [shape: bf16[2,64,128], index: 4, kind: input, shape index: {}]   ;;  %s2087_s5 = inlined_call_operand.vmem [shape: f32[1,128], index: 5, kind: input, shape index: {}]   ;;  %s2088_s6 = inlined_call_operand.vmem [shape: f32[1,128], index: 6, kind: input, shape index: {}]   ;;  %s2089_s7 = inlined_call_operand.vmem [shape: bf16[128,1024], index: 7, kind: input, shape index: {}]   ;;  %s2090_s8 = inlined_call_operand.vmem [shape: f32[1,1024], index: 8, kind: input, shape index: {}]   ;;  %s2091_s9 = inlined_call_operand.vmem [shape: f32[1,1024], index: 9, kind: input, shape index: {}]   ;;  %s2092_s10 = inlined_call_operand.vmem [shape: f32[2,1,1024], index: 10, kind: output, shape index: {}]  }
   0x1   :  { %s1814_s15 = smov 0  }
   0x2 LB: > { %s32_s16 = sadd.s32 1, %s1745_s14  ;;  %p1583_p0 = scmp.ge.s32.totalorder %s1749_s15, 1  ;;  %s1749_s15 = sphi %s1814_s15, %s20_s15   ;;  %s1745_s14 = sphi %s1812_s14, %s2094_s14   ;;  %s1741_s13 = sphi %s1810_s13, %s2093_s13  }
   0x3   : > { %p34_p1 = scmp.ge.s32.totalorder %s32_s16, 2  ;;  %p350_p2 = scmp.lt.s32.totalorder %s1749_s15, 3 }
   0x5   : > { %s2096_s16 = smov (%p34_p1, %s32_s16), 0  ;;  %p351_p3 = pnand %p1583_p0, %p350_p2 }
   0x6   : > { %p401_p4 = scmp.lt.s32.totalorder (!%p351_p3), %s1741_s13, 1 }
   0x7   : > { %354 = sbr.rel (%p351_p3) target bundleno = 687 (0x2af), region = 60 }
   0xc   : > { %v1751_v0 = vmov 0.0   ;;  %s2098_s13 = smov (!%p401_p4, %s1741_s13), 1  ;;  %vm434_vm0 = vcmask 1042432   ;;  %vm427_vm1 = vcmask 23552   ;;  %vm1752_vm2 = vmmov 0   ;;  %v687_v8 = vld [vmem:[%s2089_s7 + $0x1c0] sm:$0xff] }
   0xd   : > { %1683 = vmatprep.subr.bf16.mxu1 %v1751_v0  ;;  %s1586_s17 = sshll.u32 %s2098_s13, 2  ;;  %s1669_s18 = sshll.u32 %s2098_s13, 5  ;;  %1691 = vmatprep.mubr.msk.bf16.mxu1 %vm1752_vm2, %v1751_v0  ;;  %v691_v9 = vld [vmem:[%s2089_s7 + $0x1e0] sm:$0xff]  ;;  %v688_v10 = vld [vmem:[%s2089_s7 + $0x1c8] sm:$0xff]  ;;  %vm566_vm3 = vcmask 523264  }
   0xe   : > { %s413_s21 = scalar_lea.vmem %s2083_s1, %s1586_s17  ;;  %s418_s24 = scalar_lea.vmem %s2086_s4, %s1669_s18  ;;  %v1658_v11 = vcombine.low %v687_v8, %v691_v9  ;;  %v1659_v12 = vcombine.high %v687_v8, %v691_v9  ;;  %v692_v13 = vld [vmem:[%s2089_s7 + $0x1e8] sm:$0xff]  ;;  %v679_v14 = vld [vmem:[%s2089_s7 + $0x180] sm:$0xff] }
   0xf   : > { %v426_v1 = vld [vmem:[%s413_s21] sm:$0x7]  ;;  %s1668_s25 = sshll.u32 %s2098_s13, 4  ;;  %v1723_v2 = vld [vmem:[%s418_s24 + $0x18] sm:$0xff]   ;;  %v1724_v5 = vld [vmem:[%s418_s24 + $0x10] sm:$0xff]   ;;  %v1660_v16 = vcombine.low %v688_v10, %v692_v13  ;;  %v1661_v17 = vcombine.high %v688_v10, %v692_v13 }
  0x10   : > { %1678 = vmatprep.subr.msk.mxu0 %vm434_vm0, %v426_v1  ;;  %s408_s28 = scalar_lea.vmem %s2082_s0, %s1668_s25  ;;  %1684 = vmatpush3.bf16.msra.mxu1 %v1723_v2  ;;  %v1725_v6 = vld [vmem:[%s418_s24 + $0x8] sm:$0xff]   ;;  %v1726_v7 = vld [vmem:[%s418_s24] sm:$0xff]   ;;  %s1589_s25 = sshll.u32 %s2098_s13, 3 }
  0x11   : > { %1679 = vmatpush3.msk.msra.mxu0 %vm434_vm0, %v426_v1  ;;  %v424_v3 = vld [vmem:[%s408_s28] sm:$0xff]  ;;  %v425_v4 = vld [vmem:[%s408_s28 + $0x8] sm:$0xff]  ;;  %1685 = vmatprep.subr.bf16.mxu1 %v1751_v0  ;;  %s422_s28 = scalar_lea.vmem %s2092_s10, %s1589_s25 }
  0x12   : > { %1680 = vmatprep.mubr.msk.f32.mxu0 %vm427_vm1, %v424_v3  ;;  %v683_v15 = vld [vmem:[%s2089_s7 + $0x1a0] sm:$0xff]  ;;  %1016 = vmatprep.subr.bf16.mxu0 %v1659_v12  ;;  %v680_v40 = vld [vmem:[%s2089_s7 + $0x188] sm:$0xff] }
  0x13   : > { %1681 = vmatmul.mubr.msk.f32.vlgmr.msra.gmra.mxu0 %vm427_vm1, %v425_v4  ;;  %v1651_v18 = vcombine.high %v679_v14, %v683_v15  ;;  %v1650_v19 = vcombine.low %v679_v14, %v683_v15  ;;  %v671_v20 = vld [vmem:[%s2089_s7 + $0x140] sm:$0xff]  ;;  %v684_v41 = vld [vmem:[%s2089_s7 + $0x1a8] sm:$0xff] }
  0x14   : > { %1686 = vmatpush3.bf16.msra.mxu1 %v1724_v5  ;;  %1017 = vmatpush1.bf16.msra.mxu0 %v1658_v11  ;;  %v675_v21 = vld [vmem:[%s2089_s7 + $0x160] sm:$0xff]  ;;  %v1653_v45 = vcombine.high %v680_v40, %v684_v41  ;;  %v672_v46 = vld [vmem:[%s2089_s7 + $0x148] sm:$0xff]  ;;  %v1652_v48 = vcombine.low %v680_v40, %v684_v41  ;;  %v682_v40 = vld [vmem:[%s2089_s7 + $0x198] sm:$0xff] }
  0x15   : > { %1687 = vmatprep.subr.bf16.mxu1 %v1751_v0  ;;  %1018 = vmatprep.subr.bf16.mxu0 %v1651_v18  ;;  %v1643_v22 = vcombine.high %v671_v20, %v675_v21  ;;  %v1642_v23 = vcombine.low %v671_v20, %v675_v21  ;;  %v663_v24 = vld [vmem:[%s2089_s7 + $0x100] sm:$0xff]  ;;  %v676_v47 = vld [vmem:[%s2089_s7 + $0x168] sm:$0xff]  ;;  %v693_v20 = vld [vmem:[%s2089_s7 + $0x1f0] sm:$0xff] }
  0x16   : > { %v667_v25 = vld [vmem:[%s2089_s7 + $0x120] sm:$0xff]  ;;  %v1645_v49 = vcombine.high %v672_v46, %v676_v47  ;;  %v664_v50 = vld [vmem:[%s2089_s7 + $0x108] sm:$0xff]  ;;  %v1644_v52 = vcombine.low %v672_v46, %v676_v47  ;;  %v690_v21 = vld [vmem:[%s2089_s7 + $0x1d8] sm:$0xff] }
  0x17   : > { %v1635_v26 = vcombine.high %v663_v24, %v667_v25  ;;  %v1634_v27 = vcombine.low %v663_v24, %v667_v25  ;;  %v655_v28 = vld [vmem:[%s2089_s7 + $0xc0] sm:$0xff]  ;;  %v668_v51 = vld [vmem:[%s2089_s7 + $0x128] sm:$0xff]  ;;  %v686_v41 = vld [vmem:[%s2089_s7 + $0x1b8] sm:$0xff] }
  0x18   : > { %1688 = vmatpush3.bf16.msra.mxu1 %v1725_v6  ;;  %1019 = vmatpush1.bf16.msra.mxu0 %v1650_v19  ;;  %v659_v29 = vld [vmem:[%s2089_s7 + $0xe0] sm:$0xff]  ;;  %v1637_v53 = vcombine.high %v664_v50, %v668_v51  ;;  %v656_v54 = vld [vmem:[%s2089_s7 + $0xc8] sm:$0xff]  ;;  %v1636_v56 = vcombine.low %v664_v50, %v668_v51  ;;  %v689_v19 = vld [vmem:[%s2089_s7 + $0x1d0] sm:$0xff]  ;;  %v1657_v46 = vcombine.high %v682_v40, %v686_v41 }
  0x19   : > { %1689 = vmatprep.subr.bf16.mxu1 %v1751_v0  ;;  %1020 = vmatprep.subr.bf16.mxu0 %v1643_v22  ;;  %v1627_v30 = vcombine.high %v655_v28, %v659_v29  ;;  %v1626_v31 = vcombine.low %v655_v28, %v659_v29  ;;  %v1593_v32 = vld [vmem:[%s2084_s2] ss:$0 sm:$0xff]  ;;  %v660_v55 = vld [vmem:[%s2089_s7 + $0xe8] sm:$0xff]  ;;  %v1663_v22 = vcombine.high %v689_v19, %v693_v20  ;;  %v673_v47 = vld [vmem:[%s2089_s7 + $0x150] sm:$0xff] }
  0x1a   : > { %v1594_v34 = vld [vmem:[%s2085_s3] ss:$0 sm:$0xff]  ;;  %v1629_v57 = vcombine.high %v656_v54, %v660_v55  ;;  %v1628_v58 = vcombine.low %v656_v54, %v660_v55  ;;  %v648_v61 = vld [vmem:[%s2089_s7 + $0x88] sm:$0xff]  ;;  %v1662_v24 = vcombine.low %v689_v19, %v693_v20  ;;  %v678_v50 = vld [vmem:[%s2089_s7 + $0x178] sm:$0xff] }
  0x1b   : > { %v647_v59 = vld [vmem:[%s2089_s7 + $0x80] sm:$0xff]  ;;  %v652_v63 = vld [vmem:[%s2089_s7 + $0xa8] sm:$0xff]  ;;  %v665_v55 = vld [vmem:[%s2089_s7 + $0x110] sm:$0xff] }
  0x1c   : > { %1690 = vmatpush3.bf16.msra.mxu1 %v1726_v7  ;;  %1021 = vmatpush1.bf16.msra.mxu0 %v1642_v23  ;;  %v651_v60 = vld [vmem:[%s2089_s7 + $0xa0] sm:$0xff]  ;;  %v1620_v1 = vcombine.low %v648_v61, %v652_v63  ;;  %v1621_v2 = vcombine.high %v648_v61, %v652_v63  ;;  %v640_v6 = vld [vmem:[%s2089_s7 + $0x48] sm:$0xff]  ;;  %v694_v23 = vld [vmem:[%s2089_s7 + $0x1f8] sm:$0xff] }
  0x1d   : > { %1059 = vmatprep.subr.bf16.mxu1 %v1661_v17  ;;  %1022 = vmatprep.subr.bf16.mxu0 %v1635_v26  ;;  %v1619_v62 = vcombine.high %v647_v59, %v651_v60  ;;  %v1618_v0 = vcombine.low %v647_v59, %v651_v60  ;;  %v639_v3 = vld [vmem:[%s2089_s7 + $0x40] sm:$0xff]  ;;  %v644_v7 = vld [vmem:[%s2089_s7 + $0x68] sm:$0xff]  ;;  %v1664_v25 = vcombine.low %v690_v21, %v694_v23  ;;  %v657_v63 = vld [vmem:[%s2089_s7 + $0xd0] sm:$0xff] }
  0x1e   : > { %v643_v4 = vld [vmem:[%s2089_s7 + $0x60] sm:$0xff]  ;;  %v1612_v9 = vcombine.low %v640_v6, %v644_v7  ;;  %v1613_v10 = vcombine.high %v640_v6, %v644_v7  ;;  %v632_v13 = vld [vmem:[%s2089_s7 + $0x8] sm:$0xff]  ;;  %v1665_v26 = vcombine.high %v690_v21, %v694_v23  ;;  %v649_v7 = vld [vmem:[%s2089_s7 + $0x90] sm:$0xff] }
  0x1f   : > { %v1611_v5 = vcombine.high %v639_v3, %v643_v4  ;;  %v1610_v8 = vcombine.low %v639_v3, %v643_v4  ;;  %v631_v11 = vld [vmem:[%s2089_s7] sm:$0xff]  ;;  %v636_v15 = vld [vmem:[%s2089_s7 + $0x28] sm:$0xff]  ;;  %v633_v23 = vld [vmem:[%s2089_s7 + $0x10] sm:$0xff] }
  0x20   : > { %1023 = vmatpush1.bf16.msra.mxu0 %v1634_v27  ;;  %v635_v12 = vld [vmem:[%s2089_s7 + $0x20] sm:$0xff]  ;;  %v1604_v17 = vcombine.low %v632_v13, %v636_v15  ;;  %v1605_v18 = vcombine.high %v632_v13, %v636_v15  ;;  %v1753_v27 = vmov 0   ;;  %v641_v15 = vld [vmem:[%s2089_s7 + $0x50] sm:$0xff] }
  0x21   : > { %1024 = vmatprep.subr.bf16.mxu0 %v1627_v30  ;;  %v1603_v14 = vcombine.high %v631_v11, %v635_v12  ;;  %1048 = vmatprep.mubr.bf16.mxu0 %v1753_v27  ;;  %v1600_v28 = vld [vmem:[%s2087_s5] ss:$0 sm:$0xff] }
  0x24   : > { %1025 = vmatpush1.bf16.msra.mxu0 %v1626_v31  ;;  %v1601_v31 = vld [vmem:[%s2088_s6] ss:$0 sm:$0xff] }
  0x25   : > { %1026 = vmatprep.subr.bf16.mxu0 %v1619_v62 }
  0x28   : > { %1027 = vmatpush1.bf16.msra.mxu0 %v1618_v0  ;;  %v661_v0 = vld [vmem:[%s2089_s7 + $0xf0] sm:$0xff] }
  0x29   : > { %1028 = vmatprep.subr.bf16.mxu0 %v1611_v5  ;;  %v1631_v5 = vcombine.high %v657_v63, %v661_v0 }
  0x2c   : > { %1029 = vmatpush1.bf16.msra.mxu0 %v1610_v8  ;;  %v653_v8 = vld [vmem:[%s2089_s7 + $0xb0] sm:$0xff] }
  0x2d   : > { %1030 = vmatprep.subr.bf16.mxu0 %v1603_v14  ;;  %v1623_v13 = vcombine.high %v649_v7, %v653_v8  ;;  %v1622_v19 = vcombine.low %v649_v7, %v653_v8 }
  0xd3   : > { %v1682_v33 = vpop.f32.mrf.mxu0 }
  0xd4   : > { %v521_v35 = vmul.f32 %v1682_v33, %v1593_v32 }
  0xd5   : > { %v504_v36 = vpop.f32.mrf.mxu0 }
  0xd6   : > { %v530_v37 = vadd.f32 %v1594_v34, %v521_v35  ;;  %v520_v38 = vmul.f32 %v1593_v32, %v504_v36 }
  0xd8   : > { %v529_v39 = vadd.f32 %v1594_v34, %v520_v38  ;;  %v532_v42 = vmax.f32 %v530_v37, 0.0  ;;  %v681_v38 = vld [vmem:[%s2089_s7 + $0x190] sm:$0xff] }
  0xda   : > { %v531_v43 = vmax.f32 %v529_v39, 0.0  ;;  %v685_v39 = vld [vmem:[%s2089_s7 + $0x1b0] sm:$0xff] }
  0xdb   : > { %v1654_v51 = vcombine.low %v681_v38, %v685_v39 }
  0xdc   : > { %v541_v44 = vpack.c.bf16 %v532_v42, %v531_v43 }
  0xde   : > { %1692 = vmatmul.mubr.msk.bf16.vlgmr.msra.gmra.mxu1 %vm566_vm3, %v541_v44 }
  0xdf   : > { %1060 = vmatpush1.bf16.msra.mxu1 %v1660_v16  ;;  %v1602_v16 = vcombine.low %v631_v11, %v635_v12  ;;  %1091 = vmatprep.mubr.bf16.mxu1 %v1753_v27  ;;  %v1630_v11 = vcombine.low %v657_v63, %v661_v0 }
  0xe0   : > { %1061 = vmatprep.subr.bf16.mxu1 %v1653_v45  ;;  %v1655_v45 = vcombine.high %v681_v38, %v685_v39 }
  0xe1   : > { %1031 = vmatpush1.bf16.msra.mxu0 %v1602_v16  ;;  %v645_v16 = vld [vmem:[%s2089_s7 + $0x70] sm:$0xff] }
  0xe2   : > { %1102 = vmatprep.subr.bf16.mxu0 %v1663_v22  ;;  %v1615_v21 = vcombine.high %v641_v15, %v645_v16 }
  0xe3   : > { %1062 = vmatpush1.bf16.msra.mxu1 %v1652_v48  ;;  %v677_v48 = vld [vmem:[%s2089_s7 + $0x170] sm:$0xff] }
  0xe4   : > { %1063 = vmatprep.subr.bf16.mxu1 %v1645_v49  ;;  %v674_v49 = vld [vmem:[%s2089_s7 + $0x158] sm:$0xff]  ;;  %v1646_v59 = vcombine.low %v673_v47, %v677_v48 }
  0xe5   : > { %v1649_v54 = vcombine.high %v674_v49, %v678_v50  ;;  %v1648_v60 = vcombine.low %v674_v49, %v678_v50 }
  0xe7   : > { %1064 = vmatpush1.bf16.msra.mxu1 %v1644_v52  ;;  %v1656_v52 = vcombine.low %v682_v40, %v686_v41 }
  0xe8   : > { %1065 = vmatprep.subr.bf16.mxu1 %v1637_v53  ;;  %v1647_v53 = vcombine.high %v673_v47, %v677_v48 }
  0xeb   : > { %1066 = vmatpush1.bf16.msra.mxu1 %v1636_v56  ;;  %v669_v56 = vld [vmem:[%s2089_s7 + $0x130] sm:$0xff] }
  0xec   : > { %1067 = vmatprep.subr.bf16.mxu1 %v1629_v57  ;;  %v666_v57 = vld [vmem:[%s2089_s7 + $0x118] sm:$0xff]  ;;  %v1639_v61 = vcombine.high %v665_v55, %v669_v56  ;;  %v1638_v3 = vcombine.low %v665_v55, %v669_v56 }
  0xef   : > { %1068 = vmatpush1.bf16.msra.mxu1 %v1628_v58  ;;  %v670_v58 = vld [vmem:[%s2089_s7 + $0x138] sm:$0xff] }
  0xf0   : > { %1069 = vmatprep.subr.bf16.mxu1 %v1621_v2  ;;  %v1641_v62 = vcombine.high %v666_v57, %v670_v58  ;;  %v662_v2 = vld [vmem:[%s2089_s7 + $0xf8] sm:$0xff]  ;;  %v1640_v4 = vcombine.low %v666_v57, %v670_v58 }
  0xf3   : > { %1070 = vmatpush1.bf16.msra.mxu1 %v1620_v1  ;;  %v658_v1 = vld [vmem:[%s2089_s7 + $0xd8] sm:$0xff] }
  0xf4   : > { %1071 = vmatprep.subr.bf16.mxu1 %v1613_v10  ;;  %v1633_v6 = vcombine.high %v658_v1, %v662_v2  ;;  %v654_v10 = vld [vmem:[%s2089_s7 + $0xb8] sm:$0xff]  ;;  %v1632_v12 = vcombine.low %v658_v1, %v662_v2 }
  0xf7   : > { %1072 = vmatpush1.bf16.msra.mxu1 %v1612_v9  ;;  %v650_v9 = vld [vmem:[%s2089_s7 + $0x98] sm:$0xff] }
  0xf8   : > { %1073 = vmatprep.subr.bf16.mxu1 %v1605_v18  ;;  %v1625_v14 = vcombine.high %v650_v9, %v654_v10  ;;  %v646_v18 = vld [vmem:[%s2089_s7 + $0x78] sm:$0xff]  ;;  %v1624_v20 = vcombine.low %v650_v9, %v654_v10 }
  0xfb   : > { %1074 = vmatpush1.bf16.msra.mxu1 %v1604_v17  ;;  %v642_v17 = vld [vmem:[%s2089_s7 + $0x58] sm:$0xff] }
  0xfc   : > { %1145 = vmatprep.subr.bf16.mxu1 %v1665_v26  ;;  %v1617_v22 = vcombine.high %v642_v17, %v646_v18  ;;  %v638_v26 = vld [vmem:[%s2089_s7 + $0x38] sm:$0xff] }
 0x19e   : > { %v604_v29 = vpop.f32.mrf.mxu1 }
 0x19f   : > { %v618_v30 = vmul.f32 %v1600_v28, %v604_v29 }
 0x1a0   : > { %v1693_v32 = vpop.f32.mrf.mxu1 }
 0x1a1   : > { %v627_v34 = vadd.f32 %v1601_v31, %v618_v30 }
 0x1a2   : > { %v607_v33 = vpop.f32.mrf.mxu1 }
 0x1a3   : > { %v619_v35 = vmul.f32 %v1600_v28, %v607_v33  ;;  %v629_v42 = vmax.f32 %v627_v34, 0.0  ;;  %v1616_v28 = vcombine.low %v642_v17, %v646_v18 }
 0x1a4   : > { %v1694_v36 = vpop.f32.mrf.mxu1 }
 0x1a5   : > { %v628_v37 = vadd.f32 %v1601_v31, %v619_v35  ;;  %v1190_v35 = vlaneseq }
 0x1a7   : > { %v630_v43 = vmax.f32 %v628_v37, 0.0  ;;  %v2052_v38 = vshrl.u32 %v1190_v35, 7 }
 0x1a9   : > { %v1974_v44 = vpack.c.bf16 %v630_v43, %v629_v42  ;;  %v1196_v41 = vsub.s32 1, %v2052_v38  ;;  %v1204_v42 = vsub.s32 3, %v2052_v38  ;;  %v1192_v43 = vsub.s32 0, %v2052_v38 }
 0x1ab   : > { %1049 = vmatmul.mubr.bf16.vlgmr.msra.gmra.mxu0 %v1974_v44  ;;  %1092 = vmatmul.mubr.bf16.vlgmr.msra.gmra.mxu1 %v1974_v44 }
 0x1ac   : > { %1103 = vmatpush1.bf16.msra.mxu0 %v1662_v24  ;;  %1146 = vmatpush1.bf16.msra.mxu1 %v1664_v25  ;;  %v637_v24 = vld [vmem:[%s2089_s7 + $0x30] sm:$0xff]  ;;  %v634_v25 = vld [vmem:[%s2089_s7 + $0x18] sm:$0xff] }
 0x1ad   : > { %1104 = vmatprep.subr.bf16.mxu0 %v1655_v45  ;;  %1147 = vmatprep.subr.bf16.mxu1 %v1657_v46  ;;  %v1607_v29 = vcombine.high %v633_v23, %v637_v24  ;;  %v1609_v30 = vcombine.high %v634_v25, %v638_v26  ;;  %v1606_v31 = vcombine.low %v633_v23, %v637_v24  ;;  %v1200_v45 = vsub.s32 2, %v2052_v38 }
 0x1ae   : > { %1134 = vmatprep.mubr.bf16.mxu0 %v1753_v27  ;;  %1177 = vmatprep.mubr.bf16.mxu1 %v1753_v27  ;;  %v1614_v27 = vcombine.low %v641_v15, %v645_v16  ;;  %v1608_v32 = vcombine.low %v634_v25, %v638_v26  ;;  %v1208_v15 = vsub.s32 4, %v2052_v38  ;;  %v1216_v16 = vsub.s32 6, %v2052_v38 }
 0x1b0   : > { %1105 = vmatpush1.bf16.msra.mxu0 %v1654_v51  ;;  %1148 = vmatpush1.bf16.msra.mxu1 %v1656_v52  ;;  %v1246_v51 = vld [vmem:[%s2091_s9] sm:$0xff] }
 0x1b1   : > { %1106 = vmatprep.subr.bf16.mxu0 %v1647_v53  ;;  %1149 = vmatprep.subr.bf16.mxu1 %v1649_v54  ;;  %v1255_v55 = vrot.slane %v1246_v51, %v1196_v41  ;;  %v1263_v56 = vrot.slane %v1246_v51, %v1204_v42 }
 0x1b4   : > { %1107 = vmatpush1.bf16.msra.mxu0 %v1646_v59  ;;  %1150 = vmatpush1.bf16.msra.mxu1 %v1648_v60 }
 0x1b5   : > { %1108 = vmatprep.subr.bf16.mxu0 %v1639_v61  ;;  %1151 = vmatprep.subr.bf16.mxu1 %v1641_v62  ;;  %v1251_v61 = vrot.slane %v1246_v51, %v1192_v43  ;;  %v1259_v62 = vrot.slane %v1246_v51, %v1200_v45 }
 0x1b8   : > { %1109 = vmatpush1.bf16.msra.mxu0 %v1638_v3  ;;  %1152 = vmatpush1.bf16.msra.mxu1 %v1640_v4 }
 0x1b9   : > { %1110 = vmatprep.subr.bf16.mxu0 %v1631_v5  ;;  %1153 = vmatprep.subr.bf16.mxu1 %v1633_v6 }
 0x1bc   : > { %1111 = vmatpush1.bf16.msra.mxu0 %v1630_v11  ;;  %1154 = vmatpush1.bf16.msra.mxu1 %v1632_v12 }
 0x1bd   : > { %1112 = vmatprep.subr.bf16.mxu0 %v1623_v13  ;;  %1155 = vmatprep.subr.bf16.mxu1 %v1625_v14 }
 0x1c0   : > { %1113 = vmatpush1.bf16.msra.mxu0 %v1622_v19  ;;  %1156 = vmatpush1.bf16.msra.mxu1 %v1624_v20  ;;  %v1212_v19 = vsub.s32 5, %v2052_v38  ;;  %v1220_v20 = vsub.s32 7, %v2052_v38 }
 0x1c1   : > { %1114 = vmatprep.subr.bf16.mxu0 %v1615_v21  ;;  %1157 = vmatprep.subr.bf16.mxu1 %v1617_v22 }
 0x1c4   : > { %1115 = vmatpush1.bf16.msra.mxu0 %v1614_v27  ;;  %1158 = vmatpush1.bf16.msra.mxu1 %v1616_v28 }
 0x1c5   : > { %1116 = vmatprep.subr.bf16.mxu0 %v1607_v29  ;;  %1159 = vmatprep.subr.bf16.mxu1 %v1609_v30 }
 0x1c8   : > { %1117 = vmatpush1.bf16.msra.mxu0 %v1606_v31  ;;  %1160 = vmatpush1.bf16.msra.mxu1 %v1608_v32  ;;  %v1267_v31 = vrot.slane %v1246_v51, %v1208_v15  ;;  %v1275_v32 = vrot.slane %v1246_v51, %v1216_v16 }
 0x1cb   : > { %1135 = vmatmul.mubr.bf16.vlgmr.msra.gmra.mxu0 %v1974_v44  ;;  %1178 = vmatmul.mubr.bf16.vlgmr.msra.gmra.mxu1 %v1974_v44  ;;  %v1188_v44 = vld [vmem:[%s2090_s8] sm:$0xff] }
 0x1cc   : > { %v1197_v48 = vrot.slane %v1188_v44, %v1196_v41  ;;  %v1205_v49 = vrot.slane %v1188_v44, %v1204_v42  ;;  %v1193_v50 = vrot.slane %v1188_v44, %v1192_v43  ;;  %v1201_v52 = vrot.slane %v1188_v44, %v1200_v45 }
 0x1cd   : > { %v1209_v23 = vrot.slane %v1188_v44, %v1208_v15  ;;  %v1217_v24 = vrot.slane %v1188_v44, %v1216_v16  ;;  %v1213_v29 = vrot.slane %v1188_v44, %v1212_v19  ;;  %v1221_v30 = vrot.slane %v1188_v44, %v1220_v20 }
 0x1ce   : > { %v1279_v41 = vrot.slane %v1246_v51, %v1220_v20 }
 0x26b   : > { %v1050_v33 = vpop.f32.mrf.mxu0  ;;  %v1093_v34 = vpop.f32.mrf.mxu1 }
 0x26c   : > { %v1230_v63 = vmul.f32 %v1193_v50, %v1050_v33  ;;  %v1232_v0 = vmul.f32 %v1201_v52, %v1093_v34 }
 0x26d   : > { %v1052_v36 = vpop.f32.mrf.mxu0  ;;  %v1095_v37 = vpop.f32.mrf.mxu1 }
 0x26e   : > { %v1231_v57 = vmul.f32 %v1197_v48, %v1052_v36  ;;  %v1233_v58 = vmul.f32 %v1205_v49, %v1095_v37  ;;  %v1288_v7 = vadd.f32 %v1251_v61, %v1230_v63  ;;  %v1290_v8 = vadd.f32 %v1259_v62, %v1232_v0 }
 0x26f   : > { %v1054_v39 = vpop.f32.mrf.mxu0  ;;  %v1097_v40 = vpop.f32.mrf.mxu1 }
 0x270   : > { %v1238_v59 = vmul.f32 %v1193_v50, %v1054_v39  ;;  %v1240_v60 = vmul.f32 %v1201_v52, %v1097_v40  ;;  %v1289_v3 = vadd.f32 %v1255_v55, %v1231_v57  ;;  %v1291_v4 = vadd.f32 %v1263_v56, %v1233_v58 }
 0x271   : > { %v1056_v46 = vpop.f32.mrf.mxu0  ;;  %v1099_v47 = vpop.f32.mrf.mxu1  ;;  %v1271_v40 = vrot.slane %v1246_v51, %v1212_v19 }
 0x272   : > { %v1239_v53 = vmul.f32 %v1197_v48, %v1056_v46  ;;  %v1241_v54 = vmul.f32 %v1205_v49, %v1099_v47  ;;  %v1296_v5 = vadd.f32 %v1251_v61, %v1238_v59  ;;  %v1298_v6 = vadd.f32 %v1259_v62, %v1240_v60 }
 0x274   : > { %v1297_v1 = vadd.f32 %v1255_v55, %v1239_v53  ;;  %v1299_v2 = vadd.f32 %v1263_v56, %v1241_v54  ;;  %v1304_v11 = vmax.f32 %v1288_v7, %v1296_v5  ;;  %v1318_v12 = vmax.f32 %v1290_v8, %v1298_v6 }
 0x275   : > { %v1754_v5 = vmov 1966171168  }
 0x276   : > { %v1311_v9 = vmax.f32 %v1289_v3, %v1297_v1  ;;  %v1325_v10 = vmax.f32 %v1291_v4, %v1299_v2  ;;  %v1305_v17 = vrot.slane %v1304_v11, 4  ;;  %v1319_v18 = vrot.slane %v1318_v12, 4 }
 0x277   : > { %v1377_v6 = vunpack.c.l.s4 %v1754_v5 }
 0x278   : > { %v1312_v13 = vrot.slane %v1311_v9, 4  ;;  %v1326_v14 = vrot.slane %v1325_v10, 4  ;;  %v1306_v25 = vmax.f32 %v1304_v11, %v1305_v17  ;;  %v1320_v26 = vmax.f32 %v1318_v12, %v1319_v18 }
 0x279   : > { %v1378_v19 = vunpack.c.0.s8 %v1377_v6 }
 0x27a   : > { %v1313_v21 = vmax.f32 %v1311_v9, %v1312_v13  ;;  %v1327_v22 = vmax.f32 %v1325_v10, %v1326_v14  ;;  %v1307_v42 = vrot.slane %v1306_v25, 2  ;;  %v1321_v43 = vrot.slane %v1320_v26, 2 }
 0x27c   : > { %v1314_v33 = vrot.slane %v1313_v21, 2  ;;  %v1328_v34 = vrot.slane %v1327_v22, 2  ;;  %v1308_v61 = vmax.f32 %v1306_v25, %v1307_v42  ;;  %v1322_v51 = vmax.f32 %v1320_v26, %v1321_v43 }
 0x27e   : > { %v1315_v52 = vmax.f32 %v1313_v21, %v1314_v33  ;;  %v1329_v44 = vmax.f32 %v1327_v22, %v1328_v34  ;;  %v1309_v12 = vrot.slane %v1308_v61, 1  ;;  %v1323_v13 = vrot.slane %v1322_v51, 1 }
 0x280   : > { %v1316_v4 = vrot.slane %v1315_v52, 1  ;;  %v1330_v7 = vrot.slane %v1329_v44, 1  ;;  %v1310_v25 = vmax.f32 %v1308_v61, %v1309_v12  ;;  %v1324_v26 = vmax.f32 %v1322_v51, %v1323_v13 }
 0x282   : > { %v1317_v18 = vmax.f32 %v1315_v52, %v1316_v4  ;;  %v1331_v20 = vmax.f32 %v1329_v44, %v1330_v7 }
 0x284   : > { %v1373_v33 = vcombine.low %v1324_v26, %v1331_v20 }
 0x28b   : > { %v1136_v27 = vpop.f32.mrf.mxu0  ;;  %v1179_v28 = vpop.f32.mrf.mxu1 }
 0x28c   : > { %v1234_v35 = vmul.f32 %v1209_v23, %v1136_v27  ;;  %v1236_v36 = vmul.f32 %v1217_v24, %v1179_v28 }
 0x28d   : > { %v1138_v37 = vpop.f32.mrf.mxu0  ;;  %v1181_v39 = vpop.f32.mrf.mxu1 }
 0x28e   : > { %v1235_v45 = vmul.f32 %v1213_v29, %v1138_v37  ;;  %v1237_v46 = vmul.f32 %v1221_v30, %v1181_v39  ;;  %v1292_v53 = vadd.f32 %v1267_v31, %v1234_v35  ;;  %v1294_v54 = vadd.f32 %v1275_v32, %v1236_v36 }
 0x28f   : > { %v1140_v47 = vpop.f32.mrf.mxu0  ;;  %v1183_v48 = vpop.f32.mrf.mxu1 }
 0x290   : > { %v1242_v49 = vmul.f32 %v1209_v23, %v1140_v47  ;;  %v1244_v50 = vmul.f32 %v1217_v24, %v1183_v48  ;;  %v1293_v62 = vadd.f32 %v1271_v40, %v1235_v45  ;;  %v1295_v63 = vadd.f32 %v1279_v41, %v1237_v46 }
 0x291   : > { %v1142_v55 = vpop.f32.mrf.mxu0  ;;  %v1185_v56 = vpop.f32.mrf.mxu1 }
 0x292   : > { %v1300_v57 = vadd.f32 %v1267_v31, %v1242_v49  ;;  %v1302_v58 = vadd.f32 %v1275_v32, %v1244_v50  ;;  %v1243_v59 = vmul.f32 %v1213_v29, %v1142_v55  ;;  %v1245_v60 = vmul.f32 %v1221_v30, %v1185_v56 }
 0x293   : > { %v1372_v31 = vcombine.low %v1310_v25, %v1317_v18  ;;  %v1381_v32 = vsub.s32 %v1378_v19, %v2052_v38 }
 0x294   : > { %v1332_v0 = vmax.f32 %v1292_v53, %v1300_v57  ;;  %v1346_v1 = vmax.f32 %v1294_v54, %v1302_v58  ;;  %v1301_v2 = vadd.f32 %v1271_v40, %v1243_v59  ;;  %v1303_v3 = vadd.f32 %v1279_v41, %v1245_v60 }
 0x295   : > { %v1382_v41 = vrot.slane %v1372_v31, %v1381_v32  ;;  %v1389_v42 = vrot.slane %v1373_v33, %v1381_v32 }
 0x296   : > { %v1333_v8 = vrot.slane %v1332_v0, 4  ;;  %v1347_v9 = vrot.slane %v1346_v1, 4  ;;  %v1339_v10 = vmax.f32 %v1293_v62, %v1301_v2  ;;  %v1353_v11 = vmax.f32 %v1295_v63, %v1303_v3 }
 0x297   : > { %v1404_v50 = vcombine.low %v1382_v41, %v1389_v42 }
 0x298   : > { %v1334_v14 = vmax.f32 %v1332_v0, %v1333_v8  ;;  %v1348_v15 = vmax.f32 %v1346_v1, %v1347_v9  ;;  %v1340_v16 = vrot.slane %v1339_v10, 4  ;;  %v1354_v17 = vrot.slane %v1353_v11, 4 }
 0x299   : > { %v1412_v53 = vrot.slane %v1404_v50, %v1381_v32 }
 0x29a   : > { %v1335_v21 = vrot.slane %v1334_v14, 2  ;;  %v1349_v22 = vrot.slane %v1348_v15, 2  ;;  %v1341_v23 = vmax.f32 %v1339_v10, %v1340_v16  ;;  %v1355_v24 = vmax.f32 %v1353_v11, %v1354_v17 }
 0x29c   : > { %v1336_v27 = vmax.f32 %v1334_v14, %v1335_v21  ;;  %v1350_v28 = vmax.f32 %v1348_v15, %v1349_v22  ;;  %v1342_v29 = vrot.slane %v1341_v23, 2  ;;  %v1356_v30 = vrot.slane %v1355_v24, 2 }
 0x29e   : > { %v1337_v34 = vrot.slane %v1336_v27, 1  ;;  %v1351_v35 = vrot.slane %v1350_v28, 1  ;;  %v1343_v36 = vmax.f32 %v1341_v23, %v1342_v29  ;;  %v1357_v37 = vmax.f32 %v1355_v24, %v1356_v30 }
 0x2a0   : > { %v1344_v39 = vrot.slane %v1343_v36, 1  ;;  %v1358_v40 = vrot.slane %v1357_v37, 1  ;;  %v1338_v43 = vmax.f32 %v1336_v27, %v1337_v34  ;;  %v1352_v45 = vmax.f32 %v1350_v28, %v1351_v35 }
 0x2a2   : > { %v1345_v46 = vmax.f32 %v1343_v36, %v1344_v39  ;;  %v1359_v47 = vmax.f32 %v1357_v37, %v1358_v40 }
 0x2a4   : > { %v1374_v48 = vcombine.low %v1338_v43, %v1345_v46  ;;  %v1375_v49 = vcombine.low %v1352_v45, %v1359_v47 }
 0x2a6   : > { %v1396_v52 = vrot.slane %v1374_v48, %v1381_v32  ;;  %v1403_v44 = vrot.slane %v1375_v49, %v1381_v32 }
 0x2a8   : > { %v1405_v38 = vcombine.low %v1396_v52, %v1403_v44 }
 0x2aa   : > { %v1419_v54 = vrot.slane %v1405_v38, %v1381_v32 }
 0x2ac   : > { %v1420_v55 = vcombine.low %v1412_v53, %v1419_v54 }
 0x2ae   : > { %1422 = vst [vmem:[%s422_s28] sm:$0xff] %v1420_v55 }
 0x2af PF: > { %s20_s15 = sadd.s32 1, %s1749_s15   ;;  %s2093_s13 = smov %s1745_s14 }
 0x2b0   : > { %p17_p5 = scmp.ge.s32.totalorder %s20_s15, 4   ;;  %s2094_s14 = smov %s2096_s16 }
 0x2b2   :  { %19 = sbr.rel (!%p17_p5) target bundleno = 2 (0x2), region = 104 }

// kernel: pointnet_base_apply.11
= control target key start
LH: loop header
LB: loop body
LE: loop exit
PB: predicated region body
PF: predicated region fallthrough
CT: control target
= control target key end

     0   :  { %v3595_v36 = vmov 1983009808   ;;  %v45_v38 = vlaneseq  ;;  %s4777_s0 = inlined_call_operand.vmem [shape: f32[2,1024], index: 0, kind: input, shape index: {}]   ;;  %s4778_s1 = inlined_call_operand.vmem [shape: bf16[1024,512], index: 1, kind: input, shape index: {}]   ;;  %s4779_s2 = inlined_call_operand.vmem [shape: f32[1,512], index: 2, kind: input, shape index: {}]   ;;  %s4780_s3 = inlined_call_operand.vmem [shape: f32[1,512], index: 3, kind: input, shape index: {}]   ;;  %s4781_s4 = inlined_call_operand.vmem [shape: bf16[512,256], index: 4, kind: input, shape index: {}]   ;;  %s4782_s5 = inlined_call_operand.vmem [shape: f32[1,256], index: 5, kind: input, shape index: {}]   ;;  %s4783_s6 = inlined_call_operand.vmem [shape: f32[1,256], index: 6, kind: input, shape index: {}]   ;;  %s4784_s7 = inlined_call_operand.vmem [shape: bf16[256,10], index: 7, kind: input, shape index: {}]   ;;  %s4785_s8 = inlined_call_operand.vmem [shape: f32[1,10], index: 8, kind: input, shape index: {}]   ;;  %s4786_s9 = inlined_call_operand.vmem [shape: f32[1,10], index: 9, kind: input, shape index: {}]   ;;  %s4787_s10 = inlined_call_operand.hbm [shape: f32[2,10], index: 10, kind: output, shape index: {}]  }
   0x1   :  { %v3075_v0 = vld [vmem:[%s4778_s1 + $0xe4] ss:$16 sps:$4 sm:$0xff]   ;;  %v3079_v2 = vld [vmem:[%s4778_s1 + $0xe0] ss:$16 sps:$4 sm:$0xff]   ;;  %v43_v37 = vunpack.c.l.s4 %v3595_v36 }
   0x2   :  { %v3077_v1 = vld [vmem:[%s4778_s1 + $0x2e4] ss:$16 sps:$4 sm:$0xff]   ;;  %1627 = vmatprep.subr.bf16.mxu0 %v3075_v0  ;;  %v3080_v3 = vld [vmem:[%s4778_s1 + $0x2e0] ss:$16 sps:$4 sm:$0xff]   ;;  %v3769_v43 = vshrl.u32 %v45_v38, 7 }
   0x3   :  { %1668 = vmatprep.subr.bf16.mxu1 %v3077_v1  ;;  %v3081_v4 = vld [vmem:[%s4778_s1 + $0xc4] ss:$16 sps:$4 sm:$0xff]   ;;  %1628 = vmatpush1.bf16.msra.mxu0 %v3079_v2  ;;  %v3085_v6 = vld [vmem:[%s4778_s1 + $0xc0] ss:$16 sps:$4 sm:$0xff]   ;;  %v44_v42 = vunpack.c.0.s8 %v43_v37 }
   0x4   :  { %1669 = vmatpush1.bf16.msra.mxu1 %v3080_v3  ;;  %v3083_v5 = vld [vmem:[%s4778_s1 + $0x2c4] ss:$16 sps:$4 sm:$0xff]   ;;  %1629 = vmatprep.subr.bf16.mxu0 %v3081_v4  ;;  %v3086_v7 = vld [vmem:[%s4778_s1 + $0x2c0] ss:$16 sps:$4 sm:$0xff]  }
   0x5   :  { %1670 = vmatprep.subr.bf16.mxu1 %v3083_v5  ;;  %v3087_v8 = vld [vmem:[%s4778_s1 + $0xa4] ss:$16 sps:$4 sm:$0xff]   ;;  %v3091_v10 = vld [vmem:[%s4778_s1 + $0xa0] ss:$16 sps:$4 sm:$0xff]   ;;  %v3787_v49 = vsub.s32 %v44_v42, %v3769_v43  ;;  %v38_v42 = vld [vmem:[%s4777_s0 + $0x8] sm:$0xff] }
   0x6   :  { %v3089_v9 = vld [vmem:[%s4778_s1 + $0x2a4] ss:$16 sps:$4 sm:$0xff]   ;;  %v3092_v11 = vld [vmem:[%s4778_s1 + $0x2a0] ss:$16 sps:$4 sm:$0xff]  }
   0x7   :  { %1630 = vmatpush1.bf16.msra.mxu0 %v3085_v6  ;;  %v3093_v12 = vld [vmem:[%s4778_s1 + $0x84] ss:$16 sps:$4 sm:$0xff]   ;;  %v3097_v14 = vld [vmem:[%s4778_s1 + $0x80] ss:$16 sps:$4 sm:$0xff]  }
   0x8   :  { %1671 = vmatpush1.bf16.msra.mxu1 %v3086_v7  ;;  %1631 = vmatprep.subr.bf16.mxu0 %v3087_v8  ;;  %v3095_v13 = vld [vmem:[%s4778_s1 + $0x284] ss:$16 sps:$4 sm:$0xff]   ;;  %v3098_v15 = vld [vmem:[%s4778_s1 + $0x280] ss:$16 sps:$4 sm:$0xff]  }
   0x9   :  { %1672 = vmatprep.subr.bf16.mxu1 %v3089_v9  ;;  %v3099_v16 = vld [vmem:[%s4778_s1 + $0x64] ss:$16 sps:$4 sm:$0xff]   ;;  %v3103_v18 = vld [vmem:[%s4778_s1 + $0x60] ss:$16 sps:$4 sm:$0xff]  }
   0xa   :  { %v3101_v17 = vld [vmem:[%s4778_s1 + $0x264] ss:$16 sps:$4 sm:$0xff]   ;;  %v3104_v19 = vld [vmem:[%s4778_s1 + $0x260] ss:$16 sps:$4 sm:$0xff]  }
   0xb   :  { %1632 = vmatpush1.bf16.msra.mxu0 %v3091_v10  ;;  %v3105_v20 = vld [vmem:[%s4778_s1 + $0x44] ss:$16 sps:$4 sm:$0xff]   ;;  %v3109_v22 = vld [vmem:[%s4778_s1 + $0x40] ss:$16 sps:$4 sm:$0xff]  }
   0xc   :  { %1673 = vmatpush1.bf16.msra.mxu1 %v3092_v11  ;;  %1633 = vmatprep.subr.bf16.mxu0 %v3093_v12  ;;  %v3107_v21 = vld [vmem:[%s4778_s1 + $0x244] ss:$16 sps:$4 sm:$0xff]   ;;  %v3110_v23 = vld [vmem:[%s4778_s1 + $0x240] ss:$16 sps:$4 sm:$0xff]  }
   0xd   :  { %1674 = vmatprep.subr.bf16.mxu1 %v3095_v13  ;;  %v3111_v24 = vld [vmem:[%s4778_s1 + $0x24] ss:$16 sps:$4 sm:$0xff]   ;;  %v3115_v26 = vld [vmem:[%s4778_s1 + $0x20] ss:$16 sps:$4 sm:$0xff]  }
   0xe   :  { %v3113_v25 = vld [vmem:[%s4778_s1 + $0x224] ss:$16 sps:$4 sm:$0xff]   ;;  %v3116_v27 = vld [vmem:[%s4778_s1 + $0x220] ss:$16 sps:$4 sm:$0xff]  }
   0xf   :  { %1634 = vmatpush1.bf16.msra.mxu0 %v3097_v14  ;;  %v3117_v28 = vld [vmem:[%s4778_s1 + $0x4] ss:$16 sps:$4 sm:$0xff]   ;;  %v3121_v30 = vld [vmem:[%s4778_s1] ss:$16 sps:$4 sm:$0xff]  }
  0x10   :  { %1675 = vmatpush1.bf16.msra.mxu1 %v3098_v15  ;;  %1635 = vmatprep.subr.bf16.mxu0 %v3099_v16  ;;  %v3119_v29 = vld [vmem:[%s4778_s1 + $0x204] ss:$16 sps:$4 sm:$0xff]   ;;  %v3122_v31 = vld [vmem:[%s4778_s1 + $0x200] ss:$16 sps:$4 sm:$0xff]  }
  0x11   :  { %1676 = vmatprep.subr.bf16.mxu1 %v3101_v17  ;;  %v3123_v32 = vld [vmem:[%s4778_s1 + $0x1e4] ss:$16 sps:$4 sm:$0xff]   ;;  %v3127_v34 = vld [vmem:[%s4778_s1 + $0x1e0] ss:$16 sps:$4 sm:$0xff]  }
  0x12   :  { %v3125_v33 = vld [vmem:[%s4778_s1 + $0x3e4] ss:$16 sps:$4 sm:$0xff]   ;;  %v3128_v35 = vld [vmem:[%s4778_s1 + $0x3e0] ss:$16 sps:$4 sm:$0xff]  }
  0x13   :  { %1636 = vmatpush1.bf16.msra.mxu0 %v3103_v18  ;;  %v3129_v39 = vld [vmem:[%s4778_s1 + $0x1c4] ss:$16 sps:$4 sm:$0xff]   ;;  %v3133_v41 = vld [vmem:[%s4778_s1 + $0x1c0] ss:$16 sps:$4 sm:$0xff]  }
  0x14   :  { %1677 = vmatpush1.bf16.msra.mxu1 %v3104_v19  ;;  %1637 = vmatprep.subr.bf16.mxu0 %v3105_v20  ;;  %v3131_v40 = vld [vmem:[%s4778_s1 + $0x3c4] ss:$16 sps:$4 sm:$0xff]   ;;  %v3134_v44 = vld [vmem:[%s4778_s1 + $0x3c0] ss:$16 sps:$4 sm:$0xff]  }
  0x15   :  { %1678 = vmatprep.subr.bf16.mxu1 %v3107_v21  ;;  %v3135_v45 = vld [vmem:[%s4778_s1 + $0x1a4] ss:$16 sps:$4 sm:$0xff]   ;;  %v3139_v47 = vld [vmem:[%s4778_s1 + $0x1a0] ss:$16 sps:$4 sm:$0xff]  }
  0x16   :  { %v3137_v46 = vld [vmem:[%s4778_s1 + $0x3a4] ss:$16 sps:$4 sm:$0xff]   ;;  %v3140_v48 = vld [vmem:[%s4778_s1 + $0x3a0] ss:$16 sps:$4 sm:$0xff]  }
  0x17   :  { %1638 = vmatpush1.bf16.msra.mxu0 %v3109_v22  ;;  %v3141_v50 = vld [vmem:[%s4778_s1 + $0x184] ss:$16 sps:$4 sm:$0xff]   ;;  %v3145_v53 = vld [vmem:[%s4778_s1 + $0x180] ss:$16 sps:$4 sm:$0xff]  }
  0x18   :  { %1679 = vmatpush1.bf16.msra.mxu1 %v3110_v23  ;;  %1639 = vmatprep.subr.bf16.mxu0 %v3111_v24  ;;  %v3143_v51 = vld [vmem:[%s4778_s1 + $0x384] ss:$16 sps:$4 sm:$0xff]   ;;  %v3146_v56 = vld [vmem:[%s4778_s1 + $0x380] ss:$16 sps:$4 sm:$0xff]  }
  0x19   :  { %1680 = vmatprep.subr.bf16.mxu1 %v3113_v25  ;;  %v37_v52 = vld [vmem:[%s4777_s0] sm:$0xff] }
  0x1a   :  { %v48_v54 = vrot.slane %v37_v52, %v3787_v49  ;;  %v41_v55 = vcombine.high %v37_v52, %v37_v52  ;;  %v3147_v57 = vld [vmem:[%s4778_s1 + $0x164] ss:$16 sps:$4 sm:$0xff]   ;;  %v3151_v61 = vld [vmem:[%s4778_s1 + $0x160] ss:$16 sps:$4 sm:$0xff]  }
  0x1b   :  { %1640 = vmatpush1.bf16.msra.mxu0 %v3115_v26  ;;  %v3149_v58 = vld [vmem:[%s4778_s1 + $0x364] ss:$16 sps:$4 sm:$0xff]   ;;  %v3152_v0 = vld [vmem:[%s4778_s1 + $0x360] ss:$16 sps:$4 sm:$0xff]  }
  0x1c   :  { %1681 = vmatpush1.bf16.msra.mxu1 %v3116_v27  ;;  %1641 = vmatprep.subr.bf16.mxu0 %v3117_v28  ;;  %v56_v59 = vcombine.high %v48_v54, %v48_v54  ;;  %v55_v60 = vrot.slane %v41_v55, %v3787_v49  ;;  %v3153_v1 = vld [vmem:[%s4778_s1 + $0x144] ss:$16 sps:$4 sm:$0xff]   ;;  %v3157_v4 = vld [vmem:[%s4778_s1 + $0x140] ss:$16 sps:$4 sm:$0xff]   ;;  %v3866_v16 = vpack.c.bf16 %v48_v54, %v48_v54 }
  0x1d   :  { %1682 = vmatprep.subr.bf16.mxu1 %v3119_v29  ;;  %v3155_v2 = vld [vmem:[%s4778_s1 + $0x344] ss:$16 sps:$4 sm:$0xff]   ;;  %v3158_v5 = vld [vmem:[%s4778_s1 + $0x340] ss:$16 sps:$4 sm:$0xff]  }
  0x1e   :  { %v3815_v62 = vpack.c.bf16 %v56_v59, %v56_v59  ;;  %v57_v63 = vcombine.high %v55_v60, %v55_v60  ;;  %v3159_v6 = vld [vmem:[%s4778_s1 + $0x124] ss:$16 sps:$4 sm:$0xff]   ;;  %v3163_v8 = vld [vmem:[%s4778_s1 + $0x120] ss:$16 sps:$4 sm:$0xff]   ;;  %v3868_v17 = vpack.c.bf16 %v55_v60, %v55_v60 }
  0x1f   :  { %1642 = vmatpush1.bf16.msra.mxu0 %v3121_v30  ;;  %v3161_v7 = vld [vmem:[%s4778_s1 + $0x324] ss:$16 sps:$4 sm:$0xff]   ;;  %v3164_v9 = vld [vmem:[%s4778_s1 + $0x320] ss:$16 sps:$4 sm:$0xff]  }
  0x20   :  { %1683 = vmatpush1.bf16.msra.mxu1 %v3122_v31  ;;  %1643 = vmatprep.subr.bf16.mxu0 %v3123_v32  ;;  %v3826_v3 = vpack.c.bf16 %v57_v63, %v57_v63  ;;  %v3165_v10 = vld [vmem:[%s4778_s1 + $0x104] ss:$16 sps:$4 sm:$0xff]   ;;  %v3169_v12 = vld [vmem:[%s4778_s1 + $0x100] ss:$16 sps:$4 sm:$0xff]  }
  0x21   :  { %1684 = vmatprep.subr.bf16.mxu1 %v3125_v33  ;;  %1659 = vmatprep.mubr.bf16.mxu0 %v3815_v62  ;;  %v3167_v11 = vld [vmem:[%s4778_s1 + $0x304] ss:$16 sps:$4 sm:$0xff]   ;;  %v3170_v13 = vld [vmem:[%s4778_s1 + $0x300] ss:$16 sps:$4 sm:$0xff]  }
  0x22   :  { %1700 = vmatprep.mubr.bf16.mxu1 %v3826_v3  ;;  %v3174_v14 = vld [vmem:[%s4778_s1 + $0x4e4] ss:$16 sps:$4 sm:$0xff]   ;;  %v3172_v18 = vld [vmem:[%s4778_s1 + $0x4e0] ss:$16 sps:$4 sm:$0xff]  }
  0x23   :  { %1644 = vmatpush2.bf16.msra.mxu0 %v3127_v34  ;;  %v3177_v15 = vld [vmem:[%s4778_s1 + $0x6e4] ss:$16 sps:$4 sm:$0xff]   ;;  %v3175_v19 = vld [vmem:[%s4778_s1 + $0x6e0] ss:$16 sps:$4 sm:$0xff]  }
  0x24   :  { %1685 = vmatpush2.bf16.msra.mxu1 %v3128_v35  ;;  %1645 = vmatprep.subr.bf16.mxu0 %v3129_v39  ;;  %v3180_v20 = vld [vmem:[%s4778_s1 + $0x4c4] ss:$16 sps:$4 sm:$0xff]   ;;  %v3178_v22 = vld [vmem:[%s4778_s1 + $0x4c0] ss:$16 sps:$4 sm:$0xff]  }
  0x25   :  { %1686 = vmatprep.subr.bf16.mxu1 %v3131_v40  ;;  %v3183_v21 = vld [vmem:[%s4778_s1 + $0x6c4] ss:$16 sps:$4 sm:$0xff]   ;;  %v3181_v23 = vld [vmem:[%s4778_s1 + $0x6c0] ss:$16 sps:$4 sm:$0xff]  }
  0x26   :  { %v3186_v24 = vld [vmem:[%s4778_s1 + $0x4a4] ss:$16 sps:$4 sm:$0xff]   ;;  %v3184_v26 = vld [vmem:[%s4778_s1 + $0x4a0] ss:$16 sps:$4 sm:$0xff]  }
  0x27   :  { %1646 = vmatpush2.bf16.msra.mxu0 %v3133_v41  ;;  %v3189_v25 = vld [vmem:[%s4778_s1 + $0x6a4] ss:$16 sps:$4 sm:$0xff]   ;;  %v3187_v27 = vld [vmem:[%s4778_s1 + $0x6a0] ss:$16 sps:$4 sm:$0xff]  }
  0x28   :  { %1687 = vmatpush2.bf16.msra.mxu1 %v3134_v44  ;;  %1647 = vmatprep.subr.bf16.mxu0 %v3135_v45  ;;  %v3192_v28 = vld [vmem:[%s4778_s1 + $0x484] ss:$16 sps:$4 sm:$0xff]   ;;  %v3190_v30 = vld [vmem:[%s4778_s1 + $0x480] ss:$16 sps:$4 sm:$0xff]   ;;  %v3948_v44 = vrot.slane %v38_v42, %v3787_v49  ;;  %v58_v45 = vcombine.high %v38_v42, %v38_v42  ;;  %v3284_v42 = vld [vmem:[%s4778_s1 + $0x2a8] ss:$16 sps:$4 sm:$0xff]  }
  0x29   :  { %1688 = vmatprep.subr.bf16.mxu1 %v3137_v46  ;;  %v3195_v29 = vld [vmem:[%s4778_s1 + $0x684] ss:$16 sps:$4 sm:$0xff]   ;;  %v3193_v31 = vld [vmem:[%s4778_s1 + $0x680] ss:$16 sps:$4 sm:$0xff]  }
  0x2a   :  { %v3198_v32 = vld [vmem:[%s4778_s1 + $0x464] ss:$16 sps:$4 sm:$0xff]   ;;  %v3196_v34 = vld [vmem:[%s4778_s1 + $0x460] ss:$16 sps:$4 sm:$0xff]  }
  0x2b   :  { %1648 = vmatpush2.bf16.msra.mxu0 %v3139_v47  ;;  %v3201_v33 = vld [vmem:[%s4778_s1 + $0x664] ss:$16 sps:$4 sm:$0xff]   ;;  %v3199_v35 = vld [vmem:[%s4778_s1 + $0x660] ss:$16 sps:$4 sm:$0xff]  }
  0x2c   :  { %1689 = vmatpush2.bf16.msra.mxu1 %v3140_v48  ;;  %1649 = vmatprep.subr.bf16.mxu0 %v3141_v50  ;;  %v3204_v36 = vld [vmem:[%s4778_s1 + $0x444] ss:$16 sps:$4 sm:$0xff]   ;;  %v3202_v38 = vld [vmem:[%s4778_s1 + $0x440] ss:$16 sps:$4 sm:$0xff]   ;;  %v73_v48 = vcombine.high %v3948_v44, %v3948_v44  ;;  %v3959_v50 = vrot.slane %v58_v45, %v3787_v49  ;;  %v3290_v45 = vld [vmem:[%s4778_s1 + $0x288] ss:$16 sps:$4 sm:$0xff]  }
  0x2d   :  { %1690 = vmatprep.subr.bf16.mxu1 %v3143_v51  ;;  %v3207_v37 = vld [vmem:[%s4778_s1 + $0x644] ss:$16 sps:$4 sm:$0xff]   ;;  %v3205_v39 = vld [vmem:[%s4778_s1 + $0x640] ss:$16 sps:$4 sm:$0xff]  }
  0x2e   :  { %v3210_v40 = vld [vmem:[%s4778_s1 + $0x424] ss:$16 sps:$4 sm:$0xff]   ;;  %v3208_v46 = vld [vmem:[%s4778_s1 + $0x420] ss:$16 sps:$4 sm:$0xff]   ;;  %v74_v54 = vcombine.high %v3959_v50, %v3959_v50 }
  0x2f   :  { %1650 = vmatpush2.bf16.msra.mxu0 %v3145_v53  ;;  %v3213_v41 = vld [vmem:[%s4778_s1 + $0x624] ss:$16 sps:$4 sm:$0xff]   ;;  %v3211_v47 = vld [vmem:[%s4778_s1 + $0x620] ss:$16 sps:$4 sm:$0xff]   ;;  %v3967_v53 = vpack.c.bf16 %v73_v48, %v73_v48  ;;  %v3293_v48 = vld [vmem:[%s4778_s1 + $0x68] ss:$16 sps:$4 sm:$0xff]  }
  0x30   :  { %1691 = vmatpush2.bf16.msra.mxu1 %v3146_v56  ;;  %1651 = vmatprep.subr.bf16.mxu0 %v3147_v57  ;;  %v3216_v51 = vld [vmem:[%s4778_s1 + $0x404] ss:$16 sps:$4 sm:$0xff]   ;;  %v3214_v49 = vld [vmem:[%s4778_s1 + $0x400] ss:$16 sps:$4 sm:$0xff]   ;;  %v3977_v56 = vpack.c.bf16 %v74_v54, %v74_v54  ;;  %v3299_v54 = vld [vmem:[%s4778_s1 + $0x48] ss:$16 sps:$4 sm:$0xff]  }
  0x31   :  { %1692 = vmatprep.subr.bf16.mxu1 %v3149_v58  ;;  %v3219_v52 = vld [vmem:[%s4778_s1 + $0x604] ss:$16 sps:$4 sm:$0xff]   ;;  %v3217_v55 = vld [vmem:[%s4778_s1 + $0x600] ss:$16 sps:$4 sm:$0xff]  }
  0x32   :  { %v3222_v57 = vld [vmem:[%s4778_s1 + $0x5e4] ss:$16 sps:$4 sm:$0xff]   ;;  %v3220_v59 = vld [vmem:[%s4778_s1 + $0x5e0] ss:$16 sps:$4 sm:$0xff]  }
  0x33   :  { %1652 = vmatpush2.bf16.msra.mxu0 %v3151_v61  ;;  %v3225_v58 = vld [vmem:[%s4778_s1 + $0x7e4] ss:$16 sps:$4 sm:$0xff]   ;;  %v3223_v60 = vld [vmem:[%s4778_s1 + $0x7e0] ss:$16 sps:$4 sm:$0xff]  }
  0x34   :  { %1693 = vmatpush2.bf16.msra.mxu1 %v3152_v0  ;;  %1653 = vmatprep.subr.bf16.mxu0 %v3153_v1  ;;  %v3228_v61 = vld [vmem:[%s4778_s1 + $0x5c4] ss:$16 sps:$4 sm:$0xff]   ;;  %v3226_v0 = vld [vmem:[%s4778_s1 + $0x5c0] ss:$16 sps:$4 sm:$0xff]  }
  0x35   :  { %1694 = vmatprep.subr.bf16.mxu1 %v3155_v2  ;;  %v3231_v63 = vld [vmem:[%s4778_s1 + $0x7c4] ss:$16 sps:$4 sm:$0xff]   ;;  %v3229_v1 = vld [vmem:[%s4778_s1 + $0x7c0] ss:$16 sps:$4 sm:$0xff]  }
  0x36   :  { %v3234_v2 = vld [vmem:[%s4778_s1 + $0x5a4] ss:$16 sps:$4 sm:$0xff]  }
  0x37   :  { %1654 = vmatpush2.bf16.msra.mxu0 %v3157_v4  ;;  %v3237_v4 = vld [vmem:[%s4778_s1 + $0x7a4] ss:$16 sps:$4 sm:$0xff]  }
  0x38   :  { %1695 = vmatpush2.bf16.msra.mxu1 %v3158_v5  ;;  %1655 = vmatprep.subr.bf16.mxu0 %v3159_v6  ;;  %v3232_v5 = vld [vmem:[%s4778_s1 + $0x5a0] ss:$16 sps:$4 sm:$0xff]  }
  0x39   :  { %1696 = vmatprep.subr.bf16.mxu1 %v3161_v7  ;;  %v3235_v6 = vld [vmem:[%s4778_s1 + $0x7a0] ss:$16 sps:$4 sm:$0xff]   ;;  %v3240_v7 = vld [vmem:[%s4778_s1 + $0x584] ss:$16 sps:$4 sm:$0xff]  }
  0x3b   :  { %1656 = vmatpush2.bf16.msra.mxu0 %v3163_v8  ;;  %v3243_v8 = vld [vmem:[%s4778_s1 + $0x784] ss:$16 sps:$4 sm:$0xff]  }
  0x3c   :  { %1697 = vmatpush2.bf16.msra.mxu1 %v3164_v9  ;;  %1657 = vmatprep.subr.bf16.mxu0 %v3165_v10  ;;  %v3238_v9 = vld [vmem:[%s4778_s1 + $0x580] ss:$16 sps:$4 sm:$0xff]  }
  0x3d   :  { %1698 = vmatprep.subr.bf16.mxu1 %v3167_v11  ;;  %v3241_v10 = vld [vmem:[%s4778_s1 + $0x780] ss:$16 sps:$4 sm:$0xff]   ;;  %v3246_v11 = vld [vmem:[%s4778_s1 + $0x564] ss:$16 sps:$4 sm:$0xff]  }
  0x3f   :  { %1658 = vmatpush2.bf16.msra.mxu0 %v3169_v12  ;;  %v3249_v12 = vld [vmem:[%s4778_s1 + $0x764] ss:$16 sps:$4 sm:$0xff]  }
  0x40   :  { %1699 = vmatpush2.bf16.msra.mxu1 %v3170_v13  ;;  %1709 = vmatprep.subr.bf16.mxu0 %v3174_v14  ;;  %v3244_v13 = vld [vmem:[%s4778_s1 + $0x560] ss:$16 sps:$4 sm:$0xff]  }
  0x41   :  { %1750 = vmatprep.subr.bf16.mxu1 %v3177_v15  ;;  %v3247_v14 = vld [vmem:[%s4778_s1 + $0x760] ss:$16 sps:$4 sm:$0xff]   ;;  %v3252_v15 = vld [vmem:[%s4778_s1 + $0x544] ss:$16 sps:$4 sm:$0xff]  }
  0x42   :  { %1660 = vmatmul.mubr.bf16.vlgmr.msra.gmra.mxu0 %v3866_v16 }
  0x43   :  { %1701 = vmatmul.mubr.bf16.vlgmr.msra.gmra.mxu1 %v3868_v17  ;;  %1710 = vmatpush1.bf16.msra.mxu0 %v3172_v18  ;;  %v3255_v18 = vld [vmem:[%s4778_s1 + $0x744] ss:$16 sps:$4 sm:$0xff]  }
  0x44   :  { %1751 = vmatpush1.bf16.msra.mxu1 %v3175_v19  ;;  %1711 = vmatprep.subr.bf16.mxu0 %v3180_v20  ;;  %v3250_v19 = vld [vmem:[%s4778_s1 + $0x540] ss:$16 sps:$4 sm:$0xff]  }
  0x45   :  { %1752 = vmatprep.subr.bf16.mxu1 %v3183_v21  ;;  %1741 = vmatprep.mubr.bf16.mxu0 %v3967_v53  ;;  %v3253_v20 = vld [vmem:[%s4778_s1 + $0x740] ss:$16 sps:$4 sm:$0xff]   ;;  %v3258_v21 = vld [vmem:[%s4778_s1 + $0x524] ss:$16 sps:$4 sm:$0xff]  }
  0x46   :  { %1782 = vmatprep.mubr.bf16.mxu1 %v3977_v56 }
  0x47   :  { %1712 = vmatpush1.bf16.msra.mxu0 %v3178_v22  ;;  %v3261_v22 = vld [vmem:[%s4778_s1 + $0x724] ss:$16 sps:$4 sm:$0xff]  }
  0x48   :  { %1753 = vmatpush1.bf16.msra.mxu1 %v3181_v23  ;;  %1713 = vmatprep.subr.bf16.mxu0 %v3186_v24  ;;  %v3256_v23 = vld [vmem:[%s4778_s1 + $0x520] ss:$16 sps:$4 sm:$0xff]  }
  0x49   :  { %1754 = vmatprep.subr.bf16.mxu1 %v3189_v25  ;;  %v3259_v24 = vld [vmem:[%s4778_s1 + $0x720] ss:$16 sps:$4 sm:$0xff]   ;;  %v3264_v25 = vld [vmem:[%s4778_s1 + $0x504] ss:$16 sps:$4 sm:$0xff]  }
  0x4b   :  { %1714 = vmatpush1.bf16.msra.mxu0 %v3184_v26  ;;  %v3267_v26 = vld [vmem:[%s4778_s1 + $0x704] ss:$16 sps:$4 sm:$0xff]  }
  0x4c   :  { %1755 = vmatpush1.bf16.msra.mxu1 %v3187_v27  ;;  %1715 = vmatprep.subr.bf16.mxu0 %v3192_v28  ;;  %v3262_v27 = vld [vmem:[%s4778_s1 + $0x500] ss:$16 sps:$4 sm:$0xff]  }
  0x4d   :  { %1756 = vmatprep.subr.bf16.mxu1 %v3195_v29  ;;  %v3265_v28 = vld [vmem:[%s4778_s1 + $0x700] ss:$16 sps:$4 sm:$0xff]   ;;  %v3271_v29 = vld [vmem:[%s4778_s1 + $0xec] ss:$16 sps:$4 sm:$0xff]  }
  0x4f   :  { %1716 = vmatpush1.bf16.msra.mxu0 %v3190_v30  ;;  %v3274_v30 = vld [vmem:[%s4778_s1 + $0x2ec] ss:$16 sps:$4 sm:$0xff]  }
  0x50   :  { %1757 = vmatpush1.bf16.msra.mxu1 %v3193_v31  ;;  %1717 = vmatprep.subr.bf16.mxu0 %v3198_v32  ;;  %v4085_v31 = vpack.c.bf16 %v3948_v44, %v3948_v44  ;;  %v4089_v32 = vpack.c.bf16 %v3959_v50, %v3959_v50  ;;  %v3289_v44 = vld [vmem:[%s4778_s1 + $0x8c] ss:$16 sps:$4 sm:$0xff]   ;;  %v3296_v50 = vld [vmem:[%s4778_s1 + $0x268] ss:$16 sps:$4 sm:$0xff]  }
  0x51   :  { %1758 = vmatprep.subr.bf16.mxu1 %v3201_v33  ;;  %v3269_v33 = vld [vmem:[%s4778_s1 + $0xe8] ss:$16 sps:$4 sm:$0xff]  }
  0x53   :  { %1718 = vmatpush1.bf16.msra.mxu0 %v3196_v34  ;;  %v3272_v34 = vld [vmem:[%s4778_s1 + $0x2e8] ss:$16 sps:$4 sm:$0xff]  }
  0x54   :  { %1759 = vmatpush1.bf16.msra.mxu1 %v3199_v35  ;;  %1719 = vmatprep.subr.bf16.mxu0 %v3204_v36  ;;  %v3277_v35 = vld [vmem:[%s4778_s1 + $0xcc] ss:$16 sps:$4 sm:$0xff]  }
  0x55   :  { %1760 = vmatprep.subr.bf16.mxu1 %v3207_v37  ;;  %v3280_v36 = vld [vmem:[%s4778_s1 + $0x2cc] ss:$16 sps:$4 sm:$0xff]   ;;  %v3275_v37 = vld [vmem:[%s4778_s1 + $0xc8] ss:$16 sps:$4 sm:$0xff]  }
  0x57   :  { %1720 = vmatpush1.bf16.msra.mxu0 %v3202_v38  ;;  %v3278_v38 = vld [vmem:[%s4778_s1 + $0x2c8] ss:$16 sps:$4 sm:$0xff]  }
  0x58   :  { %1761 = vmatpush1.bf16.msra.mxu1 %v3205_v39  ;;  %1721 = vmatprep.subr.bf16.mxu0 %v3210_v40  ;;  %v3283_v39 = vld [vmem:[%s4778_s1 + $0xac] ss:$16 sps:$4 sm:$0xff]  }
  0x59   :  { %1762 = vmatprep.subr.bf16.mxu1 %v3213_v41  ;;  %v3286_v40 = vld [vmem:[%s4778_s1 + $0x2ac] ss:$16 sps:$4 sm:$0xff]   ;;  %v3281_v41 = vld [vmem:[%s4778_s1 + $0xa8] ss:$16 sps:$4 sm:$0xff]  }
  0x5b   :  { %1722 = vmatpush1.bf16.msra.mxu0 %v3208_v46  ;;  %v3295_v46 = vld [vmem:[%s4778_s1 + $0x6c] ss:$16 sps:$4 sm:$0xff]  }
  0x5c   :  { %1763 = vmatpush1.bf16.msra.mxu1 %v3211_v47  ;;  %1723 = vmatprep.subr.bf16.mxu0 %v3216_v51  ;;  %v3298_v47 = vld [vmem:[%s4778_s1 + $0x26c] ss:$16 sps:$4 sm:$0xff]  }
  0x5d   :  { %1764 = vmatprep.subr.bf16.mxu1 %v3219_v52  ;;  %v3301_v51 = vld [vmem:[%s4778_s1 + $0x4c] ss:$16 sps:$4 sm:$0xff]  }
  0x5e   :  { %v3304_v52 = vld [vmem:[%s4778_s1 + $0x24c] ss:$16 sps:$4 sm:$0xff]  }
  0x5f   :  { %1724 = vmatpush1.bf16.msra.mxu0 %v3214_v49  ;;  %v3302_v49 = vld [vmem:[%s4778_s1 + $0x248] ss:$16 sps:$4 sm:$0xff]  }
  0x60   :  { %1765 = vmatpush1.bf16.msra.mxu1 %v3217_v55  ;;  %1725 = vmatprep.subr.bf16.mxu0 %v3222_v57  ;;  %v3307_v55 = vld [vmem:[%s4778_s1 + $0x2c] ss:$16 sps:$4 sm:$0xff]  }
  0x61   :  { %1766 = vmatprep.subr.bf16.mxu1 %v3225_v58  ;;  %v3310_v57 = vld [vmem:[%s4778_s1 + $0x22c] ss:$16 sps:$4 sm:$0xff]   ;;  %v3305_v58 = vld [vmem:[%s4778_s1 + $0x28] ss:$16 sps:$4 sm:$0xff]  }
  0x63   :  { %1726 = vmatpush2.bf16.msra.mxu0 %v3220_v59  ;;  %v3308_v59 = vld [vmem:[%s4778_s1 + $0x228] ss:$16 sps:$4 sm:$0xff]  }
  0x64   :  { %1767 = vmatpush2.bf16.msra.mxu1 %v3223_v60  ;;  %1727 = vmatprep.subr.bf16.mxu0 %v3228_v61  ;;  %v3313_v60 = vld [vmem:[%s4778_s1 + $0xc] ss:$16 sps:$4 sm:$0xff]  }
  0x65   :  { %1768 = vmatprep.subr.bf16.mxu1 %v3231_v63  ;;  %v3316_v61 = vld [vmem:[%s4778_s1 + $0x20c] ss:$16 sps:$4 sm:$0xff]   ;;  %v3311_v63 = vld [vmem:[%s4778_s1 + $0x8] ss:$16 sps:$4 sm:$0xff]  }
  0x67   :  { %1728 = vmatpush2.bf16.msra.mxu0 %v3226_v0  ;;  %v3314_v0 = vld [vmem:[%s4778_s1 + $0x208] ss:$16 sps:$4 sm:$0xff]  }
  0x68   :  { %1769 = vmatpush2.bf16.msra.mxu1 %v3229_v1  ;;  %1729 = vmatprep.subr.bf16.mxu0 %v3234_v2  ;;  %v3319_v1 = vld [vmem:[%s4778_s1 + $0x1ec] ss:$16 sps:$4 sm:$0xff]  }
  0x69   :  { %1770 = vmatprep.subr.bf16.mxu1 %v3237_v4  ;;  %v3322_v2 = vld [vmem:[%s4778_s1 + $0x3ec] ss:$16 sps:$4 sm:$0xff]   ;;  %v3317_v4 = vld [vmem:[%s4778_s1 + $0x1e8] ss:$16 sps:$4 sm:$0xff]  }
  0x6b   :  { %1730 = vmatpush2.bf16.msra.mxu0 %v3232_v5  ;;  %v3320_v5 = vld [vmem:[%s4778_s1 + $0x3e8] ss:$16 sps:$4 sm:$0xff]  }
  0x6c   :  { %1771 = vmatpush2.bf16.msra.mxu1 %v3235_v6  ;;  %1731 = vmatprep.subr.bf16.mxu0 %v3240_v7  ;;  %v3325_v6 = vld [vmem:[%s4778_s1 + $0x1cc] ss:$16 sps:$4 sm:$0xff]  }
  0x6d   :  { %1772 = vmatprep.subr.bf16.mxu1 %v3243_v8  ;;  %v3328_v7 = vld [vmem:[%s4778_s1 + $0x3cc] ss:$16 sps:$4 sm:$0xff]   ;;  %v3323_v8 = vld [vmem:[%s4778_s1 + $0x1c8] ss:$16 sps:$4 sm:$0xff]  }
  0x6f   :  { %1732 = vmatpush2.bf16.msra.mxu0 %v3238_v9  ;;  %v3326_v9 = vld [vmem:[%s4778_s1 + $0x3c8] ss:$16 sps:$4 sm:$0xff]  }
  0x70   :  { %1773 = vmatpush2.bf16.msra.mxu1 %v3241_v10  ;;  %1733 = vmatprep.subr.bf16.mxu0 %v3246_v11  ;;  %v3331_v10 = vld [vmem:[%s4778_s1 + $0x1ac] ss:$16 sps:$4 sm:$0xff]  }
  0x71   :  { %1774 = vmatprep.subr.bf16.mxu1 %v3249_v12  ;;  %v3334_v11 = vld [vmem:[%s4778_s1 + $0x3ac] ss:$16 sps:$4 sm:$0xff]   ;;  %v3329_v12 = vld [vmem:[%s4778_s1 + $0x1a8] ss:$16 sps:$4 sm:$0xff]  }
  0x73   :  { %1734 = vmatpush2.bf16.msra.mxu0 %v3244_v13  ;;  %v3332_v13 = vld [vmem:[%s4778_s1 + $0x3a8] ss:$16 sps:$4 sm:$0xff]  }
  0x74   :  { %1775 = vmatpush2.bf16.msra.mxu1 %v3247_v14  ;;  %1735 = vmatprep.subr.bf16.mxu0 %v3252_v15  ;;  %v3337_v14 = vld [vmem:[%s4778_s1 + $0x18c] ss:$16 sps:$4 sm:$0xff]  }
  0x75   :  { %1776 = vmatprep.subr.bf16.mxu1 %v3255_v18  ;;  %v3340_v15 = vld [vmem:[%s4778_s1 + $0x38c] ss:$16 sps:$4 sm:$0xff]   ;;  %v3335_v18 = vld [vmem:[%s4778_s1 + $0x188] ss:$16 sps:$4 sm:$0xff]  }
  0x77   :  { %1736 = vmatpush2.bf16.msra.mxu0 %v3250_v19  ;;  %v3338_v19 = vld [vmem:[%s4778_s1 + $0x388] ss:$16 sps:$4 sm:$0xff]  }
  0x78   :  { %1777 = vmatpush2.bf16.msra.mxu1 %v3253_v20  ;;  %1737 = vmatprep.subr.bf16.mxu0 %v3258_v21  ;;  %v3343_v20 = vld [vmem:[%s4778_s1 + $0x16c] ss:$16 sps:$4 sm:$0xff]  }
  0x79   :  { %1778 = vmatprep.subr.bf16.mxu1 %v3261_v22  ;;  %v3346_v21 = vld [vmem:[%s4778_s1 + $0x36c] ss:$16 sps:$4 sm:$0xff]   ;;  %v3341_v22 = vld [vmem:[%s4778_s1 + $0x168] ss:$16 sps:$4 sm:$0xff]  }
  0x7b   :  { %1738 = vmatpush2.bf16.msra.mxu0 %v3256_v23  ;;  %v3344_v23 = vld [vmem:[%s4778_s1 + $0x368] ss:$16 sps:$4 sm:$0xff]  }
  0x7c   :  { %1779 = vmatpush2.bf16.msra.mxu1 %v3259_v24  ;;  %1739 = vmatprep.subr.bf16.mxu0 %v3264_v25  ;;  %v3349_v24 = vld [vmem:[%s4778_s1 + $0x14c] ss:$16 sps:$4 sm:$0xff]  }
  0x7d   :  { %1780 = vmatprep.subr.bf16.mxu1 %v3267_v26  ;;  %v3352_v25 = vld [vmem:[%s4778_s1 + $0x34c] ss:$16 sps:$4 sm:$0xff]   ;;  %v3347_v26 = vld [vmem:[%s4778_s1 + $0x148] ss:$16 sps:$4 sm:$0xff]  }
  0x7f   :  { %1740 = vmatpush2.bf16.msra.mxu0 %v3262_v27  ;;  %v3350_v27 = vld [vmem:[%s4778_s1 + $0x348] ss:$16 sps:$4 sm:$0xff]  }
  0x80   :  { %1781 = vmatpush2.bf16.msra.mxu1 %v3265_v28  ;;  %1791 = vmatprep.subr.bf16.mxu0 %v3271_v29  ;;  %v3355_v28 = vld [vmem:[%s4778_s1 + $0x12c] ss:$16 sps:$4 sm:$0xff]  }
  0x81   :  { %1832 = vmatprep.subr.bf16.mxu1 %v3274_v30  ;;  %v3358_v29 = vld [vmem:[%s4778_s1 + $0x32c] ss:$16 sps:$4 sm:$0xff]   ;;  %v3353_v30 = vld [vmem:[%s4778_s1 + $0x128] ss:$16 sps:$4 sm:$0xff]  }
  0x82   :  { %1742 = vmatmul.mubr.bf16.vlgmr.msra.gmra.mxu0 %v4085_v31 }
  0x83   :  { %1783 = vmatmul.mubr.bf16.vlgmr.msra.gmra.mxu1 %v4089_v32  ;;  %1792 = vmatpush1.bf16.msra.mxu0 %v3269_v33  ;;  %v3356_v33 = vld [vmem:[%s4778_s1 + $0x328] ss:$16 sps:$4 sm:$0xff]  }
  0x84   :  { %1833 = vmatpush1.bf16.msra.mxu1 %v3272_v34  ;;  %1793 = vmatprep.subr.bf16.mxu0 %v3277_v35  ;;  %v3361_v34 = vld [vmem:[%s4778_s1 + $0x10c] ss:$16 sps:$4 sm:$0xff]  }
  0x85   :  { %1834 = vmatprep.subr.bf16.mxu1 %v3280_v36  ;;  %1823 = vmatprep.mubr.bf16.mxu0 %v3815_v62  ;;  %v3292_v62 = vld [vmem:[%s4778_s1 + $0x28c] ss:$16 sps:$4 sm:$0xff]   ;;  %v3359_v36 = vld [vmem:[%s4778_s1 + $0x108] ss:$16 sps:$4 sm:$0xff]  }
  0x86   :  { %1864 = vmatprep.mubr.bf16.mxu1 %v3826_v3  ;;  %v3287_v3 = vld [vmem:[%s4778_s1 + $0x88] ss:$16 sps:$4 sm:$0xff]   ;;  %v3364_v35 = vld [vmem:[%s4778_s1 + $0x30c] ss:$16 sps:$4 sm:$0xff]  }
  0x87   :  { %1794 = vmatpush1.bf16.msra.mxu0 %v3275_v37  ;;  %v3362_v37 = vld [vmem:[%s4778_s1 + $0x308] ss:$16 sps:$4 sm:$0xff]  }
  0x88   :  { %1835 = vmatpush1.bf16.msra.mxu1 %v3278_v38  ;;  %1795 = vmatprep.subr.bf16.mxu0 %v3283_v39  ;;  %v3367_v38 = vld [vmem:[%s4778_s1 + $0x4ec] ss:$16 sps:$4 sm:$0xff]  }
  0x89   :  { %1836 = vmatprep.subr.bf16.mxu1 %v3286_v40  ;;  %v3370_v39 = vld [vmem:[%s4778_s1 + $0x6ec] ss:$16 sps:$4 sm:$0xff]   ;;  %v3365_v40 = vld [vmem:[%s4778_s1 + $0x4e8] ss:$16 sps:$4 sm:$0xff]  }
  0x8b   :  { %1796 = vmatpush1.bf16.msra.mxu0 %v3281_v41  ;;  %v3368_v41 = vld [vmem:[%s4778_s1 + $0x6e8] ss:$16 sps:$4 sm:$0xff]  }
  0x8c   :  { %1837 = vmatpush1.bf16.msra.mxu1 %v3284_v42  ;;  %1797 = vmatprep.subr.bf16.mxu0 %v3289_v44  ;;  %v3373_v42 = vld [vmem:[%s4778_s1 + $0x4cc] ss:$16 sps:$4 sm:$0xff]  }
  0x8d   :  { %1838 = vmatprep.subr.bf16.mxu1 %v3292_v62  ;;  %v3376_v44 = vld [vmem:[%s4778_s1 + $0x6cc] ss:$16 sps:$4 sm:$0xff]   ;;  %v3371_v62 = vld [vmem:[%s4778_s1 + $0x4c8] ss:$16 sps:$4 sm:$0xff]  }
  0x8f   :  { %1798 = vmatpush1.bf16.msra.mxu0 %v3287_v3  ;;  %v3374_v3 = vld [vmem:[%s4778_s1 + $0x6c8] ss:$16 sps:$4 sm:$0xff]  }
  0x90   :  { %1839 = vmatpush1.bf16.msra.mxu1 %v3290_v45  ;;  %1799 = vmatprep.subr.bf16.mxu0 %v3295_v46  ;;  %v3379_v45 = vld [vmem:[%s4778_s1 + $0x4ac] ss:$16 sps:$4 sm:$0xff]  }
  0x91   :  { %1840 = vmatprep.subr.bf16.mxu1 %v3298_v47  ;;  %v3382_v46 = vld [vmem:[%s4778_s1 + $0x6ac] ss:$16 sps:$4 sm:$0xff]   ;;  %v3377_v47 = vld [vmem:[%s4778_s1 + $0x4a8] ss:$16 sps:$4 sm:$0xff]  }
  0x93   :  { %1800 = vmatpush1.bf16.msra.mxu0 %v3293_v48  ;;  %v3388_v48 = vld [vmem:[%s4778_s1 + $0x68c] ss:$16 sps:$4 sm:$0xff]  }
  0x94   :  { %1841 = vmatpush1.bf16.msra.mxu1 %v3296_v50  ;;  %1801 = vmatprep.subr.bf16.mxu0 %v3301_v51  ;;  %v3383_v50 = vld [vmem:[%s4778_s1 + $0x488] ss:$16 sps:$4 sm:$0xff]   ;;  %v3394_v51 = vld [vmem:[%s4778_s1 + $0x66c] ss:$16 sps:$4 sm:$0xff]  }
  0x95   :  { %1842 = vmatprep.subr.bf16.mxu1 %v3304_v52  ;;  %v3389_v52 = vld [vmem:[%s4778_s1 + $0x468] ss:$16 sps:$4 sm:$0xff]  }
  0x97   :  { %1802 = vmatpush1.bf16.msra.mxu0 %v3299_v54  ;;  %v3392_v54 = vld [vmem:[%s4778_s1 + $0x668] ss:$16 sps:$4 sm:$0xff]  }
  0x98   :  { %1843 = vmatpush1.bf16.msra.mxu1 %v3302_v49  ;;  %1803 = vmatprep.subr.bf16.mxu0 %v3307_v55  ;;  %v3397_v49 = vld [vmem:[%s4778_s1 + $0x44c] ss:$16 sps:$4 sm:$0xff]  }
  0x99   :  { %1844 = vmatprep.subr.bf16.mxu1 %v3310_v57  ;;  %v3400_v55 = vld [vmem:[%s4778_s1 + $0x64c] ss:$16 sps:$4 sm:$0xff]   ;;  %v3395_v57 = vld [vmem:[%s4778_s1 + $0x448] ss:$16 sps:$4 sm:$0xff]  }
  0x9b   :  { %1804 = vmatpush1.bf16.msra.mxu0 %v3305_v58  ;;  %v3398_v58 = vld [vmem:[%s4778_s1 + $0x648] ss:$16 sps:$4 sm:$0xff]  }
  0x9c   :  { %1845 = vmatpush1.bf16.msra.mxu1 %v3308_v59  ;;  %1805 = vmatprep.subr.bf16.mxu0 %v3313_v60  ;;  %v3403_v59 = vld [vmem:[%s4778_s1 + $0x42c] ss:$16 sps:$4 sm:$0xff]  }
  0x9d   :  { %1846 = vmatprep.subr.bf16.mxu1 %v3316_v61  ;;  %v3406_v60 = vld [vmem:[%s4778_s1 + $0x62c] ss:$16 sps:$4 sm:$0xff]  }
  0x9f   :  { %1806 = vmatpush1.bf16.msra.mxu0 %v3311_v63 }
  0xa0   :  { %1847 = vmatpush1.bf16.msra.mxu1 %v3314_v0  ;;  %1807 = vmatprep.subr.bf16.mxu0 %v3319_v1 }
  0xa1   :  { %1848 = vmatprep.subr.bf16.mxu1 %v3322_v2 }
  0xa3   :  { %1808 = vmatpush2.bf16.msra.mxu0 %v3317_v4 }
  0xa4   :  { %1849 = vmatpush2.bf16.msra.mxu1 %v3320_v5  ;;  %1809 = vmatprep.subr.bf16.mxu0 %v3325_v6 }
  0xa5   :  { %1850 = vmatprep.subr.bf16.mxu1 %v3328_v7 }
  0xa7   :  { %1810 = vmatpush2.bf16.msra.mxu0 %v3323_v8 }
  0xa8   :  { %1851 = vmatpush2.bf16.msra.mxu1 %v3326_v9  ;;  %1811 = vmatprep.subr.bf16.mxu0 %v3331_v10 }
  0xa9   :  { %1852 = vmatprep.subr.bf16.mxu1 %v3334_v11 }
  0xab   :  { %1812 = vmatpush2.bf16.msra.mxu0 %v3329_v12 }
  0xac   :  { %1853 = vmatpush2.bf16.msra.mxu1 %v3332_v13  ;;  %1813 = vmatprep.subr.bf16.mxu0 %v3337_v14 }
  0xad   :  { %1854 = vmatprep.subr.bf16.mxu1 %v3340_v15 }
  0xaf   :  { %1814 = vmatpush2.bf16.msra.mxu0 %v3335_v18 }
  0xb0   :  { %1855 = vmatpush2.bf16.msra.mxu1 %v3338_v19  ;;  %1815 = vmatprep.subr.bf16.mxu0 %v3343_v20 }
  0xb1   :  { %1856 = vmatprep.subr.bf16.mxu1 %v3346_v21 }
  0xb3   :  { %1816 = vmatpush2.bf16.msra.mxu0 %v3341_v22 }
  0xb4   :  { %1857 = vmatpush2.bf16.msra.mxu1 %v3344_v23  ;;  %1817 = vmatprep.subr.bf16.mxu0 %v3349_v24 }
  0xb5   :  { %1858 = vmatprep.subr.bf16.mxu1 %v3352_v25 }
  0xb7   :  { %1818 = vmatpush2.bf16.msra.mxu0 %v3347_v26 }
  0xb8   :  { %1859 = vmatpush2.bf16.msra.mxu1 %v3350_v27  ;;  %1819 = vmatprep.subr.bf16.mxu0 %v3355_v28 }
  0xb9   :  { %1860 = vmatprep.subr.bf16.mxu1 %v3358_v29 }
  0xbb   :  { %1820 = vmatpush2.bf16.msra.mxu0 %v3353_v30 }
  0xbc   :  { %1861 = vmatpush2.bf16.msra.mxu1 %v3356_v33  ;;  %1821 = vmatprep.subr.bf16.mxu0 %v3361_v34 }
  0xbd   :  { %1862 = vmatprep.subr.bf16.mxu1 %v3364_v35 }
  0xbf   :  { %1822 = vmatpush2.bf16.msra.mxu0 %v3359_v36 }
  0xc0   :  { %1863 = vmatpush2.bf16.msra.mxu1 %v3362_v37  ;;  %1873 = vmatprep.subr.bf16.mxu0 %v3367_v38 }
  0xc1   :  { %1914 = vmatprep.subr.bf16.mxu1 %v3370_v39 }
  0xc2   :  { %1824 = vmatmul.mubr.bf16.vlgmr.msra.gmra.mxu0 %v3866_v16  ;;  %v3380_v16 = vld [vmem:[%s4778_s1 + $0x6a8] ss:$16 sps:$4 sm:$0xff]  }
  0xc3   :  { %1865 = vmatmul.mubr.bf16.vlgmr.msra.gmra.mxu1 %v3868_v17  ;;  %1874 = vmatpush1.bf16.msra.mxu0 %v3365_v40  ;;  %v3385_v17 = vld [vmem:[%s4778_s1 + $0x48c] ss:$16 sps:$4 sm:$0xff]  }
  0xc4   :  { %1915 = vmatpush1.bf16.msra.mxu1 %v3368_v41  ;;  %1875 = vmatprep.subr.bf16.mxu0 %v3373_v42 }
  0xc5   :  { %1916 = vmatprep.subr.bf16.mxu1 %v3376_v44  ;;  %1905 = vmatprep.mubr.bf16.mxu0 %v3967_v53  ;;  %v3386_v53 = vld [vmem:[%s4778_s1 + $0x688] ss:$16 sps:$4 sm:$0xff]  }
  0xc6   :  { %1946 = vmatprep.mubr.bf16.mxu1 %v3977_v56  ;;  %v3391_v56 = vld [vmem:[%s4778_s1 + $0x46c] ss:$16 sps:$4 sm:$0xff]  }
  0xc7   :  { %1876 = vmatpush1.bf16.msra.mxu0 %v3371_v62 }
  0xc8   :  { %1917 = vmatpush1.bf16.msra.mxu1 %v3374_v3  ;;  %1877 = vmatprep.subr.bf16.mxu0 %v3379_v45 }
  0xc9   :  { %1918 = vmatprep.subr.bf16.mxu1 %v3382_v46 }
  0xcb   :  { %1878 = vmatpush1.bf16.msra.mxu0 %v3377_v47 }
  0xcc   :  { %1919 = vmatpush1.bf16.msra.mxu1 %v3380_v16  ;;  %1879 = vmatprep.subr.bf16.mxu0 %v3385_v17 }
  0xcd   :  { %1920 = vmatprep.subr.bf16.mxu1 %v3388_v48 }
  0xcf   :  { %1880 = vmatpush1.bf16.msra.mxu0 %v3383_v50 }
  0xd0   :  { %1921 = vmatpush1.bf16.msra.mxu1 %v3386_v53  ;;  %1881 = vmatprep.subr.bf16.mxu0 %v3391_v56 }
  0xd1   :  { %1922 = vmatprep.subr.bf16.mxu1 %v3394_v51 }
  0xd3   :  { %1882 = vmatpush1.bf16.msra.mxu0 %v3389_v52 }
  0xd4   :  { %1923 = vmatpush1.bf16.msra.mxu1 %v3392_v54  ;;  %1883 = vmatprep.subr.bf16.mxu0 %v3397_v49 }
  0xd5   :  { %1924 = vmatprep.subr.bf16.mxu1 %v3400_v55 }
  0xd6   :  { %15 = vsyncpa [#allocation3], 0  ;;  %v3401_v61 = vld [vmem:[%s4778_s1 + $0x428] ss:$16 sps:$4 sm:$0xff]   ;;  %v3409_v0 = vld [vmem:[%s4778_s1 + $0x40c] ss:$16 sps:$4 sm:$0xff]  }
  0xd7   :  { %1884 = vmatpush1.bf16.msra.mxu0 %v3395_v57  ;;  %v3404_v63 = vld [vmem:[%s4778_s1 + $0x628] ss:$16 sps:$4 sm:$0xff]   ;;  %v3412_v1 = vld [vmem:[%s4778_s1 + $0x60c] ss:$16 sps:$4 sm:$0xff]   ;;  %s3596_s0 = smov [#allocation2]   ;;  %vm2697_vm0 = vcmask 74752  }
  0xd8   :  { %1925 = vmatpush1.bf16.msra.mxu1 %v3398_v58  ;;  %1885 = vmatprep.subr.bf16.mxu0 %v3403_v59  ;;  %v3407_v2 = vld [vmem:[%s4778_s1 + $0x408] ss:$16 sps:$4 sm:$0xff]   ;;  %v3415_v5 = vld [vmem:[%s4778_s1 + $0x5ec] ss:$16 sps:$4 sm:$0xff]  }
  0xd9   :  { %1926 = vmatprep.subr.bf16.mxu1 %v3406_v60  ;;  %v3410_v4 = vld [vmem:[%s4778_s1 + $0x608] ss:$16 sps:$4 sm:$0xff]   ;;  %v3418_v6 = vld [vmem:[%s4778_s1 + $0x7ec] ss:$16 sps:$4 sm:$0xff]  }
  0xda   :  { %v3413_v7 = vld [vmem:[%s4778_s1 + $0x5e8] ss:$16 sps:$4 sm:$0xff]   ;;  %v3421_v9 = vld [vmem:[%s4778_s1 + $0x5cc] ss:$16 sps:$4 sm:$0xff]  }
  0xdb   :  { %1886 = vmatpush1.bf16.msra.mxu0 %v3401_v61  ;;  %v3416_v8 = vld [vmem:[%s4778_s1 + $0x7e8] ss:$16 sps:$4 sm:$0xff]   ;;  %v3424_v10 = vld [vmem:[%s4778_s1 + $0x7cc] ss:$16 sps:$4 sm:$0xff]  }
  0xdc   :  { %1927 = vmatpush1.bf16.msra.mxu1 %v3404_v63  ;;  %1887 = vmatprep.subr.bf16.mxu0 %v3409_v0  ;;  %v3419_v11 = vld [vmem:[%s4778_s1 + $0x5c8] ss:$16 sps:$4 sm:$0xff]   ;;  %v3427_v13 = vld [vmem:[%s4778_s1 + $0x5ac] ss:$16 sps:$4 sm:$0xff]  }
  0xdd   :  { %1928 = vmatprep.subr.bf16.mxu1 %v3412_v1  ;;  %v3422_v12 = vld [vmem:[%s4778_s1 + $0x7c8] ss:$16 sps:$4 sm:$0xff]   ;;  %v3430_v14 = vld [vmem:[%s4778_s1 + $0x7ac] ss:$16 sps:$4 sm:$0xff]  }
  0xde   :  { %v3425_v15 = vld [vmem:[%s4778_s1 + $0x5a8] ss:$16 sps:$4 sm:$0xff]   ;;  %v3433_v19 = vld [vmem:[%s4778_s1 + $0x58c] ss:$16 sps:$4 sm:$0xff]  }
  0xdf   :  { %1888 = vmatpush1.bf16.msra.mxu0 %v3407_v2  ;;  %v3428_v18 = vld [vmem:[%s4778_s1 + $0x7a8] ss:$16 sps:$4 sm:$0xff]   ;;  %v3436_v20 = vld [vmem:[%s4778_s1 + $0x78c] ss:$16 sps:$4 sm:$0xff]  }
  0xe0   :  { %1929 = vmatpush1.bf16.msra.mxu1 %v3410_v4  ;;  %1889 = vmatprep.subr.bf16.mxu0 %v3415_v5  ;;  %v3431_v21 = vld [vmem:[%s4778_s1 + $0x588] ss:$16 sps:$4 sm:$0xff]   ;;  %v3439_v23 = vld [vmem:[%s4778_s1 + $0x56c] ss:$16 sps:$4 sm:$0xff]  }
  0xe1   :  { %1930 = vmatprep.subr.bf16.mxu1 %v3418_v6  ;;  %v3434_v22 = vld [vmem:[%s4778_s1 + $0x788] ss:$16 sps:$4 sm:$0xff]   ;;  %v3442_v24 = vld [vmem:[%s4778_s1 + $0x76c] ss:$16 sps:$4 sm:$0xff]  }
  0xe2   :  { %v3437_v25 = vld [vmem:[%s4778_s1 + $0x568] ss:$16 sps:$4 sm:$0xff]   ;;  %v3445_v27 = vld [vmem:[%s4778_s1 + $0x54c] ss:$16 sps:$4 sm:$0xff]  }
  0xe3   :  { %1890 = vmatpush2.bf16.msra.mxu0 %v3413_v7  ;;  %v3440_v26 = vld [vmem:[%s4778_s1 + $0x768] ss:$16 sps:$4 sm:$0xff]   ;;  %v3448_v28 = vld [vmem:[%s4778_s1 + $0x74c] ss:$16 sps:$4 sm:$0xff]  }
  0xe4   :  { %1931 = vmatpush2.bf16.msra.mxu1 %v3416_v8  ;;  %1891 = vmatprep.subr.bf16.mxu0 %v3421_v9  ;;  %v3443_v29 = vld [vmem:[%s4778_s1 + $0x548] ss:$16 sps:$4 sm:$0xff]   ;;  %v3451_v33 = vld [vmem:[%s4778_s1 + $0x52c] ss:$16 sps:$4 sm:$0xff]  }
  0xe5   :  { %1932 = vmatprep.subr.bf16.mxu1 %v3424_v10  ;;  %v3446_v30 = vld [vmem:[%s4778_s1 + $0x748] ss:$16 sps:$4 sm:$0xff]   ;;  %v3454_v34 = vld [vmem:[%s4778_s1 + $0x72c] ss:$16 sps:$4 sm:$0xff]  }
  0xe6   :  { %v3449_v35 = vld [vmem:[%s4778_s1 + $0x528] ss:$16 sps:$4 sm:$0xff]   ;;  %v3457_v37 = vld [vmem:[%s4778_s1 + $0x50c] ss:$16 sps:$4 sm:$0xff]  }
  0xe7   :  { %1892 = vmatpush2.bf16.msra.mxu0 %v3419_v11  ;;  %v3452_v36 = vld [vmem:[%s4778_s1 + $0x728] ss:$16 sps:$4 sm:$0xff]   ;;  %v3460_v38 = vld [vmem:[%s4778_s1 + $0x70c] ss:$16 sps:$4 sm:$0xff]  }
  0xe8   :  { %1933 = vmatpush2.bf16.msra.mxu1 %v3422_v12  ;;  %1893 = vmatprep.subr.bf16.mxu0 %v3427_v13  ;;  %v3455_v39 = vld [vmem:[%s4778_s1 + $0x508] ss:$16 sps:$4 sm:$0xff]   ;;  %v3463_v41 = vld [vmem:[%s4781_s4 + $0x74] ss:$8 sps:$4 sm:$0xff]   ;;  %v3466_v44 = vld [vmem:[%s4781_s4 + $0x64] ss:$8 sps:$4 sm:$0xff]  }
  0xe9   :  { %1934 = vmatprep.subr.bf16.mxu1 %v3430_v14  ;;  %v3458_v40 = vld [vmem:[%s4778_s1 + $0x708] ss:$16 sps:$4 sm:$0xff]   ;;  %v3469_v17 = vld [vmem:[%s4781_s4 + $0x54] ss:$8 sps:$4 sm:$0xff]   ;;  %v3472_v56 = vld [vmem:[%s4781_s4 + $0x44] ss:$8 sps:$4 sm:$0xff]  }
  0xea   :  { %v3461_v42 = vld [vmem:[%s4781_s4 + $0x70] ss:$8 sps:$4 sm:$0xff]   ;;  %v3464_v46 = vld [vmem:[%s4781_s4 + $0x60] ss:$8 sps:$4 sm:$0xff]   ;;  %v3511_v52 = vld [vmem:[%s4781_s4 + $0x174] ss:$8 sps:$4 sm:$0xff]  }
  0xeb   :  { %1894 = vmatpush2.bf16.msra.mxu0 %v3425_v15  ;;  %v3509_v51 = vld [vmem:[%s4781_s4 + $0x170] ss:$8 sps:$4 sm:$0xff]   ;;  %v3514_v54 = vld [vmem:[%s4781_s4 + $0x164] ss:$8 sps:$4 sm:$0xff]   ;;  %v3470_v49 = vld [vmem:[%s4781_s4 + $0x40] ss:$8 sps:$4 sm:$0xff]  }
  0xec   :  { %1935 = vmatpush2.bf16.msra.mxu1 %v3428_v18  ;;  %1895 = vmatprep.subr.bf16.mxu0 %v3433_v19  ;;  %v3512_v55 = vld [vmem:[%s4781_s4 + $0x160] ss:$8 sps:$4 sm:$0xff]   ;;  %v3475_v57 = vld [vmem:[%s4781_s4 + $0x34] ss:$8 sps:$4 sm:$0xff]   ;;  %v3473_v59 = vld [vmem:[%s4781_s4 + $0x30] ss:$8 sps:$4 sm:$0xff]  }
  0xed   :  { %1936 = vmatprep.subr.bf16.mxu1 %v3436_v20  ;;  %v3517_v58 = vld [vmem:[%s4781_s4 + $0x154] ss:$8 sps:$4 sm:$0xff]   ;;  %v3515_v60 = vld [vmem:[%s4781_s4 + $0x150] ss:$8 sps:$4 sm:$0xff]   ;;  %v3478_v61 = vld [vmem:[%s4781_s4 + $0x24] ss:$8 sps:$4 sm:$0xff]  }
  0xee   :  { %v3520_v63 = vld [vmem:[%s4781_s4 + $0x144] ss:$8 sps:$4 sm:$0xff]   ;;  %v3476_v0 = vld [vmem:[%s4781_s4 + $0x20] ss:$8 sps:$4 sm:$0xff]   ;;  %v3481_v2 = vld [vmem:[%s4781_s4 + $0x14] ss:$8 sps:$4 sm:$0xff]  }
  0xef   :  { %1896 = vmatpush2.bf16.msra.mxu0 %v3431_v21  ;;  %v3518_v1 = vld [vmem:[%s4781_s4 + $0x140] ss:$8 sps:$4 sm:$0xff]   ;;  %v3523_v4 = vld [vmem:[%s4781_s4 + $0x134] ss:$8 sps:$4 sm:$0xff]   ;;  %v3479_v5 = vld [vmem:[%s4781_s4 + $0x10] ss:$8 sps:$4 sm:$0xff]  }
  0xf0   :  { %1937 = vmatpush2.bf16.msra.mxu1 %v3434_v22  ;;  %1897 = vmatprep.subr.bf16.mxu0 %v3439_v23  ;;  %v3521_v6 = vld [vmem:[%s4781_s4 + $0x130] ss:$8 sps:$4 sm:$0xff]   ;;  %v3484_v7 = vld [vmem:[%s4781_s4 + $0x4] ss:$8 sps:$4 sm:$0xff]   ;;  %v3482_v9 = vld [vmem:[%s4781_s4] ss:$8 sps:$4 sm:$0xff]  }
  0xf1   :  { %1938 = vmatprep.subr.bf16.mxu1 %v3442_v24  ;;  %v3526_v8 = vld [vmem:[%s4781_s4 + $0x124] ss:$8 sps:$4 sm:$0xff]   ;;  %v3524_v10 = vld [vmem:[%s4781_s4 + $0x120] ss:$8 sps:$4 sm:$0xff]   ;;  %v3487_v11 = vld [vmem:[%s4781_s4 + $0xf4] ss:$8 sps:$4 sm:$0xff]  }
  0xf2   :  { %v3529_v12 = vld [vmem:[%s4781_s4 + $0x114] ss:$8 sps:$4 sm:$0xff]   ;;  %v3485_v13 = vld [vmem:[%s4781_s4 + $0xf0] ss:$8 sps:$4 sm:$0xff]   ;;  %v3490_v15 = vld [vmem:[%s4781_s4 + $0xe4] ss:$8 sps:$4 sm:$0xff]  }
  0xf3   :  { %1898 = vmatpush2.bf16.msra.mxu0 %v3437_v25  ;;  %v3527_v14 = vld [vmem:[%s4781_s4 + $0x110] ss:$8 sps:$4 sm:$0xff]   ;;  %v3532_v18 = vld [vmem:[%s4781_s4 + $0x104] ss:$8 sps:$4 sm:$0xff]   ;;  %v3488_v19 = vld [vmem:[%s4781_s4 + $0xe0] ss:$8 sps:$4 sm:$0xff]  }
  0xf4   :  { %1939 = vmatpush2.bf16.msra.mxu1 %v3440_v26  ;;  %1899 = vmatprep.subr.bf16.mxu0 %v3445_v27  ;;  %v3530_v20 = vld [vmem:[%s4781_s4 + $0x100] ss:$8 sps:$4 sm:$0xff]   ;;  %v3493_v21 = vld [vmem:[%s4781_s4 + $0xd4] ss:$8 sps:$4 sm:$0xff]   ;;  %v3491_v23 = vld [vmem:[%s4781_s4 + $0xd0] ss:$8 sps:$4 sm:$0xff]  }
  0xf5   :  { %1940 = vmatprep.subr.bf16.mxu1 %v3448_v28  ;;  %v3535_v22 = vld [vmem:[%s4781_s4 + $0x1f4] ss:$8 sps:$4 sm:$0xff]   ;;  %v3533_v24 = vld [vmem:[%s4781_s4 + $0x1f0] ss:$8 sps:$4 sm:$0xff]   ;;  %v3496_v25 = vld [vmem:[%s4781_s4 + $0xc4] ss:$8 sps:$4 sm:$0xff]  }
  0xf6   :  { %v3538_v26 = vld [vmem:[%s4781_s4 + $0x1e4] ss:$8 sps:$4 sm:$0xff]   ;;  %v3494_v27 = vld [vmem:[%s4781_s4 + $0xc0] ss:$8 sps:$4 sm:$0xff]  }
  0xf7   :  { %1900 = vmatpush2.bf16.msra.mxu0 %v3443_v29  ;;  %v3536_v28 = vld [vmem:[%s4781_s4 + $0x1e0] ss:$8 sps:$4 sm:$0xff]   ;;  %v3499_v29 = vld [vmem:[%s4781_s4 + $0xb4] ss:$8 sps:$4 sm:$0xff]  }
  0xf8   :  { %1941 = vmatpush2.bf16.msra.mxu1 %v3446_v30  ;;  %1901 = vmatprep.subr.bf16.mxu0 %v3451_v33  ;;  %v3541_v30 = vld [vmem:[%s4781_s4 + $0x1d4] ss:$8 sps:$4 sm:$0xff]   ;;  %v3497_v33 = vld [vmem:[%s4781_s4 + $0xb0] ss:$8 sps:$4 sm:$0xff]  }
  0xf9   :  { %1942 = vmatprep.subr.bf16.mxu1 %v3454_v34  ;;  %v3539_v34 = vld [vmem:[%s4781_s4 + $0x1d0] ss:$8 sps:$4 sm:$0xff]  }
  0xfb   :  { %1902 = vmatpush2.bf16.msra.mxu0 %v3449_v35  ;;  %v3502_v35 = vld [vmem:[%s4781_s4 + $0xa4] ss:$8 sps:$4 sm:$0xff]  }
  0xfc   :  { %1943 = vmatpush2.bf16.msra.mxu1 %v3452_v36  ;;  %1903 = vmatprep.subr.bf16.mxu0 %v3457_v37  ;;  %v3544_v36 = vld [vmem:[%s4781_s4 + $0x1c4] ss:$8 sps:$4 sm:$0xff]   ;;  %v3500_v37 = vld [vmem:[%s4781_s4 + $0xa0] ss:$8 sps:$4 sm:$0xff]  }
  0xfd   :  { %1944 = vmatprep.subr.bf16.mxu1 %v3460_v38  ;;  %v3542_v38 = vld [vmem:[%s4781_s4 + $0x1c0] ss:$8 sps:$4 sm:$0xff]  }
  0xff   :  { %1904 = vmatpush2.bf16.msra.mxu0 %v3455_v39  ;;  %v3505_v39 = vld [vmem:[%s4781_s4 + $0x94] ss:$8 sps:$4 sm:$0xff]  }
 0x100   :  { %1945 = vmatpush2.bf16.msra.mxu1 %v3458_v40  ;;  %2399 = vmatprep.subr.bf16.mxu0 %v3463_v41  ;;  %v3503_v40 = vld [vmem:[%s4781_s4 + $0x90] ss:$8 sps:$4 sm:$0xff]   ;;  %v3508_v41 = vld [vmem:[%s4781_s4 + $0x84] ss:$8 sps:$4 sm:$0xff]  }
 0x101   :  { %2440 = vmatprep.subr.bf16.mxu1 %v3511_v52 }
 0x102   :  { %v1661_v62 = vpop.f32.mrf.mxu0  ;;  %1906 = vmatmul.mubr.bf16.vlgmr.msra.gmra.mxu0 %v4085_v31 }
 0x103   :  { %v1702_v3 = vpop.f32.mrf.mxu1  ;;  %1947 = vmatmul.mubr.bf16.vlgmr.msra.gmra.mxu1 %v4089_v32  ;;  %2400 = vmatpush1.bf16.msra.mxu0 %v3461_v42  ;;  %v3467_v32 = vld [vmem:[%s4781_s4 + $0x50] ss:$8 sps:$4 sm:$0xff]   ;;  %v3506_v42 = vld [vmem:[%s4781_s4 + $0x80] ss:$8 sps:$4 sm:$0xff]  }
 0x104   :  { %v4488_v45 = vadd.f32 %v1702_v3, %v1661_v62  ;;  %v4493_v47 = vpop.f32.mrf.mxu0  ;;  %2401 = vmatprep.subr.bf16.mxu0 %v3466_v44  ;;  %2441 = vmatpush1.bf16.msra.mxu1 %v3509_v51  ;;  %v4654_v44 = vsub.s32 0, %v3769_v43  ;;  %v4659_v62 = vld [vmem:[%s4779_s2] sm:$0xf]  ;;  %v3547_v3 = vld [vmem:[%s4781_s4 + $0x1b4] ss:$8 sps:$4 sm:$0xff]   ;;  %s2705_s2 = sshll.u32 %s3596_s0, 4  ;;  %s2706_s2 = int_to_ptr.vmem [resolvable:$true] %s2705_s2 }
 0x105   :  { %v4495_v16 = vpop.f32.mrf.mxu1  ;;  %2442 = vmatprep.subr.bf16.mxu1 %v3514_v54  ;;  %v3550_v54 = vld [vmem:[%s4781_s4 + $0x1a4] ss:$8 sps:$4 sm:$0xff]   ;;  %s3573_s21 = scalar_lea.vmem %s2706_s2, 32  ;;  %p3578_p1 = scmp.lt.s32.totalorder %s2706_s2, %s2706_s2 }
 0x106   :  { %v1665_v48 = vpop.f32.mrf.mxu0  ;;  %p3574_p0 = scmp.ne.s32.totalorder %s2706_s2, %s3573_s21  ;;  %p3579_p2 = scmp.lt.s32.totalorder %s3573_s21, %s3573_s21 }
 0x107   :  { %v1706_v31 = vpop.f32.mrf.mxu1  ;;  %2402 = vmatpush1.bf16.msra.mxu0 %v3464_v46  ;;  %v4665_v46 = vsub.s32 1, %v3769_v43 }
 0x108   :  { %v1666_v50 = vpop.f32.mrf.mxu0  ;;  %2403 = vmatprep.subr.bf16.mxu0 %v3469_v17  ;;  %2443 = vmatpush1.bf16.msra.mxu1 %v3512_v55  ;;  %v3545_v17 = vld [vmem:[%s4781_s4 + $0x1b0] ss:$8 sps:$4 sm:$0xff]   ;;  %p3580_p3 = por %p3579_p2, %p3578_p1 }
 0x109   :  { %v1707_v53 = vpop.f32.mrf.mxu1  ;;  %2444 = vmatprep.subr.bf16.mxu1 %v3517_v58  ;;  %v1705_v50 = vadd.f32 %v4495_v16, %v4493_v47  ;;  %v1964_v47 = vrot.slane %v4659_v62, %v4665_v46 }
 0x10a   :  { %p3581_p4 = pnand %p3580_p3, %p3574_p0 }
 0x10b   :  { %2404 = vmatpush1.bf16.msra.mxu0 %v3467_v32  ;;  %v4673_v32 = vld [vmem:[%s4780_s3] sm:$0xf] }
 0x10c   :  { %2405 = vmatprep.subr.bf16.mxu0 %v3472_v56  ;;  %2445 = vmatpush1.bf16.msra.mxu1 %v3515_v60  ;;  %v1960_v56 = vrot.slane %v4659_v62, %v4654_v44  ;;  %v1986_v55 = vrot.slane %v4673_v32, %v4654_v44 }
 0x10d   :  { %2446 = vmatprep.subr.bf16.mxu1 %v3520_v63 }
 0x10f   :  { %2406 = vmatpush1.bf16.msra.mxu0 %v3470_v49 }
 0x110   :  { %2407 = vmatprep.subr.bf16.mxu0 %v3475_v57  ;;  %2447 = vmatpush1.bf16.msra.mxu1 %v3518_v1  ;;  %v3553_v1 = vld [vmem:[%s4781_s4 + $0x194] ss:$8 sps:$4 sm:$0xff]  }
 0x111   :  { %2448 = vmatprep.subr.bf16.mxu1 %v3523_v4 }
 0x113   :  { %2408 = vmatpush1.bf16.msra.mxu0 %v3473_v59 }
 0x114   :  { %2409 = vmatprep.subr.bf16.mxu0 %v3478_v61  ;;  %2449 = vmatpush1.bf16.msra.mxu1 %v3521_v6  ;;  %v1990_v61 = vrot.slane %v4673_v32, %v4665_v46 }
 0x115   :  { %2450 = vmatprep.subr.bf16.mxu1 %v3526_v8  ;;  %v3556_v8 = vld [vmem:[%s4781_s4 + $0x184] ss:$8 sps:$4 sm:$0xff]  }
 0x117   :  { %2410 = vmatpush1.bf16.msra.mxu0 %v3476_v0 }
 0x118   :  { %2411 = vmatprep.subr.bf16.mxu0 %v3481_v2  ;;  %2451 = vmatpush1.bf16.msra.mxu1 %v3524_v10  ;;  %v3554_v10 = vld [vmem:[%s4781_s4 + $0x180] ss:$8 sps:$4 sm:$0xff]  }
 0x119   :  { %2452 = vmatprep.subr.bf16.mxu1 %v3529_v12 }
 0x11b   :  { %2412 = vmatpush1.bf16.msra.mxu0 %v3479_v5  ;;  %v3551_v5 = vld [vmem:[%s4781_s4 + $0x190] ss:$8 sps:$4 sm:$0xff]  }
 0x11c   :  { %2413 = vmatprep.subr.bf16.mxu0 %v3484_v7  ;;  %2453 = vmatpush1.bf16.msra.mxu1 %v3527_v14 }
 0x11d   :  { %2454 = vmatprep.subr.bf16.mxu1 %v3532_v18 }
 0x11f   :  { %2414 = vmatpush1.bf16.msra.mxu0 %v3482_v9 }
 0x120   :  { %2415 = vmatprep.subr.bf16.mxu0 %v3487_v11  ;;  %2455 = vmatpush1.bf16.msra.mxu1 %v3530_v20 }
 0x121   :  { %2456 = vmatprep.subr.bf16.mxu1 %v3535_v22 }
 0x123   :  { %2416 = vmatpush2.bf16.msra.mxu0 %v3485_v13 }
 0x124   :  { %2417 = vmatprep.subr.bf16.mxu0 %v3490_v15  ;;  %2457 = vmatpush2.bf16.msra.mxu1 %v3533_v24  ;;  %v3557_v24 = vld [vmem:[%s4784_s7 + $0x78] sm:$0xff]  }
 0x125   :  { %2458 = vmatprep.subr.bf16.mxu1 %v3538_v26  ;;  %v3559_v26 = vld [vmem:[%s4784_s7 + $0x70] sm:$0xff]  }
 0x127   :  { %2418 = vmatpush2.bf16.msra.mxu0 %v3488_v19 }
 0x128   :  { %2419 = vmatprep.subr.bf16.mxu0 %v3493_v21  ;;  %2459 = vmatpush2.bf16.msra.mxu1 %v3536_v28  ;;  %v3561_v28 = vld [vmem:[%s4784_s7 + $0x68] sm:$0xff]  }
 0x129   :  { %2460 = vmatprep.subr.bf16.mxu1 %v3541_v30  ;;  %v3563_v30 = vld [vmem:[%s4784_s7 + $0x60] sm:$0xff]  }
 0x12b   :  { %2420 = vmatpush2.bf16.msra.mxu0 %v3491_v23 }
 0x12c   :  { %2421 = vmatprep.subr.bf16.mxu0 %v3496_v25  ;;  %2461 = vmatpush2.bf16.msra.mxu1 %v3539_v34  ;;  %v3558_v25 = vld [vmem:[%s4784_s7 + $0x38] sm:$0xff]  }
 0x12d   :  { %2462 = vmatprep.subr.bf16.mxu1 %v3544_v36  ;;  %v3565_v34 = vld [vmem:[%s4784_s7 + $0x58] sm:$0xff]   ;;  %v1967_v36 = vsub.s32 2, %v3769_v43 }
 0x12f   :  { %2422 = vmatpush2.bf16.msra.mxu0 %v3494_v27  ;;  %v3560_v27 = vld [vmem:[%s4784_s7 + $0x30] sm:$0xff]  }
 0x130   :  { %2423 = vmatprep.subr.bf16.mxu0 %v3499_v29  ;;  %2463 = vmatpush2.bf16.msra.mxu1 %v3542_v38  ;;  %v3562_v29 = vld [vmem:[%s4784_s7 + $0x28] sm:$0xff]  }
 0x131   :  { %2464 = vmatprep.subr.bf16.mxu1 %v3547_v3 }
 0x133   :  { %2424 = vmatpush2.bf16.msra.mxu0 %v3497_v33  ;;  %v3564_v33 = vld [vmem:[%s4784_s7 + $0x20] sm:$0xff]  }
 0x134   :  { %2425 = vmatprep.subr.bf16.mxu0 %v3502_v35  ;;  %2465 = vmatpush2.bf16.msra.mxu1 %v3545_v17  ;;  %v3566_v35 = vld [vmem:[%s4784_s7 + $0x18] sm:$0xff]  }
 0x135   :  { %2466 = vmatprep.subr.bf16.mxu1 %v3550_v54 }
 0x137   :  { %2426 = vmatpush2.bf16.msra.mxu0 %v3500_v37  ;;  %v1971_v37 = vsub.s32 3, %v3769_v43 }
 0x138   :  { %2427 = vmatprep.subr.bf16.mxu0 %v3505_v39 }
 0x139   :  { %v1998_v43 = vrot.slane %v4673_v32, %v1971_v37 }
 0x13b   :  { %2428 = vmatpush2.bf16.msra.mxu0 %v3503_v40 }
 0x13c   :  { %2429 = vmatprep.subr.bf16.mxu0 %v3508_v41 }
 0x13f   :  { %2430 = vmatpush2.bf16.msra.mxu0 %v3506_v42  ;;  %v1968_v42 = vrot.slane %v4659_v62, %v1967_v36 }
 0x140   :  { %3051 = vmatprep.subr.bf16.mxu0 %v3557_v24 }
 0x142   :  { %v1743_v48 = vpop.f32.mrf.mxu0 }
 0x143   :  { %v1784_v31 = vpop.f32.mrf.mxu1  ;;  %v1744_v53 = vadd.f32 %v1743_v48, %v4488_v45  ;;  %v3548_v45 = vld [vmem:[%s4781_s4 + $0x1a0] ss:$8 sps:$4 sm:$0xff]  }
 0x144   :  { %v1745_v51 = vpop.f32.mrf.mxu0  ;;  %2467 = vmatpush2.bf16.msra.mxu1 %v3548_v45 }
 0x145   :  { %v1786_v52 = vpop.f32.mrf.mxu1  ;;  %v1785_v49 = vadd.f32 %v1784_v31, %v1744_v53  ;;  %v1746_v57 = vadd.f32 %v1745_v51, %v1705_v50  ;;  %2468 = vmatprep.subr.bf16.mxu1 %v3553_v1  ;;  %v1994_v31 = vrot.slane %v4673_v32, %v1967_v36  ;;  %v1972_v53 = vrot.slane %v4659_v62, %v1971_v37  ;;  %v3567_v62 = vld [vmem:[%s4784_s7 + $0x50] sm:$0xff]   ;;  %v3569_v1 = vld [vmem:[%s4784_s7 + $0x48] sm:$0xff]  }
 0x146   :  { %v1747_v16 = vpop.f32.mrf.mxu0  ;;  %v3568_v32 = vld [vmem:[%s4784_s7 + $0x10] sm:$0xff]  }
 0x147   :  { %v1788_v58 = vpop.f32.mrf.mxu1  ;;  %v1977_v59 = vmul.f32 %v1960_v56, %v1785_v49  ;;  %v1787_v60 = vadd.f32 %v1786_v52, %v1746_v57 }
 0x148   :  { %v1748_v63 = vpop.f32.mrf.mxu0  ;;  %2469 = vmatpush2.bf16.msra.mxu1 %v3551_v5  ;;  %v3571_v5 = vld [vmem:[%s4784_s7 + $0x40] sm:$0xff]  }
 0x149   :  { %v1789_v0 = vpop.f32.mrf.mxu1  ;;  %v2003_v2 = vadd.f32 %v1986_v55, %v1977_v59  ;;  %v1978_v4 = vmul.f32 %v1964_v47, %v1787_v60  ;;  %2470 = vmatprep.subr.bf16.mxu1 %v3556_v8  ;;  %v2495_v8 = vld [vmem:[%s4783_s6] sm:$0x3] }
 0x14b   :  { %v2004_v6 = vadd.f32 %v1990_v61, %v1978_v4  ;;  %v2007_v7 = vmax.f32 %v2003_v2, 0.0  ;;  %v3570_v2 = vld [vmem:[%s4784_s7 + $0x8] sm:$0xff]  }
 0x14c   :  { %2471 = vmatpush2.bf16.msra.mxu1 %v3554_v10 }
 0x14d   :  { %v2008_v9 = vmax.f32 %v2004_v6, 0.0  ;;  %v2011_v12 = vpack.c.bf16 %v2007_v7, %v2007_v7  ;;  %v3572_v6 = vld [vmem:[%s4784_s7] sm:$0xff]  }
 0x14e   :  { %v2481_v7 = vld [vmem:[%s4782_s5] sm:$0x3] }
 0x14f   :  { %v2012_v11 = vpack.c.bf16 %v2008_v9, %v2008_v9  ;;  %v2486_v9 = vrot.slane %v2481_v7, %v4654_v44 }
 0x151   :  { %2431 = vmatprep.mubr.bf16.mxu0 %v2012_v11 }
 0x152   :  { %2432 = vmatmul.mubr.bf16.vlgmr.msra.gmra.mxu0 %v2011_v12  ;;  %v2500_v12 = vrot.slane %v2495_v8, %v4654_v44 }
 0x153   :  { %3052 = vmatpush3.bf16.msra.mxu0 %v3558_v25 }
 0x154   :  { %3053 = vmatprep.subr.bf16.mxu0 %v3559_v26 }
 0x157   :  { %3054 = vmatpush3.bf16.msra.mxu0 %v3560_v27 }
 0x158   :  { %3055 = vmatprep.subr.bf16.mxu0 %v3561_v28 }
 0x15b   :  { %3056 = vmatpush3.bf16.msra.mxu0 %v3562_v29 }
 0x15c   :  { %3057 = vmatprep.subr.bf16.mxu0 %v3563_v30  ;;  %v3049_v30 = vld [vmem:[%s4785_s8] ss:$0 sm:$0xff] }
 0x15f   :  { %3058 = vmatpush3.bf16.msra.mxu0 %v3564_v33 }
 0x160   :  { %3059 = vmatprep.subr.bf16.mxu0 %v3565_v34 }
 0x163   :  { %3060 = vmatpush3.bf16.msra.mxu0 %v3566_v35 }
 0x164   :  { %3061 = vmatprep.subr.bf16.mxu0 %v3567_v62 }
 0x167   :  { %3062 = vmatpush3.bf16.msra.mxu0 %v3568_v32 }
 0x168   :  { %3063 = vmatprep.subr.bf16.mxu0 %v3569_v1 }
 0x16b   :  { %3064 = vmatpush3.bf16.msra.mxu0 %v3570_v2 }
 0x16c   :  { %3065 = vmatprep.subr.bf16.mxu0 %v3571_v5 }
 0x16f   :  { %3066 = vmatpush3.bf16.msra.mxu0 %v3572_v6 }
 0x182   :  { %v1825_v13 = vpop.f32.mrf.mxu0 }
 0x183   :  { %v1866_v14 = vpop.f32.mrf.mxu1 }
 0x184   :  { %v1867_v15 = vadd.f32 %v1866_v14, %v1825_v13  ;;  %v1827_v18 = vpop.f32.mrf.mxu0  ;;  %v2490_v13 = vrot.slane %v2481_v7, %v4665_v46 }
 0x185   :  { %v1868_v19 = vpop.f32.mrf.mxu1 }
 0x186   :  { %v1829_v20 = vpop.f32.mrf.mxu0  ;;  %v1869_v40 = vadd.f32 %v1868_v19, %v1827_v18  ;;  %v2504_v19 = vrot.slane %v2495_v8, %v4665_v46  ;;  %v3050_v46 = vld [vmem:[%s4786_s9] ss:$0 sm:$0xff] }
 0x187   :  { %v1870_v21 = vpop.f32.mrf.mxu1 }
 0x188   :  { %v1830_v22 = vpop.f32.mrf.mxu0 }
 0x189   :  { %v1871_v23 = vpop.f32.mrf.mxu1 }
 0x1c2   :  { %v1907_v38 = vpop.f32.mrf.mxu0 }
 0x1c3   :  { %v1948_v39 = vpop.f32.mrf.mxu1  ;;  %v1908_v41 = vadd.f32 %v1907_v38, %v1867_v15 }
 0x1c4   :  { %v1909_v3 = vpop.f32.mrf.mxu0 }
 0x1c5   :  { %v1950_v17 = vpop.f32.mrf.mxu1  ;;  %v1949_v48 = vadd.f32 %v1948_v39, %v1908_v41  ;;  %v1910_v50 = vadd.f32 %v1909_v3, %v1869_v40 }
 0x1c6   :  { %v1911_v56 = vpop.f32.mrf.mxu0 }
 0x1c7   :  { %v1952_v51 = vpop.f32.mrf.mxu1  ;;  %v1979_v52 = vmul.f32 %v1968_v42, %v1949_v48  ;;  %v1951_v54 = vadd.f32 %v1950_v17, %v1910_v50 }
 0x1c8   :  { %v1912_v49 = vpop.f32.mrf.mxu0 }
 0x1c9   :  { %v1953_v55 = vpop.f32.mrf.mxu1  ;;  %v2005_v57 = vadd.f32 %v1994_v31, %v1979_v52  ;;  %v1980_v47 = vmul.f32 %v1972_v53, %v1951_v54 }
 0x1cb   :  { %v2006_v45 = vadd.f32 %v1998_v43, %v1980_v47  ;;  %v2009_v16 = vmax.f32 %v2005_v57, 0.0 }
 0x1cd   :  { %v2010_v58 = vmax.f32 %v2006_v45, 0.0  ;;  %v2013_v60 = vpack.c.bf16 %v2009_v16, %v2009_v16 }
 0x1cf   :  { %v2014_v59 = vpack.c.bf16 %v2010_v58, %v2010_v58 }
 0x1d1   :  { %2472 = vmatprep.mubr.bf16.mxu1 %v2014_v59 }
 0x1d2   :  { %2473 = vmatmul.mubr.bf16.vlgmr.msra.gmra.mxu1 %v2013_v60 }
 0x212   :  { %v2433_v61 = vpop.f32.mrf.mxu0 }
 0x214   :  { %v2435_v63 = vpop.f32.mrf.mxu0 }
 0x216   :  { %v2437_v0 = vpop.f32.mrf.mxu0 }
 0x218   :  { %v2438_v4 = vpop.f32.mrf.mxu0 }
 0x292   :  { %v2474_v10 = vpop.f32.mrf.mxu1 }
 0x293   :  { %v2475_v11 = vadd.f32 %v2474_v10, %v2433_v61 }
 0x294   :  { %v2476_v14 = vpop.f32.mrf.mxu1 }
 0x295   :  { %v2493_v15 = vmul.f32 %v2486_v9, %v2475_v11  ;;  %v2477_v18 = vadd.f32 %v2476_v14, %v2435_v63 }
 0x296   :  { %v2478_v20 = vpop.f32.mrf.mxu1 }
 0x297   :  { %v2507_v21 = vadd.f32 %v2500_v12, %v2493_v15  ;;  %v2494_v22 = vmul.f32 %v2490_v13, %v2477_v18 }
 0x298   :  { %v2479_v23 = vpop.f32.mrf.mxu1 }
 0x299   :  { %v2508_v24 = vadd.f32 %v2504_v19, %v2494_v22  ;;  %v2509_v25 = vmax.f32 %v2507_v21, 0.0 }
 0x29b   :  { %v2510_v26 = vmax.f32 %v2508_v24, 0.0  ;;  %v2511_v28 = vpack.c.bf16 %v2509_v25, %v2509_v25 }
 0x29d   :  { %v2512_v27 = vpack.c.bf16 %v2510_v26, %v2510_v26 }
 0x29f   :  { %2673 = vmatprep.mubr.bf16.mxu0 %v2512_v27 }
 0x2a0   :  { %2674 = vmatmul.mubr.bf16.vlgmr.msra.gmra.mxu0 %v2511_v28 }
 0x360   :  { %v3067_v29 = vpop.f32.mrf.mxu0 }
 0x362   :  { %v3068_v44 = vpop.f32.mrf.mxu0 }
 0x363   :  { %v3069_v33 = vadd.f32 %v3068_v44, %v3067_v29 }
 0x364   :  { %v3070_v34 = vpop.f32.mrf.mxu0 }
 0x365   :  { %v2688_v35 = vmul.f32 %v3069_v33, %v3049_v30 }
 0x366   :  { %v3071_v36 = vpop.f32.mrf.mxu0 }
 0x367   :  { %v2696_v37 = vadd.f32 %v3050_v46, %v2688_v35 }
 0x369   :  { %2698 = vst.msk [vmem:[#allocation2] sm:$0x3] %vm2697_vm0, %v2696_v37 }
 0x36a   :  { %3584 = shalt.err (!%p3581_p4)
}
 0x36b   :  { %2708 = dma.vmem_to_hbm [thread:$0]  %s2706_s2, 32, %s4787_s10, [#allocation3]  }
 0x36c   :  { %3593 = dma.done.wait [#allocation3], 32  }
 0x36d   :  { %3594 = vsyncadd [#allocation3], 4294967264 }
 0x36e   :  { %2712 = vsyncpa [#allocation3], 1 }

// kernel: pointnet_base_apply.9
= control target key start
LH: loop header
LB: loop body
LE: loop exit
PB: predicated region body
PF: predicated region fallthrough
CT: control target
= control target key end

     0   :  { %v8142_v36 = vmov 1983009808   ;;  %v43_v38 = vlaneseq  ;;  %s11043_s1 = inlined_call_operand.vmem [shape: bf16[1024,512], index: 1, kind: input, shape index: {}]   ;;  %s11044_s0 = inlined_call_operand.vmem [shape: f32[2,1024], index: 0, kind: input, shape index: {}]   ;;  %s11045_s4 = inlined_call_operand.vmem [shape: bf16[512,256], index: 4, kind: input, shape index: {}]   ;;  %s11046_s2 = inlined_call_operand.vmem [shape: f32[1,512], index: 2, kind: input, shape index: {}]   ;;  %s11047_s3 = inlined_call_operand.vmem [shape: f32[1,512], index: 3, kind: input, shape index: {}]   ;;  %s11048_s7 = inlined_call_operand.vmem [shape: bf16[256,4096], index: 7, kind: input, shape index: {}]   ;;  %s11049_s5 = inlined_call_operand.vmem [shape: f32[1,256], index: 5, kind: input, shape index: {}]   ;;  %s11050_s6 = inlined_call_operand.vmem [shape: f32[1,256], index: 6, kind: input, shape index: {}]   ;;  %s11051_s8 = inlined_call_operand.vmem [shape: f32[1,4096], index: 8, kind: input, shape index: {}]   ;;  %s11052_s9 = inlined_call_operand.vmem [shape: f32[1,4096], index: 9, kind: input, shape index: {}]   ;;  %s11053_s10 = inlined_call_operand.vmem [shape: f32[2,4096], index: 10, kind: output, shape index: {}]  }
   0x1   :  { %v7660_v0 = vld [vmem:[%s11043_s1 + $0xe4] ss:$16 sps:$4 sm:$0xff]   ;;  %v7664_v2 = vld [vmem:[%s11043_s1 + $0xe0] ss:$16 sps:$4 sm:$0xff]   ;;  %v41_v37 = vunpack.c.l.s4 %v8142_v36 }
   0x2   :  { %v7662_v1 = vld [vmem:[%s11043_s1 + $0x2e4] ss:$16 sps:$4 sm:$0xff]   ;;  %1625 = vmatprep.subr.bf16.mxu0 %v7660_v0  ;;  %v7665_v3 = vld [vmem:[%s11043_s1 + $0x2e0] ss:$16 sps:$4 sm:$0xff]   ;;  %v8315_v43 = vshrl.u32 %v43_v38, 7 }
   0x3   :  { %1666 = vmatprep.subr.bf16.mxu1 %v7662_v1  ;;  %v7666_v4 = vld [vmem:[%s11043_s1 + $0xc4] ss:$16 sps:$4 sm:$0xff]   ;;  %1626 = vmatpush1.bf16.msra.mxu0 %v7664_v2  ;;  %v7670_v6 = vld [vmem:[%s11043_s1 + $0xc0] ss:$16 sps:$4 sm:$0xff]   ;;  %v42_v42 = vunpack.c.0.s8 %v41_v37 }
   0x4   :  { %1667 = vmatpush1.bf16.msra.mxu1 %v7665_v3  ;;  %v7668_v5 = vld [vmem:[%s11043_s1 + $0x2c4] ss:$16 sps:$4 sm:$0xff]   ;;  %1627 = vmatprep.subr.bf16.mxu0 %v7666_v4  ;;  %v7671_v7 = vld [vmem:[%s11043_s1 + $0x2c0] ss:$16 sps:$4 sm:$0xff]   ;;  %v36_v4 = vld [vmem:[%s11044_s0 + $0x8] sm:$0xff] }
   0x5   :  { %1668 = vmatprep.subr.bf16.mxu1 %v7668_v5  ;;  %v7672_v8 = vld [vmem:[%s11043_s1 + $0xa4] ss:$16 sps:$4 sm:$0xff]   ;;  %v7676_v10 = vld [vmem:[%s11043_s1 + $0xa0] ss:$16 sps:$4 sm:$0xff]   ;;  %v8333_v49 = vsub.s32 %v42_v42, %v8315_v43 }
   0x6   :  { %v7674_v9 = vld [vmem:[%s11043_s1 + $0x2a4] ss:$16 sps:$4 sm:$0xff]   ;;  %v7677_v11 = vld [vmem:[%s11043_s1 + $0x2a0] ss:$16 sps:$4 sm:$0xff]  }
   0x7   :  { %1628 = vmatpush1.bf16.msra.mxu0 %v7670_v6  ;;  %v7678_v12 = vld [vmem:[%s11043_s1 + $0x84] ss:$16 sps:$4 sm:$0xff]   ;;  %v7682_v14 = vld [vmem:[%s11043_s1 + $0x80] ss:$16 sps:$4 sm:$0xff]  }
   0x8   :  { %1669 = vmatpush1.bf16.msra.mxu1 %v7671_v7  ;;  %1629 = vmatprep.subr.bf16.mxu0 %v7672_v8  ;;  %v7680_v13 = vld [vmem:[%s11043_s1 + $0x284] ss:$16 sps:$4 sm:$0xff]   ;;  %v7683_v15 = vld [vmem:[%s11043_s1 + $0x280] ss:$16 sps:$4 sm:$0xff]  }
   0x9   :  { %1670 = vmatprep.subr.bf16.mxu1 %v7674_v9  ;;  %v7684_v16 = vld [vmem:[%s11043_s1 + $0x64] ss:$16 sps:$4 sm:$0xff]   ;;  %v7688_v18 = vld [vmem:[%s11043_s1 + $0x60] ss:$16 sps:$4 sm:$0xff]   ;;  %v56_v9 = vcombine.high %v36_v4, %v36_v4 }
   0xa   :  { %v7686_v17 = vld [vmem:[%s11043_s1 + $0x264] ss:$16 sps:$4 sm:$0xff]   ;;  %v7689_v19 = vld [vmem:[%s11043_s1 + $0x260] ss:$16 sps:$4 sm:$0xff]  }
   0xb   :  { %1630 = vmatpush1.bf16.msra.mxu0 %v7676_v10  ;;  %v7690_v20 = vld [vmem:[%s11043_s1 + $0x44] ss:$16 sps:$4 sm:$0xff]   ;;  %v7694_v22 = vld [vmem:[%s11043_s1 + $0x40] ss:$16 sps:$4 sm:$0xff]  }
   0xc   :  { %1671 = vmatpush1.bf16.msra.mxu1 %v7677_v11  ;;  %1631 = vmatprep.subr.bf16.mxu0 %v7678_v12  ;;  %v7692_v21 = vld [vmem:[%s11043_s1 + $0x244] ss:$16 sps:$4 sm:$0xff]   ;;  %v7695_v23 = vld [vmem:[%s11043_s1 + $0x240] ss:$16 sps:$4 sm:$0xff]  }
   0xd   :  { %1672 = vmatprep.subr.bf16.mxu1 %v7680_v13  ;;  %v7696_v24 = vld [vmem:[%s11043_s1 + $0x24] ss:$16 sps:$4 sm:$0xff]   ;;  %v7700_v26 = vld [vmem:[%s11043_s1 + $0x20] ss:$16 sps:$4 sm:$0xff]  }
   0xe   :  { %v7698_v25 = vld [vmem:[%s11043_s1 + $0x224] ss:$16 sps:$4 sm:$0xff]   ;;  %v7701_v27 = vld [vmem:[%s11043_s1 + $0x220] ss:$16 sps:$4 sm:$0xff]  }
   0xf   :  { %1632 = vmatpush1.bf16.msra.mxu0 %v7682_v14  ;;  %v7702_v28 = vld [vmem:[%s11043_s1 + $0x4] ss:$16 sps:$4 sm:$0xff]   ;;  %v7706_v30 = vld [vmem:[%s11043_s1] ss:$16 sps:$4 sm:$0xff]   ;;  %v8404_v14 = vrot.slane %v36_v4, %v8333_v49 }
  0x10   :  { %1673 = vmatpush1.bf16.msra.mxu1 %v7683_v15  ;;  %1633 = vmatprep.subr.bf16.mxu0 %v7684_v16  ;;  %v7704_v29 = vld [vmem:[%s11043_s1 + $0x204] ss:$16 sps:$4 sm:$0xff]   ;;  %v7707_v31 = vld [vmem:[%s11043_s1 + $0x200] ss:$16 sps:$4 sm:$0xff]   ;;  %v8407_v15 = vrot.slane %v56_v9, %v8333_v49 }
  0x11   :  { %1674 = vmatprep.subr.bf16.mxu1 %v7686_v17  ;;  %v7708_v32 = vld [vmem:[%s11043_s1 + $0x1e4] ss:$16 sps:$4 sm:$0xff]   ;;  %v7712_v34 = vld [vmem:[%s11043_s1 + $0x1e0] ss:$16 sps:$4 sm:$0xff]  }
  0x12   :  { %v7710_v33 = vld [vmem:[%s11043_s1 + $0x3e4] ss:$16 sps:$4 sm:$0xff]   ;;  %v7713_v35 = vld [vmem:[%s11043_s1 + $0x3e0] ss:$16 sps:$4 sm:$0xff]  }
  0x13   :  { %1634 = vmatpush1.bf16.msra.mxu0 %v7688_v18  ;;  %v7714_v39 = vld [vmem:[%s11043_s1 + $0x1c4] ss:$16 sps:$4 sm:$0xff]   ;;  %v7718_v41 = vld [vmem:[%s11043_s1 + $0x1c0] ss:$16 sps:$4 sm:$0xff]  }
  0x14   :  { %1675 = vmatpush1.bf16.msra.mxu1 %v7689_v19  ;;  %1635 = vmatprep.subr.bf16.mxu0 %v7690_v20  ;;  %v7716_v40 = vld [vmem:[%s11043_s1 + $0x3c4] ss:$16 sps:$4 sm:$0xff]   ;;  %v7719_v44 = vld [vmem:[%s11043_s1 + $0x3c0] ss:$16 sps:$4 sm:$0xff]   ;;  %v71_v20 = vcombine.high %v8404_v14, %v8404_v14 }
  0x15   :  { %1676 = vmatprep.subr.bf16.mxu1 %v7692_v21  ;;  %v7720_v45 = vld [vmem:[%s11043_s1 + $0x1a4] ss:$16 sps:$4 sm:$0xff]   ;;  %v7724_v47 = vld [vmem:[%s11043_s1 + $0x1a0] ss:$16 sps:$4 sm:$0xff]   ;;  %v72_v21 = vcombine.high %v8407_v15, %v8407_v15 }
  0x16   :  { %v7722_v46 = vld [vmem:[%s11043_s1 + $0x3a4] ss:$16 sps:$4 sm:$0xff]   ;;  %v7725_v48 = vld [vmem:[%s11043_s1 + $0x3a0] ss:$16 sps:$4 sm:$0xff]  }
  0x17   :  { %1636 = vmatpush1.bf16.msra.mxu0 %v7694_v22  ;;  %v7726_v50 = vld [vmem:[%s11043_s1 + $0x184] ss:$16 sps:$4 sm:$0xff]   ;;  %v7730_v55 = vld [vmem:[%s11043_s1 + $0x180] ss:$16 sps:$4 sm:$0xff]  }
  0x18   :  { %1677 = vmatpush1.bf16.msra.mxu1 %v7695_v23  ;;  %1637 = vmatprep.subr.bf16.mxu0 %v7696_v24  ;;  %v7728_v51 = vld [vmem:[%s11043_s1 + $0x384] ss:$16 sps:$4 sm:$0xff]   ;;  %v7731_v56 = vld [vmem:[%s11043_s1 + $0x380] ss:$16 sps:$4 sm:$0xff]  }
  0x19   :  { %1678 = vmatprep.subr.bf16.mxu1 %v7698_v25  ;;  %v35_v52 = vld [vmem:[%s11044_s0] sm:$0xff] }
  0x1a   :  { %v46_v53 = vrot.slane %v35_v52, %v8333_v49  ;;  %v39_v54 = vcombine.high %v35_v52, %v35_v52  ;;  %v7732_v57 = vld [vmem:[%s11043_s1 + $0x164] ss:$16 sps:$4 sm:$0xff]   ;;  %v7736_v63 = vld [vmem:[%s11043_s1 + $0x160] ss:$16 sps:$4 sm:$0xff]  }
  0x1b   :  { %1638 = vmatpush1.bf16.msra.mxu0 %v7700_v26  ;;  %v7734_v58 = vld [vmem:[%s11043_s1 + $0x364] ss:$16 sps:$4 sm:$0xff]   ;;  %v7737_v0 = vld [vmem:[%s11043_s1 + $0x360] ss:$16 sps:$4 sm:$0xff]  }
  0x1c   :  { %1679 = vmatpush1.bf16.msra.mxu1 %v7701_v27  ;;  %1639 = vmatprep.subr.bf16.mxu0 %v7702_v28  ;;  %v54_v59 = vcombine.high %v46_v53, %v46_v53  ;;  %v53_v60 = vrot.slane %v39_v54, %v8333_v49  ;;  %v7738_v1 = vld [vmem:[%s11043_s1 + $0x144] ss:$16 sps:$4 sm:$0xff]   ;;  %v7742_v5 = vld [vmem:[%s11043_s1 + $0x140] ss:$16 sps:$4 sm:$0xff]   ;;  %v8425_v22 = vpack.c.bf16 %v46_v53, %v46_v53 }
  0x1d   :  { %1680 = vmatprep.subr.bf16.mxu1 %v7704_v29  ;;  %v7740_v2 = vld [vmem:[%s11043_s1 + $0x344] ss:$16 sps:$4 sm:$0xff]   ;;  %v7743_v6 = vld [vmem:[%s11043_s1 + $0x340] ss:$16 sps:$4 sm:$0xff]   ;;  %v8441_v28 = vpack.c.bf16 %v71_v20, %v71_v20  ;;  %v8443_v29 = vpack.c.bf16 %v72_v21, %v72_v21 }
  0x1e   :  { %v8358_v61 = vpack.c.bf16 %v54_v59, %v54_v59  ;;  %v55_v62 = vcombine.high %v53_v60, %v53_v60  ;;  %v7744_v7 = vld [vmem:[%s11043_s1 + $0x124] ss:$16 sps:$4 sm:$0xff]   ;;  %v7748_v10 = vld [vmem:[%s11043_s1 + $0x120] ss:$16 sps:$4 sm:$0xff]   ;;  %v8427_v23 = vpack.c.bf16 %v53_v60, %v53_v60 }
  0x1f   :  { %1640 = vmatpush1.bf16.msra.mxu0 %v7706_v30  ;;  %v7746_v8 = vld [vmem:[%s11043_s1 + $0x324] ss:$16 sps:$4 sm:$0xff]   ;;  %v7749_v11 = vld [vmem:[%s11043_s1 + $0x320] ss:$16 sps:$4 sm:$0xff]  }
  0x20   :  { %1681 = vmatpush1.bf16.msra.mxu1 %v7707_v31  ;;  %1641 = vmatprep.subr.bf16.mxu0 %v7708_v32  ;;  %v8372_v3 = vpack.c.bf16 %v55_v62, %v55_v62  ;;  %v7750_v12 = vld [vmem:[%s11043_s1 + $0x104] ss:$16 sps:$4 sm:$0xff]   ;;  %v7754_v16 = vld [vmem:[%s11043_s1 + $0x100] ss:$16 sps:$4 sm:$0xff]  }
  0x21   :  { %1682 = vmatprep.subr.bf16.mxu1 %v7710_v33  ;;  %1657 = vmatprep.mubr.bf16.mxu0 %v8358_v61  ;;  %v7752_v13 = vld [vmem:[%s11043_s1 + $0x304] ss:$16 sps:$4 sm:$0xff]   ;;  %v7755_v17 = vld [vmem:[%s11043_s1 + $0x300] ss:$16 sps:$4 sm:$0xff]  }
  0x22   :  { %1698 = vmatprep.mubr.bf16.mxu1 %v8372_v3  ;;  %v7760_v18 = vld [vmem:[%s11043_s1 + $0x4e4] ss:$16 sps:$4 sm:$0xff]   ;;  %v7758_v24 = vld [vmem:[%s11043_s1 + $0x4e0] ss:$16 sps:$4 sm:$0xff]  }
  0x23   :  { %1642 = vmatpush2.bf16.msra.mxu0 %v7712_v34  ;;  %v7763_v19 = vld [vmem:[%s11043_s1 + $0x6e4] ss:$16 sps:$4 sm:$0xff]   ;;  %v7761_v25 = vld [vmem:[%s11043_s1 + $0x6e0] ss:$16 sps:$4 sm:$0xff]  }
  0x24   :  { %1683 = vmatpush2.bf16.msra.mxu1 %v7713_v35  ;;  %1643 = vmatprep.subr.bf16.mxu0 %v7714_v39  ;;  %v7766_v26 = vld [vmem:[%s11043_s1 + $0x4c4] ss:$16 sps:$4 sm:$0xff]   ;;  %v7764_v30 = vld [vmem:[%s11043_s1 + $0x4c0] ss:$16 sps:$4 sm:$0xff]  }
  0x25   :  { %1684 = vmatprep.subr.bf16.mxu1 %v7716_v40  ;;  %v7769_v27 = vld [vmem:[%s11043_s1 + $0x6c4] ss:$16 sps:$4 sm:$0xff]   ;;  %v7767_v31 = vld [vmem:[%s11043_s1 + $0x6c0] ss:$16 sps:$4 sm:$0xff]  }
  0x26   :  { %v7772_v32 = vld [vmem:[%s11043_s1 + $0x4a4] ss:$16 sps:$4 sm:$0xff]   ;;  %v7770_v34 = vld [vmem:[%s11043_s1 + $0x4a0] ss:$16 sps:$4 sm:$0xff]  }
  0x27   :  { %1644 = vmatpush2.bf16.msra.mxu0 %v7718_v41  ;;  %v7775_v33 = vld [vmem:[%s11043_s1 + $0x6a4] ss:$16 sps:$4 sm:$0xff]   ;;  %v7773_v35 = vld [vmem:[%s11043_s1 + $0x6a0] ss:$16 sps:$4 sm:$0xff]  }
  0x28   :  { %1685 = vmatpush2.bf16.msra.mxu1 %v7719_v44  ;;  %1645 = vmatprep.subr.bf16.mxu0 %v7720_v45  ;;  %v7778_v36 = vld [vmem:[%s11043_s1 + $0x484] ss:$16 sps:$4 sm:$0xff]   ;;  %v7776_v38 = vld [vmem:[%s11043_s1 + $0x480] ss:$16 sps:$4 sm:$0xff]  }
  0x29   :  { %1686 = vmatprep.subr.bf16.mxu1 %v7722_v46  ;;  %v7781_v37 = vld [vmem:[%s11043_s1 + $0x684] ss:$16 sps:$4 sm:$0xff]   ;;  %v7779_v39 = vld [vmem:[%s11043_s1 + $0x680] ss:$16 sps:$4 sm:$0xff]  }
  0x2a   :  { %v7784_v40 = vld [vmem:[%s11043_s1 + $0x464] ss:$16 sps:$4 sm:$0xff]   ;;  %v7782_v42 = vld [vmem:[%s11043_s1 + $0x460] ss:$16 sps:$4 sm:$0xff]  }
  0x2b   :  { %1646 = vmatpush2.bf16.msra.mxu0 %v7724_v47  ;;  %v7787_v41 = vld [vmem:[%s11043_s1 + $0x664] ss:$16 sps:$4 sm:$0xff]   ;;  %v7785_v44 = vld [vmem:[%s11043_s1 + $0x660] ss:$16 sps:$4 sm:$0xff]  }
  0x2c   :  { %1687 = vmatpush2.bf16.msra.mxu1 %v7725_v48  ;;  %1647 = vmatprep.subr.bf16.mxu0 %v7726_v50  ;;  %v7790_v45 = vld [vmem:[%s11043_s1 + $0x444] ss:$16 sps:$4 sm:$0xff]   ;;  %v7788_v47 = vld [vmem:[%s11043_s1 + $0x440] ss:$16 sps:$4 sm:$0xff]  }
  0x2d   :  { %1688 = vmatprep.subr.bf16.mxu1 %v7728_v51  ;;  %v7793_v46 = vld [vmem:[%s11043_s1 + $0x644] ss:$16 sps:$4 sm:$0xff]   ;;  %v7791_v48 = vld [vmem:[%s11043_s1 + $0x640] ss:$16 sps:$4 sm:$0xff]  }
  0x2e   :  { %v7796_v50 = vld [vmem:[%s11043_s1 + $0x424] ss:$16 sps:$4 sm:$0xff]   ;;  %v7794_v52 = vld [vmem:[%s11043_s1 + $0x420] ss:$16 sps:$4 sm:$0xff]  }
  0x2f   :  { %1648 = vmatpush2.bf16.msra.mxu0 %v7730_v55  ;;  %v7799_v51 = vld [vmem:[%s11043_s1 + $0x624] ss:$16 sps:$4 sm:$0xff]   ;;  %v7797_v53 = vld [vmem:[%s11043_s1 + $0x620] ss:$16 sps:$4 sm:$0xff]  }
  0x30   :  { %1689 = vmatpush2.bf16.msra.mxu1 %v7731_v56  ;;  %1649 = vmatprep.subr.bf16.mxu0 %v7732_v57  ;;  %v7802_v54 = vld [vmem:[%s11043_s1 + $0x404] ss:$16 sps:$4 sm:$0xff]   ;;  %v7800_v56 = vld [vmem:[%s11043_s1 + $0x400] ss:$16 sps:$4 sm:$0xff]  }
  0x31   :  { %1690 = vmatprep.subr.bf16.mxu1 %v7734_v58  ;;  %v7805_v55 = vld [vmem:[%s11043_s1 + $0x604] ss:$16 sps:$4 sm:$0xff]   ;;  %v7803_v57 = vld [vmem:[%s11043_s1 + $0x600] ss:$16 sps:$4 sm:$0xff]  }
  0x32   :  { %v7808_v58 = vld [vmem:[%s11043_s1 + $0x5e4] ss:$16 sps:$4 sm:$0xff]   ;;  %v7806_v60 = vld [vmem:[%s11043_s1 + $0x5e0] ss:$16 sps:$4 sm:$0xff]  }
  0x33   :  { %1650 = vmatpush2.bf16.msra.mxu0 %v7736_v63  ;;  %v7811_v59 = vld [vmem:[%s11043_s1 + $0x7e4] ss:$16 sps:$4 sm:$0xff]   ;;  %v7809_v62 = vld [vmem:[%s11043_s1 + $0x7e0] ss:$16 sps:$4 sm:$0xff]  }
  0x34   :  { %1691 = vmatpush2.bf16.msra.mxu1 %v7737_v0  ;;  %1651 = vmatprep.subr.bf16.mxu0 %v7738_v1  ;;  %v7814_v63 = vld [vmem:[%s11043_s1 + $0x5c4] ss:$16 sps:$4 sm:$0xff]   ;;  %v7812_v1 = vld [vmem:[%s11043_s1 + $0x5c0] ss:$16 sps:$4 sm:$0xff]  }
  0x35   :  { %1692 = vmatprep.subr.bf16.mxu1 %v7740_v2  ;;  %v7817_v0 = vld [vmem:[%s11043_s1 + $0x7c4] ss:$16 sps:$4 sm:$0xff]   ;;  %v7815_v2 = vld [vmem:[%s11043_s1 + $0x7c0] ss:$16 sps:$4 sm:$0xff]  }
  0x36   :  { %v7820_v4 = vld [vmem:[%s11043_s1 + $0x5a4] ss:$16 sps:$4 sm:$0xff]   ;;  %v7836_v20 = vld [vmem:[%s11043_s1 + $0x540] ss:$16 sps:$4 sm:$0xff]  }
  0x37   :  { %1652 = vmatpush2.bf16.msra.mxu0 %v7742_v5  ;;  %v7823_v5 = vld [vmem:[%s11043_s1 + $0x7a4] ss:$16 sps:$4 sm:$0xff]   ;;  %v7839_v21 = vld [vmem:[%s11043_s1 + $0x740] ss:$16 sps:$4 sm:$0xff]  }
  0x38   :  { %1693 = vmatpush2.bf16.msra.mxu1 %v7743_v6  ;;  %1653 = vmatprep.subr.bf16.mxu0 %v7744_v7  ;;  %v7818_v6 = vld [vmem:[%s11043_s1 + $0x5a0] ss:$16 sps:$4 sm:$0xff]   ;;  %v7829_v9 = vld [vmem:[%s11043_s1 + $0x784] ss:$16 sps:$4 sm:$0xff]  }
  0x39   :  { %1694 = vmatprep.subr.bf16.mxu1 %v7746_v8  ;;  %v7821_v7 = vld [vmem:[%s11043_s1 + $0x7a0] ss:$16 sps:$4 sm:$0xff]   ;;  %v7826_v8 = vld [vmem:[%s11043_s1 + $0x584] ss:$16 sps:$4 sm:$0xff]  }
  0x3b   :  { %1654 = vmatpush2.bf16.msra.mxu0 %v7748_v10  ;;  %v7824_v10 = vld [vmem:[%s11043_s1 + $0x580] ss:$16 sps:$4 sm:$0xff]  }
  0x3c   :  { %1695 = vmatpush2.bf16.msra.mxu1 %v7749_v11  ;;  %1655 = vmatprep.subr.bf16.mxu0 %v7750_v12  ;;  %v7827_v11 = vld [vmem:[%s11043_s1 + $0x780] ss:$16 sps:$4 sm:$0xff]   ;;  %v7832_v12 = vld [vmem:[%s11043_s1 + $0x564] ss:$16 sps:$4 sm:$0xff]  }
  0x3d   :  { %1696 = vmatprep.subr.bf16.mxu1 %v7752_v13  ;;  %v7835_v13 = vld [vmem:[%s11043_s1 + $0x764] ss:$16 sps:$4 sm:$0xff]  }
  0x3f   :  { %1656 = vmatpush2.bf16.msra.mxu0 %v7754_v16  ;;  %v7830_v16 = vld [vmem:[%s11043_s1 + $0x560] ss:$16 sps:$4 sm:$0xff]  }
  0x40   :  { %1697 = vmatpush2.bf16.msra.mxu1 %v7755_v17  ;;  %1707 = vmatprep.subr.bf16.mxu0 %v7760_v18  ;;  %v7833_v17 = vld [vmem:[%s11043_s1 + $0x760] ss:$16 sps:$4 sm:$0xff]   ;;  %v7838_v18 = vld [vmem:[%s11043_s1 + $0x544] ss:$16 sps:$4 sm:$0xff]  }
  0x41   :  { %1748 = vmatprep.subr.bf16.mxu1 %v7763_v19  ;;  %v7841_v19 = vld [vmem:[%s11043_s1 + $0x744] ss:$16 sps:$4 sm:$0xff]  }
  0x42   :  { %1658 = vmatmul.mubr.bf16.vlgmr.msra.gmra.mxu0 %v8425_v22 }
  0x43   :  { %1699 = vmatmul.mubr.bf16.vlgmr.msra.gmra.mxu1 %v8427_v23  ;;  %1708 = vmatpush1.bf16.msra.mxu0 %v7758_v24  ;;  %v7844_v24 = vld [vmem:[%s11043_s1 + $0x524] ss:$16 sps:$4 sm:$0xff]  }
  0x44   :  { %1749 = vmatpush1.bf16.msra.mxu1 %v7761_v25  ;;  %1709 = vmatprep.subr.bf16.mxu0 %v7766_v26  ;;  %v7847_v25 = vld [vmem:[%s11043_s1 + $0x724] ss:$16 sps:$4 sm:$0xff]   ;;  %v7842_v26 = vld [vmem:[%s11043_s1 + $0x520] ss:$16 sps:$4 sm:$0xff]  }
  0x45   :  { %1750 = vmatprep.subr.bf16.mxu1 %v7769_v27  ;;  %1739 = vmatprep.mubr.bf16.mxu0 %v8441_v28  ;;  %v7845_v27 = vld [vmem:[%s11043_s1 + $0x720] ss:$16 sps:$4 sm:$0xff]  }
  0x46   :  { %1780 = vmatprep.mubr.bf16.mxu1 %v8443_v29 }
  0x47   :  { %1710 = vmatpush1.bf16.msra.mxu0 %v7764_v30  ;;  %v7850_v30 = vld [vmem:[%s11043_s1 + $0x504] ss:$16 sps:$4 sm:$0xff]  }
  0x48   :  { %1751 = vmatpush1.bf16.msra.mxu1 %v7767_v31  ;;  %1711 = vmatprep.subr.bf16.mxu0 %v7772_v32  ;;  %v7853_v31 = vld [vmem:[%s11043_s1 + $0x704] ss:$16 sps:$4 sm:$0xff]   ;;  %v7848_v32 = vld [vmem:[%s11043_s1 + $0x500] ss:$16 sps:$4 sm:$0xff]  }
  0x49   :  { %1752 = vmatprep.subr.bf16.mxu1 %v7775_v33  ;;  %v7851_v33 = vld [vmem:[%s11043_s1 + $0x700] ss:$16 sps:$4 sm:$0xff]  }
  0x4b   :  { %1712 = vmatpush1.bf16.msra.mxu0 %v7770_v34  ;;  %v7856_v34 = vld [vmem:[%s11043_s1 + $0xec] ss:$16 sps:$4 sm:$0xff]  }
  0x4c   :  { %1753 = vmatpush1.bf16.msra.mxu1 %v7773_v35  ;;  %1713 = vmatprep.subr.bf16.mxu0 %v7778_v36  ;;  %v7859_v35 = vld [vmem:[%s11043_s1 + $0x2ec] ss:$16 sps:$4 sm:$0xff]   ;;  %v8631_v36 = vpack.c.bf16 %v8404_v14, %v8404_v14 }
  0x4d   :  { %1754 = vmatprep.subr.bf16.mxu1 %v7781_v37  ;;  %v8635_v37 = vpack.c.bf16 %v8407_v15, %v8407_v15  ;;  %v7862_v14 = vld [vmem:[%s11043_s1 + $0xcc] ss:$16 sps:$4 sm:$0xff]  }
  0x4e   :  { %v7865_v15 = vld [vmem:[%s11043_s1 + $0x2cc] ss:$16 sps:$4 sm:$0xff]  }
  0x4f   :  { %1714 = vmatpush1.bf16.msra.mxu0 %v7776_v38  ;;  %v7854_v38 = vld [vmem:[%s11043_s1 + $0xe8] ss:$16 sps:$4 sm:$0xff]  }
  0x50   :  { %1755 = vmatpush1.bf16.msra.mxu1 %v7779_v39  ;;  %1715 = vmatprep.subr.bf16.mxu0 %v7784_v40  ;;  %v7857_v39 = vld [vmem:[%s11043_s1 + $0x2e8] ss:$16 sps:$4 sm:$0xff]  }
  0x51   :  { %1756 = vmatprep.subr.bf16.mxu1 %v7787_v41  ;;  %v7860_v40 = vld [vmem:[%s11043_s1 + $0xc8] ss:$16 sps:$4 sm:$0xff]  }
  0x52   :  { %v7863_v41 = vld [vmem:[%s11043_s1 + $0x2c8] ss:$16 sps:$4 sm:$0xff]  }
  0x53   :  { %1716 = vmatpush1.bf16.msra.mxu0 %v7782_v42  ;;  %v7868_v42 = vld [vmem:[%s11043_s1 + $0xac] ss:$16 sps:$4 sm:$0xff]  }
  0x54   :  { %1757 = vmatpush1.bf16.msra.mxu1 %v7785_v44  ;;  %1717 = vmatprep.subr.bf16.mxu0 %v7790_v45  ;;  %v7871_v44 = vld [vmem:[%s11043_s1 + $0x2ac] ss:$16 sps:$4 sm:$0xff]   ;;  %v7866_v45 = vld [vmem:[%s11043_s1 + $0xa8] ss:$16 sps:$4 sm:$0xff]  }
  0x55   :  { %1758 = vmatprep.subr.bf16.mxu1 %v7793_v46  ;;  %v7869_v46 = vld [vmem:[%s11043_s1 + $0x2a8] ss:$16 sps:$4 sm:$0xff]  }
  0x57   :  { %1718 = vmatpush1.bf16.msra.mxu0 %v7788_v47  ;;  %v7874_v47 = vld [vmem:[%s11043_s1 + $0x8c] ss:$16 sps:$4 sm:$0xff]  }
  0x58   :  { %1759 = vmatpush1.bf16.msra.mxu1 %v7791_v48  ;;  %1719 = vmatprep.subr.bf16.mxu0 %v7796_v50  ;;  %v7875_v48 = vld [vmem:[%s11043_s1 + $0x288] ss:$16 sps:$4 sm:$0xff]   ;;  %v7880_v50 = vld [vmem:[%s11043_s1 + $0x6c] ss:$16 sps:$4 sm:$0xff]  }
  0x59   :  { %1760 = vmatprep.subr.bf16.mxu1 %v7799_v51  ;;  %v7883_v51 = vld [vmem:[%s11043_s1 + $0x26c] ss:$16 sps:$4 sm:$0xff]  }
  0x5b   :  { %1720 = vmatpush1.bf16.msra.mxu0 %v7794_v52  ;;  %v7878_v52 = vld [vmem:[%s11043_s1 + $0x68] ss:$16 sps:$4 sm:$0xff]  }
  0x5c   :  { %1761 = vmatpush1.bf16.msra.mxu1 %v7797_v53  ;;  %1721 = vmatprep.subr.bf16.mxu0 %v7802_v54  ;;  %v7881_v53 = vld [vmem:[%s11043_s1 + $0x268] ss:$16 sps:$4 sm:$0xff]   ;;  %v7886_v54 = vld [vmem:[%s11043_s1 + $0x4c] ss:$16 sps:$4 sm:$0xff]  }
  0x5d   :  { %1762 = vmatprep.subr.bf16.mxu1 %v7805_v55  ;;  %v7889_v55 = vld [vmem:[%s11043_s1 + $0x24c] ss:$16 sps:$4 sm:$0xff]  }
  0x5f   :  { %1722 = vmatpush1.bf16.msra.mxu0 %v7800_v56  ;;  %v7884_v56 = vld [vmem:[%s11043_s1 + $0x48] ss:$16 sps:$4 sm:$0xff]  }
  0x60   :  { %1763 = vmatpush1.bf16.msra.mxu1 %v7803_v57  ;;  %1723 = vmatprep.subr.bf16.mxu0 %v7808_v58  ;;  %v7887_v57 = vld [vmem:[%s11043_s1 + $0x248] ss:$16 sps:$4 sm:$0xff]   ;;  %v7892_v58 = vld [vmem:[%s11043_s1 + $0x2c] ss:$16 sps:$4 sm:$0xff]  }
  0x61   :  { %1764 = vmatprep.subr.bf16.mxu1 %v7811_v59  ;;  %v7895_v59 = vld [vmem:[%s11043_s1 + $0x22c] ss:$16 sps:$4 sm:$0xff]  }
  0x63   :  { %1724 = vmatpush2.bf16.msra.mxu0 %v7806_v60  ;;  %v7890_v60 = vld [vmem:[%s11043_s1 + $0x28] ss:$16 sps:$4 sm:$0xff]  }
  0x64   :  { %1765 = vmatpush2.bf16.msra.mxu1 %v7809_v62  ;;  %1725 = vmatprep.subr.bf16.mxu0 %v7814_v63  ;;  %v7893_v62 = vld [vmem:[%s11043_s1 + $0x228] ss:$16 sps:$4 sm:$0xff]   ;;  %v7898_v63 = vld [vmem:[%s11043_s1 + $0xc] ss:$16 sps:$4 sm:$0xff]  }
  0x65   :  { %1766 = vmatprep.subr.bf16.mxu1 %v7817_v0  ;;  %v7901_v0 = vld [vmem:[%s11043_s1 + $0x20c] ss:$16 sps:$4 sm:$0xff]  }
  0x67   :  { %1726 = vmatpush2.bf16.msra.mxu0 %v7812_v1  ;;  %v7896_v1 = vld [vmem:[%s11043_s1 + $0x8] ss:$16 sps:$4 sm:$0xff]  }
  0x68   :  { %1767 = vmatpush2.bf16.msra.mxu1 %v7815_v2  ;;  %1727 = vmatprep.subr.bf16.mxu0 %v7820_v4  ;;  %v7899_v2 = vld [vmem:[%s11043_s1 + $0x208] ss:$16 sps:$4 sm:$0xff]   ;;  %v7904_v4 = vld [vmem:[%s11043_s1 + $0x1ec] ss:$16 sps:$4 sm:$0xff]  }
  0x69   :  { %1768 = vmatprep.subr.bf16.mxu1 %v7823_v5  ;;  %v7907_v5 = vld [vmem:[%s11043_s1 + $0x3ec] ss:$16 sps:$4 sm:$0xff]  }
  0x6b   :  { %1728 = vmatpush2.bf16.msra.mxu0 %v7818_v6  ;;  %v7902_v6 = vld [vmem:[%s11043_s1 + $0x1e8] ss:$16 sps:$4 sm:$0xff]  }
  0x6c   :  { %1769 = vmatpush2.bf16.msra.mxu1 %v7821_v7  ;;  %1729 = vmatprep.subr.bf16.mxu0 %v7826_v8  ;;  %v7905_v7 = vld [vmem:[%s11043_s1 + $0x3e8] ss:$16 sps:$4 sm:$0xff]   ;;  %v7910_v8 = vld [vmem:[%s11043_s1 + $0x1cc] ss:$16 sps:$4 sm:$0xff]  }
  0x6d   :  { %1770 = vmatprep.subr.bf16.mxu1 %v7829_v9  ;;  %v7913_v9 = vld [vmem:[%s11043_s1 + $0x3cc] ss:$16 sps:$4 sm:$0xff]  }
  0x6f   :  { %1730 = vmatpush2.bf16.msra.mxu0 %v7824_v10  ;;  %v7908_v10 = vld [vmem:[%s11043_s1 + $0x1c8] ss:$16 sps:$4 sm:$0xff]  }
  0x70   :  { %1771 = vmatpush2.bf16.msra.mxu1 %v7827_v11  ;;  %1731 = vmatprep.subr.bf16.mxu0 %v7832_v12  ;;  %v7911_v11 = vld [vmem:[%s11043_s1 + $0x3c8] ss:$16 sps:$4 sm:$0xff]   ;;  %v7916_v12 = vld [vmem:[%s11043_s1 + $0x1ac] ss:$16 sps:$4 sm:$0xff]  }
  0x71   :  { %1772 = vmatprep.subr.bf16.mxu1 %v7835_v13  ;;  %v7919_v13 = vld [vmem:[%s11043_s1 + $0x3ac] ss:$16 sps:$4 sm:$0xff]  }
  0x73   :  { %1732 = vmatpush2.bf16.msra.mxu0 %v7830_v16  ;;  %v7914_v16 = vld [vmem:[%s11043_s1 + $0x1a8] ss:$16 sps:$4 sm:$0xff]  }
  0x74   :  { %1773 = vmatpush2.bf16.msra.mxu1 %v7833_v17  ;;  %1733 = vmatprep.subr.bf16.mxu0 %v7838_v18  ;;  %v7917_v17 = vld [vmem:[%s11043_s1 + $0x3a8] ss:$16 sps:$4 sm:$0xff]   ;;  %v7922_v18 = vld [vmem:[%s11043_s1 + $0x18c] ss:$16 sps:$4 sm:$0xff]  }
  0x75   :  { %1774 = vmatprep.subr.bf16.mxu1 %v7841_v19  ;;  %v7925_v19 = vld [vmem:[%s11043_s1 + $0x38c] ss:$16 sps:$4 sm:$0xff]  }
  0x77   :  { %1734 = vmatpush2.bf16.msra.mxu0 %v7836_v20  ;;  %v7920_v20 = vld [vmem:[%s11043_s1 + $0x188] ss:$16 sps:$4 sm:$0xff]  }
  0x78   :  { %1775 = vmatpush2.bf16.msra.mxu1 %v7839_v21  ;;  %1735 = vmatprep.subr.bf16.mxu0 %v7844_v24  ;;  %v7923_v21 = vld [vmem:[%s11043_s1 + $0x388] ss:$16 sps:$4 sm:$0xff]   ;;  %v7928_v24 = vld [vmem:[%s11043_s1 + $0x16c] ss:$16 sps:$4 sm:$0xff]  }
  0x79   :  { %1776 = vmatprep.subr.bf16.mxu1 %v7847_v25  ;;  %v7931_v25 = vld [vmem:[%s11043_s1 + $0x36c] ss:$16 sps:$4 sm:$0xff]  }
  0x7b   :  { %1736 = vmatpush2.bf16.msra.mxu0 %v7842_v26  ;;  %v7926_v26 = vld [vmem:[%s11043_s1 + $0x168] ss:$16 sps:$4 sm:$0xff]  }
  0x7c   :  { %1777 = vmatpush2.bf16.msra.mxu1 %v7845_v27  ;;  %1737 = vmatprep.subr.bf16.mxu0 %v7850_v30  ;;  %v7929_v27 = vld [vmem:[%s11043_s1 + $0x368] ss:$16 sps:$4 sm:$0xff]   ;;  %v7934_v30 = vld [vmem:[%s11043_s1 + $0x14c] ss:$16 sps:$4 sm:$0xff]  }
  0x7d   :  { %1778 = vmatprep.subr.bf16.mxu1 %v7853_v31  ;;  %v7937_v31 = vld [vmem:[%s11043_s1 + $0x34c] ss:$16 sps:$4 sm:$0xff]  }
  0x7f   :  { %1738 = vmatpush2.bf16.msra.mxu0 %v7848_v32  ;;  %v7932_v32 = vld [vmem:[%s11043_s1 + $0x148] ss:$16 sps:$4 sm:$0xff]  }
  0x80   :  { %1779 = vmatpush2.bf16.msra.mxu1 %v7851_v33  ;;  %1789 = vmatprep.subr.bf16.mxu0 %v7856_v34  ;;  %v7935_v33 = vld [vmem:[%s11043_s1 + $0x348] ss:$16 sps:$4 sm:$0xff]   ;;  %v7940_v34 = vld [vmem:[%s11043_s1 + $0x12c] ss:$16 sps:$4 sm:$0xff]  }
  0x81   :  { %1830 = vmatprep.subr.bf16.mxu1 %v7859_v35  ;;  %v7943_v35 = vld [vmem:[%s11043_s1 + $0x32c] ss:$16 sps:$4 sm:$0xff]  }
  0x82   :  { %1740 = vmatmul.mubr.bf16.vlgmr.msra.gmra.mxu0 %v8631_v36 }
  0x83   :  { %1781 = vmatmul.mubr.bf16.vlgmr.msra.gmra.mxu1 %v8635_v37  ;;  %1790 = vmatpush1.bf16.msra.mxu0 %v7854_v38  ;;  %v7938_v38 = vld [vmem:[%s11043_s1 + $0x128] ss:$16 sps:$4 sm:$0xff]  }
  0x84   :  { %1831 = vmatpush1.bf16.msra.mxu1 %v7857_v39  ;;  %1791 = vmatprep.subr.bf16.mxu0 %v7862_v14  ;;  %v7941_v39 = vld [vmem:[%s11043_s1 + $0x328] ss:$16 sps:$4 sm:$0xff]   ;;  %v7946_v14 = vld [vmem:[%s11043_s1 + $0x10c] ss:$16 sps:$4 sm:$0xff]  }
  0x85   :  { %1832 = vmatprep.subr.bf16.mxu1 %v7865_v15  ;;  %1821 = vmatprep.mubr.bf16.mxu0 %v8358_v61  ;;  %v7877_v61 = vld [vmem:[%s11043_s1 + $0x28c] ss:$16 sps:$4 sm:$0xff]  }
  0x86   :  { %1862 = vmatprep.mubr.bf16.mxu1 %v8372_v3  ;;  %v7872_v3 = vld [vmem:[%s11043_s1 + $0x88] ss:$16 sps:$4 sm:$0xff]   ;;  %v7949_v15 = vld [vmem:[%s11043_s1 + $0x30c] ss:$16 sps:$4 sm:$0xff]  }
  0x87   :  { %1792 = vmatpush1.bf16.msra.mxu0 %v7860_v40  ;;  %v7944_v40 = vld [vmem:[%s11043_s1 + $0x108] ss:$16 sps:$4 sm:$0xff]  }
  0x88   :  { %1833 = vmatpush1.bf16.msra.mxu1 %v7863_v41  ;;  %1793 = vmatprep.subr.bf16.mxu0 %v7868_v42  ;;  %v7947_v41 = vld [vmem:[%s11043_s1 + $0x308] ss:$16 sps:$4 sm:$0xff]   ;;  %v7952_v42 = vld [vmem:[%s11043_s1 + $0x4ec] ss:$16 sps:$4 sm:$0xff]  }
  0x89   :  { %1834 = vmatprep.subr.bf16.mxu1 %v7871_v44  ;;  %v7955_v44 = vld [vmem:[%s11043_s1 + $0x6ec] ss:$16 sps:$4 sm:$0xff]  }
  0x8b   :  { %1794 = vmatpush1.bf16.msra.mxu0 %v7866_v45  ;;  %v7950_v45 = vld [vmem:[%s11043_s1 + $0x4e8] ss:$16 sps:$4 sm:$0xff]  }
  0x8c   :  { %1835 = vmatpush1.bf16.msra.mxu1 %v7869_v46  ;;  %1795 = vmatprep.subr.bf16.mxu0 %v7874_v47  ;;  %v7953_v46 = vld [vmem:[%s11043_s1 + $0x6e8] ss:$16 sps:$4 sm:$0xff]   ;;  %v7958_v47 = vld [vmem:[%s11043_s1 + $0x4cc] ss:$16 sps:$4 sm:$0xff]  }
  0x8d   :  { %1836 = vmatprep.subr.bf16.mxu1 %v7877_v61  ;;  %v7961_v61 = vld [vmem:[%s11043_s1 + $0x6cc] ss:$16 sps:$4 sm:$0xff]  }
  0x8f   :  { %1796 = vmatpush1.bf16.msra.mxu0 %v7872_v3  ;;  %v7956_v3 = vld [vmem:[%s11043_s1 + $0x4c8] ss:$16 sps:$4 sm:$0xff]  }
  0x90   :  { %1837 = vmatpush1.bf16.msra.mxu1 %v7875_v48  ;;  %1797 = vmatprep.subr.bf16.mxu0 %v7880_v50  ;;  %v7959_v48 = vld [vmem:[%s11043_s1 + $0x6c8] ss:$16 sps:$4 sm:$0xff]   ;;  %v7964_v50 = vld [vmem:[%s11043_s1 + $0x4ac] ss:$16 sps:$4 sm:$0xff]  }
  0x91   :  { %1838 = vmatprep.subr.bf16.mxu1 %v7883_v51  ;;  %v7967_v51 = vld [vmem:[%s11043_s1 + $0x6ac] ss:$16 sps:$4 sm:$0xff]  }
  0x93   :  { %1798 = vmatpush1.bf16.msra.mxu0 %v7878_v52  ;;  %v7962_v52 = vld [vmem:[%s11043_s1 + $0x4a8] ss:$16 sps:$4 sm:$0xff]  }
  0x94   :  { %1839 = vmatpush1.bf16.msra.mxu1 %v7881_v53  ;;  %1799 = vmatprep.subr.bf16.mxu0 %v7886_v54  ;;  %v7973_v53 = vld [vmem:[%s11043_s1 + $0x68c] ss:$16 sps:$4 sm:$0xff]  }
  0x95   :  { %1840 = vmatprep.subr.bf16.mxu1 %v7889_v55  ;;  %v7976_v54 = vld [vmem:[%s11043_s1 + $0x46c] ss:$16 sps:$4 sm:$0xff]  }
  0x96   :  { %v7979_v55 = vld [vmem:[%s11043_s1 + $0x66c] ss:$16 sps:$4 sm:$0xff]  }
  0x97   :  { %1800 = vmatpush1.bf16.msra.mxu0 %v7884_v56  ;;  %v7974_v56 = vld [vmem:[%s11043_s1 + $0x468] ss:$16 sps:$4 sm:$0xff]  }
  0x98   :  { %1841 = vmatpush1.bf16.msra.mxu1 %v7887_v57  ;;  %1801 = vmatprep.subr.bf16.mxu0 %v7892_v58  ;;  %v7977_v57 = vld [vmem:[%s11043_s1 + $0x668] ss:$16 sps:$4 sm:$0xff]   ;;  %v7982_v58 = vld [vmem:[%s11043_s1 + $0x44c] ss:$16 sps:$4 sm:$0xff]  }
  0x99   :  { %1842 = vmatprep.subr.bf16.mxu1 %v7895_v59  ;;  %v7985_v59 = vld [vmem:[%s11043_s1 + $0x64c] ss:$16 sps:$4 sm:$0xff]  }
  0x9b   :  { %1802 = vmatpush1.bf16.msra.mxu0 %v7890_v60  ;;  %v7980_v60 = vld [vmem:[%s11043_s1 + $0x448] ss:$16 sps:$4 sm:$0xff]  }
  0x9c   :  { %1843 = vmatpush1.bf16.msra.mxu1 %v7893_v62  ;;  %1803 = vmatprep.subr.bf16.mxu0 %v7898_v63  ;;  %v7983_v62 = vld [vmem:[%s11043_s1 + $0x648] ss:$16 sps:$4 sm:$0xff]   ;;  %v7988_v63 = vld [vmem:[%s11043_s1 + $0x42c] ss:$16 sps:$4 sm:$0xff]  }
  0x9d   :  { %1844 = vmatprep.subr.bf16.mxu1 %v7901_v0  ;;  %v7991_v0 = vld [vmem:[%s11043_s1 + $0x62c] ss:$16 sps:$4 sm:$0xff]  }
  0x9f   :  { %1804 = vmatpush1.bf16.msra.mxu0 %v7896_v1  ;;  %v7986_v1 = vld [vmem:[%s11043_s1 + $0x428] ss:$16 sps:$4 sm:$0xff]  }
  0xa0   :  { %1845 = vmatpush1.bf16.msra.mxu1 %v7899_v2  ;;  %1805 = vmatprep.subr.bf16.mxu0 %v7904_v4  ;;  %v7989_v2 = vld [vmem:[%s11043_s1 + $0x628] ss:$16 sps:$4 sm:$0xff]   ;;  %v7994_v4 = vld [vmem:[%s11043_s1 + $0x40c] ss:$16 sps:$4 sm:$0xff]  }
  0xa1   :  { %1846 = vmatprep.subr.bf16.mxu1 %v7907_v5  ;;  %v7997_v5 = vld [vmem:[%s11043_s1 + $0x60c] ss:$16 sps:$4 sm:$0xff]  }
  0xa3   :  { %1806 = vmatpush2.bf16.msra.mxu0 %v7902_v6  ;;  %v7992_v6 = vld [vmem:[%s11043_s1 + $0x408] ss:$16 sps:$4 sm:$0xff]  }
  0xa4   :  { %1847 = vmatpush2.bf16.msra.mxu1 %v7905_v7  ;;  %1807 = vmatprep.subr.bf16.mxu0 %v7910_v8  ;;  %v7995_v7 = vld [vmem:[%s11043_s1 + $0x608] ss:$16 sps:$4 sm:$0xff]   ;;  %v8000_v8 = vld [vmem:[%s11043_s1 + $0x5ec] ss:$16 sps:$4 sm:$0xff]  }
  0xa5   :  { %1848 = vmatprep.subr.bf16.mxu1 %v7913_v9  ;;  %v8003_v9 = vld [vmem:[%s11043_s1 + $0x7ec] ss:$16 sps:$4 sm:$0xff]  }
  0xa7   :  { %1808 = vmatpush2.bf16.msra.mxu0 %v7908_v10  ;;  %v7998_v10 = vld [vmem:[%s11043_s1 + $0x5e8] ss:$16 sps:$4 sm:$0xff]  }
  0xa8   :  { %1849 = vmatpush2.bf16.msra.mxu1 %v7911_v11  ;;  %1809 = vmatprep.subr.bf16.mxu0 %v7916_v12  ;;  %v8001_v11 = vld [vmem:[%s11043_s1 + $0x7e8] ss:$16 sps:$4 sm:$0xff]   ;;  %v8006_v12 = vld [vmem:[%s11043_s1 + $0x5cc] ss:$16 sps:$4 sm:$0xff]  }
  0xa9   :  { %1850 = vmatprep.subr.bf16.mxu1 %v7919_v13  ;;  %v8009_v13 = vld [vmem:[%s11043_s1 + $0x7cc] ss:$16 sps:$4 sm:$0xff]  }
  0xab   :  { %1810 = vmatpush2.bf16.msra.mxu0 %v7914_v16  ;;  %v8004_v16 = vld [vmem:[%s11043_s1 + $0x5c8] ss:$16 sps:$4 sm:$0xff]  }
  0xac   :  { %1851 = vmatpush2.bf16.msra.mxu1 %v7917_v17  ;;  %1811 = vmatprep.subr.bf16.mxu0 %v7922_v18  ;;  %v8007_v17 = vld [vmem:[%s11043_s1 + $0x7c8] ss:$16 sps:$4 sm:$0xff]   ;;  %v8012_v18 = vld [vmem:[%s11043_s1 + $0x5ac] ss:$16 sps:$4 sm:$0xff]  }
  0xad   :  { %1852 = vmatprep.subr.bf16.mxu1 %v7925_v19  ;;  %v8015_v19 = vld [vmem:[%s11043_s1 + $0x7ac] ss:$16 sps:$4 sm:$0xff]  }
  0xaf   :  { %1812 = vmatpush2.bf16.msra.mxu0 %v7920_v20  ;;  %v8010_v20 = vld [vmem:[%s11043_s1 + $0x5a8] ss:$16 sps:$4 sm:$0xff]  }
  0xb0   :  { %1853 = vmatpush2.bf16.msra.mxu1 %v7923_v21  ;;  %1813 = vmatprep.subr.bf16.mxu0 %v7928_v24  ;;  %v8013_v21 = vld [vmem:[%s11043_s1 + $0x7a8] ss:$16 sps:$4 sm:$0xff]   ;;  %v8018_v24 = vld [vmem:[%s11043_s1 + $0x58c] ss:$16 sps:$4 sm:$0xff]  }
  0xb1   :  { %1854 = vmatprep.subr.bf16.mxu1 %v7931_v25  ;;  %v8021_v25 = vld [vmem:[%s11043_s1 + $0x78c] ss:$16 sps:$4 sm:$0xff]  }
  0xb3   :  { %1814 = vmatpush2.bf16.msra.mxu0 %v7926_v26  ;;  %v8016_v26 = vld [vmem:[%s11043_s1 + $0x588] ss:$16 sps:$4 sm:$0xff]  }
  0xb4   :  { %1855 = vmatpush2.bf16.msra.mxu1 %v7929_v27  ;;  %1815 = vmatprep.subr.bf16.mxu0 %v7934_v30  ;;  %v8019_v27 = vld [vmem:[%s11043_s1 + $0x788] ss:$16 sps:$4 sm:$0xff]   ;;  %v8024_v30 = vld [vmem:[%s11043_s1 + $0x56c] ss:$16 sps:$4 sm:$0xff]  }
  0xb5   :  { %1856 = vmatprep.subr.bf16.mxu1 %v7937_v31  ;;  %v8027_v31 = vld [vmem:[%s11043_s1 + $0x76c] ss:$16 sps:$4 sm:$0xff]  }
  0xb7   :  { %1816 = vmatpush2.bf16.msra.mxu0 %v7932_v32  ;;  %v8022_v32 = vld [vmem:[%s11043_s1 + $0x568] ss:$16 sps:$4 sm:$0xff]  }
  0xb8   :  { %1857 = vmatpush2.bf16.msra.mxu1 %v7935_v33  ;;  %1817 = vmatprep.subr.bf16.mxu0 %v7940_v34  ;;  %v8025_v33 = vld [vmem:[%s11043_s1 + $0x768] ss:$16 sps:$4 sm:$0xff]   ;;  %v8030_v34 = vld [vmem:[%s11043_s1 + $0x54c] ss:$16 sps:$4 sm:$0xff]  }
  0xb9   :  { %1858 = vmatprep.subr.bf16.mxu1 %v7943_v35  ;;  %v8033_v35 = vld [vmem:[%s11043_s1 + $0x74c] ss:$16 sps:$4 sm:$0xff]  }
  0xbb   :  { %1818 = vmatpush2.bf16.msra.mxu0 %v7938_v38  ;;  %v8028_v38 = vld [vmem:[%s11043_s1 + $0x548] ss:$16 sps:$4 sm:$0xff]  }
  0xbc   :  { %1859 = vmatpush2.bf16.msra.mxu1 %v7941_v39  ;;  %1819 = vmatprep.subr.bf16.mxu0 %v7946_v14  ;;  %v8031_v39 = vld [vmem:[%s11043_s1 + $0x748] ss:$16 sps:$4 sm:$0xff]   ;;  %v8036_v14 = vld [vmem:[%s11043_s1 + $0x52c] ss:$16 sps:$4 sm:$0xff]  }
  0xbd   :  { %1860 = vmatprep.subr.bf16.mxu1 %v7949_v15  ;;  %v8039_v15 = vld [vmem:[%s11043_s1 + $0x72c] ss:$16 sps:$4 sm:$0xff]  }
  0xbf   :  { %1820 = vmatpush2.bf16.msra.mxu0 %v7944_v40  ;;  %v8034_v40 = vld [vmem:[%s11043_s1 + $0x528] ss:$16 sps:$4 sm:$0xff]  }
  0xc0   :  { %1861 = vmatpush2.bf16.msra.mxu1 %v7947_v41  ;;  %1871 = vmatprep.subr.bf16.mxu0 %v7952_v42  ;;  %v8037_v41 = vld [vmem:[%s11043_s1 + $0x728] ss:$16 sps:$4 sm:$0xff]   ;;  %v8042_v42 = vld [vmem:[%s11043_s1 + $0x50c] ss:$16 sps:$4 sm:$0xff]  }
  0xc1   :  { %1912 = vmatprep.subr.bf16.mxu1 %v7955_v44  ;;  %v8045_v44 = vld [vmem:[%s11043_s1 + $0x70c] ss:$16 sps:$4 sm:$0xff]  }
  0xc2   :  { %1822 = vmatmul.mubr.bf16.vlgmr.msra.gmra.mxu0 %v8425_v22  ;;  %v7965_v22 = vld [vmem:[%s11043_s1 + $0x6a8] ss:$16 sps:$4 sm:$0xff]  }
  0xc3   :  { %1863 = vmatmul.mubr.bf16.vlgmr.msra.gmra.mxu1 %v8427_v23  ;;  %1872 = vmatpush1.bf16.msra.mxu0 %v7950_v45  ;;  %v7970_v23 = vld [vmem:[%s11043_s1 + $0x48c] ss:$16 sps:$4 sm:$0xff]   ;;  %v8040_v45 = vld [vmem:[%s11043_s1 + $0x508] ss:$16 sps:$4 sm:$0xff]  }
  0xc4   :  { %1913 = vmatpush1.bf16.msra.mxu1 %v7953_v46  ;;  %1873 = vmatprep.subr.bf16.mxu0 %v7958_v47  ;;  %v8043_v46 = vld [vmem:[%s11043_s1 + $0x708] ss:$16 sps:$4 sm:$0xff]   ;;  %v8048_v47 = vld [vmem:[%s11045_s4 + $0x74] ss:$8 sps:$4 sm:$0xff]  }
  0xc5   :  { %1914 = vmatprep.subr.bf16.mxu1 %v7961_v61  ;;  %1903 = vmatprep.mubr.bf16.mxu0 %v8441_v28  ;;  %v7968_v28 = vld [vmem:[%s11043_s1 + $0x488] ss:$16 sps:$4 sm:$0xff]  }
  0xc6   :  { %1944 = vmatprep.mubr.bf16.mxu1 %v8443_v29  ;;  %v7971_v29 = vld [vmem:[%s11043_s1 + $0x688] ss:$16 sps:$4 sm:$0xff]  }
  0xc7   :  { %1874 = vmatpush1.bf16.msra.mxu0 %v7956_v3  ;;  %v8046_v61 = vld [vmem:[%s11045_s4 + $0x70] ss:$8 sps:$4 sm:$0xff]   ;;  %v8051_v3 = vld [vmem:[%s11045_s4 + $0x64] ss:$8 sps:$4 sm:$0xff]  }
  0xc8   :  { %1915 = vmatpush1.bf16.msra.mxu1 %v7959_v48  ;;  %1875 = vmatprep.subr.bf16.mxu0 %v7964_v50 }
  0xc9   :  { %1916 = vmatprep.subr.bf16.mxu1 %v7967_v51 }
  0xcb   :  { %1876 = vmatpush1.bf16.msra.mxu0 %v7962_v52  ;;  %v8049_v52 = vld [vmem:[%s11045_s4 + $0x60] ss:$8 sps:$4 sm:$0xff]  }
  0xcc   :  { %1917 = vmatpush1.bf16.msra.mxu1 %v7965_v22  ;;  %1877 = vmatprep.subr.bf16.mxu0 %v7970_v23 }
  0xcd   :  { %1918 = vmatprep.subr.bf16.mxu1 %v7973_v53  ;;  %v8054_v53 = vld [vmem:[%s11045_s4 + $0x54] ss:$8 sps:$4 sm:$0xff]  }
  0xcf   :  { %1878 = vmatpush1.bf16.msra.mxu0 %v7968_v28 }
  0xd0   :  { %1919 = vmatpush1.bf16.msra.mxu1 %v7971_v29  ;;  %1879 = vmatprep.subr.bf16.mxu0 %v7976_v54 }
  0xd1   :  { %1920 = vmatprep.subr.bf16.mxu1 %v7979_v55  ;;  %v8057_v55 = vld [vmem:[%s11045_s4 + $0x44] ss:$8 sps:$4 sm:$0xff]  }
  0xd3   :  { %1880 = vmatpush1.bf16.msra.mxu0 %v7974_v56  ;;  %v8094_v56 = vld [vmem:[%s11045_s4 + $0x170] ss:$8 sps:$4 sm:$0xff]  }
  0xd4   :  { %1921 = vmatpush1.bf16.msra.mxu1 %v7977_v57  ;;  %1881 = vmatprep.subr.bf16.mxu0 %v7982_v58  ;;  %v8096_v57 = vld [vmem:[%s11045_s4 + $0x174] ss:$8 sps:$4 sm:$0xff]   ;;  %v8099_v58 = vld [vmem:[%s11045_s4 + $0x164] ss:$8 sps:$4 sm:$0xff]  }
  0xd5   :  { %1922 = vmatprep.subr.bf16.mxu1 %v7985_v59  ;;  %v8055_v59 = vld [vmem:[%s11045_s4 + $0x40] ss:$8 sps:$4 sm:$0xff]  }
  0xd7   :  { %1882 = vmatpush1.bf16.msra.mxu0 %v7980_v60  ;;  %v8097_v60 = vld [vmem:[%s11045_s4 + $0x160] ss:$8 sps:$4 sm:$0xff]  }
  0xd8   :  { %1923 = vmatpush1.bf16.msra.mxu1 %v7983_v62  ;;  %1883 = vmatprep.subr.bf16.mxu0 %v7988_v63  ;;  %v8060_v62 = vld [vmem:[%s11045_s4 + $0x34] ss:$8 sps:$4 sm:$0xff]  }
  0xd9   :  { %1924 = vmatprep.subr.bf16.mxu1 %v7991_v0  ;;  %v8102_v63 = vld [vmem:[%s11045_s4 + $0x154] ss:$8 sps:$4 sm:$0xff]   ;;  %v8058_v0 = vld [vmem:[%s11045_s4 + $0x30] ss:$8 sps:$4 sm:$0xff]  }
  0xdb   :  { %1884 = vmatpush1.bf16.msra.mxu0 %v7986_v1  ;;  %v8100_v1 = vld [vmem:[%s11045_s4 + $0x150] ss:$8 sps:$4 sm:$0xff]  }
  0xdc   :  { %1925 = vmatpush1.bf16.msra.mxu1 %v7989_v2  ;;  %1885 = vmatprep.subr.bf16.mxu0 %v7994_v4  ;;  %v8063_v2 = vld [vmem:[%s11045_s4 + $0x24] ss:$8 sps:$4 sm:$0xff]  }
  0xdd   :  { %1926 = vmatprep.subr.bf16.mxu1 %v7997_v5  ;;  %v8105_v4 = vld [vmem:[%s11045_s4 + $0x144] ss:$8 sps:$4 sm:$0xff]   ;;  %v8061_v5 = vld [vmem:[%s11045_s4 + $0x20] ss:$8 sps:$4 sm:$0xff]  }
  0xdf   :  { %1886 = vmatpush1.bf16.msra.mxu0 %v7992_v6  ;;  %v8103_v6 = vld [vmem:[%s11045_s4 + $0x140] ss:$8 sps:$4 sm:$0xff]  }
  0xe0   :  { %1927 = vmatpush1.bf16.msra.mxu1 %v7995_v7  ;;  %1887 = vmatprep.subr.bf16.mxu0 %v8000_v8  ;;  %v8066_v7 = vld [vmem:[%s11045_s4 + $0x14] ss:$8 sps:$4 sm:$0xff]  }
  0xe1   :  { %1928 = vmatprep.subr.bf16.mxu1 %v8003_v9  ;;  %v8108_v8 = vld [vmem:[%s11045_s4 + $0x134] ss:$8 sps:$4 sm:$0xff]   ;;  %v8064_v9 = vld [vmem:[%s11045_s4 + $0x10] ss:$8 sps:$4 sm:$0xff]  }
  0xe3   :  { %1888 = vmatpush2.bf16.msra.mxu0 %v7998_v10  ;;  %v8106_v10 = vld [vmem:[%s11045_s4 + $0x130] ss:$8 sps:$4 sm:$0xff]  }
  0xe4   :  { %1929 = vmatpush2.bf16.msra.mxu1 %v8001_v11  ;;  %1889 = vmatprep.subr.bf16.mxu0 %v8006_v12  ;;  %v8069_v11 = vld [vmem:[%s11045_s4 + $0x4] ss:$8 sps:$4 sm:$0xff]  }
  0xe5   :  { %1930 = vmatprep.subr.bf16.mxu1 %v8009_v13  ;;  %v8111_v12 = vld [vmem:[%s11045_s4 + $0x124] ss:$8 sps:$4 sm:$0xff]   ;;  %v8067_v13 = vld [vmem:[%s11045_s4] ss:$8 sps:$4 sm:$0xff]  }
  0xe7   :  { %1890 = vmatpush2.bf16.msra.mxu0 %v8004_v16  ;;  %v8109_v16 = vld [vmem:[%s11045_s4 + $0x120] ss:$8 sps:$4 sm:$0xff]  }
  0xe8   :  { %1931 = vmatpush2.bf16.msra.mxu1 %v8007_v17  ;;  %1891 = vmatprep.subr.bf16.mxu0 %v8012_v18  ;;  %v8072_v17 = vld [vmem:[%s11045_s4 + $0xf4] ss:$8 sps:$4 sm:$0xff]  }
  0xe9   :  { %1932 = vmatprep.subr.bf16.mxu1 %v8015_v19  ;;  %v8114_v18 = vld [vmem:[%s11045_s4 + $0x114] ss:$8 sps:$4 sm:$0xff]   ;;  %v8070_v19 = vld [vmem:[%s11045_s4 + $0xf0] ss:$8 sps:$4 sm:$0xff]  }
  0xeb   :  { %1892 = vmatpush2.bf16.msra.mxu0 %v8010_v20  ;;  %v8112_v20 = vld [vmem:[%s11045_s4 + $0x110] ss:$8 sps:$4 sm:$0xff]  }
  0xec   :  { %1933 = vmatpush2.bf16.msra.mxu1 %v8013_v21  ;;  %1893 = vmatprep.subr.bf16.mxu0 %v8018_v24  ;;  %v8075_v21 = vld [vmem:[%s11045_s4 + $0xe4] ss:$8 sps:$4 sm:$0xff]  }
  0xed   :  { %1934 = vmatprep.subr.bf16.mxu1 %v8021_v25  ;;  %v8117_v24 = vld [vmem:[%s11045_s4 + $0x104] ss:$8 sps:$4 sm:$0xff]   ;;  %v8073_v25 = vld [vmem:[%s11045_s4 + $0xe0] ss:$8 sps:$4 sm:$0xff]  }
  0xef   :  { %1894 = vmatpush2.bf16.msra.mxu0 %v8016_v26  ;;  %v8115_v26 = vld [vmem:[%s11045_s4 + $0x100] ss:$8 sps:$4 sm:$0xff]  }
  0xf0   :  { %1935 = vmatpush2.bf16.msra.mxu1 %v8019_v27  ;;  %1895 = vmatprep.subr.bf16.mxu0 %v8024_v30  ;;  %v8078_v27 = vld [vmem:[%s11045_s4 + $0xd4] ss:$8 sps:$4 sm:$0xff]  }
  0xf1   :  { %1936 = vmatprep.subr.bf16.mxu1 %v8027_v31  ;;  %v8120_v30 = vld [vmem:[%s11045_s4 + $0x1f4] ss:$8 sps:$4 sm:$0xff]   ;;  %v8076_v31 = vld [vmem:[%s11045_s4 + $0xd0] ss:$8 sps:$4 sm:$0xff]  }
  0xf3   :  { %1896 = vmatpush2.bf16.msra.mxu0 %v8022_v32  ;;  %v8118_v32 = vld [vmem:[%s11045_s4 + $0x1f0] ss:$8 sps:$4 sm:$0xff]  }
  0xf4   :  { %1937 = vmatpush2.bf16.msra.mxu1 %v8025_v33  ;;  %1897 = vmatprep.subr.bf16.mxu0 %v8030_v34  ;;  %v8081_v33 = vld [vmem:[%s11045_s4 + $0xc4] ss:$8 sps:$4 sm:$0xff]  }
  0xf5   :  { %1938 = vmatprep.subr.bf16.mxu1 %v8033_v35  ;;  %v8123_v34 = vld [vmem:[%s11045_s4 + $0x1e4] ss:$8 sps:$4 sm:$0xff]   ;;  %v8079_v35 = vld [vmem:[%s11045_s4 + $0xc0] ss:$8 sps:$4 sm:$0xff]  }
  0xf7   :  { %1898 = vmatpush2.bf16.msra.mxu0 %v8028_v38  ;;  %v8121_v38 = vld [vmem:[%s11045_s4 + $0x1e0] ss:$8 sps:$4 sm:$0xff]  }
  0xf8   :  { %1939 = vmatpush2.bf16.msra.mxu1 %v8031_v39  ;;  %1899 = vmatprep.subr.bf16.mxu0 %v8036_v14  ;;  %v8084_v39 = vld [vmem:[%s11045_s4 + $0xb4] ss:$8 sps:$4 sm:$0xff]  }
  0xf9   :  { %1940 = vmatprep.subr.bf16.mxu1 %v8039_v15  ;;  %v8126_v14 = vld [vmem:[%s11045_s4 + $0x1d4] ss:$8 sps:$4 sm:$0xff]   ;;  %v8082_v15 = vld [vmem:[%s11045_s4 + $0xb0] ss:$8 sps:$4 sm:$0xff]  }
  0xfb   :  { %1900 = vmatpush2.bf16.msra.mxu0 %v8034_v40  ;;  %v8124_v40 = vld [vmem:[%s11045_s4 + $0x1d0] ss:$8 sps:$4 sm:$0xff]  }
  0xfc   :  { %1941 = vmatpush2.bf16.msra.mxu1 %v8037_v41  ;;  %1901 = vmatprep.subr.bf16.mxu0 %v8042_v42  ;;  %v8087_v41 = vld [vmem:[%s11045_s4 + $0xa4] ss:$8 sps:$4 sm:$0xff]  }
  0xfd   :  { %1942 = vmatprep.subr.bf16.mxu1 %v8045_v44  ;;  %v8129_v42 = vld [vmem:[%s11045_s4 + $0x1c4] ss:$8 sps:$4 sm:$0xff]   ;;  %v8085_v44 = vld [vmem:[%s11045_s4 + $0xa0] ss:$8 sps:$4 sm:$0xff]  }
  0xff   :  { %1902 = vmatpush2.bf16.msra.mxu0 %v8040_v45  ;;  %v8127_v45 = vld [vmem:[%s11045_s4 + $0x1c0] ss:$8 sps:$4 sm:$0xff]  }
 0x100   :  { %1943 = vmatpush2.bf16.msra.mxu1 %v8043_v46  ;;  %2397 = vmatprep.subr.bf16.mxu0 %v8048_v47  ;;  %v8090_v46 = vld [vmem:[%s11045_s4 + $0x94] ss:$8 sps:$4 sm:$0xff]   ;;  %v8088_v47 = vld [vmem:[%s11045_s4 + $0x90] ss:$8 sps:$4 sm:$0xff]  }
 0x101   :  { %2438 = vmatprep.subr.bf16.mxu1 %v8096_v57 }
 0x102   :  { %v1659_v48 = vpop.f32.mrf.mxu0  ;;  %1904 = vmatmul.mubr.bf16.vlgmr.msra.gmra.mxu0 %v8631_v36 }
 0x103   :  { %v1700_v50 = vpop.f32.mrf.mxu1  ;;  %1945 = vmatmul.mubr.bf16.vlgmr.msra.gmra.mxu1 %v8635_v37  ;;  %2398 = vmatpush1.bf16.msra.mxu0 %v8046_v61  ;;  %v8052_v37 = vld [vmem:[%s11045_s4 + $0x50] ss:$8 sps:$4 sm:$0xff]   ;;  %v8093_v61 = vld [vmem:[%s11045_s4 + $0x84] ss:$8 sps:$4 sm:$0xff]  }
 0x104   :  { %v9034_v51 = vadd.f32 %v1700_v50, %v1659_v48  ;;  %v9039_v22 = vpop.f32.mrf.mxu0  ;;  %2399 = vmatprep.subr.bf16.mxu0 %v8051_v3  ;;  %2439 = vmatpush1.bf16.msra.mxu1 %v8094_v56  ;;  %v8091_v3 = vld [vmem:[%s11045_s4 + $0x80] ss:$8 sps:$4 sm:$0xff]   ;;  %v9200_v48 = vsub.s32 0, %v8315_v43 }
 0x105   :  { %v9041_v23 = vpop.f32.mrf.mxu1  ;;  %2440 = vmatprep.subr.bf16.mxu1 %v8099_v58  ;;  %v9205_v50 = vld [vmem:[%s11046_s2] sm:$0xf] }
 0x106   :  { %v1663_v28 = vpop.f32.mrf.mxu0  ;;  %v1958_v56 = vrot.slane %v9205_v50, %v9200_v48 }
 0x107   :  { %v1704_v36 = vpop.f32.mrf.mxu1  ;;  %2400 = vmatpush1.bf16.msra.mxu0 %v8049_v52  ;;  %v8132_v52 = vld [vmem:[%s11045_s4 + $0x1b4] ss:$8 sps:$4 sm:$0xff]   ;;  %v8130_v28 = vld [vmem:[%s11045_s4 + $0x1b0] ss:$8 sps:$4 sm:$0xff]  }
 0x108   :  { %v1664_v29 = vpop.f32.mrf.mxu0  ;;  %2401 = vmatprep.subr.bf16.mxu0 %v8054_v53  ;;  %2441 = vmatpush1.bf16.msra.mxu1 %v8097_v60  ;;  %v9211_v53 = vsub.s32 1, %v8315_v43 }
 0x109   :  { %v1705_v54 = vpop.f32.mrf.mxu1  ;;  %2442 = vmatprep.subr.bf16.mxu1 %v8102_v63  ;;  %v9219_v29 = vld [vmem:[%s11047_s3] sm:$0xf] }
 0x10a   :  { %v1703_v54 = vadd.f32 %v9041_v23, %v9039_v22  ;;  %v1962_v22 = vrot.slane %v9205_v50, %v9211_v53 }
 0x10b   :  { %2402 = vmatpush1.bf16.msra.mxu0 %v8052_v37 }
 0x10c   :  { %2403 = vmatprep.subr.bf16.mxu0 %v8057_v55  ;;  %2443 = vmatpush1.bf16.msra.mxu1 %v8100_v1 }
 0x10d   :  { %2444 = vmatprep.subr.bf16.mxu1 %v8105_v4  ;;  %v1988_v4 = vrot.slane %v9219_v29, %v9211_v53 }
 0x10f   :  { %2404 = vmatpush1.bf16.msra.mxu0 %v8055_v59  ;;  %v8135_v59 = vld [vmem:[%s11045_s4 + $0x1a4] ss:$8 sps:$4 sm:$0xff]  }
 0x110   :  { %2405 = vmatprep.subr.bf16.mxu0 %v8060_v62  ;;  %2445 = vmatpush1.bf16.msra.mxu1 %v8103_v6  ;;  %v1984_v62 = vrot.slane %v9219_v29, %v9200_v48 }
 0x111   :  { %2446 = vmatprep.subr.bf16.mxu1 %v8108_v8 }
 0x113   :  { %2406 = vmatpush1.bf16.msra.mxu0 %v8058_v0 }
 0x114   :  { %2407 = vmatprep.subr.bf16.mxu0 %v8063_v2  ;;  %2447 = vmatpush1.bf16.msra.mxu1 %v8106_v10  ;;  %v8136_v10 = vld [vmem:[%s11045_s4 + $0x190] ss:$8 sps:$4 sm:$0xff]  }
 0x115   :  { %2448 = vmatprep.subr.bf16.mxu1 %v8111_v12 }
 0x117   :  { %2408 = vmatpush1.bf16.msra.mxu0 %v8061_v5 }
 0x118   :  { %2409 = vmatprep.subr.bf16.mxu0 %v8066_v7  ;;  %2449 = vmatpush1.bf16.msra.mxu1 %v8109_v16  ;;  %v8138_v7 = vld [vmem:[%s11045_s4 + $0x194] ss:$8 sps:$4 sm:$0xff]  }
 0x119   :  { %2450 = vmatprep.subr.bf16.mxu1 %v8114_v18 }
 0x11b   :  { %2410 = vmatpush1.bf16.msra.mxu0 %v8064_v9 }
 0x11c   :  { %2411 = vmatprep.subr.bf16.mxu0 %v8069_v11  ;;  %2451 = vmatpush1.bf16.msra.mxu1 %v8112_v20 }
 0x11d   :  { %2452 = vmatprep.subr.bf16.mxu1 %v8117_v24 }
 0x11f   :  { %2412 = vmatpush1.bf16.msra.mxu0 %v8067_v13  ;;  %v8141_v13 = vld [vmem:[%s11045_s4 + $0x184] ss:$8 sps:$4 sm:$0xff]  }
 0x120   :  { %2413 = vmatprep.subr.bf16.mxu0 %v8072_v17  ;;  %2453 = vmatpush1.bf16.msra.mxu1 %v8115_v26  ;;  %v8139_v17 = vld [vmem:[%s11045_s4 + $0x180] ss:$8 sps:$4 sm:$0xff]  }
 0x121   :  { %2454 = vmatprep.subr.bf16.mxu1 %v8120_v30 }
 0x123   :  { %2414 = vmatpush2.bf16.msra.mxu0 %v8070_v19 }
 0x124   :  { %2415 = vmatprep.subr.bf16.mxu0 %v8075_v21  ;;  %2455 = vmatpush2.bf16.msra.mxu1 %v8118_v32 }
 0x125   :  { %2456 = vmatprep.subr.bf16.mxu1 %v8123_v34  ;;  %v2751_v34 = vld [vmem:[%s11048_s7 + $0x780] sm:$0xff] }
 0x127   :  { %2416 = vmatpush2.bf16.msra.mxu0 %v8073_v25 }
 0x128   :  { %2417 = vmatprep.subr.bf16.mxu0 %v8078_v27  ;;  %2457 = vmatpush2.bf16.msra.mxu1 %v8121_v38 }
 0x129   :  { %2458 = vmatprep.subr.bf16.mxu1 %v8126_v14  ;;  %v9270_v14 = vld [vmem:[%s11048_s7 + $0x788] sm:$0xff] }
 0x12b   :  { %2418 = vmatpush2.bf16.msra.mxu0 %v8076_v31 }
 0x12c   :  { %2419 = vmatprep.subr.bf16.mxu0 %v8081_v33  ;;  %2459 = vmatpush2.bf16.msra.mxu1 %v8124_v40  ;;  %v2735_v33 = vld [vmem:[%s11048_s7 + $0x700] sm:$0xff] }
 0x12d   :  { %2460 = vmatprep.subr.bf16.mxu1 %v8129_v42  ;;  %v7371_v38 = vcombine.low %v2735_v33, %v2751_v34  ;;  %v2719_v40 = vld [vmem:[%s11048_s7 + $0x680] sm:$0xff] }
 0x12f   :  { %2420 = vmatpush2.bf16.msra.mxu0 %v8079_v35  ;;  %v9265_v35 = vld [vmem:[%s11048_s7 + $0x708] sm:$0xff] }
 0x130   :  { %2421 = vmatprep.subr.bf16.mxu0 %v8084_v39  ;;  %2461 = vmatpush2.bf16.msra.mxu1 %v8127_v45  ;;  %v7372_v39 = vcombine.high %v2735_v33, %v2751_v34  ;;  %v2687_v45 = vld [vmem:[%s11048_s7 + $0x580] sm:$0xff] }
 0x131   :  { %2462 = vmatprep.subr.bf16.mxu1 %v8132_v52 }
 0x133   :  { %2422 = vmatpush2.bf16.msra.mxu0 %v8082_v15  ;;  %v2703_v15 = vld [vmem:[%s11048_s7 + $0x600] sm:$0xff] }
 0x134   :  { %2423 = vmatprep.subr.bf16.mxu0 %v8087_v41  ;;  %2463 = vmatpush2.bf16.msra.mxu1 %v8130_v28  ;;  %v7374_v41 = vcombine.high %v9265_v35, %v9270_v14  ;;  %v7340_v42 = vcombine.high %v2703_v15, %v2719_v40 }
 0x135   :  { %2464 = vmatprep.subr.bf16.mxu1 %v8135_v59 }
 0x137   :  { %2424 = vmatpush2.bf16.msra.mxu0 %v8085_v44  ;;  %v2671_v44 = vld [vmem:[%s11048_s7 + $0x500] sm:$0xff] }
 0x138   :  { %2425 = vmatprep.subr.bf16.mxu0 %v8090_v46  ;;  %v7339_v46 = vcombine.low %v2703_v15, %v2719_v40  ;;  %v7307_v52 = vcombine.low %v2671_v44, %v2687_v45 }
 0x13b   :  { %2426 = vmatpush2.bf16.msra.mxu0 %v8088_v47  ;;  %v7308_v47 = vcombine.high %v2671_v44, %v2687_v45 }
 0x13c   :  { %2427 = vmatprep.subr.bf16.mxu0 %v8093_v61  ;;  %v2639_v61 = vld [vmem:[%s11048_s7 + $0x400] sm:$0xff] }
 0x13f   :  { %2428 = vmatpush2.bf16.msra.mxu0 %v8091_v3  ;;  %v2655_v3 = vld [vmem:[%s11048_s7 + $0x480] sm:$0xff] }
 0x140   :  { %5583 = vmatprep.subr.bf16.mxu0 %v7372_v39  ;;  %v7276_v28 = vcombine.high %v2639_v61, %v2655_v3  ;;  %v2879_v39 = vld [vmem:[%s11048_s7 + $0xb80] sm:$0xff] }
 0x142   :  { %v1741_v36 = vpop.f32.mrf.mxu0 }
 0x143   :  { %v1782_v37 = vpop.f32.mrf.mxu1  ;;  %v1742_v55 = vadd.f32 %v1741_v36, %v9034_v51  ;;  %v8133_v51 = vld [vmem:[%s11045_s4 + $0x1a0] ss:$8 sps:$4 sm:$0xff]  }
 0x144   :  { %v1743_v57 = vpop.f32.mrf.mxu0  ;;  %2465 = vmatpush2.bf16.msra.mxu1 %v8133_v51  ;;  %v2607_v36 = vld [vmem:[%s11048_s7 + $0x300] sm:$0xff] }
 0x145   :  { %v1784_v58 = vpop.f32.mrf.mxu1  ;;  %v1783_v60 = vadd.f32 %v1782_v37, %v1742_v55  ;;  %v1744_v63 = vadd.f32 %v1743_v57, %v1703_v54  ;;  %2466 = vmatprep.subr.bf16.mxu1 %v8138_v7  ;;  %v2623_v37 = vld [vmem:[%s11048_s7 + $0x380] sm:$0xff]  ;;  %v7275_v54 = vcombine.low %v2639_v61, %v2655_v3 }
 0x146   :  { %v1745_v23 = vpop.f32.mrf.mxu0  ;;  %v7244_v55 = vcombine.high %v2607_v36, %v2623_v37  ;;  %v2591_v57 = vld [vmem:[%s11048_s7 + $0x280] sm:$0xff] }
 0x147   :  { %v1786_v0 = vpop.f32.mrf.mxu1  ;;  %v1975_v1 = vmul.f32 %v1958_v56, %v1783_v60  ;;  %v1785_v2 = vadd.f32 %v1784_v58, %v1744_v63  ;;  %v2575_v56 = vld [vmem:[%s11048_s7 + $0x200] sm:$0xff]  ;;  %v7243_v58 = vcombine.low %v2607_v36, %v2623_v37 }
 0x148   :  { %v1746_v5 = vpop.f32.mrf.mxu0  ;;  %2467 = vmatpush2.bf16.msra.mxu1 %v8136_v10  ;;  %v7212_v59 = vcombine.high %v2575_v56, %v2591_v57  ;;  %v2543_v60 = vld [vmem:[%s11048_s7 + $0x100] sm:$0xff]  ;;  %v7211_v63 = vcombine.low %v2575_v56, %v2591_v57  ;;  %v2704_v57 = vld [vmem:[%s11048_s7 + $0x608] sm:$0xff] }
 0x149   :  { %v1787_v6 = vpop.f32.mrf.mxu1  ;;  %v2001_v8 = vadd.f32 %v1984_v62, %v1975_v1  ;;  %v1976_v9 = vmul.f32 %v1962_v22, %v1785_v2  ;;  %2468 = vmatprep.subr.bf16.mxu1 %v8141_v13  ;;  %v2559_v62 = vld [vmem:[%s11048_s7 + $0x180] sm:$0xff] }
 0x14a   :  { %v7180_v22 = vcombine.high %v2543_v60, %v2559_v62  ;;  %v2511_v51 = vld [vmem:[%s11048_s7] sm:$0xff]  ;;  %v7179_v0 = vcombine.low %v2543_v60, %v2559_v62 }
 0x14b   :  { %v2002_v11 = vadd.f32 %v1988_v4, %v1976_v9  ;;  %v2005_v12 = vmax.f32 %v2001_v8, 0.0  ;;  %v2527_v23 = vld [vmem:[%s11048_s7 + $0x80] sm:$0xff] }
 0x14c   :  { %2469 = vmatpush2.bf16.msra.mxu1 %v8139_v17  ;;  %v7148_v1 = vcombine.high %v2511_v51, %v2527_v23  ;;  %v2991_v2 = vld [vmem:[%s11048_s7 + $0xf00] sm:$0xff]  ;;  %v7147_v5 = vcombine.low %v2511_v51, %v2527_v23  ;;  %v9335_v17 = vsub.s32 2, %v8315_v43 }
 0x14d   :  { %v2006_v16 = vmax.f32 %v2002_v11, 0.0  ;;  %v2009_v19 = vpack.c.bf16 %v2005_v12, %v2005_v12  ;;  %5624 = vmatprep.subr.bf16.mxu1 %v7374_v41  ;;  %v3007_v4 = vld [vmem:[%s11048_s7 + $0xf80] sm:$0xff] }
 0x14e   :  { %v7628_v6 = vcombine.high %v2991_v2, %v3007_v4  ;;  %v2959_v7 = vld [vmem:[%s11048_s7 + $0xe00] sm:$0xff]  ;;  %v7627_v9 = vcombine.low %v2991_v2, %v3007_v4  ;;  %v1966_v34 = vrot.slane %v9205_v50, %v9335_v17  ;;  %v1992_v15 = vrot.slane %v9219_v29, %v9335_v17  ;;  %v2608_v2 = vld [vmem:[%s11048_s7 + $0x308] sm:$0xff] }
 0x14f   :  { %v2010_v18 = vpack.c.bf16 %v2006_v16, %v2006_v16  ;;  %v2975_v8 = vld [vmem:[%s11048_s7 + $0xe80] sm:$0xff]  ;;  %v2624_v4 = vld [vmem:[%s11048_s7 + $0x388] sm:$0xff] }
 0x150   :  { %v7596_v10 = vcombine.high %v2959_v7, %v2975_v8  ;;  %v2927_v11 = vld [vmem:[%s11048_s7 + $0xd00] sm:$0xff]  ;;  %v7595_v13 = vcombine.low %v2959_v7, %v2975_v8  ;;  %v2576_v7 = vld [vmem:[%s11048_s7 + $0x208] sm:$0xff] }
 0x151   :  { %2429 = vmatprep.mubr.bf16.mxu0 %v2010_v18  ;;  %v2943_v12 = vld [vmem:[%s11048_s7 + $0xd80] sm:$0xff]  ;;  %v2592_v8 = vld [vmem:[%s11048_s7 + $0x288] sm:$0xff] }
 0x152   :  { %2430 = vmatmul.mubr.bf16.vlgmr.msra.gmra.mxu0 %v2009_v19  ;;  %v7564_v16 = vcombine.high %v2927_v11, %v2943_v12  ;;  %v2895_v18 = vld [vmem:[%s11048_s7 + $0xc00] sm:$0xff] }
 0x153   :  { %5584 = vmatpush1.bf16.msra.mxu0 %v7371_v38  ;;  %v2911_v19 = vld [vmem:[%s11048_s7 + $0xc80] sm:$0xff] }
 0x154   :  { %5585 = vmatprep.subr.bf16.mxu0 %v7340_v42  ;;  %v2863_v38 = vld [vmem:[%s11048_s7 + $0xb00] sm:$0xff] }
 0x157   :  { %5586 = vmatpush1.bf16.msra.mxu0 %v7339_v46  ;;  %v7500_v46 = vcombine.high %v2863_v38, %v2879_v39 }
 0x158   :  { %5587 = vmatprep.subr.bf16.mxu0 %v7308_v47 }
 0x15b   :  { %5588 = vmatpush1.bf16.msra.mxu0 %v7307_v52 }
 0x15c   :  { %5589 = vmatprep.subr.bf16.mxu0 %v7276_v28 }
 0x15f   :  { %5590 = vmatpush1.bf16.msra.mxu0 %v7275_v54  ;;  %v7499_v54 = vcombine.low %v2863_v38, %v2879_v39  ;;  %v2976_v38 = vld [vmem:[%s11048_s7 + $0xe88] sm:$0xff] }
 0x160   :  { %5591 = vmatprep.subr.bf16.mxu0 %v7244_v55 }
 0x163   :  { %5592 = vmatpush1.bf16.msra.mxu0 %v7243_v58  ;;  %v2720_v58 = vld [vmem:[%s11048_s7 + $0x688] sm:$0xff] }
 0x164   :  { %5593 = vmatprep.subr.bf16.mxu0 %v7212_v59  ;;  %v7373_v59 = vcombine.low %v9265_v35, %v9270_v14  ;;  %v7342_v62 = vcombine.high %v2704_v57, %v2720_v58  ;;  %v7341_v51 = vcombine.low %v2704_v57, %v2720_v58  ;;  %v2640_v35 = vld [vmem:[%s11048_s7 + $0x408] sm:$0xff] }
 0x165   :  { %v2656_v14 = vld [vmem:[%s11048_s7 + $0x488] sm:$0xff] }
 0x167   :  { %5594 = vmatpush1.bf16.msra.mxu0 %v7211_v63  ;;  %v2672_v63 = vld [vmem:[%s11048_s7 + $0x508] sm:$0xff] }
 0x168   :  { %5595 = vmatprep.subr.bf16.mxu0 %v7180_v22  ;;  %v2688_v22 = vld [vmem:[%s11048_s7 + $0x588] sm:$0xff] }
 0x169   :  { %v7310_v23 = vcombine.high %v2672_v63, %v2688_v22 }
 0x16b   :  { %5596 = vmatpush1.bf16.msra.mxu0 %v7179_v0  ;;  %v7309_v0 = vcombine.low %v2672_v63, %v2688_v22  ;;  %v2800_v63 = vld [vmem:[%s11048_s7 + $0x908] sm:$0xff] }
 0x16c   :  { %5597 = vmatprep.subr.bf16.mxu0 %v7148_v1  ;;  %v7278_v1 = vcombine.high %v2640_v35, %v2656_v14  ;;  %v2816_v22 = vld [vmem:[%s11048_s7 + $0x988] sm:$0xff] }
 0x16f   :  { %5598 = vmatpush1.bf16.msra.mxu0 %v7147_v5  ;;  %v7277_v5 = vcombine.low %v2640_v35, %v2656_v14  ;;  %v7437_v35 = vcombine.low %v2800_v63, %v2816_v22  ;;  %v7438_v14 = vcombine.high %v2800_v63, %v2816_v22  ;;  %v2657_v63 = vld [vmem:[%s11048_s7 + $0x490] sm:$0xff]  ;;  %v2642_v22 = vld [vmem:[%s11048_s7 + $0x418] sm:$0xff] }
 0x170   :  { %5599 = vmatprep.subr.bf16.mxu0 %v7628_v6  ;;  %v7246_v6 = vcombine.high %v2608_v2, %v2624_v4 }
 0x173   :  { %5600 = vmatpush2.bf16.msra.mxu0 %v7627_v9  ;;  %v7245_v9 = vcombine.low %v2608_v2, %v2624_v4  ;;  %v2783_v2 = vld [vmem:[%s11048_s7 + $0x880] sm:$0xff]  ;;  %v2768_v4 = vld [vmem:[%s11048_s7 + $0x808] sm:$0xff] }
 0x174   :  { %5601 = vmatprep.subr.bf16.mxu0 %v7596_v10  ;;  %v7214_v10 = vcombine.high %v2576_v7, %v2592_v8 }
 0x177   :  { %5602 = vmatpush2.bf16.msra.mxu0 %v7595_v13  ;;  %v7213_v13 = vcombine.low %v2576_v7, %v2592_v8 }
 0x178   :  { %5603 = vmatprep.subr.bf16.mxu0 %v7564_v16 }
 0x182   :  { %v1823_v20 = vpop.f32.mrf.mxu0 }
 0x183   :  { %v1864_v21 = vpop.f32.mrf.mxu1 }
 0x184   :  { %v9250_v24 = vadd.f32 %v1864_v21, %v1823_v20  ;;  %v9252_v25 = vpop.f32.mrf.mxu0  ;;  %v9344_v20 = vsub.s32 3, %v8315_v43  ;;  %v7563_v21 = vcombine.low %v2927_v11, %v2943_v12  ;;  %v2544_v11 = vld [vmem:[%s11048_s7 + $0x108] sm:$0xff] }
 0x185   :  { %v9254_v26 = vpop.f32.mrf.mxu1  ;;  %v2560_v12 = vld [vmem:[%s11048_s7 + $0x188] sm:$0xff] }
 0x186   :  { %v1827_v27 = vpop.f32.mrf.mxu0  ;;  %5604 = vmatpush2.bf16.msra.mxu0 %v7563_v21  ;;  %v1996_v3 = vrot.slane %v9219_v29, %v9344_v20  ;;  %v7182_v16 = vcombine.high %v2544_v11, %v2560_v12  ;;  %v7181_v21 = vcombine.low %v2544_v11, %v2560_v12  ;;  %v2753_v11 = vld [vmem:[%s11048_s7 + $0x790] sm:$0xff]  ;;  %v2738_v12 = vld [vmem:[%s11048_s7 + $0x718] sm:$0xff] }
 0x187   :  { %v1868_v30 = vpop.f32.mrf.mxu1 }
 0x188   :  { %v1828_v31 = vpop.f32.mrf.mxu0 }
 0x189   :  { %v1869_v32 = vpop.f32.mrf.mxu1  ;;  %v7532_v31 = vcombine.high %v2895_v18, %v2911_v19 }
 0x18a   :  { %v1867_v32 = vadd.f32 %v9254_v26, %v9252_v25  ;;  %v7531_v26 = vcombine.low %v2895_v18, %v2911_v19  ;;  %v2512_v18 = vld [vmem:[%s11048_s7 + $0x8] sm:$0xff] }
 0x18b   :  { %5605 = vmatprep.subr.bf16.mxu0 %v7532_v31  ;;  %v2528_v19 = vld [vmem:[%s11048_s7 + $0x88] sm:$0xff] }
 0x18c   :  { %5606 = vmatpush2.bf16.msra.mxu0 %v7531_v26  ;;  %v3008_v31 = vld [vmem:[%s11048_s7 + $0xf88] sm:$0xff] }
 0x18d   :  { %5607 = vmatprep.subr.bf16.mxu0 %v7500_v46  ;;  %v2912_v26 = vld [vmem:[%s11048_s7 + $0xc88] sm:$0xff] }
 0x18e   :  { %v2864_v46 = vld [vmem:[%s11048_s7 + $0xb08] sm:$0xff] }
 0x190   :  { %5608 = vmatpush2.bf16.msra.mxu0 %v7499_v54 }
 0x1c2   :  { %v1905_v27 = vpop.f32.mrf.mxu0 }
 0x1c3   :  { %v1946_v30 = vpop.f32.mrf.mxu1  ;;  %v1906_v33 = vadd.f32 %v1905_v27, %v9250_v24  ;;  %v1970_v24 = vrot.slane %v9205_v50, %v9344_v20  ;;  %v7150_v27 = vcombine.high %v2512_v18, %v2528_v19 }
 0x1c4   :  { %v1907_v40 = vpop.f32.mrf.mxu0 }
 0x1c5   :  { %v1948_v41 = vpop.f32.mrf.mxu1  ;;  %v1947_v42 = vadd.f32 %v1946_v30, %v1906_v33  ;;  %v1908_v25 = vadd.f32 %v1907_v40, %v1867_v32  ;;  %v2992_v30 = vld [vmem:[%s11048_s7 + $0xf08] sm:$0xff]  ;;  %v7149_v32 = vcombine.low %v2512_v18, %v2528_v19 }
 0x1c6   :  { %v1909_v44 = vpop.f32.mrf.mxu0  ;;  %v7630_v33 = vcombine.high %v2992_v30, %v3008_v31  ;;  %v7629_v39 = vcombine.low %v2992_v30, %v3008_v31  ;;  %v2928_v40 = vld [vmem:[%s11048_s7 + $0xd08] sm:$0xff]  ;;  %v2493_v30 = vld [vmem:[%s11050_s6] sm:$0x3] }
 0x1c7   :  { %v1950_v45 = vpop.f32.mrf.mxu1  ;;  %v1977_v47 = vmul.f32 %v1966_v34, %v1947_v42  ;;  %v1949_v61 = vadd.f32 %v1948_v41, %v1908_v25  ;;  %v2960_v34 = vld [vmem:[%s11048_s7 + $0xe08] sm:$0xff] }
 0x1c8   :  { %v1910_v52 = vpop.f32.mrf.mxu0  ;;  %v2944_v41 = vld [vmem:[%s11048_s7 + $0xd88] sm:$0xff]  ;;  %v7597_v42 = vcombine.low %v2960_v34, %v2976_v38 }
 0x1c9   :  { %v1951_v28 = vpop.f32.mrf.mxu1  ;;  %v2003_v36 = vadd.f32 %v1992_v15, %v1977_v47  ;;  %v1978_v37 = vmul.f32 %v1970_v24, %v1949_v61  ;;  %v7598_v15 = vcombine.high %v2960_v34, %v2976_v38  ;;  %v7566_v25 = vcombine.high %v2928_v40, %v2944_v41  ;;  %v2896_v24 = vld [vmem:[%s11048_s7 + $0xc08] sm:$0xff] }
 0x1ca   :  { %v7565_v44 = vcombine.low %v2928_v40, %v2944_v41  ;;  %v7534_v45 = vcombine.high %v2896_v24, %v2912_v26  ;;  %v2880_v47 = vld [vmem:[%s11048_s7 + $0xb88] sm:$0xff]  ;;  %v7533_v61 = vcombine.low %v2896_v24, %v2912_v26  ;;  %v2831_v28 = vld [vmem:[%s11048_s7 + $0xa00] sm:$0xff]  ;;  %v2498_v34 = vrot.slane %v2493_v30, %v9200_v48 }
 0x1cb   :  { %v2004_v55 = vadd.f32 %v1996_v3, %v1978_v37  ;;  %v2007_v50 = vmax.f32 %v2003_v36, 0.0  ;;  %v7502_v3 = vcombine.high %v2864_v46, %v2880_v47  ;;  %v7501_v52 = vcombine.low %v2864_v46, %v2880_v47  ;;  %v2847_v36 = vld [vmem:[%s11048_s7 + $0xa80] sm:$0xff]  ;;  %v2832_v37 = vld [vmem:[%s11048_s7 + $0xa08] sm:$0xff]  ;;  %v2705_v47 = vld [vmem:[%s11048_s7 + $0x610] sm:$0xff] }
 0x1cc   :  { %v7468_v54 = vcombine.high %v2831_v28, %v2847_v36  ;;  %v2502_v41 = vrot.slane %v2493_v30, %v9211_v53  ;;  %v2561_v30 = vld [vmem:[%s11048_s7 + $0x190] sm:$0xff] }
 0x1cd   :  { %v2008_v56 = vmax.f32 %v2004_v55, 0.0  ;;  %v2011_v60 = vpack.c.bf16 %v2007_v50, %v2007_v50  ;;  %v2848_v55 = vld [vmem:[%s11048_s7 + $0xa88] sm:$0xff] }
 0x1ce   :  { %v7469_v57 = vcombine.low %v2832_v37, %v2848_v55  ;;  %v7470_v58 = vcombine.high %v2832_v37, %v2848_v55  ;;  %5609 = vmatprep.subr.bf16.mxu0 %v7468_v54  ;;  %v2673_v37 = vld [vmem:[%s11048_s7 + $0x510] sm:$0xff] }
 0x1cf   :  { %v2012_v29 = vpack.c.bf16 %v2008_v56, %v2008_v56  ;;  %v7467_v56 = vcombine.low %v2831_v28, %v2847_v36 }
 0x1d1   :  { %2470 = vmatprep.mubr.bf16.mxu1 %v2012_v29  ;;  %5610 = vmatpush2.bf16.msra.mxu0 %v7467_v56  ;;  %v2674_v56 = vld [vmem:[%s11048_s7 + $0x518] sm:$0xff] }
 0x1d2   :  { %2471 = vmatmul.mubr.bf16.vlgmr.msra.gmra.mxu1 %v2011_v60  ;;  %v2815_v60 = vld [vmem:[%s11048_s7 + $0x980] sm:$0xff] }
 0x1d3   :  { %5625 = vmatpush1.bf16.msra.mxu1 %v7373_v59  ;;  %v2799_v59 = vld [vmem:[%s11048_s7 + $0x900] sm:$0xff] }
 0x1d4   :  { %5626 = vmatprep.subr.bf16.mxu1 %v7342_v62  ;;  %v7436_v62 = vcombine.high %v2799_v59, %v2815_v60 }
 0x1d6   :  { %5611 = vmatprep.subr.bf16.mxu0 %v7436_v62  ;;  %v2641_v62 = vld [vmem:[%s11048_s7 + $0x410] sm:$0xff] }
 0x1d7   :  { %5627 = vmatpush1.bf16.msra.mxu1 %v7341_v51 }
 0x1d8   :  { %5628 = vmatprep.subr.bf16.mxu1 %v7310_v23  ;;  %v7435_v23 = vcombine.low %v2799_v59, %v2815_v60 }
 0x1da   :  { %5612 = vmatpush2.bf16.msra.mxu0 %v7435_v23 }
 0x1db   :  { %5629 = vmatpush1.bf16.msra.mxu1 %v7309_v0 }
 0x1dc   :  { %5630 = vmatprep.subr.bf16.mxu1 %v7278_v1  ;;  %v2767_v1 = vld [vmem:[%s11048_s7 + $0x800] sm:$0xff] }
 0x1dd   :  { %v7403_v7 = vcombine.low %v2767_v1, %v2783_v2 }
 0x1df   :  { %5631 = vmatpush1.bf16.msra.mxu1 %v7277_v5  ;;  %v7404_v5 = vcombine.high %v2767_v1, %v2783_v2  ;;  %v2609_v1 = vld [vmem:[%s11048_s7 + $0x310] sm:$0xff] }
 0x1e0   :  { %5632 = vmatprep.subr.bf16.mxu1 %v7246_v6  ;;  %v2784_v6 = vld [vmem:[%s11048_s7 + $0x888] sm:$0xff]  ;;  %v2625_v2 = vld [vmem:[%s11048_s7 + $0x390] sm:$0xff] }
 0x1e1   :  { %v7405_v8 = vcombine.low %v2768_v4, %v2784_v6  ;;  %5613 = vmatprep.subr.bf16.mxu0 %v7404_v5  ;;  %v2626_v5 = vld [vmem:[%s11048_s7 + $0x398] sm:$0xff] }
 0x1e2   :  { %5614 = vmatpush2.bf16.msra.mxu0 %v7403_v7 }
 0x1e3   :  { %5633 = vmatpush1.bf16.msra.mxu1 %v7245_v9  ;;  %v7406_v9 = vcombine.high %v2768_v4, %v2784_v6  ;;  %v2610_v4 = vld [vmem:[%s11048_s7 + $0x318] sm:$0xff]  ;;  %v7279_v6 = vcombine.low %v2641_v62, %v2657_v63 }
 0x1e4   :  { %5634 = vmatprep.subr.bf16.mxu1 %v7214_v10  ;;  %v2737_v10 = vld [vmem:[%s11048_s7 + $0x710] sm:$0xff] }
 0x1e5   :  { %v7375_v18 = vcombine.low %v2737_v10, %v2753_v11 }
 0x1e7   :  { %5635 = vmatpush1.bf16.msra.mxu1 %v7213_v13  ;;  %v7376_v13 = vcombine.high %v2737_v10, %v2753_v11  ;;  %v2577_v10 = vld [vmem:[%s11048_s7 + $0x210] sm:$0xff] }
 0x1e8   :  { %5636 = vmatprep.subr.bf16.mxu1 %v7182_v16  ;;  %v2754_v16 = vld [vmem:[%s11048_s7 + $0x798] sm:$0xff]  ;;  %v2593_v11 = vld [vmem:[%s11048_s7 + $0x290] sm:$0xff] }
 0x1e9   :  { %v7377_v19 = vcombine.low %v2738_v12, %v2754_v16  ;;  %5665 = vmatprep.subr.bf16.mxu0 %v7376_v13  ;;  %v2594_v13 = vld [vmem:[%s11048_s7 + $0x298] sm:$0xff] }
 0x1eb   :  { %5637 = vmatpush1.bf16.msra.mxu1 %v7181_v21  ;;  %v7378_v21 = vcombine.high %v2738_v12, %v2754_v16  ;;  %v2578_v12 = vld [vmem:[%s11048_s7 + $0x218] sm:$0xff]  ;;  %v7247_v16 = vcombine.low %v2609_v1, %v2625_v2 }
 0x1ec   :  { %5638 = vmatprep.subr.bf16.mxu1 %v7150_v27  ;;  %v2479_v27 = vld [vmem:[%s11049_s5] sm:$0x3] }
 0x1ed   :  { %v2484_v31 = vrot.slane %v2479_v27, %v9200_v48  ;;  %v2488_v38 = vrot.slane %v2479_v27, %v9211_v53  ;;  %v2545_v27 = vld [vmem:[%s11048_s7 + $0x110] sm:$0xff] }
 0x1ef   :  { %5639 = vmatpush1.bf16.msra.mxu1 %v7149_v32 }
 0x1f0   :  { %5640 = vmatprep.subr.bf16.mxu1 %v7630_v33 }
 0x1f3   :  { %5641 = vmatpush2.bf16.msra.mxu1 %v7629_v39 }
 0x1f4   :  { %5642 = vmatprep.subr.bf16.mxu1 %v7598_v15 }
 0x1f7   :  { %5643 = vmatpush2.bf16.msra.mxu1 %v7597_v42 }
 0x1f8   :  { %5644 = vmatprep.subr.bf16.mxu1 %v7566_v25 }
 0x1fb   :  { %5645 = vmatpush2.bf16.msra.mxu1 %v7565_v44 }
 0x1fc   :  { %5646 = vmatprep.subr.bf16.mxu1 %v7534_v45 }
 0x1ff   :  { %5647 = vmatpush2.bf16.msra.mxu1 %v7533_v61  ;;  %v2721_v61 = vld [vmem:[%s11048_s7 + $0x690] sm:$0xff] }
 0x200   :  { %5648 = vmatprep.subr.bf16.mxu1 %v7502_v3  ;;  %v2706_v3 = vld [vmem:[%s11048_s7 + $0x618] sm:$0xff]  ;;  %v7344_v54 = vcombine.high %v2705_v47, %v2721_v61 }
 0x203   :  { %5649 = vmatpush2.bf16.msra.mxu1 %v7501_v52  ;;  %v2722_v52 = vld [vmem:[%s11048_s7 + $0x698] sm:$0xff] }
 0x204   :  { %5650 = vmatprep.subr.bf16.mxu1 %v7470_v58  ;;  %v7346_v55 = vcombine.high %v2706_v3, %v2722_v52  ;;  %v7343_v58 = vcombine.low %v2705_v47, %v2721_v61  ;;  %v2994_v47 = vld [vmem:[%s11048_s7 + $0xf18] sm:$0xff] }
 0x205   :  { %v3010_v61 = vld [vmem:[%s11048_s7 + $0xf98] sm:$0xff] }
 0x207   :  { %5651 = vmatpush2.bf16.msra.mxu1 %v7469_v57  ;;  %v2690_v57 = vld [vmem:[%s11048_s7 + $0x598] sm:$0xff] }
 0x208   :  { %5652 = vmatprep.subr.bf16.mxu1 %v7438_v14  ;;  %v7314_v60 = vcombine.high %v2674_v56, %v2690_v57  ;;  %v7280_v14 = vcombine.high %v2641_v62, %v2657_v63  ;;  %v2929_v62 = vld [vmem:[%s11048_s7 + $0xd10] sm:$0xff] }
 0x209   :  { %v2945_v63 = vld [vmem:[%s11048_s7 + $0xd90] sm:$0xff] }
 0x20b   :  { %5653 = vmatpush2.bf16.msra.mxu1 %v7437_v35  ;;  %v7313_v35 = vcombine.low %v2674_v56, %v2690_v57  ;;  %v2962_v56 = vld [vmem:[%s11048_s7 + $0xe18] sm:$0xff] }
 0x20c   :  { %5654 = vmatprep.subr.bf16.mxu1 %v7406_v9  ;;  %v7250_v9 = vcombine.high %v2610_v4, %v2626_v5  ;;  %v2978_v57 = vld [vmem:[%s11048_s7 + $0xe98] sm:$0xff] }
 0x20f   :  { %5655 = vmatpush2.bf16.msra.mxu1 %v7405_v8  ;;  %v7248_v8 = vcombine.high %v2609_v1, %v2625_v2  ;;  %v2897_v1 = vld [vmem:[%s11048_s7 + $0xc10] sm:$0xff] }
 0x210   :  { %5706 = vmatprep.subr.bf16.mxu1 %v7378_v21  ;;  %v7218_v21 = vcombine.high %v2578_v12, %v2594_v13  ;;  %v2913_v2 = vld [vmem:[%s11048_s7 + $0xc90] sm:$0xff] }
 0x212   :  { %v2431_v50 = vpop.f32.mrf.mxu0 }
 0x214   :  { %v2433_v29 = vpop.f32.mrf.mxu0 }
 0x216   :  { %v2435_v51 = vpop.f32.mrf.mxu0 }
 0x217   :  { %v2658_v51 = vld [vmem:[%s11048_s7 + $0x498] sm:$0xff] }
 0x218   :  { %v2436_v0 = vpop.f32.mrf.mxu0  ;;  %v7281_v7 = vcombine.low %v2642_v22, %v2658_v51 }
 0x219   :  { %v7282_v0 = vcombine.high %v2642_v22, %v2658_v51  ;;  %v2930_v22 = vld [vmem:[%s11048_s7 + $0xd18] sm:$0xff] }
 0x21a   :  { %v2946_v51 = vld [vmem:[%s11048_s7 + $0xd98] sm:$0xff] }
 0x292   :  { %v2472_v32 = vpop.f32.mrf.mxu1 }
 0x293   :  { %v2473_v33 = vadd.f32 %v2472_v32, %v2431_v50  ;;  %v2689_v50 = vld [vmem:[%s11048_s7 + $0x590] sm:$0xff]  ;;  %v2562_v32 = vld [vmem:[%s11048_s7 + $0x198] sm:$0xff] }
 0x294   :  { %v2474_v39 = vpop.f32.mrf.mxu1  ;;  %v7312_v59 = vcombine.high %v2673_v37, %v2689_v50  ;;  %v7311_v23 = vcombine.low %v2673_v37, %v2689_v50  ;;  %v2977_v50 = vld [vmem:[%s11048_s7 + $0xe90] sm:$0xff] }
 0x295   :  { %v2491_v15 = vmul.f32 %v2484_v31, %v2473_v33  ;;  %v2475_v40 = vadd.f32 %v2474_v39, %v2433_v29  ;;  %v7345_v29 = vcombine.low %v2706_v3, %v2722_v52  ;;  %v2546_v31 = vld [vmem:[%s11048_s7 + $0x118] sm:$0xff]  ;;  %v7215_v33 = vcombine.low %v2577_v10, %v2593_v11 }
 0x296   :  { %v2476_v42 = vpop.f32.mrf.mxu1  ;;  %v7186_v39 = vcombine.high %v2546_v31, %v2562_v32 }
 0x297   :  { %v2505_v25 = vadd.f32 %v2498_v34, %v2491_v15  ;;  %v2492_v24 = vmul.f32 %v2488_v38, %v2475_v40  ;;  %v7217_v34 = vcombine.low %v2578_v12, %v2594_v13  ;;  %v7184_v38 = vcombine.high %v2545_v27, %v2561_v30  ;;  %v2513_v15 = vld [vmem:[%s11048_s7 + $0x10] sm:$0xff]  ;;  %v2530_v42 = vld [vmem:[%s11048_s7 + $0x98] sm:$0xff] }
 0x298   :  { %v2477_v26 = vpop.f32.mrf.mxu1  ;;  %v2529_v40 = vld [vmem:[%s11048_s7 + $0x90] sm:$0xff]  ;;  %v2866_v12 = vld [vmem:[%s11048_s7 + $0xb18] sm:$0xff] }
 0x299   :  { %v2506_v44 = vadd.f32 %v2502_v41, %v2492_v24  ;;  %v2507_v45 = vmax.f32 %v2505_v25, 0.0  ;;  %v2514_v41 = vld [vmem:[%s11048_s7 + $0x18] sm:$0xff]  ;;  %v7183_v25 = vcombine.low %v2545_v27, %v2561_v30  ;;  %v7185_v24 = vcombine.low %v2546_v31, %v2562_v32  ;;  %v2833_v27 = vld [vmem:[%s11048_s7 + $0xa10] sm:$0xff] }
 0x29a   :  { %v7152_v26 = vcombine.high %v2513_v15, %v2529_v40  ;;  %v7151_v3 = vcombine.low %v2513_v15, %v2529_v40  ;;  %v7153_v52 = vcombine.low %v2514_v41, %v2530_v42  ;;  %v2882_v13 = vld [vmem:[%s11048_s7 + $0xb98] sm:$0xff]  ;;  %v2849_v30 = vld [vmem:[%s11048_s7 + $0xa90] sm:$0xff] }
 0x29b   :  { %v2508_v46 = vmax.f32 %v2506_v44, 0.0  ;;  %v9509_v36 = vpack.c.bf16 %v2507_v45, %v2507_v45  ;;  %v7154_v44 = vcombine.high %v2514_v41, %v2530_v42  ;;  %v2993_v45 = vld [vmem:[%s11048_s7 + $0xf10] sm:$0xff]  ;;  %v2834_v31 = vld [vmem:[%s11048_s7 + $0xa18] sm:$0xff] }
 0x29c   :  { %v2850_v32 = vld [vmem:[%s11048_s7 + $0xa98] sm:$0xff]  ;;  %v2801_v15 = vld [vmem:[%s11048_s7 + $0x910] sm:$0xff] }
 0x29d   :  { %v9507_v28 = vpack.c.bf16 %v2508_v46, %v2508_v46  ;;  %v3009_v46 = vld [vmem:[%s11048_s7 + $0xf90] sm:$0xff]  ;;  %v2802_v41 = vld [vmem:[%s11048_s7 + $0x918] sm:$0xff] }
 0x29e   :  { %v7632_v37 = vcombine.high %v2993_v45, %v3009_v46  ;;  %v2817_v40 = vld [vmem:[%s11048_s7 + $0x990] sm:$0xff]  ;;  %v2818_v42 = vld [vmem:[%s11048_s7 + $0x998] sm:$0xff] }
 0x29f   :  { %5615 = vmatprep.mubr.bf16.mxu0 %v9507_v28  ;;  %5656 = vmatprep.mubr.bf16.mxu1 %v9507_v28 }
 0x2a0   :  { %5616 = vmatmul.mubr.bf16.vlgmr.msra.gmra.mxu0 %v9509_v36  ;;  %5657 = vmatmul.mubr.bf16.vlgmr.msra.gmra.mxu1 %v9509_v36 }
 0x2a1   :  { %5666 = vmatpush1.bf16.msra.mxu0 %v7375_v18  ;;  %5707 = vmatpush1.bf16.msra.mxu1 %v7377_v19  ;;  %v7249_v18 = vcombine.low %v2610_v4, %v2626_v5  ;;  %v7216_v19 = vcombine.high %v2577_v10, %v2593_v11  ;;  %v2898_v4 = vld [vmem:[%s11048_s7 + $0xc18] sm:$0xff]  ;;  %v2865_v10 = vld [vmem:[%s11048_s7 + $0xb10] sm:$0xff] }
 0x2a2   :  { %5697 = vmatprep.mubr.bf16.mxu0 %v9507_v28  ;;  %5738 = vmatprep.mubr.bf16.mxu1 %v9507_v28  ;;  %v2914_v5 = vld [vmem:[%s11048_s7 + $0xc98] sm:$0xff]  ;;  %v2881_v11 = vld [vmem:[%s11048_s7 + $0xb90] sm:$0xff] }
 0x2a3   :  { %5667 = vmatprep.subr.bf16.mxu0 %v7344_v54  ;;  %5708 = vmatprep.subr.bf16.mxu1 %v7346_v55  ;;  %v7634_v54 = vcombine.high %v2994_v47, %v3010_v61  ;;  %v2961_v55 = vld [vmem:[%s11048_s7 + $0xe10] sm:$0xff] }
 0x2a5   :  { %5668 = vmatpush1.bf16.msra.mxu0 %v7343_v58  ;;  %5709 = vmatpush1.bf16.msra.mxu1 %v7345_v29  ;;  %v7631_v58 = vcombine.low %v2993_v45, %v3009_v46  ;;  %v7633_v29 = vcombine.low %v2994_v47, %v3010_v61  ;;  %v2769_v45 = vld [vmem:[%s11048_s7 + $0x810] sm:$0xff]  ;;  %v2770_v47 = vld [vmem:[%s11048_s7 + $0x818] sm:$0xff] }
 0x2a6   :  { %5669 = vmatprep.subr.bf16.mxu0 %v7312_v59  ;;  %5710 = vmatprep.subr.bf16.mxu1 %v7314_v60  ;;  %v7600_v59 = vcombine.high %v2961_v55, %v2977_v50  ;;  %v7602_v60 = vcombine.high %v2962_v56, %v2978_v57  ;;  %v2785_v46 = vld [vmem:[%s11048_s7 + $0x890] sm:$0xff]  ;;  %v2786_v61 = vld [vmem:[%s11048_s7 + $0x898] sm:$0xff] }
 0x2a9   :  { %5670 = vmatpush1.bf16.msra.mxu0 %v7311_v23  ;;  %5711 = vmatpush1.bf16.msra.mxu1 %v7313_v35  ;;  %v7599_v23 = vcombine.low %v2961_v55, %v2977_v50  ;;  %v7601_v35 = vcombine.low %v2962_v56, %v2978_v57  ;;  %v2739_v55 = vld [vmem:[%s11048_s7 + $0x720] sm:$0xff]  ;;  %v2740_v56 = vld [vmem:[%s11048_s7 + $0x728] sm:$0xff] }
 0x2aa   :  { %5671 = vmatprep.subr.bf16.mxu0 %v7280_v14  ;;  %5712 = vmatprep.subr.bf16.mxu1 %v7282_v0  ;;  %v7568_v14 = vcombine.high %v2929_v62, %v2945_v63  ;;  %v7570_v0 = vcombine.high %v2930_v22, %v2946_v51  ;;  %v2755_v50 = vld [vmem:[%s11048_s7 + $0x7a0] sm:$0xff]  ;;  %v2756_v57 = vld [vmem:[%s11048_s7 + $0x7a8] sm:$0xff] }
 0x2ad   :  { %5672 = vmatpush1.bf16.msra.mxu0 %v7279_v6  ;;  %5713 = vmatpush1.bf16.msra.mxu1 %v7281_v7  ;;  %v7567_v6 = vcombine.low %v2929_v62, %v2945_v63  ;;  %v7569_v7 = vcombine.low %v2930_v22, %v2946_v51  ;;  %v2707_v62 = vld [vmem:[%s11048_s7 + $0x620] sm:$0xff]  ;;  %v2708_v22 = vld [vmem:[%s11048_s7 + $0x628] sm:$0xff] }
 0x2ae   :  { %5673 = vmatprep.subr.bf16.mxu0 %v7248_v8  ;;  %5714 = vmatprep.subr.bf16.mxu1 %v7250_v9  ;;  %v7536_v8 = vcombine.high %v2897_v1, %v2913_v2  ;;  %v7538_v9 = vcombine.high %v2898_v4, %v2914_v5  ;;  %v2723_v63 = vld [vmem:[%s11048_s7 + $0x6a0] sm:$0xff]  ;;  %v2724_v51 = vld [vmem:[%s11048_s7 + $0x6a8] sm:$0xff] }
 0x2b1   :  { %5674 = vmatpush1.bf16.msra.mxu0 %v7247_v16  ;;  %5715 = vmatpush1.bf16.msra.mxu1 %v7249_v18  ;;  %v7535_v16 = vcombine.low %v2897_v1, %v2913_v2  ;;  %v7537_v18 = vcombine.low %v2898_v4, %v2914_v5  ;;  %v2675_v1 = vld [vmem:[%s11048_s7 + $0x520] sm:$0xff]  ;;  %v2676_v4 = vld [vmem:[%s11048_s7 + $0x528] sm:$0xff] }
 0x2b2   :  { %5675 = vmatprep.subr.bf16.mxu0 %v7216_v19  ;;  %5716 = vmatprep.subr.bf16.mxu1 %v7218_v21  ;;  %v7504_v19 = vcombine.high %v2865_v10, %v2881_v11  ;;  %v7506_v21 = vcombine.high %v2866_v12, %v2882_v13  ;;  %v2691_v2 = vld [vmem:[%s11048_s7 + $0x5a0] sm:$0xff]  ;;  %v2692_v5 = vld [vmem:[%s11048_s7 + $0x5a8] sm:$0xff] }
 0x2b5   :  { %5676 = vmatpush1.bf16.msra.mxu0 %v7215_v33  ;;  %5717 = vmatpush1.bf16.msra.mxu1 %v7217_v34  ;;  %v7503_v33 = vcombine.low %v2865_v10, %v2881_v11  ;;  %v7505_v34 = vcombine.low %v2866_v12, %v2882_v13  ;;  %v2643_v10 = vld [vmem:[%s11048_s7 + $0x420] sm:$0xff]  ;;  %v2644_v12 = vld [vmem:[%s11048_s7 + $0x428] sm:$0xff] }
 0x2b6   :  { %5677 = vmatprep.subr.bf16.mxu0 %v7184_v38  ;;  %5718 = vmatprep.subr.bf16.mxu1 %v7186_v39  ;;  %v7472_v38 = vcombine.high %v2833_v27, %v2849_v30  ;;  %v7474_v39 = vcombine.high %v2834_v31, %v2850_v32  ;;  %v2659_v11 = vld [vmem:[%s11048_s7 + $0x4a0] sm:$0xff]  ;;  %v2660_v13 = vld [vmem:[%s11048_s7 + $0x4a8] sm:$0xff] }
 0x2b9   :  { %5678 = vmatpush1.bf16.msra.mxu0 %v7183_v25  ;;  %5719 = vmatpush1.bf16.msra.mxu1 %v7185_v24  ;;  %v7471_v25 = vcombine.low %v2833_v27, %v2849_v30  ;;  %v7473_v24 = vcombine.low %v2834_v31, %v2850_v32  ;;  %v2611_v27 = vld [vmem:[%s11048_s7 + $0x320] sm:$0xff]  ;;  %v2612_v31 = vld [vmem:[%s11048_s7 + $0x328] sm:$0xff] }
 0x2ba   :  { %5679 = vmatprep.subr.bf16.mxu0 %v7152_v26  ;;  %5720 = vmatprep.subr.bf16.mxu1 %v7154_v44  ;;  %v7440_v26 = vcombine.high %v2801_v15, %v2817_v40  ;;  %v7442_v44 = vcombine.high %v2802_v41, %v2818_v42  ;;  %v2627_v30 = vld [vmem:[%s11048_s7 + $0x3a0] sm:$0xff]  ;;  %v2628_v32 = vld [vmem:[%s11048_s7 + $0x3a8] sm:$0xff] }
 0x2bd   :  { %5680 = vmatpush1.bf16.msra.mxu0 %v7151_v3  ;;  %5721 = vmatpush1.bf16.msra.mxu1 %v7153_v52  ;;  %v7439_v3 = vcombine.low %v2801_v15, %v2817_v40  ;;  %v7441_v52 = vcombine.low %v2802_v41, %v2818_v42  ;;  %v2579_v15 = vld [vmem:[%s11048_s7 + $0x220] sm:$0xff]  ;;  %v2580_v41 = vld [vmem:[%s11048_s7 + $0x228] sm:$0xff] }
 0x2be   :  { %5681 = vmatprep.subr.bf16.mxu0 %v7632_v37  ;;  %5722 = vmatprep.subr.bf16.mxu1 %v7634_v54  ;;  %v7408_v37 = vcombine.high %v2769_v45, %v2785_v46  ;;  %v7410_v54 = vcombine.high %v2770_v47, %v2786_v61  ;;  %v2595_v40 = vld [vmem:[%s11048_s7 + $0x2a0] sm:$0xff]  ;;  %v2596_v42 = vld [vmem:[%s11048_s7 + $0x2a8] sm:$0xff] }
 0x2c1   :  { %5682 = vmatpush2.bf16.msra.mxu0 %v7631_v58  ;;  %5723 = vmatpush2.bf16.msra.mxu1 %v7633_v29  ;;  %v7407_v58 = vcombine.low %v2769_v45, %v2785_v46  ;;  %v7409_v29 = vcombine.low %v2770_v47, %v2786_v61  ;;  %v2547_v45 = vld [vmem:[%s11048_s7 + $0x120] sm:$0xff]  ;;  %v2548_v47 = vld [vmem:[%s11048_s7 + $0x128] sm:$0xff] }
 0x2c2   :  { %5683 = vmatprep.subr.bf16.mxu0 %v7600_v59  ;;  %5724 = vmatprep.subr.bf16.mxu1 %v7602_v60  ;;  %v7380_v59 = vcombine.high %v2739_v55, %v2755_v50  ;;  %v7382_v60 = vcombine.high %v2740_v56, %v2756_v57  ;;  %v2563_v46 = vld [vmem:[%s11048_s7 + $0x1a0] sm:$0xff]  ;;  %v2564_v61 = vld [vmem:[%s11048_s7 + $0x1a8] sm:$0xff] }
 0x2c5   :  { %5684 = vmatpush2.bf16.msra.mxu0 %v7599_v23  ;;  %5725 = vmatpush2.bf16.msra.mxu1 %v7601_v35  ;;  %v7379_v23 = vcombine.low %v2739_v55, %v2755_v50  ;;  %v7381_v35 = vcombine.low %v2740_v56, %v2756_v57  ;;  %v2515_v55 = vld [vmem:[%s11048_s7 + $0x20] sm:$0xff]  ;;  %v2516_v56 = vld [vmem:[%s11048_s7 + $0x28] sm:$0xff] }
 0x2c6   :  { %5685 = vmatprep.subr.bf16.mxu0 %v7568_v14  ;;  %5726 = vmatprep.subr.bf16.mxu1 %v7570_v0  ;;  %v7348_v14 = vcombine.high %v2707_v62, %v2723_v63  ;;  %v7350_v0 = vcombine.high %v2708_v22, %v2724_v51  ;;  %v2531_v50 = vld [vmem:[%s11048_s7 + $0xa0] sm:$0xff]  ;;  %v2532_v57 = vld [vmem:[%s11048_s7 + $0xa8] sm:$0xff] }
 0x2c9   :  { %5686 = vmatpush2.bf16.msra.mxu0 %v7567_v6  ;;  %5727 = vmatpush2.bf16.msra.mxu1 %v7569_v7  ;;  %v7347_v6 = vcombine.low %v2707_v62, %v2723_v63  ;;  %v7349_v7 = vcombine.low %v2708_v22, %v2724_v51  ;;  %v2995_v62 = vld [vmem:[%s11048_s7 + $0xf20] sm:$0xff]  ;;  %v2996_v22 = vld [vmem:[%s11048_s7 + $0xf28] sm:$0xff] }
 0x2ca   :  { %5687 = vmatprep.subr.bf16.mxu0 %v7536_v8  ;;  %5728 = vmatprep.subr.bf16.mxu1 %v7538_v9  ;;  %v7316_v8 = vcombine.high %v2675_v1, %v2691_v2  ;;  %v7318_v9 = vcombine.high %v2676_v4, %v2692_v5  ;;  %v3011_v63 = vld [vmem:[%s11048_s7 + $0xfa0] sm:$0xff]  ;;  %v3012_v51 = vld [vmem:[%s11048_s7 + $0xfa8] sm:$0xff] }
 0x2cd   :  { %5688 = vmatpush2.bf16.msra.mxu0 %v7535_v16  ;;  %5729 = vmatpush2.bf16.msra.mxu1 %v7537_v18  ;;  %v7315_v16 = vcombine.low %v2675_v1, %v2691_v2  ;;  %v7317_v18 = vcombine.low %v2676_v4, %v2692_v5  ;;  %v2963_v1 = vld [vmem:[%s11048_s7 + $0xe20] sm:$0xff]  ;;  %v2964_v4 = vld [vmem:[%s11048_s7 + $0xe28] sm:$0xff] }
 0x2ce   :  { %5689 = vmatprep.subr.bf16.mxu0 %v7504_v19  ;;  %5730 = vmatprep.subr.bf16.mxu1 %v7506_v21  ;;  %v7284_v19 = vcombine.high %v2643_v10, %v2659_v11  ;;  %v7286_v21 = vcombine.high %v2644_v12, %v2660_v13  ;;  %v2979_v2 = vld [vmem:[%s11048_s7 + $0xea0] sm:$0xff]  ;;  %v2980_v5 = vld [vmem:[%s11048_s7 + $0xea8] sm:$0xff] }
 0x2d1   :  { %5690 = vmatpush2.bf16.msra.mxu0 %v7503_v33  ;;  %5731 = vmatpush2.bf16.msra.mxu1 %v7505_v34  ;;  %v7283_v33 = vcombine.low %v2643_v10, %v2659_v11  ;;  %v7285_v34 = vcombine.low %v2644_v12, %v2660_v13  ;;  %v2931_v10 = vld [vmem:[%s11048_s7 + $0xd20] sm:$0xff]  ;;  %v2932_v12 = vld [vmem:[%s11048_s7 + $0xd28] sm:$0xff] }
 0x2d2   :  { %5691 = vmatprep.subr.bf16.mxu0 %v7472_v38  ;;  %5732 = vmatprep.subr.bf16.mxu1 %v7474_v39  ;;  %v7252_v38 = vcombine.high %v2611_v27, %v2627_v30  ;;  %v7254_v39 = vcombine.high %v2612_v31, %v2628_v32  ;;  %v2947_v11 = vld [vmem:[%s11048_s7 + $0xda0] sm:$0xff]  ;;  %v2948_v13 = vld [vmem:[%s11048_s7 + $0xda8] sm:$0xff] }
 0x2d5   :  { %5692 = vmatpush2.bf16.msra.mxu0 %v7471_v25  ;;  %5733 = vmatpush2.bf16.msra.mxu1 %v7473_v24  ;;  %v7251_v25 = vcombine.low %v2611_v27, %v2627_v30  ;;  %v7253_v24 = vcombine.low %v2612_v31, %v2628_v32  ;;  %v2899_v27 = vld [vmem:[%s11048_s7 + $0xc20] sm:$0xff]  ;;  %v2900_v31 = vld [vmem:[%s11048_s7 + $0xc28] sm:$0xff] }
 0x2d6   :  { %5693 = vmatprep.subr.bf16.mxu0 %v7440_v26  ;;  %5734 = vmatprep.subr.bf16.mxu1 %v7442_v44  ;;  %v7220_v26 = vcombine.high %v2579_v15, %v2595_v40  ;;  %v7222_v44 = vcombine.high %v2580_v41, %v2596_v42  ;;  %v2915_v30 = vld [vmem:[%s11048_s7 + $0xca0] sm:$0xff]  ;;  %v2916_v32 = vld [vmem:[%s11048_s7 + $0xca8] sm:$0xff] }
 0x2d9   :  { %5694 = vmatpush2.bf16.msra.mxu0 %v7439_v3  ;;  %5735 = vmatpush2.bf16.msra.mxu1 %v7441_v52  ;;  %v7219_v3 = vcombine.low %v2579_v15, %v2595_v40  ;;  %v7221_v52 = vcombine.low %v2580_v41, %v2596_v42  ;;  %v2867_v15 = vld [vmem:[%s11048_s7 + $0xb20] sm:$0xff]  ;;  %v2868_v41 = vld [vmem:[%s11048_s7 + $0xb28] sm:$0xff] }
 0x2da   :  { %5695 = vmatprep.subr.bf16.mxu0 %v7408_v37  ;;  %5736 = vmatprep.subr.bf16.mxu1 %v7410_v54  ;;  %v7188_v37 = vcombine.high %v2547_v45, %v2563_v46  ;;  %v7190_v54 = vcombine.high %v2548_v47, %v2564_v61  ;;  %v2883_v40 = vld [vmem:[%s11048_s7 + $0xba0] sm:$0xff]  ;;  %v2884_v42 = vld [vmem:[%s11048_s7 + $0xba8] sm:$0xff] }
 0x2dd   :  { %5696 = vmatpush2.bf16.msra.mxu0 %v7407_v58  ;;  %5737 = vmatpush2.bf16.msra.mxu1 %v7409_v29  ;;  %v7187_v58 = vcombine.low %v2547_v45, %v2563_v46  ;;  %v7189_v29 = vcombine.low %v2548_v47, %v2564_v61  ;;  %v2835_v45 = vld [vmem:[%s11048_s7 + $0xa20] sm:$0xff]  ;;  %v2836_v47 = vld [vmem:[%s11048_s7 + $0xa28] sm:$0xff] }
 0x2de   :  { %5747 = vmatprep.subr.bf16.mxu0 %v7380_v59  ;;  %5788 = vmatprep.subr.bf16.mxu1 %v7382_v60  ;;  %v7156_v59 = vcombine.high %v2515_v55, %v2531_v50  ;;  %v7158_v60 = vcombine.high %v2516_v56, %v2532_v57  ;;  %v2851_v46 = vld [vmem:[%s11048_s7 + $0xaa0] sm:$0xff]  ;;  %v2852_v61 = vld [vmem:[%s11048_s7 + $0xaa8] sm:$0xff] }
 0x2e0   :  { %5698 = vmatmul.mubr.bf16.vlgmr.msra.gmra.mxu0 %v9509_v36  ;;  %5739 = vmatmul.mubr.bf16.vlgmr.msra.gmra.mxu1 %v9509_v36 }
 0x2e1   :  { %5748 = vmatpush1.bf16.msra.mxu0 %v7379_v23  ;;  %5779 = vmatprep.mubr.bf16.mxu0 %v9507_v28  ;;  %v7155_v23 = vcombine.low %v2515_v55, %v2531_v50  ;;  %v2803_v55 = vld [vmem:[%s11048_s7 + $0x920] sm:$0xff] }
 0x2e2   :  { %5789 = vmatpush1.bf16.msra.mxu1 %v7381_v35  ;;  %5820 = vmatprep.mubr.bf16.mxu1 %v9507_v28  ;;  %v7157_v35 = vcombine.low %v2516_v56, %v2532_v57  ;;  %v2819_v50 = vld [vmem:[%s11048_s7 + $0x9a0] sm:$0xff]  ;;  %v2804_v56 = vld [vmem:[%s11048_s7 + $0x928] sm:$0xff] }
 0x2e3   :  { %5749 = vmatprep.subr.bf16.mxu0 %v7348_v14  ;;  %5790 = vmatprep.subr.bf16.mxu1 %v7350_v0  ;;  %v7636_v14 = vcombine.high %v2995_v62, %v3011_v63  ;;  %v7638_v0 = vcombine.high %v2996_v22, %v3012_v51  ;;  %v2820_v57 = vld [vmem:[%s11048_s7 + $0x9a8] sm:$0xff] }
 0x2e5   :  { %5750 = vmatpush1.bf16.msra.mxu0 %v7347_v6  ;;  %v7635_v6 = vcombine.low %v2995_v62, %v3011_v63  ;;  %v2771_v62 = vld [vmem:[%s11048_s7 + $0x820] sm:$0xff] }
 0x2e6   :  { %5791 = vmatpush1.bf16.msra.mxu1 %v7349_v7  ;;  %5751 = vmatprep.subr.bf16.mxu0 %v7316_v8  ;;  %v7637_v7 = vcombine.low %v2996_v22, %v3012_v51  ;;  %v7604_v8 = vcombine.high %v2963_v1, %v2979_v2  ;;  %v2787_v63 = vld [vmem:[%s11048_s7 + $0x8a0] sm:$0xff]  ;;  %v2772_v22 = vld [vmem:[%s11048_s7 + $0x828] sm:$0xff] }
 0x2e7   :  { %5792 = vmatprep.subr.bf16.mxu1 %v7318_v9  ;;  %v7606_v9 = vcombine.high %v2964_v4, %v2980_v5  ;;  %v2788_v51 = vld [vmem:[%s11048_s7 + $0x8a8] sm:$0xff] }
 0x2e9   :  { %5752 = vmatpush1.bf16.msra.mxu0 %v7315_v16  ;;  %v7603_v16 = vcombine.low %v2963_v1, %v2979_v2  ;;  %v2741_v1 = vld [vmem:[%s11048_s7 + $0x730] sm:$0xff] }
 0x2ea   :  { %5793 = vmatpush1.bf16.msra.mxu1 %v7317_v18  ;;  %5753 = vmatprep.subr.bf16.mxu0 %v7284_v19  ;;  %v7605_v18 = vcombine.low %v2964_v4, %v2980_v5  ;;  %v7572_v19 = vcombine.high %v2931_v10, %v2947_v11  ;;  %v2757_v2 = vld [vmem:[%s11048_s7 + $0x7b0] sm:$0xff]  ;;  %v2742_v4 = vld [vmem:[%s11048_s7 + $0x738] sm:$0xff] }
 0x2eb   :  { %5794 = vmatprep.subr.bf16.mxu1 %v7286_v21  ;;  %v7574_v21 = vcombine.high %v2932_v12, %v2948_v13  ;;  %v2758_v5 = vld [vmem:[%s11048_s7 + $0x7b8] sm:$0xff] }
 0x2ed   :  { %5754 = vmatpush1.bf16.msra.mxu0 %v7283_v33  ;;  %v7571_v33 = vcombine.low %v2931_v10, %v2947_v11  ;;  %v2709_v10 = vld [vmem:[%s11048_s7 + $0x630] sm:$0xff] }
 0x2ee   :  { %5795 = vmatpush1.bf16.msra.mxu1 %v7285_v34  ;;  %5755 = vmatprep.subr.bf16.mxu0 %v7252_v38  ;;  %v7573_v34 = vcombine.low %v2932_v12, %v2948_v13  ;;  %v7540_v38 = vcombine.high %v2899_v27, %v2915_v30  ;;  %v2725_v11 = vld [vmem:[%s11048_s7 + $0x6b0] sm:$0xff]  ;;  %v7383_v12 = vcombine.low %v2741_v1, %v2757_v2  ;;  %v2710_v13 = vld [vmem:[%s11048_s7 + $0x638] sm:$0xff] }
 0x2ef   :  { %5796 = vmatprep.subr.bf16.mxu1 %v7254_v39  ;;  %v7542_v39 = vcombine.high %v2900_v31, %v2916_v32 }
 0x2f1   :  { %5756 = vmatpush1.bf16.msra.mxu0 %v7251_v25  ;;  %v7539_v25 = vcombine.low %v2899_v27, %v2915_v30  ;;  %v2693_v27 = vld [vmem:[%s11048_s7 + $0x5b0] sm:$0xff] }
 0x2f2   :  { %5797 = vmatpush1.bf16.msra.mxu1 %v7253_v24  ;;  %5757 = vmatprep.subr.bf16.mxu0 %v7220_v26  ;;  %v7541_v24 = vcombine.low %v2900_v31, %v2916_v32  ;;  %v7508_v26 = vcombine.high %v2867_v15, %v2883_v40  ;;  %v2678_v31 = vld [vmem:[%s11048_s7 + $0x538] sm:$0xff] }
 0x2f3   :  { %5798 = vmatprep.subr.bf16.mxu1 %v7222_v44  ;;  %v7510_v44 = vcombine.high %v2868_v41, %v2884_v42  ;;  %v2694_v32 = vld [vmem:[%s11048_s7 + $0x5b8] sm:$0xff] }
 0x2f5   :  { %5758 = vmatpush1.bf16.msra.mxu0 %v7219_v3  ;;  %v7507_v3 = vcombine.low %v2867_v15, %v2883_v40  ;;  %v2645_v15 = vld [vmem:[%s11048_s7 + $0x430] sm:$0xff] }
 0x2f6   :  { %5799 = vmatpush1.bf16.msra.mxu1 %v7221_v52  ;;  %5759 = vmatprep.subr.bf16.mxu0 %v7188_v37  ;;  %v7509_v52 = vcombine.low %v2868_v41, %v2884_v42  ;;  %v7476_v37 = vcombine.high %v2835_v45, %v2851_v46  ;;  %v2661_v40 = vld [vmem:[%s11048_s7 + $0x4b0] sm:$0xff]  ;;  %v2646_v41 = vld [vmem:[%s11048_s7 + $0x438] sm:$0xff] }
 0x2f7   :  { %5800 = vmatprep.subr.bf16.mxu1 %v7190_v54  ;;  %v7478_v54 = vcombine.high %v2836_v47, %v2852_v61  ;;  %v2662_v42 = vld [vmem:[%s11048_s7 + $0x4b8] sm:$0xff] }
 0x2f9   :  { %5760 = vmatpush1.bf16.msra.mxu0 %v7187_v58  ;;  %v7475_v58 = vcombine.low %v2835_v45, %v2851_v46  ;;  %v2613_v45 = vld [vmem:[%s11048_s7 + $0x330] sm:$0xff] }
 0x2fa   :  { %5801 = vmatpush1.bf16.msra.mxu1 %v7189_v29  ;;  %5761 = vmatprep.subr.bf16.mxu0 %v7156_v59  ;;  %v7477_v29 = vcombine.low %v2836_v47, %v2852_v61  ;;  %v7444_v59 = vcombine.high %v2803_v55, %v2819_v50  ;;  %v2629_v46 = vld [vmem:[%s11048_s7 + $0x3b0] sm:$0xff]  ;;  %v2614_v47 = vld [vmem:[%s11048_s7 + $0x338] sm:$0xff] }
 0x2fb   :  { %5802 = vmatprep.subr.bf16.mxu1 %v7158_v60  ;;  %v7446_v60 = vcombine.high %v2804_v56, %v2820_v57  ;;  %v2630_v61 = vld [vmem:[%s11048_s7 + $0x3b8] sm:$0xff] }
 0x2fd   :  { %5762 = vmatpush1.bf16.msra.mxu0 %v7155_v23  ;;  %v7443_v23 = vcombine.low %v2803_v55, %v2819_v50  ;;  %v2581_v55 = vld [vmem:[%s11048_s7 + $0x230] sm:$0xff] }
 0x2fe   :  { %5803 = vmatpush1.bf16.msra.mxu1 %v7157_v35  ;;  %5763 = vmatprep.subr.bf16.mxu0 %v7636_v14  ;;  %v7445_v35 = vcombine.low %v2804_v56, %v2820_v57  ;;  %v7412_v14 = vcombine.high %v2771_v62, %v2787_v63  ;;  %v2597_v50 = vld [vmem:[%s11048_s7 + $0x2b0] sm:$0xff]  ;;  %v2582_v56 = vld [vmem:[%s11048_s7 + $0x238] sm:$0xff] }
 0x2ff   :  { %5804 = vmatprep.subr.bf16.mxu1 %v7638_v0  ;;  %v7414_v0 = vcombine.high %v2772_v22, %v2788_v51  ;;  %v2598_v57 = vld [vmem:[%s11048_s7 + $0x2b8] sm:$0xff] }
 0x301   :  { %5764 = vmatpush2.bf16.msra.mxu0 %v7635_v6  ;;  %v7411_v6 = vcombine.low %v2771_v62, %v2787_v63  ;;  %v2549_v62 = vld [vmem:[%s11048_s7 + $0x130] sm:$0xff] }
 0x302   :  { %5805 = vmatpush2.bf16.msra.mxu1 %v7637_v7  ;;  %5765 = vmatprep.subr.bf16.mxu0 %v7604_v8  ;;  %v7413_v7 = vcombine.low %v2772_v22, %v2788_v51  ;;  %v7384_v8 = vcombine.high %v2741_v1, %v2757_v2  ;;  %v2565_v63 = vld [vmem:[%s11048_s7 + $0x1b0] sm:$0xff]  ;;  %v2550_v22 = vld [vmem:[%s11048_s7 + $0x138] sm:$0xff] }
 0x303   :  { %5806 = vmatprep.subr.bf16.mxu1 %v7606_v9  ;;  %v7386_v9 = vcombine.high %v2742_v4, %v2758_v5  ;;  %v2566_v51 = vld [vmem:[%s11048_s7 + $0x1b8] sm:$0xff]  ;;  %v2517_v1 = vld [vmem:[%s11048_s7 + $0x30] sm:$0xff] }
 0x304   :  { %v2533_v2 = vld [vmem:[%s11048_s7 + $0xb0] sm:$0xff] }
 0x305   :  { %5766 = vmatpush2.bf16.msra.mxu0 %v7603_v16  ;;  %v2726_v16 = vld [vmem:[%s11048_s7 + $0x6b8] sm:$0xff] }
 0x306   :  { %5807 = vmatpush2.bf16.msra.mxu1 %v7605_v18  ;;  %5767 = vmatprep.subr.bf16.mxu0 %v7572_v19  ;;  %v7385_v18 = vcombine.low %v2742_v4, %v2758_v5  ;;  %v7352_v19 = vcombine.high %v2709_v10, %v2725_v11  ;;  %v7354_v30 = vcombine.high %v2710_v13, %v2726_v16  ;;  %v2518_v4 = vld [vmem:[%s11048_s7 + $0x38] sm:$0xff] }
 0x307   :  { %5808 = vmatprep.subr.bf16.mxu1 %v7574_v21  ;;  %v2677_v21 = vld [vmem:[%s11048_s7 + $0x530] sm:$0xff]  ;;  %v2534_v5 = vld [vmem:[%s11048_s7 + $0xb8] sm:$0xff] }
 0x309   :  { %5768 = vmatpush2.bf16.msra.mxu0 %v7571_v33  ;;  %v7351_v33 = vcombine.low %v2709_v10, %v2725_v11  ;;  %v2997_v10 = vld [vmem:[%s11048_s7 + $0xf30] sm:$0xff] }
 0x30a   :  { %5809 = vmatpush2.bf16.msra.mxu1 %v7573_v34  ;;  %5769 = vmatprep.subr.bf16.mxu0 %v7540_v38  ;;  %v7353_v34 = vcombine.low %v2710_v13, %v2726_v16  ;;  %v7320_v38 = vcombine.high %v2677_v21, %v2693_v27  ;;  %v3013_v11 = vld [vmem:[%s11048_s7 + $0xfb0] sm:$0xff]  ;;  %v3014_v13 = vld [vmem:[%s11048_s7 + $0xfb8] sm:$0xff]  ;;  %v7159_v16 = vcombine.low %v2517_v1, %v2533_v2 }
 0x30b   :  { %5810 = vmatprep.subr.bf16.mxu1 %v7542_v39  ;;  %v7322_v39 = vcombine.high %v2678_v31, %v2694_v32 }
 0x30d   :  { %5770 = vmatpush2.bf16.msra.mxu0 %v7539_v25  ;;  %v7319_v25 = vcombine.low %v2677_v21, %v2693_v27  ;;  %v2965_v27 = vld [vmem:[%s11048_s7 + $0xe30] sm:$0xff] }
 0x30e   :  { %5811 = vmatpush2.bf16.msra.mxu1 %v7541_v24  ;;  %5771 = vmatprep.subr.bf16.mxu0 %v7508_v26  ;;  %v7321_v24 = vcombine.low %v2678_v31, %v2694_v32  ;;  %v7288_v26 = vcombine.high %v2645_v15, %v2661_v40  ;;  %v2966_v31 = vld [vmem:[%s11048_s7 + $0xe38] sm:$0xff] }
 0x30f   :  { %5812 = vmatprep.subr.bf16.mxu1 %v7510_v44  ;;  %v7290_v44 = vcombine.high %v2646_v41, %v2662_v42  ;;  %v2982_v32 = vld [vmem:[%s11048_s7 + $0xeb8] sm:$0xff] }
 0x311   :  { %5772 = vmatpush2.bf16.msra.mxu0 %v7507_v3  ;;  %v7287_v3 = vcombine.low %v2645_v15, %v2661_v40  ;;  %v2933_v15 = vld [vmem:[%s11048_s7 + $0xd30] sm:$0xff] }
 0x312   :  { %5813 = vmatpush2.bf16.msra.mxu1 %v7509_v52  ;;  %5773 = vmatprep.subr.bf16.mxu0 %v7476_v37  ;;  %v7289_v52 = vcombine.low %v2646_v41, %v2662_v42  ;;  %v7256_v37 = vcombine.high %v2613_v45, %v2629_v46  ;;  %v2949_v40 = vld [vmem:[%s11048_s7 + $0xdb0] sm:$0xff]  ;;  %v2934_v41 = vld [vmem:[%s11048_s7 + $0xd38] sm:$0xff] }
 0x313   :  { %5814 = vmatprep.subr.bf16.mxu1 %v7478_v54  ;;  %v7258_v54 = vcombine.high %v2614_v47, %v2630_v61  ;;  %v2950_v42 = vld [vmem:[%s11048_s7 + $0xdb8] sm:$0xff] }
 0x315   :  { %5774 = vmatpush2.bf16.msra.mxu0 %v7475_v58  ;;  %v7255_v58 = vcombine.low %v2613_v45, %v2629_v46  ;;  %v2901_v45 = vld [vmem:[%s11048_s7 + $0xc30] sm:$0xff] }
 0x316   :  { %5815 = vmatpush2.bf16.msra.mxu1 %v7477_v29  ;;  %5775 = vmatprep.subr.bf16.mxu0 %v7444_v59  ;;  %v7257_v29 = vcombine.low %v2614_v47, %v2630_v61  ;;  %v7224_v59 = vcombine.high %v2581_v55, %v2597_v50  ;;  %v2917_v46 = vld [vmem:[%s11048_s7 + $0xcb0] sm:$0xff]  ;;  %v2902_v47 = vld [vmem:[%s11048_s7 + $0xc38] sm:$0xff] }
 0x317   :  { %5816 = vmatprep.subr.bf16.mxu1 %v7446_v60  ;;  %v7226_v60 = vcombine.high %v2582_v56, %v2598_v57  ;;  %v2918_v61 = vld [vmem:[%s11048_s7 + $0xcb8] sm:$0xff] }
 0x319   :  { %5776 = vmatpush2.bf16.msra.mxu0 %v7443_v23  ;;  %v7223_v23 = vcombine.low %v2581_v55, %v2597_v50  ;;  %v2869_v55 = vld [vmem:[%s11048_s7 + $0xb30] sm:$0xff] }
 0x31a   :  { %5817 = vmatpush2.bf16.msra.mxu1 %v7445_v35  ;;  %5777 = vmatprep.subr.bf16.mxu0 %v7412_v14  ;;  %v7225_v35 = vcombine.low %v2582_v56, %v2598_v57  ;;  %v7192_v14 = vcombine.high %v2549_v62, %v2565_v63  ;;  %v2885_v50 = vld [vmem:[%s11048_s7 + $0xbb0] sm:$0xff]  ;;  %v2870_v56 = vld [vmem:[%s11048_s7 + $0xb38] sm:$0xff] }
 0x31b   :  { %5818 = vmatprep.subr.bf16.mxu1 %v7414_v0  ;;  %v7194_v0 = vcombine.high %v2550_v22, %v2566_v51  ;;  %v2886_v57 = vld [vmem:[%s11048_s7 + $0xbb8] sm:$0xff] }
 0x31d   :  { %5778 = vmatpush2.bf16.msra.mxu0 %v7411_v6  ;;  %v7191_v6 = vcombine.low %v2549_v62, %v2565_v63  ;;  %v2837_v62 = vld [vmem:[%s11048_s7 + $0xa30] sm:$0xff] }
 0x31e   :  { %5819 = vmatpush2.bf16.msra.mxu1 %v7413_v7  ;;  %5829 = vmatprep.subr.bf16.mxu0 %v7384_v8  ;;  %v7193_v7 = vcombine.low %v2550_v22, %v2566_v51  ;;  %v7160_v8 = vcombine.high %v2517_v1, %v2533_v2  ;;  %v2853_v63 = vld [vmem:[%s11048_s7 + $0xab0] sm:$0xff]  ;;  %v2838_v22 = vld [vmem:[%s11048_s7 + $0xa38] sm:$0xff] }
 0x31f   :  { %5870 = vmatprep.subr.bf16.mxu1 %v7386_v9  ;;  %v7162_v9 = vcombine.high %v2518_v4, %v2534_v5  ;;  %v2854_v51 = vld [vmem:[%s11048_s7 + $0xab8] sm:$0xff]  ;;  %v2805_v1 = vld [vmem:[%s11048_s7 + $0x930] sm:$0xff] }
 0x320   :  { %5780 = vmatmul.mubr.bf16.vlgmr.msra.gmra.mxu0 %v9509_v36  ;;  %v2821_v2 = vld [vmem:[%s11048_s7 + $0x9b0] sm:$0xff] }
 0x321   :  { %5821 = vmatmul.mubr.bf16.vlgmr.msra.gmra.mxu1 %v9509_v36  ;;  %5830 = vmatpush1.bf16.msra.mxu0 %v7383_v12  ;;  %v2998_v12 = vld [vmem:[%s11048_s7 + $0xf38] sm:$0xff] }
 0x322   :  { %5861 = vmatprep.mubr.bf16.mxu0 %v9507_v28  ;;  %5871 = vmatpush1.bf16.msra.mxu1 %v7385_v18  ;;  %v7161_v18 = vcombine.low %v2518_v4, %v2534_v5  ;;  %v7642_v21 = vcombine.high %v2998_v12, %v3014_v13  ;;  %v2806_v4 = vld [vmem:[%s11048_s7 + $0x938] sm:$0xff] }
 0x323   :  { %5902 = vmatprep.mubr.bf16.mxu1 %v9507_v28  ;;  %5831 = vmatprep.subr.bf16.mxu0 %v7352_v19  ;;  %v7640_v19 = vcombine.high %v2997_v10, %v3013_v11  ;;  %v2822_v5 = vld [vmem:[%s11048_s7 + $0x9b8] sm:$0xff] }
 0x324   :  { %5872 = vmatprep.subr.bf16.mxu1 %v7354_v30  ;;  %v2981_v30 = vld [vmem:[%s11048_s7 + $0xeb0] sm:$0xff] }
 0x325   :  { %5832 = vmatpush1.bf16.msra.mxu0 %v7351_v33  ;;  %v7639_v33 = vcombine.low %v2997_v10, %v3013_v11  ;;  %v2773_v10 = vld [vmem:[%s11048_s7 + $0x830] sm:$0xff] }
 0x326   :  { %5873 = vmatpush1.bf16.msra.mxu1 %v7353_v34  ;;  %5833 = vmatprep.subr.bf16.mxu0 %v7320_v38  ;;  %v7641_v34 = vcombine.low %v2998_v12, %v3014_v13  ;;  %v7608_v38 = vcombine.high %v2965_v27, %v2981_v30  ;;  %v2789_v11 = vld [vmem:[%s11048_s7 + $0x8b0] sm:$0xff]  ;;  %v2774_v12 = vld [vmem:[%s11048_s7 + $0x838] sm:$0xff] }
 0x327   :  { %5874 = vmatprep.subr.bf16.mxu1 %v7322_v39  ;;  %v7610_v39 = vcombine.high %v2966_v31, %v2982_v32  ;;  %v2790_v13 = vld [vmem:[%s11048_s7 + $0x8b8] sm:$0xff] }
 0x329   :  { %5834 = vmatpush1.bf16.msra.mxu0 %v7319_v25  ;;  %v7607_v25 = vcombine.low %v2965_v27, %v2981_v30  ;;  %v2743_v27 = vld [vmem:[%s11048_s7 + $0x740] sm:$0xff] }
 0x32a   :  { %5875 = vmatpush1.bf16.msra.mxu1 %v7321_v24  ;;  %5835 = vmatprep.subr.bf16.mxu0 %v7288_v26  ;;  %v7609_v24 = vcombine.low %v2966_v31, %v2982_v32  ;;  %v7576_v26 = vcombine.high %v2933_v15, %v2949_v40  ;;  %v2759_v30 = vld [vmem:[%s11048_s7 + $0x7c0] sm:$0xff]  ;;  %v2744_v31 = vld [vmem:[%s11048_s7 + $0x748] sm:$0xff] }
 0x32b   :  { %5876 = vmatprep.subr.bf16.mxu1 %v7290_v44  ;;  %v7578_v44 = vcombine.high %v2934_v41, %v2950_v42  ;;  %v2760_v32 = vld [vmem:[%s11048_s7 + $0x7c8] sm:$0xff] }
 0x32d   :  { %5836 = vmatpush1.bf16.msra.mxu0 %v7287_v3  ;;  %v7575_v3 = vcombine.low %v2933_v15, %v2949_v40  ;;  %v7390_v15 = vcombine.high %v2744_v31, %v2760_v32  ;;  %v10097_v40 = vld [vmem:[%s11052_s9] sm:$0xff] }
 0x32e   :  { %5877 = vmatpush1.bf16.msra.mxu1 %v7289_v52  ;;  %5837 = vmatprep.subr.bf16.mxu0 %v7256_v37  ;;  %v7577_v52 = vcombine.low %v2934_v41, %v2950_v42  ;;  %v7544_v37 = vcombine.high %v2901_v45, %v2917_v46  ;;  %v2711_v41 = vld [vmem:[%s11048_s7 + $0x640] sm:$0xff]  ;;  %v7387_v42 = vcombine.low %v2743_v27, %v2759_v30 }
 0x32f   :  { %5878 = vmatprep.subr.bf16.mxu1 %v7258_v54  ;;  %v7546_v54 = vcombine.high %v2902_v47, %v2918_v61 }
 0x331   :  { %5838 = vmatpush1.bf16.msra.mxu0 %v7255_v58  ;;  %v7543_v58 = vcombine.low %v2901_v45, %v2917_v46  ;;  %v2728_v45 = vld [vmem:[%s11048_s7 + $0x6c8] sm:$0xff]  ;;  %v7389_v46 = vcombine.low %v2744_v31, %v2760_v32 }
 0x332   :  { %5879 = vmatpush1.bf16.msra.mxu1 %v7257_v29  ;;  %5839 = vmatprep.subr.bf16.mxu0 %v7224_v59  ;;  %v7545_v29 = vcombine.low %v2902_v47, %v2918_v61  ;;  %v7512_v59 = vcombine.high %v2869_v55, %v2885_v50  ;;  %v6450_v47 = vrot.slane %v10097_v40, %v9200_v48 }
 0x333   :  { %5880 = vmatprep.subr.bf16.mxu1 %v7226_v60  ;;  %v7514_v60 = vcombine.high %v2870_v56, %v2886_v57  ;;  %v6458_v61 = vrot.slane %v10097_v40, %v9335_v17 }
 0x335   :  { %5840 = vmatpush1.bf16.msra.mxu0 %v7223_v23  ;;  %v7511_v23 = vcombine.low %v2869_v55, %v2885_v50 }
 0x336   :  { %5881 = vmatpush1.bf16.msra.mxu1 %v7225_v35  ;;  %5841 = vmatprep.subr.bf16.mxu0 %v7192_v14  ;;  %v7513_v35 = vcombine.low %v2870_v56, %v2886_v57  ;;  %v7480_v14 = vcombine.high %v2837_v62, %v2853_v63  ;;  %v6454_v56 = vrot.slane %v10097_v40, %v9211_v53 }
 0x337   :  { %5882 = vmatprep.subr.bf16.mxu1 %v7194_v0  ;;  %v7482_v0 = vcombine.high %v2838_v22, %v2854_v51 }
 0x339   :  { %5842 = vmatpush1.bf16.msra.mxu0 %v7191_v6  ;;  %v7479_v6 = vcombine.low %v2837_v62, %v2853_v63 }
 0x33a   :  { %5883 = vmatpush1.bf16.msra.mxu1 %v7193_v7  ;;  %5843 = vmatprep.subr.bf16.mxu0 %v7160_v8  ;;  %v7481_v7 = vcombine.low %v2838_v22, %v2854_v51  ;;  %v7448_v8 = vcombine.high %v2805_v1, %v2821_v2  ;;  %v6462_v22 = vrot.slane %v10097_v40, %v9344_v20 }
 0x33b   :  { %5884 = vmatprep.subr.bf16.mxu1 %v7162_v9  ;;  %v7450_v9 = vcombine.high %v2806_v4, %v2822_v5 }
 0x33d   :  { %5844 = vmatpush1.bf16.msra.mxu0 %v7159_v16  ;;  %v7447_v16 = vcombine.low %v2805_v1, %v2821_v2 }
 0x33e   :  { %5885 = vmatpush1.bf16.msra.mxu1 %v7161_v18  ;;  %5845 = vmatprep.subr.bf16.mxu0 %v7640_v19  ;;  %v7449_v18 = vcombine.low %v2806_v4, %v2822_v5  ;;  %v7416_v19 = vcombine.high %v2773_v10, %v2789_v11  ;;  %v2647_v4 = vld [vmem:[%s11048_s7 + $0x440] sm:$0xff] }
 0x33f   :  { %5886 = vmatprep.subr.bf16.mxu1 %v7642_v21  ;;  %v7418_v21 = vcombine.high %v2774_v12, %v2790_v13  ;;  %v2663_v5 = vld [vmem:[%s11048_s7 + $0x4c0] sm:$0xff] }
 0x341   :  { %5846 = vmatpush2.bf16.msra.mxu0 %v7639_v33  ;;  %v7415_v33 = vcombine.low %v2773_v10, %v2789_v11  ;;  %v2664_v10 = vld [vmem:[%s11048_s7 + $0x4c8] sm:$0xff] }
 0x342   :  { %5887 = vmatpush2.bf16.msra.mxu1 %v7641_v34  ;;  %5847 = vmatprep.subr.bf16.mxu0 %v7608_v38  ;;  %v7417_v34 = vcombine.low %v2774_v12, %v2790_v13  ;;  %v7388_v38 = vcombine.high %v2743_v27, %v2759_v30  ;;  %v7292_v27 = vcombine.high %v2647_v4, %v2663_v5 }
 0x343   :  { %5888 = vmatprep.subr.bf16.mxu1 %v7610_v39  ;;  %v10092_v39 = vld [vmem:[%s11051_s8] sm:$0xff] }
 0x345   :  { %5848 = vmatpush2.bf16.msra.mxu0 %v7607_v25  ;;  %v6250_v25 = vrot.slane %v10092_v39, %v9200_v48 }
 0x346   :  { %5889 = vmatpush2.bf16.msra.mxu1 %v7609_v24  ;;  %5849 = vmatprep.subr.bf16.mxu0 %v7576_v26  ;;  %v6258_v24 = vrot.slane %v10092_v39, %v9335_v17  ;;  %v2727_v26 = vld [vmem:[%s11048_s7 + $0x6c0] sm:$0xff] }
 0x347   :  { %5890 = vmatprep.subr.bf16.mxu1 %v7578_v44  ;;  %v2712_v44 = vld [vmem:[%s11048_s7 + $0x648] sm:$0xff]  ;;  %v7355_v57 = vcombine.low %v2711_v41, %v2727_v26 }
 0x349   :  { %5850 = vmatpush2.bf16.msra.mxu0 %v7575_v3  ;;  %v6254_v3 = vrot.slane %v10092_v39, %v9211_v53 }
 0x34a   :  { %5891 = vmatpush2.bf16.msra.mxu1 %v7577_v52  ;;  %5851 = vmatprep.subr.bf16.mxu0 %v7544_v37  ;;  %v6262_v52 = vrot.slane %v10092_v39, %v9344_v20  ;;  %v2679_v37 = vld [vmem:[%s11048_s7 + $0x540] sm:$0xff] }
 0x34b   :  { %5892 = vmatprep.subr.bf16.mxu1 %v7546_v54  ;;  %v2695_v54 = vld [vmem:[%s11048_s7 + $0x5c0] sm:$0xff] }
 0x34d   :  { %5852 = vmatpush2.bf16.msra.mxu0 %v7543_v58  ;;  %v7356_v58 = vcombine.high %v2711_v41, %v2727_v26 }
 0x34e   :  { %5893 = vmatpush2.bf16.msra.mxu1 %v7545_v29  ;;  %5853 = vmatprep.subr.bf16.mxu0 %v7512_v59  ;;  %v7358_v29 = vcombine.high %v2712_v44, %v2728_v45  ;;  %v2680_v59 = vld [vmem:[%s11048_s7 + $0x548] sm:$0xff] }
 0x34f   :  { %5894 = vmatprep.subr.bf16.mxu1 %v7514_v60  ;;  %v2696_v60 = vld [vmem:[%s11048_s7 + $0x5c8] sm:$0xff] }
 0x350   :  { %v7326_v2 = vcombine.high %v2680_v59, %v2696_v60 }
 0x351   :  { %5854 = vmatpush2.bf16.msra.mxu0 %v7511_v23 }
 0x352   :  { %5895 = vmatpush2.bf16.msra.mxu1 %v7513_v35  ;;  %5855 = vmatprep.subr.bf16.mxu0 %v7480_v14  ;;  %v7357_v35 = vcombine.low %v2712_v44, %v2728_v45  ;;  %v7324_v14 = vcombine.high %v2679_v37, %v2695_v54 }
 0x353   :  { %5896 = vmatprep.subr.bf16.mxu1 %v7482_v0 }
 0x355   :  { %5856 = vmatpush2.bf16.msra.mxu0 %v7479_v6 }
 0x356   :  { %5897 = vmatpush2.bf16.msra.mxu1 %v7481_v7  ;;  %5857 = vmatprep.subr.bf16.mxu0 %v7448_v8  ;;  %v7323_v8 = vcombine.low %v2679_v37, %v2695_v54 }
 0x357   :  { %5898 = vmatprep.subr.bf16.mxu1 %v7450_v9  ;;  %v2648_v9 = vld [vmem:[%s11048_s7 + $0x448] sm:$0xff] }
 0x358   :  { %v7294_v32 = vcombine.high %v2648_v9, %v2664_v10 }
 0x359   :  { %5858 = vmatpush2.bf16.msra.mxu0 %v7447_v16 }
 0x35a   :  { %5899 = vmatpush2.bf16.msra.mxu1 %v7449_v18  ;;  %5859 = vmatprep.subr.bf16.mxu0 %v7416_v19 }
 0x35b   :  { %5900 = vmatprep.subr.bf16.mxu1 %v7418_v21  ;;  %v7325_v21 = vcombine.low %v2680_v59, %v2696_v60 }
 0x35d   :  { %5860 = vmatpush2.bf16.msra.mxu0 %v7415_v33  ;;  %v2615_v33 = vld [vmem:[%s11048_s7 + $0x340] sm:$0xff] }
 0x35e   :  { %5901 = vmatpush2.bf16.msra.mxu1 %v7417_v34  ;;  %5911 = vmatprep.subr.bf16.mxu0 %v7388_v38  ;;  %v2631_v34 = vld [vmem:[%s11048_s7 + $0x3c0] sm:$0xff]  ;;  %v2616_v38 = vld [vmem:[%s11048_s7 + $0x348] sm:$0xff] }
 0x35f   :  { %5952 = vmatprep.subr.bf16.mxu1 %v7390_v15  ;;  %v2632_v15 = vld [vmem:[%s11048_s7 + $0x3c8] sm:$0xff]  ;;  %v7260_v26 = vcombine.high %v2615_v33, %v2631_v34 }
 0x360   :  { %5862 = vmatmul.mubr.bf16.vlgmr.msra.gmra.mxu0 %v9509_v36  ;;  %v5617_v55 = vpop.f32.mrf.mxu0  ;;  %v5658_v50 = vpop.f32.mrf.mxu1  ;;  %v7262_v45 = vcombine.high %v2616_v38, %v2632_v15  ;;  %v7261_v37 = vcombine.low %v2616_v38, %v2632_v15 }
 0x361   :  { %5903 = vmatmul.mubr.bf16.vlgmr.msra.gmra.mxu1 %v9509_v36  ;;  %v6407_v62 = vmul.f32 %v6250_v25, %v5617_v55  ;;  %v6409_v63 = vmul.f32 %v6258_v24, %v5658_v50  ;;  %5912 = vmatpush1.bf16.msra.mxu0 %v7387_v42  ;;  %v7291_v25 = vcombine.low %v2647_v4, %v2663_v5  ;;  %v2551_v50 = vld [vmem:[%s11048_s7 + $0x140] sm:$0xff]  ;;  %v3000_v5 = vld [vmem:[%s11048_s7 + $0xf48] sm:$0xff] }
 0x362   :  { %5943 = vmatprep.mubr.bf16.mxu0 %v9507_v28  ;;  %5953 = vmatpush1.bf16.msra.mxu1 %v7389_v46  ;;  %v5619_v51 = vpop.f32.mrf.mxu0  ;;  %v5660_v23 = vpop.f32.mrf.mxu1  ;;  %v7293_v24 = vcombine.low %v2648_v9, %v2664_v10  ;;  %v2583_v46 = vld [vmem:[%s11048_s7 + $0x240] sm:$0xff] }
 0x363   :  { %5984 = vmatprep.mubr.bf16.mxu1 %v9507_v28  ;;  %v6408_v0 = vmul.f32 %v6254_v3, %v5619_v51  ;;  %v6410_v1 = vmul.f32 %v6262_v52, %v5660_v23  ;;  %5913 = vmatprep.subr.bf16.mxu0 %v7356_v58  ;;  %v6607_v11 = vadd.f32 %v6450_v47, %v6407_v62  ;;  %v2599_v47 = vld [vmem:[%s11048_s7 + $0x2c0] sm:$0xff]  ;;  %v2600_v3 = vld [vmem:[%s11048_s7 + $0x2c8] sm:$0xff] }
 0x364   :  { %5954 = vmatprep.subr.bf16.mxu1 %v7358_v29  ;;  %v5621_v6 = vpop.f32.mrf.mxu0  ;;  %v5662_v7 = vpop.f32.mrf.mxu1  ;;  %v6609_v12 = vadd.f32 %v6458_v61, %v6409_v63  ;;  %v2584_v61 = vld [vmem:[%s11048_s7 + $0x248] sm:$0xff]  ;;  %v7259_v52 = vcombine.low %v2615_v33, %v2631_v34  ;;  %v7228_v54 = vcombine.high %v2583_v46, %v2599_v47  ;;  %v7227_v29 = vcombine.low %v2583_v46, %v2599_v47  ;;  %v2519_v63 = vld [vmem:[%s11048_s7 + $0x40] sm:$0xff] }
 0x365   :  { %v6608_v13 = vadd.f32 %v6454_v56, %v6408_v0  ;;  %v6610_v16 = vadd.f32 %v6462_v22, %v6410_v1  ;;  %5914 = vmatpush1.bf16.msra.mxu0 %v7355_v57  ;;  %v7230_v55 = vcombine.high %v2584_v61, %v2600_v3  ;;  %v2567_v56 = vld [vmem:[%s11048_s7 + $0x1c0] sm:$0xff]  ;;  %v2552_v57 = vld [vmem:[%s11048_s7 + $0x148] sm:$0xff]  ;;  %v7229_v59 = vcombine.low %v2584_v61, %v2600_v3 }
 0x366   :  { %5955 = vmatpush1.bf16.msra.mxu1 %v7357_v35  ;;  %v5622_v18 = vpop.f32.mrf.mxu0  ;;  %v5663_v19 = vpop.f32.mrf.mxu1  ;;  %5915 = vmatprep.subr.bf16.mxu0 %v7324_v14  ;;  %v2568_v58 = vld [vmem:[%s11048_s7 + $0x1c8] sm:$0xff]  ;;  %v7196_v60 = vcombine.high %v2551_v50, %v2567_v56  ;;  %v2535_v22 = vld [vmem:[%s11048_s7 + $0xc0] sm:$0xff]  ;;  %v7195_v35 = vcombine.low %v2551_v50, %v2567_v56 }
 0x367   :  { %v6671_v30 = vcombine.low %v6607_v11, %v6608_v13  ;;  %v6672_v31 = vcombine.low %v6609_v12, %v6610_v16  ;;  %5956 = vmatprep.subr.bf16.mxu1 %v7326_v2  ;;  %v7198_v62 = vcombine.high %v2552_v57, %v2568_v58  ;;  %v2520_v51 = vld [vmem:[%s11048_s7 + $0x48] sm:$0xff]  ;;  %v7197_v14 = vcombine.low %v2552_v57, %v2568_v58  ;;  %v2999_v2 = vld [vmem:[%s11048_s7 + $0xf40] sm:$0xff] }
 0x368   :  { %v2536_v23 = vld [vmem:[%s11048_s7 + $0xc8] sm:$0xff]  ;;  %v7164_v0 = vcombine.high %v2519_v63, %v2535_v22  ;;  %v3015_v4 = vld [vmem:[%s11048_s7 + $0xfc0] sm:$0xff]  ;;  %v7163_v7 = vcombine.low %v2519_v63, %v2535_v22 }
 0x369   :  { %v6679_v41 = vrot.slane %v6671_v30, %v8333_v49  ;;  %v6686_v42 = vrot.slane %v6672_v31, %v8333_v49  ;;  %5916 = vmatpush1.bf16.msra.mxu0 %v7323_v8  ;;  %v7166_v1 = vcombine.high %v2520_v51, %v2536_v23  ;;  %v3016_v6 = vld [vmem:[%s11048_s7 + $0xfc8] sm:$0xff]  ;;  %v7165_v8 = vcombine.low %v2520_v51, %v2536_v23  ;;  %v2967_v11 = vld [vmem:[%s11048_s7 + $0xe40] sm:$0xff] }
 0x36a   :  { %5957 = vmatpush1.bf16.msra.mxu1 %v7325_v21  ;;  %5917 = vmatprep.subr.bf16.mxu0 %v7292_v27  ;;  %v7644_v9 = vcombine.high %v2999_v2, %v3015_v4  ;;  %v7646_v10 = vcombine.high %v3000_v5, %v3016_v6  ;;  %v2983_v12 = vld [vmem:[%s11048_s7 + $0xec0] sm:$0xff]  ;;  %v2968_v13 = vld [vmem:[%s11048_s7 + $0xe48] sm:$0xff]  ;;  %v7643_v18 = vcombine.low %v2999_v2, %v3015_v4 }
 0x36b   :  { %v6687_v44 = vcombine.low %v6679_v41, %v6686_v42  ;;  %5958 = vmatprep.subr.bf16.mxu1 %v7294_v32  ;;  %v2984_v16 = vld [vmem:[%s11048_s7 + $0xec8] sm:$0xff]  ;;  %v7645_v19 = vcombine.low %v3000_v5, %v3016_v6  ;;  %v7612_v21 = vcombine.high %v2967_v11, %v2983_v12  ;;  %v2935_v30 = vld [vmem:[%s11048_s7 + $0xd40] sm:$0xff]  ;;  %v7611_v34 = vcombine.low %v2967_v11, %v2983_v12 }
 0x36c   :  { %v7614_v27 = vcombine.high %v2968_v13, %v2984_v16  ;;  %v2951_v31 = vld [vmem:[%s11048_s7 + $0xdc0] sm:$0xff]  ;;  %v2936_v32 = vld [vmem:[%s11048_s7 + $0xd48] sm:$0xff]  ;;  %v7613_v38 = vcombine.low %v2968_v13, %v2984_v16  ;;  %v2745_v13 = vld [vmem:[%s11048_s7 + $0x750] sm:$0xff] }
 0x36d   :  { %6815 = vst [vmem:[%s11053_s10] sm:$0xff] %v6687_v44  ;;  %5918 = vmatpush1.bf16.msra.mxu0 %v7291_v25  ;;  %v2952_v33 = vld [vmem:[%s11048_s7 + $0xdc8] sm:$0xff]  ;;  %v7580_v15 = vcombine.high %v2935_v30, %v2951_v31  ;;  %v2903_v42 = vld [vmem:[%s11048_s7 + $0xc40] sm:$0xff]  ;;  %v7579_v44 = vcombine.low %v2935_v30, %v2951_v31  ;;  %v2761_v16 = vld [vmem:[%s11048_s7 + $0x7d0] sm:$0xff]  ;;  %v10320_v30 = vsub.s32 6, %v8315_v43 }
 0x36e   :  { %5959 = vmatpush1.bf16.msra.mxu1 %v7293_v24  ;;  %5919 = vmatprep.subr.bf16.mxu0 %v7260_v26  ;;  %v7582_v41 = vcombine.high %v2936_v32, %v2952_v33  ;;  %v2919_v25 = vld [vmem:[%s11048_s7 + $0xcc0] sm:$0xff]  ;;  %v2904_v24 = vld [vmem:[%s11048_s7 + $0xc48] sm:$0xff] }
 0x36f   :  { %5960 = vmatprep.subr.bf16.mxu1 %v7262_v45  ;;  %v2920_v26 = vld [vmem:[%s11048_s7 + $0xcc8] sm:$0xff]  ;;  %v7581_v45 = vcombine.low %v2936_v32, %v2952_v33  ;;  %v7548_v46 = vcombine.high %v2903_v42, %v2919_v25  ;;  %v2871_v61 = vld [vmem:[%s11048_s7 + $0xb40] sm:$0xff]  ;;  %v7392_v32 = vcombine.high %v2745_v13, %v2761_v16 }
 0x370   :  { %v7550_v47 = vcombine.high %v2904_v24, %v2920_v26  ;;  %v2887_v3 = vld [vmem:[%s11048_s7 + $0xbc0] sm:$0xff] }
 0x371   :  { %5920 = vmatpush1.bf16.msra.mxu0 %v7259_v52  ;;  %v2872_v52 = vld [vmem:[%s11048_s7 + $0xb48] sm:$0xff]  ;;  %v7516_v50 = vcombine.high %v2871_v61, %v2887_v3  ;;  %v2839_v57 = vld [vmem:[%s11048_s7 + $0xa40] sm:$0xff] }
 0x372   :  { %5961 = vmatpush1.bf16.msra.mxu1 %v7261_v37  ;;  %5921 = vmatprep.subr.bf16.mxu0 %v7228_v54  ;;  %v2888_v37 = vld [vmem:[%s11048_s7 + $0xbc8] sm:$0xff]  ;;  %v7547_v54 = vcombine.low %v2903_v42, %v2919_v25  ;;  %v2855_v58 = vld [vmem:[%s11048_s7 + $0xac0] sm:$0xff]  ;;  %v6274_v42 = vrot.slane %v10092_v39, %v10320_v30  ;;  %v7391_v25 = vcombine.low %v2745_v13, %v2761_v16 }
 0x373   :  { %5962 = vmatprep.subr.bf16.mxu1 %v7230_v55  ;;  %v7549_v55 = vcombine.low %v2904_v24, %v2920_v26  ;;  %v7518_v56 = vcombine.high %v2872_v52, %v2888_v37  ;;  %v7484_v63 = vcombine.high %v2839_v57, %v2855_v58  ;;  %v2807_v51 = vld [vmem:[%s11048_s7 + $0x940] sm:$0xff]  ;;  %v2729_v24 = vld [vmem:[%s11048_s7 + $0x6d0] sm:$0xff]  ;;  %v2730_v26 = vld [vmem:[%s11048_s7 + $0x6d8] sm:$0xff] }
 0x374   :  { %v2823_v23 = vld [vmem:[%s11048_s7 + $0x9c0] sm:$0xff] }
 0x375   :  { %5922 = vmatpush1.bf16.msra.mxu0 %v7227_v29  ;;  %v2840_v29 = vld [vmem:[%s11048_s7 + $0xa48] sm:$0xff]  ;;  %v7452_v2 = vcombine.high %v2807_v51, %v2823_v23  ;;  %v2775_v5 = vld [vmem:[%s11048_s7 + $0x840] sm:$0xff] }
 0x376   :  { %5963 = vmatpush1.bf16.msra.mxu1 %v7229_v59  ;;  %5923 = vmatprep.subr.bf16.mxu0 %v7196_v60  ;;  %v2856_v59 = vld [vmem:[%s11048_s7 + $0xac8] sm:$0xff]  ;;  %v7515_v60 = vcombine.low %v2871_v61, %v2887_v3  ;;  %v2791_v6 = vld [vmem:[%s11048_s7 + $0x8c0] sm:$0xff] }
 0x377   :  { %5964 = vmatprep.subr.bf16.mxu1 %v7198_v62  ;;  %v7517_v62 = vcombine.low %v2872_v52, %v2888_v37  ;;  %v7486_v22 = vcombine.high %v2840_v29, %v2856_v59  ;;  %v7420_v11 = vcombine.high %v2775_v5, %v2791_v6  ;;  %v2697_v52 = vld [vmem:[%s11048_s7 + $0x5d0] sm:$0xff]  ;;  %v2682_v37 = vld [vmem:[%s11048_s7 + $0x558] sm:$0xff] }
 0x379   :  { %5924 = vmatpush1.bf16.msra.mxu0 %v7195_v35  ;;  %v2808_v35 = vld [vmem:[%s11048_s7 + $0x948] sm:$0xff] }
 0x37a   :  { %5965 = vmatpush1.bf16.msra.mxu1 %v7197_v14  ;;  %5925 = vmatprep.subr.bf16.mxu0 %v7164_v0  ;;  %v2824_v14 = vld [vmem:[%s11048_s7 + $0x9c8] sm:$0xff]  ;;  %v7483_v0 = vcombine.low %v2839_v57, %v2855_v58 }
 0x37b   :  { %5966 = vmatprep.subr.bf16.mxu1 %v7166_v1  ;;  %v7485_v1 = vcombine.low %v2840_v29, %v2856_v59  ;;  %v7454_v4 = vcombine.high %v2808_v35, %v2824_v14 }
 0x37d   :  { %5926 = vmatpush1.bf16.msra.mxu0 %v7163_v7  ;;  %v2776_v7 = vld [vmem:[%s11048_s7 + $0x848] sm:$0xff] }
 0x37e   :  { %5967 = vmatpush1.bf16.msra.mxu1 %v7165_v8  ;;  %5927 = vmatprep.subr.bf16.mxu0 %v7644_v9  ;;  %v2792_v8 = vld [vmem:[%s11048_s7 + $0x8c8] sm:$0xff]  ;;  %v7451_v9 = vcombine.low %v2807_v51, %v2823_v23 }
 0x37f   :  { %5968 = vmatprep.subr.bf16.mxu1 %v7646_v10  ;;  %v7453_v10 = vcombine.low %v2808_v35, %v2824_v14  ;;  %v7422_v12 = vcombine.high %v2776_v7, %v2792_v8  ;;  %v7421_v31 = vcombine.low %v2776_v7, %v2792_v8  ;;  %v2666_v7 = vld [vmem:[%s11048_s7 + $0x4d8] sm:$0xff] }
 0x381   :  { %5928 = vmatpush2.bf16.msra.mxu0 %v7643_v18  ;;  %v2746_v18 = vld [vmem:[%s11048_s7 + $0x758] sm:$0xff] }
 0x382   :  { %5969 = vmatpush2.bf16.msra.mxu1 %v7645_v19  ;;  %5929 = vmatprep.subr.bf16.mxu0 %v7612_v21  ;;  %v2762_v19 = vld [vmem:[%s11048_s7 + $0x7d8] sm:$0xff]  ;;  %v7419_v21 = vcombine.low %v2775_v5, %v2791_v6 }
 0x383   :  { %5970 = vmatprep.subr.bf16.mxu1 %v7614_v27  ;;  %v10317_v27 = vsub.s32 4, %v8315_v43  ;;  %v7394_v33 = vcombine.high %v2746_v18, %v2762_v19  ;;  %v2650_v6 = vld [vmem:[%s11048_s7 + $0x458] sm:$0xff] }
 0x385   :  { %5930 = vmatpush2.bf16.msra.mxu0 %v7611_v34  ;;  %v10323_v34 = vsub.s32 5, %v8315_v43 }
 0x386   :  { %5971 = vmatpush2.bf16.msra.mxu1 %v7613_v38  ;;  %5931 = vmatprep.subr.bf16.mxu0 %v7580_v15  ;;  %v10326_v38 = vsub.s32 7, %v8315_v43  ;;  %v2713_v15 = vld [vmem:[%s11048_s7 + $0x650] sm:$0xff]  ;;  %v2714_v43 = vld [vmem:[%s11048_s7 + $0x658] sm:$0xff] }
 0x387   :  { %5972 = vmatprep.subr.bf16.mxu1 %v7582_v41  ;;  %v6266_v41 = vrot.slane %v10092_v39, %v10317_v27  ;;  %v6270_v61 = vrot.slane %v10092_v39, %v10323_v34  ;;  %v7360_v57 = vcombine.high %v2713_v15, %v2729_v24  ;;  %v7362_v58 = vcombine.high %v2714_v43, %v2730_v26 }
 0x388   :  { %v6278_v3 = vrot.slane %v10092_v39, %v10326_v38  ;;  %v6478_v39 = vrot.slane %v10097_v40, %v10326_v38 }
 0x389   :  { %5932 = vmatpush2.bf16.msra.mxu0 %v7579_v44  ;;  %v7393_v44 = vcombine.low %v2746_v18, %v2762_v19 }
 0x38a   :  { %5973 = vmatpush2.bf16.msra.mxu1 %v7581_v45  ;;  %5933 = vmatprep.subr.bf16.mxu0 %v7548_v46  ;;  %v2681_v45 = vld [vmem:[%s11048_s7 + $0x550] sm:$0xff]  ;;  %v6466_v46 = vrot.slane %v10097_v40, %v10317_v27 }
 0x38b   :  { %5974 = vmatprep.subr.bf16.mxu1 %v7550_v47  ;;  %v6474_v47 = vrot.slane %v10097_v40, %v10320_v30  ;;  %v7328_v51 = vcombine.high %v2681_v45, %v2697_v52 }
 0x38d   :  { %5934 = vmatpush2.bf16.msra.mxu0 %v7547_v54  ;;  %v2698_v54 = vld [vmem:[%s11048_s7 + $0x5d8] sm:$0xff] }
 0x38e   :  { %5975 = vmatpush2.bf16.msra.mxu1 %v7549_v55  ;;  %5935 = vmatprep.subr.bf16.mxu0 %v7516_v50  ;;  %v7330_v23 = vcombine.high %v2682_v37, %v2698_v54  ;;  %v7329_v13 = vcombine.low %v2682_v37, %v2698_v54 }
 0x38f   :  { %5976 = vmatprep.subr.bf16.mxu1 %v7518_v56  ;;  %v6470_v56 = vrot.slane %v10097_v40, %v10323_v34 }
 0x391   :  { %5936 = vmatpush2.bf16.msra.mxu0 %v7515_v60  ;;  %v7359_v60 = vcombine.low %v2713_v15, %v2729_v24  ;;  %v2634_v15 = vld [vmem:[%s11048_s7 + $0x3d8] sm:$0xff]  ;;  %v7297_v24 = vcombine.low %v2650_v6, %v2666_v7 }
 0x392   :  { %5977 = vmatpush2.bf16.msra.mxu1 %v7517_v62  ;;  %5937 = vmatprep.subr.bf16.mxu0 %v7484_v63 }
 0x393   :  { %5978 = vmatprep.subr.bf16.mxu1 %v7486_v22  ;;  %v7361_v22 = vcombine.low %v2714_v43, %v2730_v26 }
 0x395   :  { %5938 = vmatpush2.bf16.msra.mxu0 %v7483_v0 }
 0x396   :  { %5979 = vmatpush2.bf16.msra.mxu1 %v7485_v1  ;;  %5939 = vmatprep.subr.bf16.mxu0 %v7452_v2  ;;  %v2649_v1 = vld [vmem:[%s11048_s7 + $0x450] sm:$0xff] }
 0x397   :  { %5980 = vmatprep.subr.bf16.mxu1 %v7454_v4  ;;  %v2665_v2 = vld [vmem:[%s11048_s7 + $0x4d0] sm:$0xff] }
 0x398   :  { %v7296_v16 = vcombine.high %v2649_v1, %v2665_v2 }
 0x399   :  { %5940 = vmatpush2.bf16.msra.mxu0 %v7451_v9 }
 0x39a   :  { %5981 = vmatpush2.bf16.msra.mxu1 %v7453_v10  ;;  %5941 = vmatprep.subr.bf16.mxu0 %v7420_v11  ;;  %v7327_v10 = vcombine.low %v2681_v45, %v2697_v52  ;;  %v2585_v45 = vld [vmem:[%s11048_s7 + $0x250] sm:$0xff] }
 0x39b   :  { %5982 = vmatprep.subr.bf16.mxu1 %v7422_v12 }
 0x39d   :  { %5942 = vmatpush2.bf16.msra.mxu0 %v7419_v21  ;;  %v7298_v21 = vcombine.high %v2650_v6, %v2666_v7 }
 0x39e   :  { %5983 = vmatpush2.bf16.msra.mxu1 %v7421_v31  ;;  %5993 = vmatprep.subr.bf16.mxu0 %v7392_v32  ;;  %v2617_v31 = vld [vmem:[%s11048_s7 + $0x350] sm:$0xff] }
 0x39f   :  { %6034 = vmatprep.subr.bf16.mxu1 %v7394_v33  ;;  %v2633_v32 = vld [vmem:[%s11048_s7 + $0x3d0] sm:$0xff]  ;;  %v2618_v33 = vld [vmem:[%s11048_s7 + $0x358] sm:$0xff] }
 0x3a0   :  { %v5699_v55 = vpop.f32.mrf.mxu0  ;;  %v5740_v50 = vpop.f32.mrf.mxu1  ;;  %5944 = vmatmul.mubr.bf16.vlgmr.msra.gmra.mxu0 %v9509_v36  ;;  %v7264_v43 = vcombine.high %v2617_v31, %v2633_v32  ;;  %v7265_v52 = vcombine.low %v2618_v33, %v2634_v15 }
 0x3a1   :  { %v6411_v29 = vmul.f32 %v6266_v41, %v5699_v55  ;;  %v6413_v59 = vmul.f32 %v6274_v42, %v5740_v50  ;;  %5985 = vmatmul.mubr.bf16.vlgmr.msra.gmra.mxu1 %v9509_v36  ;;  %5994 = vmatpush1.bf16.msra.mxu0 %v7391_v25  ;;  %v7295_v25 = vcombine.low %v2649_v1, %v2665_v2  ;;  %v2553_v55 = vld [vmem:[%s11048_s7 + $0x150] sm:$0xff]  ;;  %v3002_v1 = vld [vmem:[%s11048_s7 + $0xf58] sm:$0xff] }
 0x3a2   :  { %6025 = vmatprep.mubr.bf16.mxu0 %v9507_v28  ;;  %6035 = vmatpush1.bf16.msra.mxu1 %v7393_v44  ;;  %v5701_v62 = vpop.f32.mrf.mxu0  ;;  %v5742_v63 = vpop.f32.mrf.mxu1  ;;  %v7266_v44 = vcombine.high %v2618_v33, %v2634_v15  ;;  %v2569_v50 = vld [vmem:[%s11048_s7 + $0x1d0] sm:$0xff]  ;;  %v3018_v2 = vld [vmem:[%s11048_s7 + $0xfd8] sm:$0xff] }
 0x3a3   :  { %v6611_v35 = vadd.f32 %v6466_v46, %v6411_v29  ;;  %v6613_v14 = vadd.f32 %v6474_v47, %v6413_v59  ;;  %6066 = vmatprep.mubr.bf16.mxu1 %v9507_v28  ;;  %v6412_v40 = vmul.f32 %v6270_v61, %v5701_v62  ;;  %v6414_v0 = vmul.f32 %v6278_v3, %v5742_v63  ;;  %v2601_v46 = vld [vmem:[%s11048_s7 + $0x2d0] sm:$0xff]  ;;  %v2586_v47 = vld [vmem:[%s11048_s7 + $0x258] sm:$0xff] }
 0x3a4   :  { %v5703_v4 = vpop.f32.mrf.mxu0  ;;  %v5744_v5 = vpop.f32.mrf.mxu1  ;;  %5995 = vmatprep.subr.bf16.mxu0 %v7360_v57  ;;  %6036 = vmatprep.subr.bf16.mxu1 %v7362_v58  ;;  %v2602_v61 = vld [vmem:[%s11048_s7 + $0x2d8] sm:$0xff]  ;;  %v7263_v3 = vcombine.low %v2617_v31, %v2633_v32  ;;  %v7232_v37 = vcombine.high %v2585_v45, %v2601_v46  ;;  %v7231_v57 = vcombine.low %v2585_v45, %v2601_v46  ;;  %v2537_v62 = vld [vmem:[%s11048_s7 + $0xd0] sm:$0xff] }
 0x3a5   :  { %v6612_v8 = vadd.f32 %v6470_v56, %v6412_v40  ;;  %v6614_v9 = vadd.f32 %v6478_v39, %v6414_v0  ;;  %5996 = vmatpush1.bf16.msra.mxu0 %v7359_v60  ;;  %v7234_v54 = vcombine.high %v2586_v47, %v2602_v61  ;;  %v2554_v56 = vld [vmem:[%s11048_s7 + $0x158] sm:$0xff]  ;;  %v7233_v58 = vcombine.low %v2586_v47, %v2602_v61  ;;  %v2521_v60 = vld [vmem:[%s11048_s7 + $0x50] sm:$0xff] }
 0x3a6   :  { %6037 = vmatpush1.bf16.msra.mxu1 %v7361_v22  ;;  %v5704_v11 = vpop.f32.mrf.mxu0  ;;  %v5745_v12 = vpop.f32.mrf.mxu1  ;;  %5997 = vmatprep.subr.bf16.mxu0 %v7328_v51  ;;  %v2570_v39 = vld [vmem:[%s11048_s7 + $0x1d8] sm:$0xff]  ;;  %v7200_v29 = vcombine.high %v2553_v55, %v2569_v50  ;;  %v7199_v51 = vcombine.low %v2553_v55, %v2569_v50  ;;  %v3001_v40 = vld [vmem:[%s11048_s7 + $0xf50] sm:$0xff]  ;;  %v7167_v4 = vcombine.low %v2521_v60, %v2537_v62 }
 0x3a7   :  { %v6688_v18 = vcombine.low %v6611_v35, %v6612_v8  ;;  %v6689_v19 = vcombine.low %v6613_v14, %v6614_v9  ;;  %6038 = vmatprep.subr.bf16.mxu1 %v7330_v23  ;;  %v7202_v59 = vcombine.high %v2554_v56, %v2570_v39  ;;  %v2522_v63 = vld [vmem:[%s11048_s7 + $0x58] sm:$0xff]  ;;  %v7201_v23 = vcombine.low %v2554_v56, %v2570_v39  ;;  %v3017_v0 = vld [vmem:[%s11048_s7 + $0xfd0] sm:$0xff] }
 0x3a8   :  { %v2538_v22 = vld [vmem:[%s11048_s7 + $0xd8] sm:$0xff]  ;;  %v7168_v35 = vcombine.high %v2521_v60, %v2537_v62  ;;  %v7648_v6 = vcombine.high %v3001_v40, %v3017_v0  ;;  %v7650_v7 = vcombine.high %v3002_v1, %v3018_v2  ;;  %v2969_v8 = vld [vmem:[%s11048_s7 + $0xe50] sm:$0xff]  ;;  %v7647_v12 = vcombine.low %v3001_v40, %v3017_v0 }
 0x3a9   :  { %v6696_v41 = vrot.slane %v6688_v18, %v8333_v49  ;;  %v6703_v42 = vrot.slane %v6689_v19, %v8333_v49  ;;  %5998 = vmatpush1.bf16.msra.mxu0 %v7327_v10  ;;  %v7170_v14 = vcombine.high %v2522_v63, %v2538_v22  ;;  %v7169_v5 = vcombine.low %v2522_v63, %v2538_v22  ;;  %v2985_v9 = vld [vmem:[%s11048_s7 + $0xed0] sm:$0xff]  ;;  %v2970_v10 = vld [vmem:[%s11048_s7 + $0xe58] sm:$0xff] }
 0x3aa   :  { %6039 = vmatpush1.bf16.msra.mxu1 %v7329_v13  ;;  %5999 = vmatprep.subr.bf16.mxu0 %v7296_v16  ;;  %v2986_v11 = vld [vmem:[%s11048_s7 + $0xed8] sm:$0xff]  ;;  %v7649_v13 = vcombine.low %v3002_v1, %v3018_v2  ;;  %v7616_v16 = vcombine.high %v2969_v8, %v2985_v9  ;;  %v2937_v19 = vld [vmem:[%s11048_s7 + $0xd50] sm:$0xff]  ;;  %v7615_v33 = vcombine.low %v2969_v8, %v2985_v9 }
 0x3ab   :  { %v6704_v26 = vcombine.low %v6696_v41, %v6703_v42  ;;  %6040 = vmatprep.subr.bf16.mxu1 %v7298_v21  ;;  %v7618_v18 = vcombine.high %v2970_v10, %v2986_v11  ;;  %v2953_v21 = vld [vmem:[%s11048_s7 + $0xdd0] sm:$0xff]  ;;  %v2938_v31 = vld [vmem:[%s11048_s7 + $0xd58] sm:$0xff]  ;;  %v7617_v15 = vcombine.low %v2970_v10, %v2986_v11  ;;  %v2747_v11 = vld [vmem:[%s11048_s7 + $0x760] sm:$0xff] }
 0x3ac   :  { %v2954_v32 = vld [vmem:[%s11048_s7 + $0xdd8] sm:$0xff]  ;;  %v7584_v41 = vcombine.high %v2937_v19, %v2953_v21  ;;  %v2873_v61 = vld [vmem:[%s11048_s7 + $0xb50] sm:$0xff] }
 0x3ad   :  { %6816 = vst [vmem:[%s11053_s10 + $0x8] sm:$0xff] %v6704_v26  ;;  %6000 = vmatpush1.bf16.msra.mxu0 %v7295_v25  ;;  %v7586_v42 = vcombine.high %v2938_v31, %v2954_v32  ;;  %v2905_v25 = vld [vmem:[%s11048_s7 + $0xc50] sm:$0xff]  ;;  %v2922_v26 = vld [vmem:[%s11048_s7 + $0xcd8] sm:$0xff]  ;;  %v7585_v45 = vcombine.low %v2938_v31, %v2954_v32 }
 0x3ae   :  { %6041 = vmatpush1.bf16.msra.mxu1 %v7297_v24  ;;  %6001 = vmatprep.subr.bf16.mxu0 %v7264_v43  ;;  %v2921_v24 = vld [vmem:[%s11048_s7 + $0xcd0] sm:$0xff]  ;;  %v2906_v43 = vld [vmem:[%s11048_s7 + $0xc58] sm:$0xff] }
 0x3af   :  { %6042 = vmatprep.subr.bf16.mxu1 %v7266_v44  ;;  %v7583_v44 = vcombine.low %v2937_v19, %v2953_v21  ;;  %v7552_v46 = vcombine.high %v2905_v25, %v2921_v24  ;;  %v7554_v47 = vcombine.high %v2906_v43, %v2922_v26  ;;  %v7553_v55 = vcombine.low %v2906_v43, %v2922_v26  ;;  %v2841_v39 = vld [vmem:[%s11048_s7 + $0xa50] sm:$0xff]  ;;  %v10548_v21 = vld [vmem:[%s11051_s8 + $0x8] sm:$0xff] }
 0x3b0   :  { %v2809_v22 = vld [vmem:[%s11048_s7 + $0x950] sm:$0xff]  ;;  %v2732_v43 = vld [vmem:[%s11048_s7 + $0x6e8] sm:$0xff]  ;;  %v6290_v26 = vrot.slane %v10548_v21, %v9335_v17 }
 0x3b1   :  { %6002 = vmatpush1.bf16.msra.mxu0 %v7263_v3  ;;  %v2889_v3 = vld [vmem:[%s11048_s7 + $0xbd0] sm:$0xff] }
 0x3b2   :  { %6043 = vmatpush1.bf16.msra.mxu1 %v7265_v52  ;;  %6003 = vmatprep.subr.bf16.mxu0 %v7232_v37  ;;  %v2874_v52 = vld [vmem:[%s11048_s7 + $0xb58] sm:$0xff]  ;;  %v7520_v50 = vcombine.high %v2873_v61, %v2889_v3  ;;  %v2777_v2 = vld [vmem:[%s11048_s7 + $0x850] sm:$0xff] }
 0x3b3   :  { %6044 = vmatprep.subr.bf16.mxu1 %v7234_v54  ;;  %v2890_v37 = vld [vmem:[%s11048_s7 + $0xbd8] sm:$0xff]  ;;  %v7551_v54 = vcombine.low %v2905_v25, %v2921_v24  ;;  %v2716_v24 = vld [vmem:[%s11048_s7 + $0x668] sm:$0xff] }
 0x3b4   :  { %v7522_v56 = vcombine.high %v2874_v52, %v2890_v37  ;;  %v7521_v60 = vcombine.low %v2874_v52, %v2890_v37 }
 0x3b5   :  { %6004 = vmatpush1.bf16.msra.mxu0 %v7231_v57  ;;  %v2857_v57 = vld [vmem:[%s11048_s7 + $0xad0] sm:$0xff] }
 0x3b6   :  { %6045 = vmatpush1.bf16.msra.mxu1 %v7233_v58  ;;  %6005 = vmatprep.subr.bf16.mxu0 %v7200_v29  ;;  %v2842_v58 = vld [vmem:[%s11048_s7 + $0xa58] sm:$0xff]  ;;  %v7488_v62 = vcombine.high %v2841_v39, %v2857_v57 }
 0x3b7   :  { %6046 = vmatprep.subr.bf16.mxu1 %v7202_v59  ;;  %v2858_v29 = vld [vmem:[%s11048_s7 + $0xad8] sm:$0xff]  ;;  %v7519_v59 = vcombine.low %v2873_v61, %v2889_v3  ;;  %v2683_v61 = vld [vmem:[%s11048_s7 + $0x560] sm:$0xff] }
 0x3b8   :  { %v7490_v63 = vcombine.high %v2842_v58, %v2858_v29  ;;  %v7489_v40 = vcombine.low %v2842_v58, %v2858_v29  ;;  %v2699_v3 = vld [vmem:[%s11048_s7 + $0x5e0] sm:$0xff] }
 0x3b9   :  { %6006 = vmatpush1.bf16.msra.mxu0 %v7199_v51  ;;  %v2825_v51 = vld [vmem:[%s11048_s7 + $0x9d0] sm:$0xff] }
 0x3ba   :  { %6047 = vmatpush1.bf16.msra.mxu1 %v7201_v23  ;;  %6007 = vmatprep.subr.bf16.mxu0 %v7168_v35  ;;  %v2810_v23 = vld [vmem:[%s11048_s7 + $0x958] sm:$0xff]  ;;  %v7456_v0 = vcombine.high %v2809_v22, %v2825_v51 }
 0x3bb   :  { %6048 = vmatprep.subr.bf16.mxu1 %v7170_v14  ;;  %v2826_v35 = vld [vmem:[%s11048_s7 + $0x9d8] sm:$0xff]  ;;  %v7487_v14 = vcombine.low %v2841_v39, %v2857_v57  ;;  %v2700_v39 = vld [vmem:[%s11048_s7 + $0x5e8] sm:$0xff] }
 0x3bc   :  { %v7458_v1 = vcombine.high %v2810_v23, %v2826_v35  ;;  %v7457_v8 = vcombine.low %v2810_v23, %v2826_v35 }
 0x3bd   :  { %6008 = vmatpush1.bf16.msra.mxu0 %v7167_v4  ;;  %v2793_v4 = vld [vmem:[%s11048_s7 + $0x8d0] sm:$0xff] }
 0x3be   :  { %6049 = vmatpush1.bf16.msra.mxu1 %v7169_v5  ;;  %6009 = vmatprep.subr.bf16.mxu0 %v7648_v6  ;;  %v2778_v5 = vld [vmem:[%s11048_s7 + $0x858] sm:$0xff]  ;;  %v7424_v9 = vcombine.high %v2777_v2, %v2793_v4 }
 0x3bf   :  { %6050 = vmatprep.subr.bf16.mxu1 %v7650_v7  ;;  %v2794_v6 = vld [vmem:[%s11048_s7 + $0x8d8] sm:$0xff]  ;;  %v7455_v7 = vcombine.low %v2809_v22, %v2825_v51  ;;  %v7332_v22 = vcombine.high %v2683_v61, %v2699_v3 }
 0x3c0   :  { %v7426_v10 = vcombine.high %v2778_v5, %v2794_v6  ;;  %v7425_v19 = vcombine.low %v2778_v5, %v2794_v6 }
 0x3c1   :  { %6010 = vmatpush2.bf16.msra.mxu0 %v7647_v12  ;;  %v2763_v12 = vld [vmem:[%s11048_s7 + $0x7e0] sm:$0xff] }
 0x3c2   :  { %6051 = vmatpush2.bf16.msra.mxu1 %v7649_v13  ;;  %6011 = vmatprep.subr.bf16.mxu0 %v7616_v16  ;;  %v2748_v13 = vld [vmem:[%s11048_s7 + $0x768] sm:$0xff]  ;;  %v7396_v31 = vcombine.high %v2747_v11, %v2763_v12  ;;  %v7395_v25 = vcombine.low %v2747_v11, %v2763_v12 }
 0x3c3   :  { %6052 = vmatprep.subr.bf16.mxu1 %v7618_v18  ;;  %v2764_v16 = vld [vmem:[%s11048_s7 + $0x7e8] sm:$0xff]  ;;  %v7423_v18 = vcombine.low %v2777_v2, %v2793_v4 }
 0x3c4   :  { %v7398_v32 = vcombine.high %v2748_v13, %v2764_v16  ;;  %v2652_v2 = vld [vmem:[%s11048_s7 + $0x468] sm:$0xff] }
 0x3c5   :  { %6012 = vmatpush2.bf16.msra.mxu0 %v7615_v33  ;;  %v10553_v33 = vld [vmem:[%s11052_s9 + $0x8] sm:$0xff] }
 0x3c6   :  { %6053 = vmatpush2.bf16.msra.mxu1 %v7617_v15  ;;  %6013 = vmatprep.subr.bf16.mxu0 %v7584_v41  ;;  %v2715_v15 = vld [vmem:[%s11048_s7 + $0x660] sm:$0xff]  ;;  %v6490_v37 = vrot.slane %v10553_v33, %v9335_v17  ;;  %v6494_v29 = vrot.slane %v10553_v33, %v9344_v20  ;;  %v2668_v4 = vld [vmem:[%s11048_s7 + $0x4e8] sm:$0xff] }
 0x3c7   :  { %6054 = vmatprep.subr.bf16.mxu1 %v7586_v42  ;;  %v2731_v41 = vld [vmem:[%s11048_s7 + $0x6e0] sm:$0xff]  ;;  %v6282_v42 = vrot.slane %v10548_v21, %v9200_v48 }
 0x3c9   :  { %6014 = vmatpush2.bf16.msra.mxu0 %v7583_v44  ;;  %v7397_v44 = vcombine.low %v2748_v13, %v2764_v16 }
 0x3ca   :  { %6055 = vmatpush2.bf16.msra.mxu1 %v7585_v45  ;;  %6015 = vmatprep.subr.bf16.mxu0 %v7552_v46  ;;  %v6482_v45 = vrot.slane %v10553_v33, %v9200_v48  ;;  %v6286_v46 = vrot.slane %v10548_v21, %v9211_v53 }
 0x3cb   :  { %6056 = vmatprep.subr.bf16.mxu1 %v7554_v47  ;;  %v7364_v47 = vcombine.high %v2715_v15, %v2731_v41 }
 0x3cd   :  { %6016 = vmatpush2.bf16.msra.mxu0 %v7551_v54  ;;  %v6486_v54 = vrot.slane %v10553_v33, %v9211_v53 }
 0x3ce   :  { %6057 = vmatpush2.bf16.msra.mxu1 %v7553_v55  ;;  %6017 = vmatprep.subr.bf16.mxu0 %v7520_v50  ;;  %v6294_v55 = vrot.slane %v10548_v21, %v9344_v20  ;;  %v7366_v50 = vcombine.high %v2716_v24, %v2732_v43 }
 0x3cf   :  { %6058 = vmatprep.subr.bf16.mxu1 %v7522_v56  ;;  %v2684_v56 = vld [vmem:[%s11048_s7 + $0x568] sm:$0xff] }
 0x3d0   :  { %v7334_v35 = vcombine.high %v2684_v56, %v2700_v39 }
 0x3d1   :  { %6018 = vmatpush2.bf16.msra.mxu0 %v7519_v59  ;;  %v7363_v59 = vcombine.low %v2715_v15, %v2731_v41  ;;  %v2620_v41 = vld [vmem:[%s11048_s7 + $0x368] sm:$0xff] }
 0x3d2   :  { %6059 = vmatpush2.bf16.msra.mxu1 %v7521_v60  ;;  %6019 = vmatprep.subr.bf16.mxu0 %v7488_v62 }
 0x3d3   :  { %6060 = vmatprep.subr.bf16.mxu1 %v7490_v63  ;;  %v7365_v63 = vcombine.low %v2716_v24, %v2732_v43 }
 0x3d5   :  { %6020 = vmatpush2.bf16.msra.mxu0 %v7487_v14  ;;  %v2651_v14 = vld [vmem:[%s11048_s7 + $0x460] sm:$0xff] }
 0x3d6   :  { %6061 = vmatpush2.bf16.msra.mxu1 %v7489_v40  ;;  %6021 = vmatprep.subr.bf16.mxu0 %v7456_v0  ;;  %v2667_v40 = vld [vmem:[%s11048_s7 + $0x4e0] sm:$0xff] }
 0x3d7   :  { %6062 = vmatprep.subr.bf16.mxu1 %v7458_v1  ;;  %v7300_v13 = vcombine.high %v2651_v14, %v2667_v40  ;;  %v7299_v24 = vcombine.low %v2651_v14, %v2667_v40 }
 0x3d9   :  { %6022 = vmatpush2.bf16.msra.mxu0 %v7455_v7 }
 0x3da   :  { %6063 = vmatpush2.bf16.msra.mxu1 %v7457_v8  ;;  %6023 = vmatprep.subr.bf16.mxu0 %v7424_v9  ;;  %v7331_v8 = vcombine.low %v2683_v61, %v2699_v3  ;;  %v7333_v9 = vcombine.low %v2684_v56, %v2700_v39  ;;  %v2588_v3 = vld [vmem:[%s11048_s7 + $0x268] sm:$0xff]  ;;  %v2555_v56 = vld [vmem:[%s11048_s7 + $0x160] sm:$0xff] }
 0x3db   :  { %6064 = vmatprep.subr.bf16.mxu1 %v7426_v10  ;;  %v2571_v39 = vld [vmem:[%s11048_s7 + $0x1e0] sm:$0xff] }
 0x3dd   :  { %6024 = vmatpush2.bf16.msra.mxu0 %v7423_v18 }
 0x3de   :  { %6065 = vmatpush2.bf16.msra.mxu1 %v7425_v19  ;;  %6075 = vmatprep.subr.bf16.mxu0 %v7396_v31  ;;  %v7302_v19 = vcombine.high %v2652_v2, %v2668_v4  ;;  %v2619_v31 = vld [vmem:[%s11048_s7 + $0x360] sm:$0xff] }
 0x3df   :  { %6116 = vmatprep.subr.bf16.mxu1 %v7398_v32  ;;  %v2635_v32 = vld [vmem:[%s11048_s7 + $0x3e0] sm:$0xff] }
 0x3e0   :  { %v5781_v52 = vpop.f32.mrf.mxu0  ;;  %6026 = vmatmul.mubr.bf16.vlgmr.msra.gmra.mxu0 %v9509_v36 }
 0x3e1   :  { %v6415_v57 = vmul.f32 %v6282_v42, %v5781_v52  ;;  %v5822_v58 = vpop.f32.mrf.mxu1  ;;  %6067 = vmatmul.mubr.bf16.vlgmr.msra.gmra.mxu1 %v9509_v36  ;;  %6076 = vmatpush1.bf16.msra.mxu0 %v7395_v25  ;;  %v2636_v42 = vld [vmem:[%s11048_s7 + $0x3e8] sm:$0xff] }
 0x3e2   :  { %v6417_v60 = vmul.f32 %v6290_v26, %v5822_v58  ;;  %6107 = vmatprep.mubr.bf16.mxu0 %v9507_v28  ;;  %6117 = vmatpush1.bf16.msra.mxu1 %v7397_v44  ;;  %v5783_v62 = vpop.f32.mrf.mxu0  ;;  %v7301_v26 = vcombine.low %v2652_v2, %v2668_v4  ;;  %v7268_v44 = vcombine.high %v2619_v31, %v2635_v32  ;;  %v2604_v52 = vld [vmem:[%s11048_s7 + $0x2e8] sm:$0xff]  ;;  %v3019_v2 = vld [vmem:[%s11048_s7 + $0xfe0] sm:$0xff] }
 0x3e3   :  { %6148 = vmatprep.mubr.bf16.mxu1 %v9507_v28  ;;  %v6416_v51 = vmul.f32 %v6286_v46, %v5783_v62  ;;  %v5824_v23 = vpop.f32.mrf.mxu1  ;;  %6077 = vmatprep.subr.bf16.mxu0 %v7364_v47  ;;  %v6615_v5 = vadd.f32 %v6482_v45, %v6415_v57  ;;  %v7270_v45 = vcombine.high %v2620_v41, %v2636_v42  ;;  %v2587_v46 = vld [vmem:[%s11048_s7 + $0x260] sm:$0xff]  ;;  %v2556_v57 = vld [vmem:[%s11048_s7 + $0x168] sm:$0xff] }
 0x3e4   :  { %v6418_v0 = vmul.f32 %v6294_v55, %v5824_v23  ;;  %v5785_v1 = vpop.f32.mrf.mxu0  ;;  %6118 = vmatprep.subr.bf16.mxu1 %v7366_v50  ;;  %v6617_v10 = vadd.f32 %v6490_v37, %v6417_v60  ;;  %v2603_v47 = vld [vmem:[%s11048_s7 + $0x2e0] sm:$0xff]  ;;  %v7267_v37 = vcombine.low %v2619_v31, %v2635_v32  ;;  %v7238_v50 = vcombine.high %v2588_v3, %v2604_v52  ;;  %v2572_v58 = vld [vmem:[%s11048_s7 + $0x1e8] sm:$0xff] }
 0x3e5   :  { %v6616_v6 = vadd.f32 %v6486_v54, %v6416_v51  ;;  %v5826_v7 = vpop.f32.mrf.mxu1  ;;  %6078 = vmatpush1.bf16.msra.mxu0 %v7363_v59  ;;  %v7269_v54 = vcombine.low %v2620_v41, %v2636_v42  ;;  %v7236_v55 = vcombine.high %v2587_v46, %v2603_v47  ;;  %v7237_v59 = vcombine.low %v2588_v3, %v2604_v52  ;;  %v2524_v51 = vld [vmem:[%s11048_s7 + $0x68] sm:$0xff]  ;;  %v3003_v1 = vld [vmem:[%s11048_s7 + $0xf60] sm:$0xff] }
 0x3e6   :  { %v6618_v11 = vadd.f32 %v6494_v29, %v6418_v0  ;;  %6119 = vmatpush1.bf16.msra.mxu1 %v7365_v63  ;;  %v5786_v12 = vpop.f32.mrf.mxu0  ;;  %6079 = vmatprep.subr.bf16.mxu0 %v7332_v22  ;;  %v7235_v29 = vcombine.low %v2587_v46, %v2603_v47  ;;  %v7204_v60 = vcombine.high %v2555_v56, %v2571_v39  ;;  %v2523_v63 = vld [vmem:[%s11048_s7 + $0x60] sm:$0xff]  ;;  %v2540_v23 = vld [vmem:[%s11048_s7 + $0xe8] sm:$0xff] }
 0x3e7   :  { %v6705_v16 = vcombine.low %v6615_v5, %v6616_v6  ;;  %v5827_v18 = vpop.f32.mrf.mxu1  ;;  %6120 = vmatprep.subr.bf16.mxu1 %v7334_v35  ;;  %v7206_v62 = vcombine.high %v2556_v57, %v2572_v58  ;;  %v2539_v22 = vld [vmem:[%s11048_s7 + $0xe0] sm:$0xff]  ;;  %v7203_v35 = vcombine.low %v2555_v56, %v2571_v39  ;;  %v7205_v14 = vcombine.low %v2556_v57, %v2572_v58  ;;  %v3004_v4 = vld [vmem:[%s11048_s7 + $0xf68] sm:$0xff] }
 0x3e8   :  { %v6706_v15 = vcombine.low %v6617_v10, %v6618_v11  ;;  %v7172_v40 = vcombine.high %v2523_v63, %v2539_v22  ;;  %v7174_v0 = vcombine.high %v2524_v51, %v2540_v23  ;;  %v3020_v5 = vld [vmem:[%s11048_s7 + $0xfe8] sm:$0xff]  ;;  %v7171_v6 = vcombine.low %v2523_v63, %v2539_v22  ;;  %v2971_v10 = vld [vmem:[%s11048_s7 + $0xe60] sm:$0xff] }
 0x3e9   :  { %v6713_v25 = vrot.slane %v6705_v16, %v8333_v49  ;;  %6080 = vmatpush1.bf16.msra.mxu0 %v7331_v8  ;;  %v7173_v7 = vcombine.low %v2524_v51, %v2540_v23  ;;  %v7652_v8 = vcombine.high %v3003_v1, %v3019_v2  ;;  %v2987_v11 = vld [vmem:[%s11048_s7 + $0xee0] sm:$0xff]  ;;  %v2972_v12 = vld [vmem:[%s11048_s7 + $0xe68] sm:$0xff]  ;;  %v7651_v16 = vcombine.low %v3003_v1, %v3019_v2 }
 0x3ea   :  { %v6720_v43 = vrot.slane %v6706_v15, %v8333_v49  ;;  %6121 = vmatpush1.bf16.msra.mxu1 %v7333_v9  ;;  %6081 = vmatprep.subr.bf16.mxu0 %v7300_v13  ;;  %v7654_v9 = vcombine.high %v3004_v4, %v3020_v5  ;;  %v2988_v13 = vld [vmem:[%s11048_s7 + $0xee8] sm:$0xff]  ;;  %v7653_v18 = vcombine.low %v3004_v4, %v3020_v5  ;;  %v2939_v32 = vld [vmem:[%s11048_s7 + $0xd60] sm:$0xff] }
 0x3eb   :  { %6122 = vmatprep.subr.bf16.mxu1 %v7302_v19  ;;  %v7620_v19 = vcombine.high %v2971_v10, %v2987_v11  ;;  %v7622_v31 = vcombine.high %v2972_v12, %v2988_v13  ;;  %v2955_v15 = vld [vmem:[%s11048_s7 + $0xde0] sm:$0xff]  ;;  %v2940_v41 = vld [vmem:[%s11048_s7 + $0xd68] sm:$0xff] }
 0x3ec   :  { %v6721_v61 = vcombine.low %v6713_v25, %v6720_v43  ;;  %v2956_v42 = vld [vmem:[%s11048_s7 + $0xde8] sm:$0xff]  ;;  %v7619_v25 = vcombine.low %v2971_v10, %v2987_v11  ;;  %v7588_v43 = vcombine.high %v2939_v32, %v2955_v15 }
 0x3ed   :  { %6082 = vmatpush1.bf16.msra.mxu0 %v7299_v24  ;;  %v7621_v24 = vcombine.low %v2972_v12, %v2988_v13  ;;  %v2908_v46 = vld [vmem:[%s11048_s7 + $0xc68] sm:$0xff]  ;;  %v7589_v3 = vcombine.low %v2940_v41, %v2956_v42 }
 0x3ee   :  { %6817 = vst [vmem:[%s11053_s10 + $0x10] sm:$0xff] %v6721_v61  ;;  %6123 = vmatpush1.bf16.msra.mxu1 %v7301_v26  ;;  %6083 = vmatprep.subr.bf16.mxu0 %v7268_v44  ;;  %v7590_v26 = vcombine.high %v2940_v41, %v2956_v42  ;;  %v2907_v44 = vld [vmem:[%s11048_s7 + $0xc60] sm:$0xff]  ;;  %v2924_v47 = vld [vmem:[%s11048_s7 + $0xce8] sm:$0xff]  ;;  %v7587_v61 = vcombine.low %v2939_v32, %v2955_v15  ;;  %v2766_v32 = vld [vmem:[%s11048_s7 + $0x7f8] sm:$0xff] }
 0x3ef   :  { %6124 = vmatprep.subr.bf16.mxu1 %v7270_v45  ;;  %v2923_v45 = vld [vmem:[%s11048_s7 + $0xce0] sm:$0xff]  ;;  %v2892_v56 = vld [vmem:[%s11048_s7 + $0xbe8] sm:$0xff]  ;;  %v7557_v57 = vcombine.low %v2908_v46, %v2924_v47 }
 0x3f0   :  { %v7556_v52 = vcombine.high %v2907_v44, %v2923_v45  ;;  %v7555_v39 = vcombine.low %v2907_v44, %v2923_v45  ;;  %v2860_v63 = vld [vmem:[%s11048_s7 + $0xae8] sm:$0xff]  ;;  %v2718_v45 = vld [vmem:[%s11048_s7 + $0x678] sm:$0xff] }
 0x3f1   :  { %6084 = vmatpush1.bf16.msra.mxu0 %v7267_v37  ;;  %v7558_v37 = vcombine.high %v2908_v46, %v2924_v47  ;;  %v2828_v1 = vld [vmem:[%s11048_s7 + $0x9e8] sm:$0xff]  ;;  %v2734_v46 = vld [vmem:[%s11048_s7 + $0x6f8] sm:$0xff]  ;;  %v6306_v47 = vrot.slane %v10548_v21, %v10320_v30 }
 0x3f2   :  { %6125 = vmatpush1.bf16.msra.mxu1 %v7269_v54  ;;  %6085 = vmatprep.subr.bf16.mxu0 %v7236_v55  ;;  %v2875_v54 = vld [vmem:[%s11048_s7 + $0xb60] sm:$0xff]  ;;  %v2796_v10 = vld [vmem:[%s11048_s7 + $0x8e8] sm:$0xff] }
 0x3f3   :  { %6126 = vmatprep.subr.bf16.mxu1 %v7238_v50  ;;  %v2891_v55 = vld [vmem:[%s11048_s7 + $0xbe0] sm:$0xff]  ;;  %v2876_v50 = vld [vmem:[%s11048_s7 + $0xb68] sm:$0xff] }
 0x3f4   :  { %v7524_v58 = vcombine.high %v2875_v54, %v2891_v55  ;;  %v7523_v22 = vcombine.low %v2875_v54, %v2891_v55  ;;  %v7525_v51 = vcombine.low %v2876_v50, %v2892_v56  ;;  %v2685_v54 = vld [vmem:[%s11048_s7 + $0x570] sm:$0xff] }
 0x3f5   :  { %6086 = vmatpush1.bf16.msra.mxu0 %v7235_v29  ;;  %v7526_v29 = vcombine.high %v2876_v50, %v2892_v56  ;;  %v2701_v55 = vld [vmem:[%s11048_s7 + $0x5f0] sm:$0xff]  ;;  %v6506_v56 = vrot.slane %v10553_v33, %v10320_v30 }
 0x3f6   :  { %6127 = vmatpush1.bf16.msra.mxu1 %v7237_v59  ;;  %6087 = vmatprep.subr.bf16.mxu0 %v7204_v60  ;;  %v2843_v59 = vld [vmem:[%s11048_s7 + $0xa60] sm:$0xff] }
 0x3f7   :  { %6128 = vmatprep.subr.bf16.mxu1 %v7206_v62  ;;  %v2859_v60 = vld [vmem:[%s11048_s7 + $0xae0] sm:$0xff]  ;;  %v2844_v62 = vld [vmem:[%s11048_s7 + $0xa68] sm:$0xff] }
 0x3f8   :  { %v7492_v23 = vcombine.high %v2843_v59, %v2859_v60  ;;  %v7491_v2 = vcombine.low %v2843_v59, %v2859_v60  ;;  %v7493_v4 = vcombine.low %v2844_v62, %v2860_v63  ;;  %v2702_v59 = vld [vmem:[%s11048_s7 + $0x5f8] sm:$0xff] }
 0x3f9   :  { %6088 = vmatpush1.bf16.msra.mxu0 %v7203_v35  ;;  %v7494_v35 = vcombine.high %v2844_v62, %v2860_v63  ;;  %v6510_v63 = vrot.slane %v10553_v33, %v10326_v38 }
 0x3fa   :  { %6129 = vmatpush1.bf16.msra.mxu1 %v7205_v14  ;;  %6089 = vmatprep.subr.bf16.mxu0 %v7172_v40  ;;  %v2811_v14 = vld [vmem:[%s11048_s7 + $0x960] sm:$0xff] }
 0x3fb   :  { %6130 = vmatprep.subr.bf16.mxu1 %v7174_v0  ;;  %v2827_v40 = vld [vmem:[%s11048_s7 + $0x9e0] sm:$0xff]  ;;  %v2812_v0 = vld [vmem:[%s11048_s7 + $0x968] sm:$0xff] }
 0x3fc   :  { %v7460_v5 = vcombine.high %v2811_v14, %v2827_v40  ;;  %v7459_v11 = vcombine.low %v2811_v14, %v2827_v40  ;;  %v7461_v12 = vcombine.low %v2812_v0, %v2828_v1 }
 0x3fd   :  { %6090 = vmatpush1.bf16.msra.mxu0 %v7171_v6  ;;  %v7462_v6 = vcombine.high %v2812_v0, %v2828_v1 }
 0x3fe   :  { %6131 = vmatpush1.bf16.msra.mxu1 %v7173_v7  ;;  %6091 = vmatprep.subr.bf16.mxu0 %v7652_v8  ;;  %v2779_v7 = vld [vmem:[%s11048_s7 + $0x860] sm:$0xff] }
 0x3ff   :  { %6132 = vmatprep.subr.bf16.mxu1 %v7654_v9  ;;  %v2795_v8 = vld [vmem:[%s11048_s7 + $0x8e0] sm:$0xff]  ;;  %v2780_v9 = vld [vmem:[%s11048_s7 + $0x868] sm:$0xff] }
 0x400   :  { %v7428_v13 = vcombine.high %v2779_v7, %v2795_v8  ;;  %v7427_v15 = vcombine.low %v2779_v7, %v2795_v8  ;;  %v7429_v41 = vcombine.low %v2780_v9, %v2796_v10  ;;  %v2670_v7 = vld [vmem:[%s11048_s7 + $0x4f8] sm:$0xff] }
 0x401   :  { %6092 = vmatpush2.bf16.msra.mxu0 %v7651_v16  ;;  %v7430_v16 = vcombine.high %v2780_v9, %v2796_v10  ;;  %v7335_v10 = vcombine.low %v2685_v54, %v2701_v55 }
 0x402   :  { %6133 = vmatpush2.bf16.msra.mxu1 %v7653_v18  ;;  %6093 = vmatprep.subr.bf16.mxu0 %v7620_v19  ;;  %v2749_v18 = vld [vmem:[%s11048_s7 + $0x770] sm:$0xff] }
 0x403   :  { %6134 = vmatprep.subr.bf16.mxu1 %v7622_v31  ;;  %v2765_v19 = vld [vmem:[%s11048_s7 + $0x7f0] sm:$0xff]  ;;  %v2750_v31 = vld [vmem:[%s11048_s7 + $0x778] sm:$0xff] }
 0x404   :  { %v7400_v42 = vcombine.high %v2749_v18, %v2765_v19  ;;  %v7399_v44 = vcombine.low %v2749_v18, %v2765_v19 }
 0x405   :  { %6094 = vmatpush2.bf16.msra.mxu0 %v7619_v25  ;;  %v7402_v25 = vcombine.high %v2750_v31, %v2766_v32 }
 0x406   :  { %6135 = vmatpush2.bf16.msra.mxu1 %v7621_v24  ;;  %6095 = vmatprep.subr.bf16.mxu0 %v7588_v43  ;;  %v2717_v24 = vld [vmem:[%s11048_s7 + $0x670] sm:$0xff] }
 0x407   :  { %6136 = vmatprep.subr.bf16.mxu1 %v7590_v26  ;;  %v2733_v43 = vld [vmem:[%s11048_s7 + $0x6f0] sm:$0xff]  ;;  %v6298_v26 = vrot.slane %v10548_v21, %v10317_v27 }
 0x409   :  { %6096 = vmatpush2.bf16.msra.mxu0 %v7587_v61  ;;  %v7401_v61 = vcombine.low %v2750_v31, %v2766_v32  ;;  %v2621_v32 = vld [vmem:[%s11048_s7 + $0x370] sm:$0xff] }
 0x40a   :  { %6137 = vmatpush2.bf16.msra.mxu1 %v7589_v3  ;;  %6097 = vmatprep.subr.bf16.mxu0 %v7556_v52  ;;  %v6498_v3 = vrot.slane %v10553_v33, %v10317_v27  ;;  %v6302_v52 = vrot.slane %v10548_v21, %v10323_v34 }
 0x40b   :  { %6138 = vmatprep.subr.bf16.mxu1 %v7558_v37  ;;  %v7368_v37 = vcombine.high %v2717_v24, %v2733_v43 }
 0x40d   :  { %6098 = vmatpush2.bf16.msra.mxu0 %v7555_v39  ;;  %v6502_v39 = vrot.slane %v10553_v33, %v10323_v34  ;;  %v2669_v33 = vld [vmem:[%s11048_s7 + $0x4f0] sm:$0xff] }
 0x40e   :  { %6139 = vmatpush2.bf16.msra.mxu1 %v7557_v57  ;;  %6099 = vmatprep.subr.bf16.mxu0 %v7524_v58  ;;  %v6310_v57 = vrot.slane %v10548_v21, %v10326_v38  ;;  %v7370_v58 = vcombine.high %v2718_v45, %v2734_v46 }
 0x40f   :  { %6140 = vmatprep.subr.bf16.mxu1 %v7526_v29  ;;  %v2686_v29 = vld [vmem:[%s11048_s7 + $0x578] sm:$0xff] }
 0x410   :  { %v7338_v1 = vcombine.high %v2686_v29, %v2702_v59 }
 0x411   :  { %6100 = vmatpush2.bf16.msra.mxu0 %v7523_v22  ;;  %v7367_v22 = vcombine.low %v2717_v24, %v2733_v43 }
 0x412   :  { %6141 = vmatpush2.bf16.msra.mxu1 %v7525_v51  ;;  %6101 = vmatprep.subr.bf16.mxu0 %v7492_v23  ;;  %v7369_v23 = vcombine.low %v2718_v45, %v2734_v46 }
 0x413   :  { %6142 = vmatprep.subr.bf16.mxu1 %v7494_v35  ;;  %v7336_v35 = vcombine.high %v2685_v54, %v2701_v55 }
 0x415   :  { %6102 = vmatpush2.bf16.msra.mxu0 %v7491_v2  ;;  %v2653_v2 = vld [vmem:[%s11048_s7 + $0x470] sm:$0xff] }
 0x416   :  { %6143 = vmatpush2.bf16.msra.mxu1 %v7493_v4  ;;  %6103 = vmatprep.subr.bf16.mxu0 %v7460_v5  ;;  %v7303_v43 = vcombine.low %v2653_v2, %v2669_v33 }
 0x417   :  { %6144 = vmatprep.subr.bf16.mxu1 %v7462_v6 }
 0x419   :  { %6104 = vmatpush2.bf16.msra.mxu0 %v7459_v11 }
 0x41a   :  { %6145 = vmatpush2.bf16.msra.mxu1 %v7461_v12  ;;  %6105 = vmatprep.subr.bf16.mxu0 %v7428_v13  ;;  %v7337_v13 = vcombine.low %v2686_v29, %v2702_v59  ;;  %v2574_v29 = vld [vmem:[%s11048_s7 + $0x1f8] sm:$0xff] }
 0x41b   :  { %6146 = vmatprep.subr.bf16.mxu1 %v7430_v16  ;;  %v7304_v16 = vcombine.high %v2653_v2, %v2669_v33  ;;  %v3021_v2 = vld [vmem:[%s11048_s7 + $0xff0] sm:$0xff]  ;;  %v3006_v33 = vld [vmem:[%s11048_s7 + $0xf78] sm:$0xff] }
 0x41d   :  { %6106 = vmatpush2.bf16.msra.mxu0 %v7427_v15  ;;  %v2637_v15 = vld [vmem:[%s11048_s7 + $0x3f0] sm:$0xff] }
 0x41e   :  { %6147 = vmatpush2.bf16.msra.mxu1 %v7429_v41  ;;  %6157 = vmatprep.subr.bf16.mxu0 %v7400_v42  ;;  %v2622_v42 = vld [vmem:[%s11048_s7 + $0x378] sm:$0xff]  ;;  %v7272_v45 = vcombine.high %v2621_v32, %v2637_v15  ;;  %v7271_v54 = vcombine.low %v2621_v32, %v2637_v15 }
 0x41f   :  { %6198 = vmatprep.subr.bf16.mxu1 %v7402_v25  ;;  %v2638_v25 = vld [vmem:[%s11048_s7 + $0x3f8] sm:$0xff] }
 0x420   :  { %v5863_v50 = vpop.f32.mrf.mxu0  ;;  %6108 = vmatmul.mubr.bf16.vlgmr.msra.gmra.mxu0 %v9509_v36  ;;  %v7274_v46 = vcombine.high %v2622_v42, %v2638_v25  ;;  %v7273_v55 = vcombine.low %v2622_v42, %v2638_v25  ;;  %v2942_v32 = vld [vmem:[%s11048_s7 + $0xd78] sm:$0xff] }
 0x421   :  { %v6419_v60 = vmul.f32 %v6298_v26, %v5863_v50  ;;  %v5904_v62 = vpop.f32.mrf.mxu1  ;;  %6149 = vmatmul.mubr.bf16.vlgmr.msra.gmra.mxu1 %v9509_v36  ;;  %6158 = vmatpush1.bf16.msra.mxu0 %v7399_v44  ;;  %v2958_v15 = vld [vmem:[%s11048_s7 + $0xdf8] sm:$0xff] }
 0x422   :  { %v6421_v51 = vmul.f32 %v6306_v47, %v5904_v62  ;;  %6189 = vmatprep.mubr.bf16.mxu0 %v9507_v28  ;;  %6199 = vmatpush1.bf16.msra.mxu1 %v7401_v61  ;;  %v5865_v21 = vpop.f32.mrf.mxu0  ;;  %v2589_v47 = vld [vmem:[%s11048_s7 + $0x270] sm:$0xff] }
 0x423   :  { %v6619_v14 = vadd.f32 %v6498_v3, %v6419_v60  ;;  %6230 = vmatprep.mubr.bf16.mxu1 %v9507_v28  ;;  %v6420_v40 = vmul.f32 %v6302_v52, %v5865_v21  ;;  %v5906_v0 = vpop.f32.mrf.mxu1  ;;  %6159 = vmatprep.subr.bf16.mxu0 %v7368_v37  ;;  %v2654_v28 = vld [vmem:[%s11048_s7 + $0x478] sm:$0xff]  ;;  %v2605_v61 = vld [vmem:[%s11048_s7 + $0x2f0] sm:$0xff] }
 0x424   :  { %v6621_v4 = vadd.f32 %v6506_v56, %v6421_v51  ;;  %v6422_v5 = vmul.f32 %v6310_v57, %v5906_v0  ;;  %v5867_v6 = vpop.f32.mrf.mxu0  ;;  %6200 = vmatprep.subr.bf16.mxu1 %v7370_v58  ;;  %v7306_v31 = vcombine.high %v2654_v28, %v2670_v7  ;;  %v7305_v44 = vcombine.low %v2654_v28, %v2670_v7  ;;  %v2590_v52 = vld [vmem:[%s11048_s7 + $0x278] sm:$0xff]  ;;  %v2573_v57 = vld [vmem:[%s11048_s7 + $0x1f0] sm:$0xff] }
 0x425   :  { %v6620_v8 = vadd.f32 %v6502_v39, %v6420_v40  ;;  %v5908_v9 = vpop.f32.mrf.mxu1  ;;  %6160 = vmatpush1.bf16.msra.mxu0 %v7367_v22  ;;  %v2606_v37 = vld [vmem:[%s11048_s7 + $0x2f8] sm:$0xff]  ;;  %v7240_v50 = vcombine.high %v2589_v47, %v2605_v61  ;;  %v2557_v39 = vld [vmem:[%s11048_s7 + $0x170] sm:$0xff]  ;;  %v7239_v59 = vcombine.low %v2589_v47, %v2605_v61  ;;  %v7593_v47 = vcombine.low %v2942_v32, %v2958_v15 }
 0x426   :  { %v6622_v11 = vadd.f32 %v6510_v63, %v6422_v5  ;;  %6201 = vmatpush1.bf16.msra.mxu1 %v7369_v23  ;;  %v5868_v12 = vpop.f32.mrf.mxu0  ;;  %6161 = vmatprep.subr.bf16.mxu0 %v7336_v35  ;;  %v7242_v56 = vcombine.high %v2590_v52, %v2606_v37  ;;  %v2558_v58 = vld [vmem:[%s11048_s7 + $0x178] sm:$0xff]  ;;  %v7241_v60 = vcombine.low %v2590_v52, %v2606_v37  ;;  %v2525_v22 = vld [vmem:[%s11048_s7 + $0x70] sm:$0xff] }
 0x427   :  { %v6722_v18 = vcombine.low %v6619_v14, %v6620_v8  ;;  %v5909_v19 = vpop.f32.mrf.mxu1  ;;  %6202 = vmatprep.subr.bf16.mxu1 %v7338_v1  ;;  %v7208_v62 = vcombine.high %v2557_v39, %v2573_v57  ;;  %v7210_v63 = vcombine.high %v2558_v58, %v2574_v29  ;;  %v2541_v51 = vld [vmem:[%s11048_s7 + $0xf0] sm:$0xff]  ;;  %v2526_v21 = vld [vmem:[%s11048_s7 + $0x78] sm:$0xff]  ;;  %v7207_v35 = vcombine.low %v2557_v39, %v2573_v57 }
 0x428   :  { %v6723_v41 = vcombine.low %v6621_v4, %v6622_v11  ;;  %v2542_v23 = vld [vmem:[%s11048_s7 + $0xf8] sm:$0xff]  ;;  %v7209_v14 = vcombine.low %v2558_v58, %v2574_v29  ;;  %v7176_v40 = vcombine.high %v2525_v22, %v2541_v51  ;;  %v3005_v1 = vld [vmem:[%s11048_s7 + $0xf70] sm:$0xff]  ;;  %v7175_v5 = vcombine.low %v2525_v22, %v2541_v51 }
 0x429   :  { %v6730_v24 = vrot.slane %v6722_v18, %v8333_v49  ;;  %6162 = vmatpush1.bf16.msra.mxu0 %v7335_v10  ;;  %v7178_v0 = vcombine.high %v2526_v21, %v2542_v23  ;;  %v3022_v4 = vld [vmem:[%s11048_s7 + $0xff8] sm:$0xff]  ;;  %v7177_v6 = vcombine.low %v2526_v21, %v2542_v23  ;;  %v7656_v28 = vcombine.high %v3005_v1, %v3021_v2  ;;  %v2973_v8 = vld [vmem:[%s11048_s7 + $0xe70] sm:$0xff] }
 0x42a   :  { %v6737_v26 = vrot.slane %v6723_v41, %v8333_v49  ;;  %6203 = vmatpush1.bf16.msra.mxu1 %v7337_v13  ;;  %6163 = vmatprep.subr.bf16.mxu0 %v7304_v16  ;;  %v7658_v7 = vcombine.high %v3006_v33, %v3022_v4  ;;  %v2989_v9 = vld [vmem:[%s11048_s7 + $0xef0] sm:$0xff]  ;;  %v2974_v10 = vld [vmem:[%s11048_s7 + $0xe78] sm:$0xff]  ;;  %v7655_v12 = vcombine.low %v3005_v1, %v3021_v2 }
 0x42b   :  { %6204 = vmatprep.subr.bf16.mxu1 %v7306_v31  ;;  %v2990_v11 = vld [vmem:[%s11048_s7 + $0xef8] sm:$0xff]  ;;  %v7657_v13 = vcombine.low %v3006_v33, %v3022_v4  ;;  %v7624_v16 = vcombine.high %v2973_v8, %v2989_v9  ;;  %v2941_v19 = vld [vmem:[%s11048_s7 + $0xd70] sm:$0xff]  ;;  %v7623_v41 = vcombine.low %v2973_v8, %v2989_v9 }
 0x42c   :  { %v6738_v3 = vcombine.low %v6730_v24, %v6737_v26  ;;  %v7626_v18 = vcombine.high %v2974_v10, %v2990_v11  ;;  %v2957_v31 = vld [vmem:[%s11048_s7 + $0xdf0] sm:$0xff]  ;;  %v7625_v42 = vcombine.low %v2974_v10, %v2990_v11  ;;  %v7594_v24 = vcombine.high %v2942_v32, %v2958_v15 }
 0x42d   :  { %6164 = vmatpush1.bf16.msra.mxu0 %v7303_v43  ;;  %v7592_v25 = vcombine.high %v2941_v19, %v2957_v31  ;;  %v2909_v43 = vld [vmem:[%s11048_s7 + $0xc70] sm:$0xff] }
 0x42e   :  { %6818 = vst [vmem:[%s11053_s10 + $0x18] sm:$0xff] %v6738_v3  ;;  %6205 = vmatpush1.bf16.msra.mxu1 %v7305_v44  ;;  %6165 = vmatprep.subr.bf16.mxu0 %v7272_v45  ;;  %v2925_v26 = vld [vmem:[%s11048_s7 + $0xcf0] sm:$0xff]  ;;  %v2910_v44 = vld [vmem:[%s11048_s7 + $0xc78] sm:$0xff] }
 0x42f   :  { %6206 = vmatprep.subr.bf16.mxu1 %v7274_v46  ;;  %v2926_v45 = vld [vmem:[%s11048_s7 + $0xcf8] sm:$0xff]  ;;  %v7591_v46 = vcombine.low %v2941_v19, %v2957_v31  ;;  %v7560_v61 = vcombine.high %v2909_v43, %v2925_v26  ;;  %v2877_v52 = vld [vmem:[%s11048_s7 + $0xb70] sm:$0xff] }
 0x430   :  { %v7562_v3 = vcombine.high %v2910_v44, %v2926_v45  ;;  %v2893_v37 = vld [vmem:[%s11048_s7 + $0xbf0] sm:$0xff] }
 0x431   :  { %6166 = vmatpush1.bf16.msra.mxu0 %v7271_v54  ;;  %v2878_v54 = vld [vmem:[%s11048_s7 + $0xb78] sm:$0xff]  ;;  %v7528_v39 = vcombine.high %v2877_v52, %v2893_v37  ;;  %v2845_v58 = vld [vmem:[%s11048_s7 + $0xa70] sm:$0xff] }
 0x432   :  { %6207 = vmatpush1.bf16.msra.mxu1 %v7273_v55  ;;  %6167 = vmatprep.subr.bf16.mxu0 %v7240_v50  ;;  %v2894_v55 = vld [vmem:[%s11048_s7 + $0xbf8] sm:$0xff]  ;;  %v7559_v50 = vcombine.low %v2909_v43, %v2925_v26  ;;  %v2861_v29 = vld [vmem:[%s11048_s7 + $0xaf0] sm:$0xff] }
 0x433   :  { %6208 = vmatprep.subr.bf16.mxu1 %v7242_v56  ;;  %v7561_v56 = vcombine.low %v2910_v44, %v2926_v45  ;;  %v7530_v57 = vcombine.high %v2878_v54, %v2894_v55  ;;  %v7496_v22 = vcombine.high %v2845_v58, %v2861_v29  ;;  %v2813_v21 = vld [vmem:[%s11048_s7 + $0x970] sm:$0xff] }
 0x434   :  { %v2829_v23 = vld [vmem:[%s11048_s7 + $0x9f0] sm:$0xff] }
 0x435   :  { %6168 = vmatpush1.bf16.msra.mxu0 %v7239_v59  ;;  %v2846_v59 = vld [vmem:[%s11048_s7 + $0xa78] sm:$0xff]  ;;  %v7464_v1 = vcombine.high %v2813_v21, %v2829_v23  ;;  %v2781_v33 = vld [vmem:[%s11048_s7 + $0x870] sm:$0xff] }
 0x436   :  { %6209 = vmatpush1.bf16.msra.mxu1 %v7241_v60  ;;  %6169 = vmatprep.subr.bf16.mxu0 %v7208_v62  ;;  %v2862_v60 = vld [vmem:[%s11048_s7 + $0xaf8] sm:$0xff]  ;;  %v7527_v62 = vcombine.low %v2877_v52, %v2893_v37  ;;  %v2797_v4 = vld [vmem:[%s11048_s7 + $0x8f0] sm:$0xff] }
 0x437   :  { %6210 = vmatprep.subr.bf16.mxu1 %v7210_v63  ;;  %v7529_v63 = vcombine.low %v2878_v54, %v2894_v55  ;;  %v7498_v51 = vcombine.high %v2846_v59, %v2862_v60  ;;  %v7432_v8 = vcombine.high %v2781_v33, %v2797_v4  ;;  %v7431_v10 = vcombine.low %v2781_v33, %v2797_v4 }
 0x439   :  { %6170 = vmatpush1.bf16.msra.mxu0 %v7207_v35  ;;  %v2814_v35 = vld [vmem:[%s11048_s7 + $0x978] sm:$0xff] }
 0x43a   :  { %6211 = vmatpush1.bf16.msra.mxu1 %v7209_v14  ;;  %6171 = vmatprep.subr.bf16.mxu0 %v7176_v40  ;;  %v2830_v14 = vld [vmem:[%s11048_s7 + $0x9f8] sm:$0xff]  ;;  %v7495_v40 = vcombine.low %v2845_v58, %v2861_v29 }
 0x43b   :  { %6212 = vmatprep.subr.bf16.mxu1 %v7178_v0  ;;  %v7497_v0 = vcombine.low %v2846_v59, %v2862_v60  ;;  %v7466_v2 = vcombine.high %v2814_v35, %v2830_v14 }
 0x43d   :  { %6172 = vmatpush1.bf16.msra.mxu0 %v7175_v5  ;;  %v2782_v5 = vld [vmem:[%s11048_s7 + $0x878] sm:$0xff] }
 0x43e   :  { %6213 = vmatpush1.bf16.msra.mxu1 %v7177_v6  ;;  %6173 = vmatprep.subr.bf16.mxu0 %v7656_v28  ;;  %v2798_v6 = vld [vmem:[%s11048_s7 + $0x8f8] sm:$0xff]  ;;  %v7463_v28 = vcombine.low %v2813_v21, %v2829_v23 }
 0x43f   :  { %6214 = vmatprep.subr.bf16.mxu1 %v7658_v7  ;;  %v7465_v7 = vcombine.low %v2814_v35, %v2830_v14  ;;  %v7434_v9 = vcombine.high %v2782_v5, %v2798_v6  ;;  %v7433_v11 = vcombine.low %v2782_v5, %v2798_v6 }
 0x441   :  { %6174 = vmatpush2.bf16.msra.mxu0 %v7655_v12  ;;  %v6241_v12 = vld [vmem:[%s11051_s8 + $0x10] sm:$0xff] }
 0x442   :  { %6215 = vmatpush2.bf16.msra.mxu1 %v7657_v13  ;;  %6175 = vmatprep.subr.bf16.mxu0 %v7624_v16  ;;  %v6314_v13 = vrot.slane %v6241_v12, %v9200_v48  ;;  %v6441_v16 = vld [vmem:[%s11052_s9 + $0x10] sm:$0xff]  ;;  %v6318_v19 = vrot.slane %v6241_v12, %v9211_v53  ;;  %v6326_v32 = vrot.slane %v6241_v12, %v9344_v20 }
 0x443   :  { %6216 = vmatprep.subr.bf16.mxu1 %v7626_v18  ;;  %v6322_v18 = vrot.slane %v6241_v12, %v9335_v17  ;;  %v6522_v43 = vrot.slane %v6441_v16, %v9335_v17  ;;  %v6526_v44 = vrot.slane %v6441_v16, %v9344_v20  ;;  %v6330_v59 = vrot.slane %v6241_v12, %v10317_v27 }
 0x444   :  { %v6338_v60 = vrot.slane %v6241_v12, %v10320_v30  ;;  %v6342_v21 = vrot.slane %v6241_v12, %v10326_v38  ;;  %v6534_v14 = vrot.slane %v6441_v16, %v10323_v34 }
 0x445   :  { %6176 = vmatpush2.bf16.msra.mxu0 %v7623_v41  ;;  %v6514_v41 = vrot.slane %v6441_v16, %v9200_v48 }
 0x446   :  { %6217 = vmatpush2.bf16.msra.mxu1 %v7625_v42  ;;  %6177 = vmatprep.subr.bf16.mxu0 %v7592_v25  ;;  %v6518_v25 = vrot.slane %v6441_v16, %v9211_v53 }
 0x447   :  { %6218 = vmatprep.subr.bf16.mxu1 %v7594_v24 }
 0x449   :  { %6178 = vmatpush2.bf16.msra.mxu0 %v7591_v46 }
 0x44a   :  { %6219 = vmatpush2.bf16.msra.mxu1 %v7593_v47  ;;  %6179 = vmatprep.subr.bf16.mxu0 %v7560_v61 }
 0x44b   :  { %6220 = vmatprep.subr.bf16.mxu1 %v7562_v3 }
 0x44d   :  { %6180 = vmatpush2.bf16.msra.mxu0 %v7559_v50 }
 0x44e   :  { %6221 = vmatpush2.bf16.msra.mxu1 %v7561_v56  ;;  %6181 = vmatprep.subr.bf16.mxu0 %v7528_v39 }
 0x44f   :  { %6222 = vmatprep.subr.bf16.mxu1 %v7530_v57 }
 0x451   :  { %6182 = vmatpush2.bf16.msra.mxu0 %v7527_v62  ;;  %v6530_v62 = vrot.slane %v6441_v16, %v10317_v27 }
 0x452   :  { %6223 = vmatpush2.bf16.msra.mxu1 %v7529_v63  ;;  %6183 = vmatprep.subr.bf16.mxu0 %v7496_v22  ;;  %v6334_v63 = vrot.slane %v6241_v12, %v10323_v34 }
 0x453   :  { %6224 = vmatprep.subr.bf16.mxu1 %v7498_v51  ;;  %v6538_v51 = vrot.slane %v6441_v16, %v10320_v30 }
 0x455   :  { %6184 = vmatpush2.bf16.msra.mxu0 %v7495_v40 }
 0x456   :  { %6225 = vmatpush2.bf16.msra.mxu1 %v7497_v0  ;;  %6185 = vmatprep.subr.bf16.mxu0 %v7464_v1  ;;  %v6542_v1 = vrot.slane %v6441_v16, %v10326_v38  ;;  %v6242_v16 = vld [vmem:[%s11051_s8 + $0x18] sm:$0xff] }
 0x457   :  { %6226 = vmatprep.subr.bf16.mxu1 %v7466_v2 }
 0x459   :  { %6186 = vmatpush2.bf16.msra.mxu0 %v7463_v28 }
 0x45a   :  { %6227 = vmatpush2.bf16.msra.mxu1 %v7465_v7  ;;  %6187 = vmatprep.subr.bf16.mxu0 %v7432_v8 }
 0x45b   :  { %6228 = vmatprep.subr.bf16.mxu1 %v7434_v9 }
 0x45d   :  { %6188 = vmatpush2.bf16.msra.mxu0 %v7431_v10 }
 0x45e   :  { %6229 = vmatpush2.bf16.msra.mxu1 %v7433_v11 }
 0x460   :  { %v5945_v31 = vpop.f32.mrf.mxu0  ;;  %6190 = vmatmul.mubr.bf16.vlgmr.msra.gmra.mxu0 %v9509_v36 }
 0x461   :  { %v6423_v15 = vmul.f32 %v6314_v13, %v5945_v31  ;;  %v5986_v42 = vpop.f32.mrf.mxu1  ;;  %6231 = vmatmul.mubr.bf16.vlgmr.msra.gmra.mxu1 %v9509_v36 }
 0x462   :  { %v6425_v24 = vmul.f32 %v6322_v18, %v5986_v42  ;;  %v5947_v26 = vpop.f32.mrf.mxu0  ;;  %v6350_v42 = vrot.slane %v6242_v16, %v9211_v53 }
 0x463   :  { %v6424_v45 = vmul.f32 %v6318_v19, %v5947_v26  ;;  %v5988_v46 = vpop.f32.mrf.mxu1  ;;  %v6623_v3 = vadd.f32 %v6514_v41, %v6423_v15  ;;  %v6442_v15 = vld [vmem:[%s11052_s9 + $0x18] sm:$0xff]  ;;  %v6354_v41 = vrot.slane %v6242_v16, %v9335_v17 }
 0x464   :  { %v6426_v47 = vmul.f32 %v6326_v32, %v5988_v46  ;;  %v5949_v61 = vpop.f32.mrf.mxu0  ;;  %v6625_v54 = vadd.f32 %v6522_v43, %v6425_v24  ;;  %v6346_v32 = vrot.slane %v6242_v16, %v9200_v48  ;;  %v6358_v24 = vrot.slane %v6242_v16, %v9344_v20 }
 0x465   :  { %v6624_v52 = vadd.f32 %v6518_v25, %v6424_v45  ;;  %v5990_v37 = vpop.f32.mrf.mxu1  ;;  %v6546_v26 = vrot.slane %v6442_v15, %v9200_v48  ;;  %v6550_v45 = vrot.slane %v6442_v15, %v9211_v53 }
 0x466   :  { %v6626_v55 = vadd.f32 %v6526_v44, %v6426_v47  ;;  %v5950_v50 = vpop.f32.mrf.mxu0  ;;  %v6554_v47 = vrot.slane %v6442_v15, %v9335_v17 }
 0x467   :  { %v6739_v56 = vcombine.low %v6623_v3, %v6624_v52  ;;  %v5991_v36 = vpop.f32.mrf.mxu1  ;;  %v6558_v3 = vrot.slane %v6442_v15, %v9344_v20  ;;  %v6362_v20 = vrot.slane %v6242_v16, %v10317_v27 }
 0x468   :  { %v6740_v39 = vcombine.low %v6625_v54, %v6626_v55 }
 0x469   :  { %v6747_v57 = vrot.slane %v6739_v56, %v8333_v49 }
 0x46a   :  { %v6754_v58 = vrot.slane %v6740_v39, %v8333_v49 }
 0x46c   :  { %v6755_v29 = vcombine.low %v6747_v57, %v6754_v58 }
 0x46e   :  { %6819 = vst [vmem:[%s11053_s10 + $0x20] sm:$0xff] %v6755_v29 }
 0x4a0   :  { %v6027_v22 = vpop.f32.mrf.mxu0 }
 0x4a1   :  { %v6427_v23 = vmul.f32 %v6330_v59, %v6027_v22  ;;  %v6068_v35 = vpop.f32.mrf.mxu1  ;;  %v6366_v22 = vrot.slane %v6242_v16, %v10323_v34 }
 0x4a2   :  { %v6429_v40 = vmul.f32 %v6338_v60, %v6068_v35  ;;  %v6029_v0 = vpop.f32.mrf.mxu0 }
 0x4a3   :  { %v6627_v2 = vadd.f32 %v6530_v62, %v6427_v23  ;;  %v6428_v33 = vmul.f32 %v6334_v63, %v6029_v0  ;;  %v6070_v4 = vpop.f32.mrf.mxu1  ;;  %v6370_v62 = vrot.slane %v6242_v16, %v10320_v30  ;;  %v6562_v63 = vrot.slane %v6442_v15, %v10317_v27 }
 0x4a4   :  { %v6629_v5 = vadd.f32 %v6538_v51, %v6429_v40  ;;  %v6430_v6 = vmul.f32 %v6342_v21, %v6070_v4  ;;  %v6031_v28 = vpop.f32.mrf.mxu0  ;;  %v6570_v21 = vrot.slane %v6442_v15, %v10320_v30  ;;  %v6374_v23 = vrot.slane %v6242_v16, %v10326_v38 }
 0x4a5   :  { %v6628_v7 = vadd.f32 %v6534_v14, %v6428_v33  ;;  %v6072_v8 = vpop.f32.mrf.mxu1  ;;  %v6566_v40 = vrot.slane %v6442_v15, %v10323_v34 }
 0x4a6   :  { %v6630_v9 = vadd.f32 %v6542_v1, %v6430_v6  ;;  %v6032_v10 = vpop.f32.mrf.mxu0 }
 0x4a7   :  { %v6756_v11 = vcombine.low %v6627_v2, %v6628_v7  ;;  %v6073_v12 = vpop.f32.mrf.mxu1  ;;  %v6574_v2 = vrot.slane %v6442_v15, %v10326_v38 }
 0x4a8   :  { %v6757_v13 = vcombine.low %v6629_v5, %v6630_v9 }
 0x4a9   :  { %v6764_v18 = vrot.slane %v6756_v11, %v8333_v49 }
 0x4aa   :  { %v6771_v19 = vrot.slane %v6757_v13, %v8333_v49 }
 0x4ac   :  { %v6772_v31 = vcombine.low %v6764_v18, %v6771_v19 }
 0x4ae   :  { %6820 = vst [vmem:[%s11053_s10 + $0x28] sm:$0xff] %v6772_v31 }
 0x4e0   :  { %v6109_v25 = vpop.f32.mrf.mxu0 }
 0x4e1   :  { %v6431_v43 = vmul.f32 %v6346_v32, %v6109_v25  ;;  %v6150_v44 = vpop.f32.mrf.mxu1 }
 0x4e2   :  { %v6433_v46 = vmul.f32 %v6354_v41, %v6150_v44  ;;  %v6111_v61 = vpop.f32.mrf.mxu0 }
 0x4e3   :  { %v6432_v52 = vmul.f32 %v6350_v42, %v6111_v61  ;;  %v6152_v37 = vpop.f32.mrf.mxu1  ;;  %v6631_v50 = vadd.f32 %v6546_v26, %v6431_v43 }
 0x4e4   :  { %v6434_v54 = vmul.f32 %v6358_v24, %v6152_v37  ;;  %v6113_v55 = vpop.f32.mrf.mxu0  ;;  %v6633_v39 = vadd.f32 %v6554_v47, %v6433_v46 }
 0x4e5   :  { %v6632_v56 = vadd.f32 %v6550_v45, %v6432_v52  ;;  %v6154_v36 = vpop.f32.mrf.mxu1 }
 0x4e6   :  { %v6634_v57 = vadd.f32 %v6558_v3, %v6434_v54  ;;  %v6114_v58 = vpop.f32.mrf.mxu0 }
 0x4e7   :  { %v6773_v48 = vcombine.low %v6631_v50, %v6632_v56  ;;  %v6155_v29 = vpop.f32.mrf.mxu1 }
 0x4e8   :  { %v6774_v59 = vcombine.low %v6633_v39, %v6634_v57 }
 0x4e9   :  { %v6781_v53 = vrot.slane %v6773_v48, %v8333_v49 }
 0x4ea   :  { %v6788_v17 = vrot.slane %v6774_v59, %v8333_v49 }
 0x4ec   :  { %v6789_v60 = vcombine.low %v6781_v53, %v6788_v17 }
 0x4ee   :  { %6821 = vst [vmem:[%s11053_s10 + $0x30] sm:$0xff] %v6789_v60 }
 0x520   :  { %v6191_v51 = vpop.f32.mrf.mxu0 }
 0x521   :  { %v6435_v35 = vmul.f32 %v6362_v20, %v6191_v51  ;;  %v6232_v14 = vpop.f32.mrf.mxu1 }
 0x522   :  { %v6437_v0 = vmul.f32 %v6370_v62, %v6232_v14  ;;  %v6193_v1 = vpop.f32.mrf.mxu0 }
 0x523   :  { %v6635_v33 = vadd.f32 %v6562_v63, %v6435_v35  ;;  %v6436_v4 = vmul.f32 %v6366_v22, %v6193_v1  ;;  %v6234_v5 = vpop.f32.mrf.mxu1 }
 0x524   :  { %v6637_v6 = vadd.f32 %v6570_v21, %v6437_v0  ;;  %v6438_v27 = vmul.f32 %v6374_v23, %v6234_v5  ;;  %v6195_v28 = vpop.f32.mrf.mxu0 }
 0x525   :  { %v6636_v7 = vadd.f32 %v6566_v40, %v6436_v4  ;;  %v6236_v8 = vpop.f32.mrf.mxu1 }
 0x526   :  { %v6638_v9 = vadd.f32 %v6574_v2, %v6438_v27  ;;  %v6196_v30 = vpop.f32.mrf.mxu0 }
 0x527   :  { %v6790_v10 = vcombine.low %v6635_v33, %v6636_v7  ;;  %v6237_v11 = vpop.f32.mrf.mxu1 }
 0x528   :  { %v6791_v12 = vcombine.low %v6637_v6, %v6638_v9 }
 0x529   :  { %v6798_v13 = vrot.slane %v6790_v10, %v8333_v49 }
 0x52a   :  { %v6805_v34 = vrot.slane %v6791_v12, %v8333_v49 }
 0x52c   :  { %v6806_v18 = vcombine.low %v6798_v13, %v6805_v34 }
 0x52e   :  { %6822 = vst [vmem:[%s11053_s10 + $0x38] sm:$0xff] %v6806_v18 }

</bundles_post_ra>
